<compile_context>
chip_gen: v7x
topology: tpu7x:2x2x1
jax: 0.10.0
libtpu: 0.0.40
codegen_flags: <defaults>
</compile_context>

<pallas_src>
import math
import functools

import numpy as np
import jax
import jax.numpy as jnp
from jax.experimental import pallas as pl
from jax.experimental.pallas import tpu as pltpu


# ----------------------------------------------------------------------------
# Host-side real spherical harmonics (equivalent to SphericalFilter.Yreal, which
# uses scipy.special.sph_harm on detached CPU numpy arrays).
# TODO(synk): scipy sph_harm has no Pallas equivalent; it is reproduced here with an
# associated-Legendre recurrence in numpy (float64) as host-side precompute.
# ----------------------------------------------------------------------------
def _assoc_legendre(l, m, x):
    """P_l^m(x), m>=0, l>=m, with Condon-Shortley phase (matches scipy lpmv)."""
    pmm = np.ones_like(x)
    if m > 0:
        somx2 = np.sqrt(np.maximum(0.0, (1.0 - x) * (1.0 + x)))
        fact = 1.0
        for _ in range(m):
            pmm = -pmm * fact * somx2
            fact += 2.0
    if l == m:
        return pmm
    pmmp1 = x * (2 * m + 1) * pmm
    if l == m + 1:
        return pmmp1
    pll = pmmp1
    for ll in range(m + 2, l + 1):
        pll = (x * (2 * ll - 1) * pmmp1 - (ll + m - 1) * pmm) / (ll - m)
        pmm, pmmp1 = pmmp1, pll
    return pll


def _real_sph_harm(m, l, az, polar):
    """Real part of the SphericalFilter.Yreal combination of sph_harm(+/-m, l)."""
    mm = abs(m)
    norm = math.sqrt(
        (2 * l + 1) / (4 * math.pi) * math.factorial(l - mm) / math.factorial(l + mm)
    )
    P = _assoc_legendre(l, mm, np.cos(polar))
    if m == 0:
        return norm * P
    sign = 1.0 if (mm % 2 == 0) else -1.0
    if m > 0:
        return sign * math.sqrt(2.0) * norm * P * np.cos(mm * az)
    return sign * math.sqrt(2.0) * norm * P * np.sin(mm * az)


def compute_y_stack(x_np, max_freq, shift):
    """(N, 2*max_freq+1): columns are m = -max_freq .. max_freq, l = |m| + shift."""
    az, polar = x_np[..., 0], x_np[..., 1]
    cols = [
        _real_sph_harm(m, abs(m) + shift, az, polar)
        for m in range(-max_freq, max_freq + 1)
    ]
    return np.stack(cols, axis=-1).astype(np.float32)


# ----------------------------------------------------------------------------
# Pallas kernel: fused SINRNoSkip forward over a tile of N points.
# ----------------------------------------------------------------------------
def sinr_kernel(depth, hidden, y_ref, a_ref, wf_ref, bf_ref, wfw_ref,
                wc_ref, bc_ref, wo_ref, bo_ref, out_ref):
    H = hidden
    y = y_ref[...]                      # (TN, (D+1)*F)   bf16
    a = a_ref[...]                      # (TN, C)         bf16

    # One wide dot for all depth+1 filter linears (block-diagonal fused weight).
    ftr_all = (jnp.dot(y, wf_ref[...], preferred_element_type=jnp.float32)
               + bf_ref[...])           # (TN, (D+1)*H)   f32

    # One wide dot for all depth code linears, hoisted out of the serial z chain.
    # Bias here is b_code[i] + b_fw[i] (folded host-side).
    amp_all = (jnp.dot(a, wc_ref[...], preferred_element_type=jnp.float32)
               + bc_ref[...])           # (TN, D*H)       f32

    z = ftr_all[:, :H]                  # layer-0 filter output, f32
    for i in range(depth):              # depth is a compile-time Python int -> unrolled
        z_next = jnp.dot(z.astype(jnp.bfloat16), wfw_ref[i],
                         preferred_element_type=jnp.float32)
        z = (z_next + amp_all[:, i * H:(i + 1) * H]) \
            * ftr_all[:, (i + 1) * H:(i + 2) * H]

    # Output projection kept in f32 (tiny); lane-reduce result matches the (TN, 1)
    # output block layout, so no sublane->lane relayout in the epilogue.
    out_ref[...] = jnp.sum(z * wo_ref[...], axis=-1, keepdims=True) + bo_ref[...]


def sinr_noskip_pallas(x, y_stack, a, params, *, tile_n=512):
    depth_p1, N, F = y_stack.shape
    depth = depth_p1 - 1
    H = params["w_ftr"].shape[-1]
    C = a.shape[-1]

    # ---- host-side fusion / layout prep -------------------------------------
    # Lane-packed y: y_flat[n, s*F + f] = y_stack[s, n, f]
    y_flat = jnp.transpose(y_stack, (1, 0, 2)).reshape(N, depth_p1 * F)

    # Block-diagonal fused filter weight ((D+1)*F, (D+1)*H) and flat bias.
    wf_big = jnp.zeros((depth_p1 * F, depth_p1 * H), jnp.float32)
    for s in range(depth_p1):
        wf_big = wf_big.at[s * F:(s + 1) * F, s * H:(s + 1) * H].set(params["w_ftr"][s])
    bf_big = params["b_ftr"].reshape(1, depth_p1 * H)

    # Fused code weight (C, D*H); fold b_fw into the code bias (they are summed anyway).
    wc_big = jnp.transpose(params["w_code"], (1, 0, 2)).reshape(C, depth * H)
    bc_big = (params["b_code"] + params["b_fw"]).reshape(1, depth * H)

    # bf16 inputs/weights for the MXU; biases / output weights stay f32.
    y_bf = y_flat.astype(jnp.bfloat16)
    a_bf = a.astype(jnp.bfloat16)
    wf_bf = wf_big.astype(jnp.bfloat16)
    wc_bf = wc_big.astype(jnp.bfloat16)
    wfw_bf = params["w_fw"].astype(jnp.bfloat16)     # (depth, H, H)
    wo = params["w_out"].astype(jnp.float32)         # (1, H)
    bo = params["b_out"].astype(jnp.float32)         # (1, 1)

    # Pad the point dimension to a multiple of tile_n (tail tile handling).
    pad = (-N) % tile_n
    if pad:
        y_bf = jnp.pad(y_bf, ((0, pad), (0, 0)))
        a_bf = jnp.pad(a_bf, ((0, pad), (0, 0)))
    N_pad = N + pad
    grid_n = N_pad // tile_n

    def full_spec(shape):
        nd = len(shape)
        return pl.BlockSpec(shape, lambda i, _nd=nd: (0,) * _nd)

    kernel = functools.partial(sinr_kernel, depth, H)
    out = pl.pallas_call(
        kernel,
        out_shape=jax.ShapeDtypeStruct((N_pad, 1), jnp.float32),
        grid=(grid_n,),
        in_specs=[
            pl.BlockSpec((tile_n, depth_p1 * F), lambda i: (i, 0)),   # y_flat (bf16)
            pl.BlockSpec((tile_n, C), lambda i: (i, 0)),              # a      (bf16)
            full_spec(wf_bf.shape),                                   # fused filter W
            full_spec(bf_big.shape),                                  # fused filter b
            full_spec(wfw_bf.shape),                                  # forward W (D,H,H)
            full_spec(wc_bf.shape),                                   # fused code W
            full_spec(bc_big.shape),                                  # fused code+fw b
            full_spec(wo.shape),                                      # out W (1,H)
            full_spec(bo.shape),                                      # out b (1,1)
        ],
        out_specs=pl.BlockSpec((tile_n, 1), lambda i: (i, 0)),
        compiler_params=pltpu.CompilerParams(
            dimension_semantics=("parallel",),
            vmem_limit_bytes=48 * 1024 * 1024,
        ),
    )(y_bf, a_bf, wf_bf, bf_big, wfw_bf, wc_bf, bc_big, wo, bo)

    # Module returns (out[..., 0], x)
    return out[:N, 0], x


# ----------------------------------------------------------------------------
# Pure-JAX references for verification.
# ----------------------------------------------------------------------------
def sinr_noskip_ref(y_stack, a, params, depth, matmul_dtype=None):
    """matmul_dtype=None -> full f32; jnp.bfloat16 -> mirrors the kernel's precision."""
    def mm(lhs, rhs):
        if matmul_dtype is not None:
            lhs, rhs = lhs.astype(matmul_dtype), rhs.astype(matmul_dtype)
        return jnp.dot(lhs, rhs, preferred_element_type=jnp.float32)

    z = mm(y_stack[0], params["w_ftr"][0]) + params["b_ftr"][0]
    for i in range(depth):
        amp = mm(a, params["w_code"][i]) + (params["b_code"][i] + params["b_fw"][i])
        ftr = mm(y_stack[i + 1], params["w_ftr"][i + 1]) + params["b_ftr"][i + 1]
        z = (mm(z, params["w_fw"][i]) + amp) * ftr
    return jnp.sum(z * params["w_out"], axis=-1) + params["b_out"][0, 0]


if __name__ == "__main__":
    # Module-default channel sizes (lane-aligned H=128), modest point count.
    depth, max_freq, hidden_dim, code_dim = 5, 4, 128, 400
    N, tile_n = 1024, 512          # grid = 2 -> both v7x TensorCores get work
    F = 2 * max_freq + 1

    key = jax.random.PRNGKey(0)
    keys = jax.random.split(key, 12)

    # Inputs: x = (azimuth, polar) coords per point, a = latent code per point.
    az = jax.random.uniform(keys[0], (N,), minval=0.0, maxval=2.0 * math.pi)
    polar = jax.random.uniform(keys[1], (N,), minval=0.0, maxval=math.pi)
    x = jnp.stack([az, polar], axis=-1).astype(jnp.float32)
    a = jax.random.normal(keys[2], (N, code_dim), dtype=jnp.float32)

    # Precompute real spherical-harmonic features for every filter shift.
    x_np = np.asarray(x, dtype=np.float64)
    y_stack = jnp.asarray(
        np.stack([compute_y_stack(x_np, max_freq, s) for s in range(depth + 1)], axis=0),
        dtype=jnp.float32,
    )

    # Deterministic synthetic parameters (weights stored as (in, out) for x @ W).
    def init(k, shape, fan_in):
        return jax.random.normal(k, shape, dtype=jnp.float32) / math.sqrt(fan_in)

    params = {
        "w_ftr": init(keys[3], (depth + 1, F, hidden_dim), F),
        "b_ftr": init(keys[4], (depth + 1, hidden_dim), F),
        "w_fw": init(keys[5], (depth, hidden_dim, hidden_dim), hidden_dim),
        "b_fw": init(keys[6], (depth, hidden_dim), hidden_dim),
        "w_code": init(keys[7], (depth, code_dim, hidden_dim), code_dim),
        "b_code": init(keys[8], (depth, hidden_dim), code_dim),
        "w_out": init(keys[9], (1, hidden_dim), hidden_dim),
        "b_out": init(keys[10], (1, 1), hidden_dim),
    }

    out, x_passthru = sinr_noskip_pallas(x, y_stack, a, params, tile_n=tile_n)
    out = jax.block_until_ready(out)
    assert out.shape == (N,) and x_passthru.shape == (N, 2)

    # Tight check: pure-JAX mirror with the same bf16 matmul precision as the kernel.
    ref_bf16 = sinr_noskip_ref(y_stack, a, params, depth, matmul_dtype=jnp.bfloat16)
    assert jnp.allclose(out, ref_bf16, rtol=2e-3, atol=2e-3), (
        f"max abs err vs bf16 mirror = {float(jnp.max(jnp.abs(out - ref_bf16)))}"
    )

    # Loose sanity check against the full-f32 module math (bf16 rounding tolerance).
    ref_f32 = sinr_noskip_ref(y_stack, a, params, depth, matmul_dtype=None)
    rel = jnp.max(jnp.abs(out - ref_f32) / (1.0 + jnp.abs(ref_f32)))
    assert float(rel) < 0.2, f"relative deviation vs f32 reference = {float(rel)}"

    print("KERNEL_OK")
</pallas_src>

<mosaic_0001>
module attributes {stable_mosaic.version = 11 : i64} {
  func.func @sinr_kernel(%arg0: i32, %arg1: memref<512x54xbf16, #tpu.memory_space<vmem>>, %arg2: memref<512x400xbf16, #tpu.memory_space<vmem>>, %arg3: memref<54x768xbf16, #tpu.memory_space<vmem>>, %arg4: memref<1x768xf32, #tpu.memory_space<vmem>>, %arg5: memref<5x128x128xbf16, #tpu.memory_space<vmem>>, %arg6: memref<400x640xbf16, #tpu.memory_space<vmem>>, %arg7: memref<1x640xf32, #tpu.memory_space<vmem>>, %arg8: memref<1x128xf32, #tpu.memory_space<vmem>>, %arg9: memref<1x1xf32, #tpu.memory_space<vmem>>, %arg10: memref<512x1xf32, #tpu.memory_space<vmem>>) attributes {dimension_semantics = [#tpu.dimension_semantics<parallel>], iteration_bounds = array<i64: 2>, scalar_prefetch = 0 : i64, scratch_operands = 0 : i64, tpu.core_type = #tpu.core_type<tc>, window_params = [{transform_indices = @transform_0, window_bounds = array<i64: 512, 54>}, {transform_indices = @transform_1, window_bounds = array<i64: 512, 400>}, {pipeline_mode = #tpu.pipeline_mode<synchronous>, transform_indices = @transform_2, window_bounds = array<i64: 54, 768>}, {pipeline_mode = #tpu.pipeline_mode<synchronous>, transform_indices = @transform_3, window_bounds = array<i64: 1, 768>}, {pipeline_mode = #tpu.pipeline_mode<synchronous>, transform_indices = @transform_4, window_bounds = array<i64: 5, 128, 128>}, {pipeline_mode = #tpu.pipeline_mode<synchronous>, transform_indices = @transform_5, window_bounds = array<i64: 400, 640>}, {pipeline_mode = #tpu.pipeline_mode<synchronous>, transform_indices = @transform_6, window_bounds = array<i64: 1, 640>}, {pipeline_mode = #tpu.pipeline_mode<synchronous>, transform_indices = @transform_7, window_bounds = array<i64: 1, 128>}, {pipeline_mode = #tpu.pipeline_mode<synchronous>, transform_indices = @transform_8, window_bounds = array<i64: 1, 1>}, {transform_indices = @transform_9, window_bounds = array<i64: 512, 1>}]} {
    %c0 = arith.constant 0 : index
    %c0_0 = arith.constant 0 : index
    %0 = vector.load %arg1[%c0, %c0_0] : memref<512x54xbf16, #tpu.memory_space<vmem>>, vector<512x54xbf16>
    %c0_1 = arith.constant 0 : index
    %c0_2 = arith.constant 0 : index
    %1 = vector.load %arg2[%c0_1, %c0_2] : memref<512x400xbf16, #tpu.memory_space<vmem>>, vector<512x400xbf16>
    %c0_3 = arith.constant 0 : index
    %c0_4 = arith.constant 0 : index
    %2 = vector.load %arg3[%c0_3, %c0_4] : memref<54x768xbf16, #tpu.memory_space<vmem>>, vector<54x768xbf16>
    %cst = arith.constant dense<0.000000e+00> : vector<512x768xf32>
    %3 = tpu.matmul %0, %2, %cst {dimension_numbers = #tpu.dot_dimension_numbers<[1], [0], [0], [1], [0, 0, 1, 1], [], []>} : vector<512x54xbf16>, vector<54x768xbf16>, vector<512x768xf32> -> vector<512x768xf32>
    %c0_5 = arith.constant 0 : index
    %c0_6 = arith.constant 0 : index
    %4 = vector.load %arg4[%c0_5, %c0_6] : memref<1x768xf32, #tpu.memory_space<vmem>>, vector<1x768xf32>
    %5 = vector.broadcast %4 : vector<1x768xf32> to vector<512x768xf32>
    %6 = arith.addf %3, %5 : vector<512x768xf32>
    %c0_7 = arith.constant 0 : index
    %c0_8 = arith.constant 0 : index
    %7 = vector.load %arg6[%c0_7, %c0_8] : memref<400x640xbf16, #tpu.memory_space<vmem>>, vector<400x640xbf16>
    %cst_9 = arith.constant dense<0.000000e+00> : vector<512x640xf32>
    %8 = tpu.matmul %1, %7, %cst_9 {dimension_numbers = #tpu.dot_dimension_numbers<[1], [0], [0], [1], [0, 0, 1, 1], [], []>} : vector<512x400xbf16>, vector<400x640xbf16>, vector<512x640xf32> -> vector<512x640xf32>
    %c0_10 = arith.constant 0 : index
    %c0_11 = arith.constant 0 : index
    %9 = vector.load %arg7[%c0_10, %c0_11] : memref<1x640xf32, #tpu.memory_space<vmem>>, vector<1x640xf32>
    %10 = vector.broadcast %9 : vector<1x640xf32> to vector<512x640xf32>
    %11 = arith.addf %8, %10 : vector<512x640xf32>
    %12 = vector.extract_strided_slice %6 {offsets = [0, 0], sizes = [512, 128], strides = [1, 1]} : vector<512x768xf32> to vector<512x128xf32>
    %13 = arith.truncf %12 : vector<512x128xf32> to vector<512x128xbf16>
    %c0_12 = arith.constant 0 : index
    %c0_13 = arith.constant 0 : index
    %c0_14 = arith.constant 0 : index
    %14 = vector.load %arg5[%c0_12, %c0_13, %c0_14] : memref<5x128x128xbf16, #tpu.memory_space<vmem>>, vector<1x128x128xbf16>
    %15 = vector.shape_cast %14 : vector<1x128x128xbf16> to vector<128x128xbf16>
    %cst_15 = arith.constant dense<0.000000e+00> : vector<512x128xf32>
    %16 = tpu.matmul %13, %15, %cst_15 {dimension_numbers = #tpu.dot_dimension_numbers<[1], [0], [0], [1], [0, 0, 1, 1], [], []>} : vector<512x128xbf16>, vector<128x128xbf16>, vector<512x128xf32> -> vector<512x128xf32>
    %17 = vector.extract_strided_slice %11 {offsets = [0, 0], sizes = [512, 128], strides = [1, 1]} : vector<512x640xf32> to vector<512x128xf32>
    %18 = arith.addf %16, %17 : vector<512x128xf32>
    %19 = vector.extract_strided_slice %6 {offsets = [0, 128], sizes = [512, 128], strides = [1, 1]} : vector<512x768xf32> to vector<512x128xf32>
    %20 = arith.mulf %18, %19 : vector<512x128xf32>
    %21 = arith.truncf %20 : vector<512x128xf32> to vector<512x128xbf16>
    %c1 = arith.constant 1 : index
    %c0_16 = arith.constant 0 : index
    %c0_17 = arith.constant 0 : index
    %22 = vector.load %arg5[%c1, %c0_16, %c0_17] : memref<5x128x128xbf16, #tpu.memory_space<vmem>>, vector<1x128x128xbf16>
    %23 = vector.shape_cast %22 : vector<1x128x128xbf16> to vector<128x128xbf16>
    %cst_18 = arith.constant dense<0.000000e+00> : vector<512x128xf32>
    %24 = tpu.matmul %21, %23, %cst_18 {dimension_numbers = #tpu.dot_dimension_numbers<[1], [0], [0], [1], [0, 0, 1, 1], [], []>} : vector<512x128xbf16>, vector<128x128xbf16>, vector<512x128xf32> -> vector<512x128xf32>
    %25 = vector.extract_strided_slice %11 {offsets = [0, 128], sizes = [512, 128], strides = [1, 1]} : vector<512x640xf32> to vector<512x128xf32>
    %26 = arith.addf %24, %25 : vector<512x128xf32>
    %27 = vector.extract_strided_slice %6 {offsets = [0, 256], sizes = [512, 128], strides = [1, 1]} : vector<512x768xf32> to vector<512x128xf32>
    %28 = arith.mulf %26, %27 : vector<512x128xf32>
    %29 = arith.truncf %28 : vector<512x128xf32> to vector<512x128xbf16>
    %c2 = arith.constant 2 : index
    %c0_19 = arith.constant 0 : index
    %c0_20 = arith.constant 0 : index
    %30 = vector.load %arg5[%c2, %c0_19, %c0_20] : memref<5x128x128xbf16, #tpu.memory_space<vmem>>, vector<1x128x128xbf16>
    %31 = vector.shape_cast %30 : vector<1x128x128xbf16> to vector<128x128xbf16>
    %cst_21 = arith.constant dense<0.000000e+00> : vector<512x128xf32>
    %32 = tpu.matmul %29, %31, %cst_21 {dimension_numbers = #tpu.dot_dimension_numbers<[1], [0], [0], [1], [0, 0, 1, 1], [], []>} : vector<512x128xbf16>, vector<128x128xbf16>, vector<512x128xf32> -> vector<512x128xf32>
    %33 = vector.extract_strided_slice %11 {offsets = [0, 256], sizes = [512, 128], strides = [1, 1]} : vector<512x640xf32> to vector<512x128xf32>
    %34 = arith.addf %32, %33 : vector<512x128xf32>
    %35 = vector.extract_strided_slice %6 {offsets = [0, 384], sizes = [512, 128], strides = [1, 1]} : vector<512x768xf32> to vector<512x128xf32>
    %36 = arith.mulf %34, %35 : vector<512x128xf32>
    %37 = arith.truncf %36 : vector<512x128xf32> to vector<512x128xbf16>
    %c3 = arith.constant 3 : index
    %c0_22 = arith.constant 0 : index
    %c0_23 = arith.constant 0 : index
    %38 = vector.load %arg5[%c3, %c0_22, %c0_23] : memref<5x128x128xbf16, #tpu.memory_space<vmem>>, vector<1x128x128xbf16>
    %39 = vector.shape_cast %38 : vector<1x128x128xbf16> to vector<128x128xbf16>
    %cst_24 = arith.constant dense<0.000000e+00> : vector<512x128xf32>
    %40 = tpu.matmul %37, %39, %cst_24 {dimension_numbers = #tpu.dot_dimension_numbers<[1], [0], [0], [1], [0, 0, 1, 1], [], []>} : vector<512x128xbf16>, vector<128x128xbf16>, vector<512x128xf32> -> vector<512x128xf32>
    %41 = vector.extract_strided_slice %11 {offsets = [0, 384], sizes = [512, 128], strides = [1, 1]} : vector<512x640xf32> to vector<512x128xf32>
    %42 = arith.addf %40, %41 : vector<512x128xf32>
    %43 = vector.extract_strided_slice %6 {offsets = [0, 512], sizes = [512, 128], strides = [1, 1]} : vector<512x768xf32> to vector<512x128xf32>
    %44 = arith.mulf %42, %43 : vector<512x128xf32>
    %45 = arith.truncf %44 : vector<512x128xf32> to vector<512x128xbf16>
    %c4 = arith.constant 4 : index
    %c0_25 = arith.constant 0 : index
    %c0_26 = arith.constant 0 : index
    %46 = vector.load %arg5[%c4, %c0_25, %c0_26] : memref<5x128x128xbf16, #tpu.memory_space<vmem>>, vector<1x128x128xbf16>
    %47 = vector.shape_cast %46 : vector<1x128x128xbf16> to vector<128x128xbf16>
    %cst_27 = arith.constant dense<0.000000e+00> : vector<512x128xf32>
    %48 = tpu.matmul %45, %47, %cst_27 {dimension_numbers = #tpu.dot_dimension_numbers<[1], [0], [0], [1], [0, 0, 1, 1], [], []>} : vector<512x128xbf16>, vector<128x128xbf16>, vector<512x128xf32> -> vector<512x128xf32>
    %49 = vector.extract_strided_slice %11 {offsets = [0, 512], sizes = [512, 128], strides = [1, 1]} : vector<512x640xf32> to vector<512x128xf32>
    %50 = arith.addf %48, %49 : vector<512x128xf32>
    %51 = vector.extract_strided_slice %6 {offsets = [0, 640], sizes = [512, 128], strides = [1, 1]} : vector<512x768xf32> to vector<512x128xf32>
    %52 = arith.mulf %50, %51 : vector<512x128xf32>
    %c0_28 = arith.constant 0 : index
    %c0_29 = arith.constant 0 : index
    %53 = vector.load %arg8[%c0_28, %c0_29] : memref<1x128xf32, #tpu.memory_space<vmem>>, vector<1x128xf32>
    %54 = vector.broadcast %53 : vector<1x128xf32> to vector<512x128xf32>
    %55 = arith.mulf %52, %54 : vector<512x128xf32>
    %cst_30 = arith.constant dense<0.000000e+00> : vector<512xf32>
    %56 = vector.multi_reduction <add>, %55, %cst_30 [1] : vector<512x128xf32> to vector<512xf32>
    %57 = vector.shape_cast %56 : vector<512xf32> to vector<512x1xf32>
    %c0_31 = arith.constant 0 : index
    %c0_32 = arith.constant 0 : index
    %58 = vector.load %arg9[%c0_31, %c0_32] : memref<1x1xf32, #tpu.memory_space<vmem>>, vector<1x1xf32>
    %59 = vector.broadcast %58 : vector<1x1xf32> to vector<512x1xf32>
    %60 = arith.addf %57, %59 : vector<512x1xf32>
    %c0_33 = arith.constant 0 : index
    %c0_34 = arith.constant 0 : index
    %61 = vector.load %arg10[%c0_33, %c0_34] : memref<512x1xf32, #tpu.memory_space<vmem>>, vector<512x1xf32>
    tpu.vector_store %arg10[%c0_33, %c0_34], %60 {strides = array<i32>} : memref<512x1xf32, #tpu.memory_space<vmem>>, vector<512x1xf32>,
    return
  }
  func.func @transform_0(%arg0: i32) -> (i32, i32) {
    %c0_i32 = arith.constant 0 : i32
    %c0_i32_0 = arith.constant 0 : i32
    return %arg0, %c0_i32 : i32, i32
  }
  func.func @transform_1(%arg0: i32) -> (i32, i32) {
    %c0_i32 = arith.constant 0 : i32
    %c0_i32_0 = arith.constant 0 : i32
    return %arg0, %c0_i32 : i32, i32
  }
  func.func @transform_2(%arg0: i32) -> (i32, i32) {
    %c0_i32 = arith.constant 0 : i32
    %c0_i32_0 = arith.constant 0 : i32
    %c0_i32_1 = arith.constant 0 : i32
    return %c0_i32, %c0_i32_0 : i32, i32
  }
  func.func @transform_3(%arg0: i32) -> (i32, i32) {
    %c0_i32 = arith.constant 0 : i32
    %c0_i32_0 = arith.constant 0 : i32
    %c0_i32_1 = arith.constant 0 : i32
    return %c0_i32, %c0_i32_0 : i32, i32
  }
  func.func @transform_4(%arg0: i32) -> (i32, i32, i32) {
    %c0_i32 = arith.constant 0 : i32
    %c0_i32_0 = arith.constant 0 : i32
    %c0_i32_1 = arith.constant 0 : i32
    %c0_i32_2 = arith.constant 0 : i32
    return %c0_i32, %c0_i32_0, %c0_i32_1 : i32, i32, i32
  }
  func.func @transform_5(%arg0: i32) -> (i32, i32) {
    %c0_i32 = arith.constant 0 : i32
    %c0_i32_0 = arith.constant 0 : i32
    %c0_i32_1 = arith.constant 0 : i32
    return %c0_i32, %c0_i32_0 : i32, i32
  }
  func.func @transform_6(%arg0: i32) -> (i32, i32) {
    %c0_i32 = arith.constant 0 : i32
    %c0_i32_0 = arith.constant 0 : i32
    %c0_i32_1 = arith.constant 0 : i32
    return %c0_i32, %c0_i32_0 : i32, i32
  }
  func.func @transform_7(%arg0: i32) -> (i32, i32) {
    %c0_i32 = arith.constant 0 : i32
    %c0_i32_0 = arith.constant 0 : i32
    %c0_i32_1 = arith.constant 0 : i32
    return %c0_i32, %c0_i32_0 : i32, i32
  }
  func.func @transform_8(%arg0: i32) -> (i32, i32) {
    %c0_i32 = arith.constant 0 : i32
    %c0_i32_0 = arith.constant 0 : i32
    %c0_i32_1 = arith.constant 0 : i32
    return %c0_i32, %c0_i32_0 : i32, i32
  }
  func.func @transform_9(%arg0: i32) -> (i32, i32) {
    %c0_i32 = arith.constant 0 : i32
    %c0_i32_0 = arith.constant 0 : i32
    return %arg0, %c0_i32 : i32, i32
  }
}

</mosaic_0001>

<bundles_post_ra>
// kernel: tpu_custom_call.1
= control target key start
LH: loop header
LB: loop body
LE: loop exit
PB: predicated region body
PF: predicated region fallthrough
CT: control target
= control target key end

     0   :  { %s10854_s11 = smov 0   ;;  %s15969_s0 = inlined_call_operand.vmem [shape: bf16[1024,54], index: 0, kind: input, shape index: {}]   ;;  %s15970_s1 = inlined_call_operand.vmem [shape: bf16[1024,400], index: 1, kind: input, shape index: {}]   ;;  %s15971_s2 = inlined_call_operand.vmem [shape: bf16[54,768], index: 2, kind: input, shape index: {}]   ;;  %s15972_s3 = inlined_call_operand.vmem [shape: f32[1,768], index: 3, kind: input, shape index: {}]   ;;  %s15973_s4 = inlined_call_operand.vmem [shape: bf16[5,128,128], index: 4, kind: input, shape index: {}]   ;;  %s15974_s5 = inlined_call_operand.vmem [shape: bf16[400,640], index: 5, kind: input, shape index: {}]   ;;  %s15975_s6 = inlined_call_operand.vmem [shape: f32[1,640], index: 6, kind: input, shape index: {}]   ;;  %s15976_s7 = inlined_call_operand.vmem [shape: f32[1,128], index: 7, kind: input, shape index: {}]   ;;  %s15977_s8 = inlined_call_operand.<no memory space> [shape: f32[1,1], index: 8, kind: input, shape index: {}]   ;;  %s15978_s9 = inlined_call_operand.vmem [shape: f32[1024,1], index: 9, kind: output, shape index: {}]  }
   0x1   :  { %v14_v0 = vstv %s15977_s8 }
   0x2   :  { %15 = vst [vmem:[#allocation2] sm:$0x1] %v14_v0 }
   0x3 LB: > { %s8223_s12 = sadd.s32 4294967295, %s10798_s11   ;;  %p8227_p0 = scmp.ge.s32.totalorder %s10798_s11, 1  ;;  %s10798_s11 = sphi %s10854_s11, %s21_s11  }
   0x4   : > { %p302_p1 = scmp.lt.s32.totalorder %s10798_s11, 3 }
   0x6   : > { %p303_p2 = pnand %p8227_p0, %p302_p1 }
   0x8   : > { %306 = sbr.rel (%p303_p2) target bundleno = 2371 (0x943), region = 56 }
   0xf   : > { %v10169_v1 = vld [vmem:[%s15971_s2 + $0x4] ss:$24 sps:$4 sm:$0xff]   ;;  %v10171_v2 = vld [vmem:[%s15971_s2] ss:$24 sps:$4 sm:$0xff]   ;;  %v15980_v3 = vmov 0   ;;  %s8228_s16 = sshll.u32 %s8223_s12, 6 }
  0x10   : > { %1022 = vmatprep.mubr.bf16.mxu0 %v15980_v3  ;;  %1262 = vmatprep.mubr.bf16.mxu1 %v15980_v3  ;;  %v10172_v4 = vld [vmem:[%s15971_s2 + $0x34] ss:$24 sps:$4 sm:$0xff]   ;;  %p345_p3 = scmp.lt.s32.totalorder %s8228_s16, 127  ;;  %v10174_v5 = vld [vmem:[%s15971_s2 + $0x30] ss:$24 sps:$4 sm:$0xff]   ;;  %vm971_vm0 = vcmask 1042432  }
  0x11   : > { %990 = vmatprep.subr.bf16.mxu0 %v10169_v1  ;;  %9448 = vmatprep.subr.bf16.mxu1 %v10169_v1  ;;  %v10175_v6 = vld [vmem:[%s15971_s2 + $0x64] ss:$24 sps:$4 sm:$0xff]   ;;  %v574_v7 = vld [vmem:[%s15971_s2 + $0x90] sm:$0x77]  ;;  %v10177_v8 = vld [vmem:[%s15971_s2 + $0x60] ss:$24 sps:$4 sm:$0xff]  }
  0x12   : > { %991 = vmatpush1.bf16.msra.mxu0 %v10171_v2  ;;  %9452 = vmatpush1.bf16.msra.mxu1 %v10171_v2  ;;  %s17291_s16 = smov (!%p345_p3, %s8228_s16), 127  ;;  %v8285_v9 = vcombine.low %v574_v7, %v574_v7  ;;  %v8286_v10 = vcombine.high %v574_v7, %v574_v7  ;;  %v10184_v11 = vld [vmem:[%s15971_s2 + $0x14] ss:$24 sps:$4 sm:$0xff]   ;;  %vm874_vm1 = vcmask 441344   ;;  %v10182_v16 = vld [vmem:[%s15971_s2 + $0x10] ss:$24 sps:$4 sm:$0xff]  }
  0x13   : > { %992 = vmatprep.subr.bf16.mxu0 %v10172_v4  ;;  %9449 = vmatprep.subr.bf16.mxu1 %v10172_v4  ;;  %s8229_s25 = sshll.u32 %s17291_s16, 2  ;;  %v10199_v13 = vld [vmem:[%s15971_s2 + $0xc] ss:$24 sps:$4 sm:$0xff]   ;;  %v10197_v17 = vld [vmem:[%s15971_s2 + $0x8] ss:$24 sps:$4 sm:$0xff]   ;;  %s8847_s20 = sshll.u32 %s17291_s16, 4 }
  0x14   : > { %s10891_s30 = scalar_lea.vmem %s15969_s0, %s8229_s25  ;;  %v973_v12 = vsel %vm971_vm0, %v8285_v9, 0  ;;  %v10200_v18 = vld [vmem:[%s15971_s2 + $0x40] ss:$24 sps:$4 sm:$0xff]   ;;  %v10202_v21 = vld [vmem:[%s15971_s2 + $0x44] ss:$24 sps:$4 sm:$0xff]   ;;  %s10989_s23 = scalar_lea.vmem %s15970_s1, %s8847_s20  ;;  %vm3484_vm2 = vcmask 130048  }
  0x15   : > { %v10903_v14 = vld [vmem:[%s10891_s30] sm:$0xff]   ;;  %v10921_v19 = vld [vmem:[%s10891_s30 + $0x8] sm:$0xff]   ;;  %v10205_v22 = vld [vmem:[%s15971_s2 + $0x3c] ss:$24 sps:$4 sm:$0xff]   ;;  %s8234_s13 = sshll.u32 %s17291_s16, 3  ;;  %vm8090_vm3 = vcmask 7168  }
  0x16   : > { %993 = vmatpush1.bf16.msra.mxu0 %v10174_v5  ;;  %9453 = vmatpush1.bf16.msra.mxu1 %v10174_v5  ;;  %v10181_v15 = vld [vmem:[%s10891_s30 + $0xc0] sm:$0xff]   ;;  %v10186_v20 = vld [vmem:[%s10891_s30 + $0xc8] sm:$0xff]   ;;  %v10203_v23 = vld [vmem:[%s15971_s2 + $0x38] ss:$24 sps:$4 sm:$0xff]   ;;  %s15772_s15 = scalar_lea.vmem %s15978_s9, %s8234_s13 }
  0x17   : > { %994 = vmatprep.subr.bf16.mxu0 %v10175_v6  ;;  %9450 = vmatprep.subr.bf16.mxu1 %v10175_v6  ;;  %v10210_v24 = vld [vmem:[%s15971_s2 + $0x6c] ss:$24 sps:$4 sm:$0xff]   ;;  %v575_v25 = vld [vmem:[%s15971_s2 + $0x98] sm:$0x77]  ;;  %v10208_v26 = vld [vmem:[%s15971_s2 + $0x68] ss:$24 sps:$4 sm:$0xff]  }
  0x18   : > { %v8287_v27 = vcombine.low %v575_v25, %v575_v25  ;;  %v10948_v28 = vld [vmem:[%s10891_s30 + $0x10] sm:$0xff]   ;;  %v8288_v29 = vcombine.high %v575_v25, %v575_v25  ;;  %v10189_v34 = vld [vmem:[%s10891_s30 + $0x18] sm:$0xff]   ;;  %v576_v36 = vld [vmem:[%s15971_s2 + $0xa0] sm:$0x77] }
  0x19   : > { %v10188_v30 = vld [vmem:[%s10891_s30 + $0xd0] sm:$0xff]   ;;  %v10190_v35 = vld [vmem:[%s10891_s30 + $0xd8] sm:$0xff]   ;;  %v8290_v37 = vcombine.high %v576_v36, %v576_v36  ;;  %v8289_v38 = vcombine.low %v576_v36, %v576_v36  ;;  %v10191_v40 = vld [vmem:[%s10891_s30 + $0x20] sm:$0xff]  }
  0x1a   : > { %995 = vmatpush1.bf16.msra.mxu0 %v10177_v8  ;;  %9454 = vmatpush1.bf16.msra.mxu1 %v10177_v8  ;;  %v979_v31 = vsel %vm971_vm0, %v8287_v27, 0  ;;  %v10218_v32 = vld [vmem:[%s15971_s2 + $0x70] ss:$24 sps:$4 sm:$0xff]   ;;  %v10220_v33 = vld [vmem:[%s15971_s2 + $0x74] ss:$24 sps:$4 sm:$0xff]   ;;  %v10192_v41 = vld [vmem:[%s10891_s30 + $0xe0] sm:$0xff]  }
  0x1b   : > { %8291 = vmatprep.subr.msk.bf16.mxu0 %vm971_vm0, %v8286_v10  ;;  %9451 = vmatprep.subr.msk.bf16.mxu1 %vm971_vm0, %v8286_v10  ;;  %v985_v39 = vsel %vm971_vm0, %v8289_v38, 0  ;;  %v10193_v42 = vld [vmem:[%s10891_s30 + $0x28] sm:$0xff]   ;;  %v10195_v44 = vld [vmem:[%s10891_s30 + $0x30] sm:$0xff]   ;;  %v10206_v46 = vld [vmem:[%s10891_s30 + $0x38] sm:$0xff]  }
  0x1c   : > { %v10194_v43 = vld [vmem:[%s10891_s30 + $0xe8] sm:$0xff]   ;;  %v10196_v45 = vld [vmem:[%s10891_s30 + $0xf0] sm:$0xff]   ;;  %v10207_v47 = vld [vmem:[%s10891_s30 + $0xf8] sm:$0xff]  }
  0x1d   : > { %v10213_v48 = vld [vmem:[%s10891_s30 + $0x40] sm:$0xff]   ;;  %v10214_v50 = vld [vmem:[%s10891_s30 + $0x48] sm:$0xff]   ;;  %v11021_v51 = vld [vmem:[%s10891_s30 + $0x50] sm:$0xff]  }
  0x1e   : > { %997 = vmatpush1.bf16.msra.mxu0 %v973_v12  ;;  %9455 = vmatpush1.bf16.msra.mxu1 %v973_v12  ;;  %v10236_v49 = vld [vmem:[%s15974_s5 + $0xc] ss:$20 sps:$4 sm:$0xff]   ;;  %v11030_v52 = vld [vmem:[%s10891_s30 + $0x58] sm:$0xff]   ;;  %v11054_v55 = vld [vmem:[%s10891_s30 + $0x70] sm:$0xff]  }
  0x1f   : > { %1696 = vmatprep.subr.bf16.mxu0 %v10184_v11  ;;  %1343 = vmatprep.subr.bf16.mxu1 %v10199_v13  ;;  %v11038_v53 = vld [vmem:[%s10891_s30 + $0x60] sm:$0xff]   ;;  %v11046_v54 = vld [vmem:[%s10891_s30 + $0x68] sm:$0xff]   ;;  %v11062_v56 = vld [vmem:[%s10891_s30 + $0x78] sm:$0xff]  }
  0x20   : > { %v11070_v57 = vld [vmem:[%s10891_s30 + $0x80] sm:$0xff]   ;;  %v11084_v60 = vld [vmem:[%s10891_s30 + $0x88] sm:$0xff]   ;;  %v11104_v1 = vld [vmem:[%s10891_s30 + $0x90] sm:$0xff]  }
  0x21   : > { %8292 = vmatmul.mubr.msk.bf16.vlgmr.msra.gmra.mrb[0].mxu0 %vm874_vm1, %v10903_v14  ;;  %8316 = vmatmul.mubr.msk.bf16.vlgmr.msra.gmra.mrb[0].mxu1 %vm874_vm1, %v10181_v15  ;;  %v10248_v58 = vld [vmem:[%s15974_s5 + $0x4] ss:$20 sps:$4 sm:$0xff]   ;;  %v10246_v59 = vld [vmem:[%s15974_s5] ss:$20 sps:$4 sm:$0xff]   ;;  %v10252_v62 = vld [vmem:[%s15974_s5 + $0x28] ss:$20 sps:$4 sm:$0xff]  }
  0x22   : > { %1697 = vmatpush1.bf16.msra.mxu0 %v10182_v16  ;;  %1032 = vmatprep.mubr.bf16.mxu0 %v15980_v3  ;;  %v10254_v61 = vld [vmem:[%s15974_s5 + $0x2c] ss:$20 sps:$4 sm:$0xff]   ;;  %v10257_v63 = vld [vmem:[%s15974_s5 + $0x54] ss:$20 sps:$4 sm:$0xff]   ;;  %v10255_v0 = vld [vmem:[%s15974_s5 + $0x50] ss:$20 sps:$4 sm:$0xff]  }
  0x23   : > { %1272 = vmatprep.mubr.bf16.mxu1 %v15980_v3  ;;  %1344 = vmatpush1.bf16.msra.mxu1 %v10197_v17  ;;  %v10260_v2 = vld [vmem:[%s15974_s5 + $0x7c] ss:$20 sps:$4 sm:$0xff]   ;;  %v10258_v4 = vld [vmem:[%s15974_s5 + $0x78] ss:$20 sps:$4 sm:$0xff]   ;;  %v10261_v6 = vld [vmem:[%s15974_s5 + $0xa0] ss:$20 sps:$4 sm:$0xff]  }
  0x24   : > { %1698 = vmatprep.subr.bf16.mxu0 %v10202_v21  ;;  %1345 = vmatprep.subr.bf16.mxu1 %v10205_v22  ;;  %v10263_v5 = vld [vmem:[%s15974_s5 + $0xa4] ss:$20 sps:$4 sm:$0xff]   ;;  %v10269_v8 = vld [vmem:[%s15974_s5 + $0xcc] ss:$20 sps:$4 sm:$0xff]   ;;  %v10267_v9 = vld [vmem:[%s15974_s5 + $0xc8] ss:$20 sps:$4 sm:$0xff]  }
  0x25   : > { %v11125_v7 = vld [vmem:[%s10891_s30 + $0x98] sm:$0xff]   ;;  %v10272_v10 = vld [vmem:[%s15974_s5 + $0xf4] ss:$20 sps:$4 sm:$0xff]   ;;  %v10270_v11 = vld [vmem:[%s15974_s5 + $0xf0] ss:$20 sps:$4 sm:$0xff]  }
  0x26   : > { %1699 = vmatpush1.bf16.msra.mxu0 %v10200_v18  ;;  %v10275_v12 = vld [vmem:[%s15974_s5 + $0x11c] ss:$20 sps:$4 sm:$0xff]   ;;  %v10273_v13 = vld [vmem:[%s15974_s5 + $0x118] ss:$20 sps:$4 sm:$0xff]   ;;  %v10276_v16 = vld [vmem:[%s15974_s5 + $0x140] ss:$20 sps:$4 sm:$0xff]  }
  0x27   : > { %1346 = vmatpush1.bf16.msra.mxu1 %v10203_v23  ;;  %1700 = vmatprep.subr.bf16.mxu0 %v10220_v33  ;;  %v10278_v15 = vld [vmem:[%s15974_s5 + $0x144] ss:$20 sps:$4 sm:$0xff]   ;;  %v10284_v17 = vld [vmem:[%s15974_s5 + $0x16c] ss:$20 sps:$4 sm:$0xff]   ;;  %v10282_v18 = vld [vmem:[%s15974_s5 + $0x168] ss:$20 sps:$4 sm:$0xff]  }
  0x28   : > { %1347 = vmatprep.subr.bf16.mxu1 %v10210_v24  ;;  %v10285_v21 = vld [vmem:[%s15974_s5 + $0x190] ss:$20 sps:$4 sm:$0xff]   ;;  %v10288_v23 = vld [vmem:[%s15974_s5 + $0x1b8] ss:$20 sps:$4 sm:$0xff]  }
  0x29   : > { %8293 = vmatmul.mubr.msk.bf16.gmra.mrb[4].mxu0 %vm874_vm1, %v10921_v19  ;;  %8317 = vmatmul.mubr.msk.bf16.gmra.mrb[4].mxu1 %vm874_vm1, %v10186_v20  ;;  %v10287_v20 = vld [vmem:[%s15974_s5 + $0x194] ss:$20 sps:$4 sm:$0xff]   ;;  %v10290_v22 = vld [vmem:[%s15974_s5 + $0x1bc] ss:$20 sps:$4 sm:$0xff]   ;;  %v10293_v25 = vld [vmem:[%s15974_s5 + $0x1e4] ss:$20 sps:$4 sm:$0xff]  }
  0x2a   : > { %1042 = vmatprep.mubr.bf16.mxu0 %v15980_v3  ;;  %1282 = vmatprep.mubr.bf16.mxu1 %v15980_v3  ;;  %v11194_v24 = vld [vmem:[%s10891_s30 + $0xb0] sm:$0xff]   ;;  %v10299_v27 = vld [vmem:[%s15974_s5 + $0x20c] ss:$20 sps:$4 sm:$0xff]  }
  0x2b   : > { %1348 = vmatpush1.bf16.msra.mxu1 %v10208_v26  ;;  %1701 = vmatpush1.bf16.msra.mxu0 %v10218_v32  ;;  %v10291_v26 = vld [vmem:[%s15974_s5 + $0x1e0] ss:$20 sps:$4 sm:$0xff]   ;;  %v10305_v32 = vld [vmem:[%s15974_s5 + $0x25c] ss:$20 sps:$4 sm:$0xff]   ;;  %v10303_v33 = vld [vmem:[%s15974_s5 + $0x258] ss:$20 sps:$4 sm:$0xff]  }
  0x2c   : > { %8324 = vmatprep.subr.msk.bf16.mxu1 %vm971_vm0, %v8288_v29  ;;  %8357 = vmatprep.subr.msk.bf16.mxu0 %vm971_vm0, %v8290_v37  ;;  %v11215_v29 = vld [vmem:[%s10891_s30 + $0xb8] sm:$0xff]   ;;  %v10641_v36 = vld [vmem:[%s10891_s30] sm:$0xff]  }
  0x2d   : > { %v10237_v37 = vld [vmem:[%s15974_s5 + $0x30] ss:$20 sps:$4 sm:$0xff]  }
  0x2e   : > { %v10242_v38 = vld [vmem:[%s15974_s5 + $0x5c] ss:$20 sps:$4 sm:$0xff]  }
  0x2f   : > { %1350 = vmatpush1.bf16.msra.mxu1 %v979_v31  ;;  %1703 = vmatpush1.bf16.msra.mxu0 %v985_v39  ;;  %v10300_v31 = vld [vmem:[%s15974_s5 + $0x230] ss:$20 sps:$4 sm:$0xff]   ;;  %v579_v39 = vlaneseq }
  0x30   : > { %4287 = vmatprep.subr.bf16.mxu0 %v10236_v49  ;;  %3581 = vmatprep.subr.bf16.mxu1 %v10248_v58  ;;  %v10266_v49 = vld [vmem:[%s15974_s5 + $0xd4] ss:$20 sps:$4 sm:$0xff]  }
  0x31   : > { %8294 = vmatmul.mubr.msk.bf16.gmra.mrb[8].mxu0 %vm874_vm1, %v10948_v28  ;;  %8318 = vmatmul.mubr.msk.bf16.gmra.mrb[8].mxu1 %vm874_vm1, %v10188_v30  ;;  %v10302_v30 = vld [vmem:[%s15974_s5 + $0x234] ss:$20 sps:$4 sm:$0xff]  }
  0x32   : > { %1052 = vmatprep.mubr.bf16.mxu0 %v15980_v3  ;;  %1292 = vmatprep.mubr.bf16.mxu1 %v15980_v3 }
  0x39   : > { %8295 = vmatmul.mubr.msk.bf16.gmra.mrb[12].mxu0 %vm874_vm1, %v10189_v34  ;;  %8319 = vmatmul.mubr.msk.bf16.gmra.mrb[12].mxu1 %vm874_vm1, %v10190_v35  ;;  %v10239_v35 = vld [vmem:[%s15974_s5 + $0x34] ss:$20 sps:$4 sm:$0xff]  }
  0x3a   : > { %1062 = vmatprep.mubr.bf16.mxu0 %v15980_v3  ;;  %1302 = vmatprep.mubr.bf16.mxu1 %v15980_v3 }
  0x41   : > { %8296 = vmatmul.mubr.msk.bf16.gmra.mrb[16].mxu0 %vm874_vm1, %v10191_v40  ;;  %8320 = vmatmul.mubr.msk.bf16.gmra.mrb[16].mxu1 %vm874_vm1, %v10192_v41  ;;  %v10245_v41 = vld [vmem:[%s15974_s5 + $0x84] ss:$20 sps:$4 sm:$0xff]  }
  0x42   : > { %1072 = vmatprep.mubr.bf16.mxu0 %v15980_v3  ;;  %1312 = vmatprep.mubr.bf16.mxu1 %v15980_v3 }
  0x49   : > { %8297 = vmatmul.mubr.msk.bf16.gmra.mrb[20].mxu0 %vm874_vm1, %v10193_v42  ;;  %8321 = vmatmul.mubr.msk.bf16.gmra.mrb[20].mxu1 %vm874_vm1, %v10194_v43  ;;  %v11265_v43 = vshrl.u32 %v579_v39, 7 }
  0x4a   : > { %1082 = vmatprep.mubr.bf16.mxu0 %v15980_v3  ;;  %1322 = vmatprep.mubr.bf16.mxu1 %v15980_v3 }
  0x4b   : > { %16033 = vst [vmem:[#allocation3_spill] sm:$0xff] %v11265_v43 }
  0x51   : > { %8298 = vmatmul.mubr.msk.bf16.gmra.mrb[24].mxu0 %vm874_vm1, %v10195_v44  ;;  %8322 = vmatmul.mubr.msk.bf16.gmra.mrb[24].mxu1 %vm874_vm1, %v10196_v45  ;;  %v10251_v45 = vld [vmem:[%s15974_s5 + $0xac] ss:$20 sps:$4 sm:$0xff]  }
  0x52   : > { %1092 = vmatprep.mubr.bf16.mxu0 %v15980_v3  ;;  %1332 = vmatprep.mubr.bf16.mxu1 %v15980_v3 }
  0x59   : > { %8299 = vmatmul.mubr.msk.bf16.gmra.mrb[28].mxu0 %vm874_vm1, %v10206_v46  ;;  %8323 = vmatmul.mubr.msk.bf16.gmra.mrb[28].mxu1 %vm874_vm1, %v10207_v47  ;;  %v10249_v47 = vld [vmem:[%s15974_s5 + $0xa8] ss:$20 sps:$4 sm:$0xff]  }
  0x5a   : > { %1102 = vmatprep.mubr.bf16.mxu0 %v15980_v3  ;;  %1375 = vmatprep.mubr.bf16.mxu1 %v15980_v3 }
  0x61   : > { %8300 = vmatmul.mubr.msk.bf16.gmra.mrb[32].mxu0 %vm874_vm1, %v10213_v48  ;;  %8325 = vmatmul.mubr.msk.bf16.vlgmr.msra.gmra.mrb[32].mxu1 %vm874_vm1, %v10903_v14  ;;  %v11152_v14 = vld [vmem:[%s10891_s30 + $0xa0] sm:$0xff]  }
  0x62   : > { %1112 = vmatprep.mubr.bf16.mxu0 %v15980_v3  ;;  %1385 = vmatprep.mubr.bf16.mxu1 %v15980_v3 }
  0x63   : > { %3582 = vmatpush1.bf16.msra.mxu1 %v10246_v59  ;;  %v10264_v59 = vld [vmem:[%s15974_s5 + $0xd0] ss:$20 sps:$4 sm:$0xff]  }
  0x64   : > { %3583 = vmatprep.subr.bf16.mxu1 %v10254_v61 }
  0x67   : > { %3584 = vmatpush1.bf16.msra.mxu1 %v10252_v62  ;;  %v10281_v62 = vld [vmem:[%s15974_s5 + $0xfc] ss:$20 sps:$4 sm:$0xff]  }
  0x68   : > { %3585 = vmatprep.subr.bf16.mxu1 %v10257_v63 }
  0x69   : > { %8301 = vmatmul.mubr.msk.bf16.gmra.mrb[36].mxu0 %vm874_vm1, %v10214_v50  ;;  %8326 = vmatmul.mubr.msk.bf16.gmra.mrb[36].mxu1 %vm874_vm1, %v10921_v19  ;;  %v11173_v19 = vld [vmem:[%s10891_s30 + $0xa8] sm:$0xff]  }
  0x6a   : > { %1122 = vmatprep.mubr.bf16.mxu0 %v15980_v3  ;;  %1395 = vmatprep.mubr.bf16.mxu1 %v15980_v3 }
  0x6b   : > { %3586 = vmatpush1.bf16.msra.mxu1 %v10255_v0 }
  0x6c   : > { %3587 = vmatprep.subr.bf16.mxu1 %v10260_v2 }
  0x6f   : > { %3588 = vmatpush1.bf16.msra.mxu1 %v10258_v4 }
  0x70   : > { %3589 = vmatprep.subr.bf16.mxu1 %v10263_v5 }
  0x71   : > { %8302 = vmatmul.mubr.msk.bf16.gmra.mrb[40].mxu0 %vm874_vm1, %v11021_v51  ;;  %8327 = vmatmul.mubr.msk.bf16.gmra.mrb[40].mxu1 %vm874_vm1, %v10948_v28  ;;  %v10297_v28 = vld [vmem:[%s15974_s5 + $0x208] ss:$20 sps:$4 sm:$0xff]  }
  0x72   : > { %1132 = vmatprep.mubr.bf16.mxu0 %v15980_v3  ;;  %1405 = vmatprep.mubr.bf16.mxu1 %v15980_v3 }
  0x73   : > { %3590 = vmatpush1.bf16.msra.mxu1 %v10261_v6  ;;  %v10279_v6 = vld [vmem:[%s15974_s5 + $0xf8] ss:$20 sps:$4 sm:$0xff]  }
  0x74   : > { %3591 = vmatprep.subr.bf16.mxu1 %v10269_v8  ;;  %v10296_v8 = vld [vmem:[%s15974_s5 + $0x124] ss:$20 sps:$4 sm:$0xff]  }
  0x77   : > { %3592 = vmatpush1.bf16.msra.mxu1 %v10267_v9  ;;  %v10644_v9 = vld [vmem:[%s10891_s30 + $0x18] sm:$0xff]  }
  0x78   : > { %3593 = vmatprep.subr.bf16.mxu1 %v10272_v10 }
  0x79   : > { %8303 = vmatmul.mubr.msk.bf16.gmra.mrb[44].mxu0 %vm874_vm1, %v11030_v52  ;;  %8328 = vmatmul.mubr.msk.bf16.gmra.mrb[44].mxu1 %vm874_vm1, %v10189_v34  ;;  %v10234_v34 = vld [vmem:[%s15974_s5 + $0x8] ss:$20 sps:$4 sm:$0xff]  }
  0x7a   : > { %1142 = vmatprep.mubr.bf16.mxu0 %v15980_v3  ;;  %1415 = vmatprep.mubr.bf16.mxu1 %v15980_v3 }
  0x7b   : > { %3594 = vmatpush1.bf16.msra.mxu1 %v10270_v11  ;;  %v10294_v11 = vld [vmem:[%s15974_s5 + $0x120] ss:$20 sps:$4 sm:$0xff]  }
  0x7c   : > { %3595 = vmatprep.subr.bf16.mxu1 %v10275_v12 }
  0x7f   : > { %3596 = vmatpush1.bf16.msra.mxu1 %v10273_v13  ;;  %v10311_v13 = vld [vmem:[%s15974_s5 + $0x14c] ss:$20 sps:$4 sm:$0xff]  }
  0x80   : > { %3597 = vmatprep.subr.bf16.mxu1 %v10278_v15 }
  0x81   : > { %8304 = vmatmul.mubr.msk.bf16.gmra.mrb[48].mxu0 %vm874_vm1, %v11038_v53  ;;  %8329 = vmatmul.mubr.msk.bf16.gmra.mrb[48].mxu1 %vm874_vm1, %v10191_v40  ;;  %v10240_v40 = vld [vmem:[%s15974_s5 + $0x58] ss:$20 sps:$4 sm:$0xff]  }
  0x82   : > { %1152 = vmatprep.mubr.bf16.mxu0 %v15980_v3  ;;  %1425 = vmatprep.mubr.bf16.mxu1 %v15980_v3 }
  0x83   : > { %3598 = vmatpush1.bf16.msra.mxu1 %v10276_v16 }
  0x84   : > { %3599 = vmatprep.subr.bf16.mxu1 %v10284_v17 }
  0x87   : > { %3600 = vmatpush1.bf16.msra.mxu1 %v10282_v18 }
  0x88   : > { %3601 = vmatprep.subr.bf16.mxu1 %v10287_v20 }
  0x89   : > { %8305 = vmatmul.mubr.msk.bf16.gmra.mrb[52].mxu0 %vm874_vm1, %v11046_v54  ;;  %8330 = vmatmul.mubr.msk.bf16.gmra.mrb[52].mxu1 %vm874_vm1, %v10193_v42  ;;  %v10642_v42 = vld [vmem:[%s10891_s30 + $0x8] sm:$0xff]  }
  0x8a   : > { %1162 = vmatprep.mubr.bf16.mxu0 %v15980_v3  ;;  %1435 = vmatprep.mubr.bf16.mxu1 %v15980_v3 }
  0x8b   : > { %3602 = vmatpush1.bf16.msra.mxu1 %v10285_v21  ;;  %v10309_v21 = vld [vmem:[%s15974_s5 + $0x148] ss:$20 sps:$4 sm:$0xff]  }
  0x8c   : > { %3603 = vmatprep.subr.bf16.mxu1 %v10290_v22  ;;  %v10320_v22 = vld [vmem:[%s15974_s5 + $0x174] ss:$20 sps:$4 sm:$0xff]  }
  0x8f   : > { %3604 = vmatpush1.bf16.msra.mxu1 %v10288_v23 }
  0x90   : > { %3605 = vmatprep.subr.bf16.mxu1 %v10293_v25  ;;  %v10645_v25 = vld [vmem:[%s10891_s30 + $0x20] sm:$0xff]  }
  0x91   : > { %8306 = vmatmul.mubr.msk.bf16.gmra.mrb[56].mxu0 %vm874_vm1, %v11054_v55  ;;  %8331 = vmatmul.mubr.msk.bf16.gmra.mrb[56].mxu1 %vm874_vm1, %v10195_v44  ;;  %v10243_v44 = vld [vmem:[%s15974_s5 + $0x80] ss:$20 sps:$4 sm:$0xff]  }
  0x92   : > { %1172 = vmatprep.mubr.bf16.mxu0 %v15980_v3  ;;  %1445 = vmatprep.mubr.bf16.mxu1 %v15980_v3 }
  0x93   : > { %3606 = vmatpush1.bf16.msra.mxu1 %v10291_v26  ;;  %v10318_v26 = vld [vmem:[%s15974_s5 + $0x170] ss:$20 sps:$4 sm:$0xff]  }
  0x94   : > { %3607 = vmatprep.subr.bf16.mxu1 %v10299_v27 }
  0x97   : > { %3608 = vmatpush1.bf16.msra.mxu1 %v10297_v28  ;;  %v10329_v28 = vld [vmem:[%s15974_s5 + $0x19c] ss:$20 sps:$4 sm:$0xff]  }
  0x98   : > { %3609 = vmatprep.subr.bf16.mxu1 %v10302_v30 }
  0x99   : > { %8307 = vmatmul.mubr.msk.bf16.gmra.mrb[60].mxu0 %vm874_vm1, %v11062_v56  ;;  %8332 = vmatmul.mubr.msk.bf16.gmra.mrb[60].mxu1 %vm874_vm1, %v10206_v46  ;;  %v15979_v46 = vsub.s32 0, %v11265_v43 }
  0x9a   : > { %1182 = vmatprep.mubr.bf16.mxu0 %v15980_v3  ;;  %1455 = vmatprep.mubr.bf16.mxu1 %v15980_v3 }
  0x9b   : > { %3610 = vmatpush1.bf16.msra.mxu1 %v10300_v31 }
  0x9c   : > { %3611 = vmatprep.subr.bf16.mxu1 %v10305_v32 }
  0x9f   : > { %3612 = vmatpush1.bf16.msra.mxu1 %v10303_v33 }
  0xa1   : > { %8308 = vmatmul.mubr.msk.bf16.gmra.mrb[64].mxu0 %vm874_vm1, %v11070_v57  ;;  %8333 = vmatmul.mubr.msk.bf16.gmra.mrb[64].mxu1 %vm874_vm1, %v10213_v48  ;;  %v577_v48 = vld [vmem:[%s15972_s3] sm:$0x3f] }
  0xa2   : > { %1192 = vmatprep.mubr.bf16.mxu0 %v15980_v3  ;;  %1465 = vmatprep.mubr.bf16.mxu1 %v15980_v3  ;;  %v11291_v58 = vrot.slane %v577_v48, %v15979_v46  ;;  %v10336_v48 = vld [vmem:[%s15974_s5 + $0x1c0] ss:$20 sps:$4 sm:$0xff]  }
  0xa9   : > { %8309 = vmatmul.mubr.msk.bf16.gmra.mrb[68].mxu0 %vm874_vm1, %v11084_v60  ;;  %8334 = vmatmul.mubr.msk.bf16.gmra.mrb[68].mxu1 %vm874_vm1, %v10214_v50  ;;  %v10643_v50 = vld [vmem:[%s10891_s30 + $0x10] sm:$0xff]  }
  0xaa   : > { %1202 = vmatprep.mubr.bf16.mxu0 %v15980_v3  ;;  %1475 = vmatprep.mubr.bf16.mxu1 %v15980_v3 }
  0xb1   : > { %8310 = vmatmul.mubr.msk.bf16.gmra.mrb[72].mxu0 %vm874_vm1, %v11104_v1  ;;  %8335 = vmatmul.mubr.msk.bf16.gmra.mrb[72].mxu1 %vm874_vm1, %v11021_v51 }
  0xb2   : > { %1212 = vmatprep.mubr.bf16.mxu0 %v15980_v3  ;;  %1485 = vmatprep.mubr.bf16.mxu1 %v15980_v3 }
  0xb9   : > { %8311 = vmatmul.mubr.msk.bf16.gmra.mrb[76].mxu0 %vm874_vm1, %v11125_v7  ;;  %8336 = vmatmul.mubr.msk.bf16.gmra.mrb[76].mxu1 %vm874_vm1, %v11030_v52 }
  0xba   : > { %1222 = vmatprep.mubr.bf16.mxu0 %v15980_v3  ;;  %1495 = vmatprep.mubr.bf16.mxu1 %v15980_v3 }
  0xc1   : > { %8312 = vmatmul.mubr.msk.bf16.gmra.mrb[80].mxu0 %vm874_vm1, %v11152_v14  ;;  %8337 = vmatmul.mubr.msk.bf16.gmra.mrb[80].mxu1 %vm874_vm1, %v11038_v53 }
  0xc2   : > { %1232 = vmatprep.mubr.bf16.mxu0 %v15980_v3  ;;  %1505 = vmatprep.mubr.bf16.mxu1 %v15980_v3 }
  0xc9   : > { %8313 = vmatmul.mubr.msk.bf16.gmra.mrb[84].mxu0 %vm874_vm1, %v11173_v19  ;;  %8338 = vmatmul.mubr.msk.bf16.gmra.mrb[84].mxu1 %vm874_vm1, %v11046_v54 }
  0xca   : > { %1242 = vmatprep.mubr.bf16.mxu0 %v15980_v3  ;;  %1515 = vmatprep.mubr.bf16.mxu1 %v15980_v3 }
  0xd1   : > { %8314 = vmatmul.mubr.msk.bf16.gmra.mrb[88].mxu0 %vm874_vm1, %v11194_v24  ;;  %8339 = vmatmul.mubr.msk.bf16.gmra.mrb[88].mxu1 %vm874_vm1, %v11054_v55 }
  0xd2   : > { %1252 = vmatprep.mubr.bf16.mxu0 %v15980_v3  ;;  %1525 = vmatprep.mubr.bf16.mxu1 %v15980_v3 }
  0xd9   : > { %8315 = vmatmul.mubr.msk.bf16.gmra.mrb[92].mxu0 %vm874_vm1, %v11215_v29  ;;  %8340 = vmatmul.mubr.msk.bf16.gmra.mrb[92].mxu1 %vm874_vm1, %v11062_v56 }
  0xda   : > { %1535 = vmatprep.mubr.bf16.mxu1 %v15980_v3  ;;  %1728 = vmatprep.mubr.bf16.mxu0 %v15980_v3 }
  0xe1   : > { %8341 = vmatmul.mubr.msk.bf16.gmra.mrb[96].mxu1 %vm874_vm1, %v11070_v57  ;;  %8358 = vmatmul.mubr.msk.bf16.vlgmr.msra.gmra.mrb[96].mxu0 %vm874_vm1, %v10641_v36  ;;  %v10646_v36 = vld [vmem:[%s10891_s30 + $0x28] sm:$0xff]  }
  0xe2   : > { %4288 = vmatpush1.bf16.msra.mxu0 %v10234_v34  ;;  %1545 = vmatprep.mubr.bf16.mxu1 %v15980_v3 }
  0xe3   : > { %1738 = vmatprep.mubr.bf16.mxu0 %v15980_v3  ;;  %4289 = vmatprep.subr.bf16.mxu0 %v10239_v35  ;;  %v10327_v35 = vld [vmem:[%s15974_s5 + $0x198] ss:$20 sps:$4 sm:$0xff]  }
  0xe6   : > { %4290 = vmatpush1.bf16.msra.mxu0 %v10237_v37 }
  0xe7   : > { %4291 = vmatprep.subr.bf16.mxu0 %v10242_v38 }
  0xe9   : > { %8342 = vmatmul.mubr.msk.bf16.gmra.mrb[100].mxu1 %vm874_vm1, %v11084_v60  ;;  %8359 = vmatmul.mubr.msk.bf16.gmra.mrb[100].mxu0 %vm874_vm1, %v10642_v42 }
  0xea   : > { %1555 = vmatprep.mubr.bf16.mxu1 %v15980_v3  ;;  %1748 = vmatprep.mubr.bf16.mxu0 %v15980_v3 }
  0xeb   : > { %4292 = vmatpush1.bf16.msra.mxu0 %v10240_v40 }
  0xec   : > { %4293 = vmatprep.subr.bf16.mxu0 %v10245_v41 }
  0xef   : > { %4294 = vmatpush1.bf16.msra.mxu0 %v10243_v44 }
  0xf0   : > { %4295 = vmatprep.subr.bf16.mxu0 %v10251_v45 }
  0xf1   : > { %8343 = vmatmul.mubr.msk.bf16.gmra.mrb[104].mxu1 %vm874_vm1, %v11104_v1  ;;  %8360 = vmatmul.mubr.msk.bf16.gmra.mrb[104].mxu0 %vm874_vm1, %v10643_v50 }
  0xf2   : > { %1565 = vmatprep.mubr.bf16.mxu1 %v15980_v3  ;;  %1758 = vmatprep.mubr.bf16.mxu0 %v15980_v3 }
  0xf3   : > { %4296 = vmatpush1.bf16.msra.mxu0 %v10249_v47  ;;  %v10647_v47 = vld [vmem:[%s10891_s30 + $0x30] sm:$0xff]  }
  0xf4   : > { %v1024_v61 = vpop.f32.mrb[0].mxu0  ;;  %4297 = vmatprep.subr.bf16.mxu0 %v10266_v49  ;;  %v10338_v49 = vld [vmem:[%s15974_s5 + $0x1c4] ss:$20 sps:$4 sm:$0xff]  }
  0xf5   : > { %v11299_v63 = vpop.f32.mrb[1].mxu0  ;;  %v11302_v2 = vadd.f32 %v1024_v61, %v11291_v58 }
  0xf6   : > { %16034 = vst [vmem:[#allocation4_spill] sm:$0xff] %v11299_v63  ;;  %v1028_v0 = vpop.f32.mrb[2].mxu0 }
  0xf7   : > { %v11305_v4 = vadd.f32 %v1028_v0, %v11291_v58  ;;  %v11307_v5 = vpop.f32.mrb[3].mxu0  ;;  %4298 = vmatpush1.bf16.msra.mxu0 %v10264_v59 }
  0xf8   : > { %16035 = vst [vmem:[#allocation5_spill] sm:$0xff] %v11307_v5  ;;  %4299 = vmatprep.subr.bf16.mxu0 %v10281_v62 }
  0xf9   : > { %8344 = vmatmul.mubr.msk.bf16.gmra.mrb[108].mxu1 %vm874_vm1, %v11125_v7  ;;  %8361 = vmatmul.mubr.msk.bf16.gmra.mrb[108].mxu0 %vm874_vm1, %v10644_v9  ;;  %v11508_v9 = vld [vmem:[%s10891_s30 + $0xd8] sm:$0xff]  }
  0xfa   : > { %1575 = vmatprep.mubr.bf16.mxu1 %v15980_v3  ;;  %1768 = vmatprep.mubr.bf16.mxu0 %v15980_v3 }
  0xfb   : > { %4300 = vmatpush1.bf16.msra.mxu0 %v10279_v6 }
  0xfc   : > { %v1034_v12 = vpop.f32.mrb[4].mxu0  ;;  %4301 = vmatprep.subr.bf16.mxu0 %v10296_v8  ;;  %v10648_v8 = vld [vmem:[%s10891_s30 + $0x38] sm:$0xff]  }
  0xfd   : > { %v11329_v15 = vpop.f32.mrb[5].mxu0  ;;  %v11332_v17 = vadd.f32 %v1034_v12, %v11291_v58 }
  0xfe   : > { %16036 = vst [vmem:[#allocation6_spill] sm:$0xff] %v11329_v15  ;;  %v1038_v16 = vpop.f32.mrb[6].mxu0  ;;  %v11702_v15 = vld [vmem:[%s10989_s23 + $0x60] ss:$16 sps:$4 sm:$0xff]  }
  0xff   : > { %v11335_v18 = vadd.f32 %v1038_v16, %v11291_v58  ;;  %v11337_v20 = vpop.f32.mrb[7].mxu0  ;;  %4302 = vmatpush1.bf16.msra.mxu0 %v10294_v11 }
 0x100   : > { %16037 = vst [vmem:[#allocation7_spill] sm:$0xff] %v11337_v20  ;;  %4303 = vmatprep.subr.bf16.mxu0 %v10311_v13 }
 0x101   : > { %8345 = vmatmul.mubr.msk.bf16.gmra.mrb[112].mxu1 %vm874_vm1, %v11152_v14  ;;  %8362 = vmatmul.mubr.msk.bf16.gmra.mrb[112].mxu0 %vm874_vm1, %v10645_v25 }
 0x102   : > { %1585 = vmatprep.mubr.bf16.mxu1 %v15980_v3  ;;  %1778 = vmatprep.mubr.bf16.mxu0 %v15980_v3 }
 0x103   : > { %4304 = vmatpush1.bf16.msra.mxu0 %v10309_v21 }
 0x104   : > { %v1044_v27 = vpop.f32.mrb[8].mxu0  ;;  %4305 = vmatprep.subr.bf16.mxu0 %v10320_v22 }
 0x105   : > { %v11359_v30 = vpop.f32.mrb[9].mxu0  ;;  %v11362_v32 = vadd.f32 %v1044_v27, %v11291_v58  ;;  %v10650_v27 = vld [vmem:[%s10891_s30 + $0x40] sm:$0xff]  }
 0x106   : > { %16038 = vst [vmem:[#allocation8_spill] sm:$0xff] %v11359_v30  ;;  %v1048_v31 = vpop.f32.mrb[10].mxu0  ;;  %v11669_v30 = vld [vmem:[%s10989_s23 + $0x40] ss:$16 sps:$4 sm:$0xff]  }
 0x107   : > { %v11365_v33 = vadd.f32 %v1048_v31, %v11291_v58  ;;  %v11367_v34 = vpop.f32.mrb[11].mxu0  ;;  %4306 = vmatpush1.bf16.msra.mxu0 %v10318_v26  ;;  %v11435_v26 = vld [vmem:[%s10891_s30 + $0xc0] sm:$0xff]  }
 0x108   : > { %16039 = vst [vmem:[#allocation9_spill] sm:$0xff] %v11367_v34  ;;  %4307 = vmatprep.subr.bf16.mxu0 %v10329_v28  ;;  %v10345_v28 = vld [vmem:[%s15974_s5 + $0x1e8] ss:$20 sps:$4 sm:$0xff]   ;;  %v10347_v31 = vld [vmem:[%s15974_s5 + $0x1ec] ss:$20 sps:$4 sm:$0xff]  }
 0x109   : > { %8346 = vmatmul.mubr.msk.bf16.gmra.mrb[116].mxu1 %vm874_vm1, %v11173_v19  ;;  %8363 = vmatmul.mubr.msk.bf16.gmra.mrb[116].mxu0 %vm874_vm1, %v10646_v36 }
 0x10a   : > { %1595 = vmatprep.mubr.bf16.mxu1 %v15980_v3  ;;  %1788 = vmatprep.mubr.bf16.mxu0 %v15980_v3 }
 0x10b   : > { %4308 = vmatpush1.bf16.msra.mxu0 %v10327_v35 }
 0x10c   : > { %v1054_v38 = vpop.f32.mrb[12].mxu0  ;;  %4309 = vmatprep.subr.bf16.mxu0 %v10338_v49  ;;  %v11460_v49 = vld [vmem:[%s10891_s30 + $0xc8] sm:$0xff]  }
 0x10d   : > { %v11380_v39 = vpop.f32.mrb[13].mxu0  ;;  %v11383_v41 = vadd.f32 %v1054_v38, %v11291_v58 }
 0x10e   : > { %16040 = vst [vmem:[#allocation10_spill] sm:$0xff] %v11380_v39  ;;  %v1058_v40 = vpop.f32.mrb[14].mxu0  ;;  %v11672_v39 = vld [vmem:[%s10989_s23 + $0x64] ss:$16 sps:$4 sm:$0xff]  }
 0x10f   : > { %v11386_v42 = vadd.f32 %v1058_v40, %v11291_v58  ;;  %v11388_v44 = vpop.f32.mrb[15].mxu0  ;;  %4310 = vmatpush1.bf16.msra.mxu0 %v10336_v48 }
 0x110   : > { %16041 = vst [vmem:[#allocation11_spill] sm:$0xff] %v11388_v44  ;;  %4311 = vmatprep.subr.bf16.mxu0 %v10347_v31 }
 0x111   : > { %8347 = vmatmul.mubr.msk.bf16.gmra.mrb[120].mxu1 %vm874_vm1, %v11194_v24  ;;  %8364 = vmatmul.mubr.msk.bf16.gmra.mrb[120].mxu0 %vm874_vm1, %v10647_v47 }
 0x112   : > { %1605 = vmatprep.mubr.bf16.mxu1 %v15980_v3  ;;  %1798 = vmatprep.mubr.bf16.mxu0 %v15980_v3 }
 0x113   : > { %4312 = vmatpush1.bf16.msra.mxu0 %v10345_v28 }
 0x114   : > { %v1064_v50 = vpop.f32.mrb[16].mxu0 }
 0x115   : > { %v11404_v59 = vpop.f32.mrb[17].mxu0  ;;  %v11407_v62 = vadd.f32 %v1064_v50, %v11291_v58  ;;  %v10652_v50 = vld [vmem:[%s10891_s30 + $0x48] sm:$0xff]  }
 0x116   : > { %16042 = vst [vmem:[#allocation12_spill] sm:$0xff] %v11404_v59  ;;  %v1068_v61 = vpop.f32.mrb[18].mxu0  ;;  %v16070_v59 = vmov 0  }
 0x117   : > { %v11410_v0 = vadd.f32 %v1068_v61, %v11291_v58  ;;  %v11412_v6 = vpop.f32.mrb[19].mxu0 }
 0x118   : > { %16043 = vst [vmem:[#allocation13_spill] sm:$0xff] %v11412_v6  ;;  %v11607_v6 = vld [vmem:[%s10891_s30 + $0xf8] sm:$0xff]  }
 0x119   : > { %8348 = vmatmul.mubr.msk.bf16.gmra.mrb[124].mxu1 %vm874_vm1, %v11215_v29  ;;  %8365 = vmatmul.mubr.msk.bf16.gmra.mrb[124].mxu0 %vm874_vm1, %v10648_v8 }
 0x11a   : > { %1615 = vmatprep.mubr.bf16.mxu1 %v15980_v3  ;;  %1808 = vmatprep.mubr.bf16.mxu0 %v15980_v3 }
 0x11c   : > { %v1074_v11 = vpop.f32.mrb[20].mxu0 }
 0x11d   : > { %v11422_v12 = vpop.f32.mrb[21].mxu0  ;;  %v11425_v16 = vadd.f32 %v1074_v11, %v11291_v58 }
 0x11e   : > { %16044 = vst [vmem:[#allocation14_spill] sm:$0xff] %v11422_v12  ;;  %v1078_v13 = vpop.f32.mrb[22].mxu0 }
 0x11f   : > { %v11428_v21 = vadd.f32 %v1078_v13, %v11291_v58  ;;  %v11430_v22 = vpop.f32.mrb[23].mxu0 }
 0x120   : > { %16045 = vst [vmem:[#allocation15_spill] sm:$0xff] %v11430_v22 }
 0x121   : > { %8349 = vmatmul.mubr.msk.bf16.gmra.mrb[128].mxu1 %vm874_vm1, %v11435_v26  ;;  %8366 = vmatmul.mubr.msk.bf16.gmra.mrb[128].mxu0 %vm874_vm1, %v10650_v27 }
 0x122   : > { %1625 = vmatprep.mubr.bf16.mxu1 %v15980_v3  ;;  %1818 = vmatprep.mubr.bf16.mxu0 %v15980_v3 }
 0x124   : > { %v1084_v35 = vpop.f32.mrb[24].mxu0 }
 0x125   : > { %v11449_v36 = vpop.f32.mrb[25].mxu0  ;;  %v11452_v40 = vadd.f32 %v1084_v35, %v11291_v58 }
 0x126   : > { %16046 = vst [vmem:[#allocation16_spill] sm:$0xff] %v11449_v36  ;;  %v1088_v38 = vpop.f32.mrb[26].mxu0 }
 0x127   : > { %v11455_v47 = vadd.f32 %v1088_v38, %v11291_v58  ;;  %v11457_v48 = vpop.f32.mrb[27].mxu0  ;;  %v11483_v38 = vld [vmem:[%s10891_s30 + $0xd0] sm:$0xff]  }
 0x128   : > { %16047 = vst [vmem:[#allocation17_spill] sm:$0xff] %v11457_v48 }
 0x129   : > { %8350 = vmatmul.mubr.msk.bf16.gmra.mrb[132].mxu1 %vm874_vm1, %v11460_v49  ;;  %8367 = vmatmul.mubr.msk.bf16.gmra.mrb[132].mxu0 %vm874_vm1, %v10652_v50  ;;  %v10354_v50 = vld [vmem:[%s15974_s5 + $0x210] ss:$20 sps:$4 sm:$0xff]  }
 0x12a   : > { %1635 = vmatprep.mubr.bf16.mxu1 %v15980_v3  ;;  %1828 = vmatprep.mubr.bf16.mxu0 %v15980_v3 }
 0x12c   : > { %v1094_v8 = vpop.f32.mrb[28].mxu0 }
 0x12d   : > { %v11470_v11 = vpop.f32.mrb[29].mxu0  ;;  %v11473_v27 = vadd.f32 %v1094_v8, %v11291_v58  ;;  %v10356_v8 = vld [vmem:[%s15974_s5 + $0x214] ss:$20 sps:$4 sm:$0xff]  }
 0x12e   : > { %16048 = vst [vmem:[#allocation18_spill] sm:$0xff] %v11470_v11  ;;  %v1098_v13 = vpop.f32.mrb[30].mxu0  ;;  %4313 = vmatprep.subr.bf16.mxu0 %v10356_v8 }
 0x12f   : > { %v11476_v28 = vadd.f32 %v1098_v13, %v11291_v58  ;;  %v11478_v31 = vpop.f32.mrb[31].mxu0  ;;  %4314 = vmatpush1.bf16.msra.mxu0 %v10354_v50  ;;  %v11531_v50 = vld [vmem:[%s10891_s30 + $0xe0] sm:$0xff]  }
 0x130   : > { %16049 = vst [vmem:[#allocation19_spill] sm:$0xff] %v11478_v31 }
 0x131   : > { %8351 = vmatmul.mubr.msk.bf16.gmra.mrb[136].mxu1 %vm874_vm1, %v11483_v38  ;;  %8368 = vmatmul.mubr.msk.bf16.gmra.mrb[136].mxu0 %vm874_vm1, %v11021_v51 }
 0x132   : > { %1645 = vmatprep.mubr.bf16.mxu1 %v15980_v3  ;;  %1838 = vmatprep.mubr.bf16.mxu0 %v15980_v3 }
 0x134   : > { %v1104_v13 = vpop.f32.mrb[32].mxu0 }
 0x135   : > { %v11497_v46 = vpop.f32.mrb[33].mxu0  ;;  %v11500_v51 = vadd.f32 %v1104_v13, %v11291_v58 }
 0x136   : > { %16050 = vst [vmem:[#allocation20_spill] sm:$0xff] %v11497_v46  ;;  %v1108_v35 = vpop.f32.mrb[34].mxu0 }
 0x137   : > { %v11503_v61 = vadd.f32 %v1108_v35, %v11291_v58  ;;  %v11505_v25 = vpop.f32.mrb[35].mxu0 }
 0x138   : > { %16051 = vst [vmem:[#allocation21_spill] sm:$0xff] %v11505_v25 }
 0x139   : > { %8352 = vmatmul.mubr.msk.bf16.gmra.mrb[140].mxu1 %vm874_vm1, %v11508_v9  ;;  %8369 = vmatmul.mubr.msk.bf16.gmra.mrb[140].mxu0 %vm874_vm1, %v11030_v52 }
 0x13a   : > { %1655 = vmatprep.mubr.bf16.mxu1 %v15980_v3  ;;  %1848 = vmatprep.mubr.bf16.mxu0 %v15980_v3 }
 0x13c   : > { %v1114_v8 = vpop.f32.mrb[36].mxu0 }
 0x13d   : > { %v11518_v35 = vpop.f32.mrb[37].mxu0  ;;  %v11521_v45 = vadd.f32 %v1114_v8, %v11291_v58  ;;  %v10363_v8 = vld [vmem:[%s15974_s5 + $0x238] ss:$20 sps:$4 sm:$0xff]  }
 0x13e   : > { %16052 = vst [vmem:[#allocation22_spill] sm:$0xff] %v11518_v35  ;;  %v1118_v13 = vpop.f32.mrb[38].mxu0  ;;  %v11556_v35 = vld [vmem:[%s10891_s30 + $0xe8] sm:$0xff]  }
 0x13f   : > { %v11524_v37 = vadd.f32 %v1118_v13, %v11291_v58  ;;  %v11526_v23 = vpop.f32.mrb[39].mxu0  ;;  %v10365_v13 = vld [vmem:[%s15974_s5 + $0x23c] ss:$20 sps:$4 sm:$0xff]  }
 0x140   : > { %16053 = vst [vmem:[#allocation23_spill] sm:$0xff] %v11526_v23  ;;  %4315 = vmatprep.subr.bf16.mxu0 %v10365_v13 }
 0x141   : > { %8353 = vmatmul.mubr.msk.bf16.gmra.mrb[144].mxu1 %vm874_vm1, %v11531_v50  ;;  %8370 = vmatmul.mubr.msk.bf16.gmra.mrb[144].mxu0 %vm874_vm1, %v11038_v53 }
 0x142   : > { %1665 = vmatprep.mubr.bf16.mxu1 %v15980_v3  ;;  %1858 = vmatprep.mubr.bf16.mxu0 %v15980_v3 }
 0x143   : > { %4316 = vmatpush1.bf16.msra.mxu0 %v10363_v8  ;;  %v11579_v8 = vld [vmem:[%s10891_s30 + $0xf0] sm:$0xff]  }
 0x144   : > { %v1124_v52 = vpop.f32.mrb[40].mxu0 }
 0x145   : > { %v11545_v10 = vpop.f32.mrb[41].mxu0  ;;  %v11548_v53 = vadd.f32 %v1124_v52, %v11291_v58 }
 0x146   : > { %16054 = vst [vmem:[#allocation24_spill] sm:$0xff] %v11545_v10  ;;  %v1128_v25 = vpop.f32.mrb[42].mxu0 }
 0x147   : > { %16055 = vst [vmem:[#allocation25_spill] sm:$0xff] %v11548_v53  ;;  %v11551_v23 = vadd.f32 %v1128_v25, %v11291_v58  ;;  %v11553_v46 = vpop.f32.mrb[43].mxu0  ;;  %v12132_v53 = vld [vmem:[%s10989_s23 + $0x1e0] ss:$16 sps:$4 sm:$0xff]  }
 0x148   : > { %16057 = vst [vmem:[#allocation27_spill] sm:$0xff] %v11553_v46 }
 0x149   : > { %16056 = vst [vmem:[#allocation26_spill] sm:$0xff] %v11551_v23  ;;  %8354 = vmatmul.mubr.msk.bf16.gmra.mrb[148].mxu1 %vm874_vm1, %v11556_v35  ;;  %8371 = vmatmul.mubr.msk.bf16.gmra.mrb[148].mxu0 %vm874_vm1, %v11046_v54 }
 0x14a   : > { %1675 = vmatprep.mubr.bf16.mxu1 %v15980_v3  ;;  %1868 = vmatprep.mubr.bf16.mxu0 %v15980_v3 }
 0x14c   : > { %v1134_v52 = vpop.f32.mrb[44].mxu0 }
 0x14d   : > { %v11566_v25 = vpop.f32.mrb[45].mxu0  ;;  %v11569_v46 = vadd.f32 %v1134_v52, %v11291_v58  ;;  %v10372_v52 = vld [vmem:[%s15974_s5 + $0x260] ss:$20 sps:$4 sm:$0xff]  }
 0x14e   : > { %16058 = vst [vmem:[#allocation28_spill] sm:$0xff] %v11566_v25  ;;  %v1138_v13 = vpop.f32.mrb[46].mxu0  ;;  %v11596_v25 = vld [vmem:[%s10989_s23 + $0x4] ss:$16 sps:$4 sm:$0xff]  }
 0x14f   : > { %16059 = vst [vmem:[#allocation29_spill] sm:$0xff] %v11569_v46  ;;  %v11572_v10 = vadd.f32 %v1138_v13, %v11291_v58  ;;  %v11574_v48 = vpop.f32.mrb[47].mxu0  ;;  %v10374_v13 = vld [vmem:[%s15974_s5 + $0x264] ss:$20 sps:$4 sm:$0xff]   ;;  %v11947_v46 = vld [vmem:[%s10989_s23 + $0x140] ss:$16 sps:$4 sm:$0xff]  }
 0x150   : > { %16061 = vst [vmem:[#allocation31_spill] sm:$0xff] %v11574_v48  ;;  %4317 = vmatprep.subr.bf16.mxu0 %v10374_v13 }
 0x151   : > { %16060 = vst [vmem:[#allocation30_spill] sm:$0xff] %v11572_v10  ;;  %8355 = vmatmul.mubr.msk.bf16.gmra.mrb[152].mxu1 %vm874_vm1, %v11579_v8  ;;  %8372 = vmatmul.mubr.msk.bf16.gmra.mrb[152].mxu0 %vm874_vm1, %v11054_v55  ;;  %v12093_v10 = vld [vmem:[%s10989_s23 + $0x1c0] ss:$16 sps:$4 sm:$0xff]  }
 0x152   : > { %1685 = vmatprep.mubr.bf16.mxu1 %v15980_v3  ;;  %1878 = vmatprep.mubr.bf16.mxu0 %v15980_v3 }
 0x153   : > { %4318 = vmatpush1.bf16.msra.mxu0 %v10372_v52 }
 0x154   : > { %v1144_v54 = vpop.f32.mrb[48].mxu0 }
 0x155   : > { %v11593_v48 = vpop.f32.mrb[49].mxu0  ;;  %v11599_v31 = vadd.f32 %v1144_v54, %v11291_v58 }
 0x156   : > { %16062 = vst [vmem:[#allocation32_spill] sm:$0xff] %v11593_v48  ;;  %v1148_v55 = vpop.f32.mrb[50].mxu0  ;;  %v11623_v48 = vld [vmem:[%s10989_s23 + $0x24] ss:$16 sps:$4 sm:$0xff]  }
 0x157   : > { %16063 = vst [vmem:[#allocation33_spill] sm:$0xff] %v11599_v31  ;;  %v11602_v36 = vadd.f32 %v1148_v55, %v11291_v58  ;;  %v11604_v11 = vpop.f32.mrb[51].mxu0  ;;  %v11620_v55 = vld [vmem:[%s10989_s23] ss:$16 sps:$4 sm:$0xff]  }
 0x158   : > { %16065 = vst [vmem:[#allocation35_spill] sm:$0xff] %v11604_v11  ;;  %v11877_v31 = vld [vmem:[%s10989_s23 + $0x100] ss:$16 sps:$4 sm:$0xff]  }
 0x159   : > { %16064 = vst [vmem:[#allocation34_spill] sm:$0xff] %v11602_v36  ;;  %8356 = vmatmul.mubr.msk.bf16.gmra.mrb[156].mxu1 %vm874_vm1, %v11607_v6  ;;  %8373 = vmatmul.mubr.msk.bf16.gmra.mrb[156].mxu0 %vm874_vm1, %v11062_v56 }
 0x15a   : > { %1888 = vmatprep.mubr.bf16.mxu0 %v15980_v3  ;;  %3613 = vmatprep.mubr.bf16.mxu1 %v11596_v25  ;;  %v11646_v3 = vld [vmem:[%s10989_s23 + $0x20] ss:$16 sps:$4 sm:$0xff]  }
 0x15c   : > { %v1154_v54 = vpop.f32.mrb[52].mxu0 }
 0x15d   : > { %v11617_v13 = vpop.f32.mrb[53].mxu0  ;;  %v11626_v22 = vadd.f32 %v1154_v54, %v11291_v58 }
 0x15e   : > { %16066 = vst [vmem:[#allocation36_spill] sm:$0xff] %v11617_v13  ;;  %v1158_v11 = vpop.f32.mrb[54].mxu0  ;;  %v10383_v13 = vld [vmem:[%s15974_s5 + $0x28c] ss:$20 sps:$4 sm:$0xff]  }
 0x15f   : > { %16067 = vst [vmem:[#allocation37_spill] sm:$0xff] %v11626_v22  ;;  %v11629_v56 = vadd.f32 %v1158_v11, %v11291_v58  ;;  %v11631_v52 = vpop.f32.mrb[55].mxu0  ;;  %4640 = vmatprep.subr.bf16.mxu0 %v10383_v13  ;;  %v11807_v22 = vld [vmem:[%s10989_s23 + $0xc0] ss:$16 sps:$4 sm:$0xff]  }
 0x160   : > { %16069 = vst [vmem:[#allocation39_spill] sm:$0xff] %v11631_v52 }
 0x161   : > { %16068 = vst [vmem:[#allocation38_spill] sm:$0xff] %v11629_v56  ;;  %8374 = vmatmul.mubr.msk.bf16.gmra.mrb[160].mxu0 %vm874_vm1, %v11070_v57  ;;  %3614 = vmatmul.mubr.bf16.vlgmr.msra.gmra.mrb[160].mxu1 %v11620_v55  ;;  %v11649_v57 = vld [vmem:[%s10989_s23 + $0x44] ss:$16 sps:$4 sm:$0xff]  }
 0x162   : > { %1898 = vmatprep.mubr.bf16.mxu0 %v16070_v59  ;;  %3623 = vmatprep.mubr.bf16.mxu1 %v11623_v48 }
 0x164   : > { %v1164_v11 = vpop.f32.mrb[56].mxu0 }
 0x165   : > { %v11643_v54 = vpop.f32.mrb[57].mxu0  ;;  %v11652_v12 = vadd.f32 %v1164_v11, %v11291_v58 }
 0x166   : > { %16071 = vst [vmem:[#allocation40_spill] sm:$0xff] %v11643_v54  ;;  %v1168_v52 = vpop.f32.mrb[58].mxu0 }
 0x167   : > { %16072 = vst [vmem:[#allocation41_spill] sm:$0xff] %v11652_v12  ;;  %v11655_v34 = vadd.f32 %v1168_v52, %v11291_v58  ;;  %v11657_v44 = vpop.f32.mrb[59].mxu0  ;;  %v11737_v12 = vld [vmem:[%s10989_s23 + $0x80] ss:$16 sps:$4 sm:$0xff]  }
 0x168   : > { %16074 = vst [vmem:[#allocation43_spill] sm:$0xff] %v11657_v44 }
 0x169   : > { %16073 = vst [vmem:[#allocation42_spill] sm:$0xff] %v11655_v34  ;;  %8375 = vmatmul.mubr.msk.bf16.gmra.mrb[164].mxu0 %vm874_vm1, %v11084_v60  ;;  %3624 = vmatmul.mubr.bf16.gmra.mrb[164].mxu1 %v11646_v3 }
 0x16a   : > { %1908 = vmatprep.mubr.bf16.mxu0 %v16070_v59  ;;  %3633 = vmatprep.mubr.bf16.mxu1 %v11649_v57 }
 0x16c   : > { %v1174_v54 = vpop.f32.mrb[60].mxu0 }
 0x16d   : > { %v11666_v11 = vpop.f32.mrb[61].mxu0  ;;  %v11675_v44 = vadd.f32 %v1174_v54, %v11291_v58 }
 0x16e   : > { %16075 = vst [vmem:[#allocation44_spill] sm:$0xff] %v11666_v11  ;;  %v1178_v52 = vpop.f32.mrb[62].mxu0  ;;  %v1264_v11 = vpop.f32.mrb[0].mxu1 }
 0x16f   : > { %16076 = vst [vmem:[#allocation45_spill] sm:$0xff] %v11675_v44  ;;  %v11678_v60 = vadd.f32 %v1178_v52, %v11291_v58  ;;  %v11680_v13 = vpop.f32.mrb[63].mxu0  ;;  %v11689_v54 = vpop.f32.mrb[1].mxu1  ;;  %v11692_v52 = vadd.f32 %v1264_v11, %v11291_v58  ;;  %v11705_v44 = vld [vmem:[%s10989_s23 + $0x84] ss:$16 sps:$4 sm:$0xff]  }
 0x170   : > { %16078 = vst [vmem:[#allocation47_spill] sm:$0xff] %v11680_v13  ;;  %16079 = vst [vmem:[#allocation48_spill] sm:$0xff] %v11689_v54  ;;  %v1268_v13 = vpop.f32.mrb[2].mxu1 }
 0x171   : > { %16077 = vst [vmem:[#allocation46_spill] sm:$0xff] %v11678_v60  ;;  %8376 = vmatmul.mubr.msk.bf16.gmra.mrb[168].mxu0 %vm874_vm1, %v11104_v1  ;;  %3634 = vmatmul.mubr.bf16.gmra.mrb[168].mxu1 %v11669_v30  ;;  %16080 = vst [vmem:[#allocation49_spill] sm:$0xff] %v11692_v52  ;;  %v11695_v63 = vadd.f32 %v1268_v13, %v11291_v58  ;;  %v11697_v5 = vpop.f32.mrb[3].mxu1 }
 0x172   : > { %1918 = vmatprep.mubr.bf16.mxu0 %v16070_v59  ;;  %3643 = vmatprep.mubr.bf16.mxu1 %v11672_v39  ;;  %16082 = vst [vmem:[#allocation51_spill] sm:$0xff] %v11697_v5  ;;  %v1274_v5 = vpop.f32.mrb[4].mxu1 }
 0x173   : > { %16081 = vst [vmem:[#allocation50_spill] sm:$0xff] %v11695_v63 }
 0x174   : > { %v1184_v20 = vpop.f32.mrb[64].mxu0 }
 0x175   : > { %v11699_v1 = vpop.f32.mrb[65].mxu0  ;;  %v11708_v60 = vadd.f32 %v1184_v20, %v11291_v58 }
 0x176   : > { %16083 = vst [vmem:[#allocation52_spill] sm:$0xff] %v11699_v1  ;;  %v1188_v43 = vpop.f32.mrb[66].mxu0 }
 0x177   : > { %16084 = vst [vmem:[#allocation53_spill] sm:$0xff] %v11708_v60  ;;  %v11711_v11 = vadd.f32 %v1188_v43, %v11291_v58  ;;  %v11713_v54 = vpop.f32.mrb[67].mxu0  ;;  %v11725_v43 = vadd.f32 %v1274_v5, %v11291_v58  ;;  %v11740_v60 = vld [vmem:[%s10989_s23 + $0xa4] ss:$16 sps:$4 sm:$0xff]  }
 0x178   : > { %16086 = vst [vmem:[#allocation55_spill] sm:$0xff] %v11713_v54  ;;  %v11727_v54 = vpop.f32.mrb[5].mxu1 }
 0x179   : > { %16085 = vst [vmem:[#allocation54_spill] sm:$0xff] %v11711_v11  ;;  %8377 = vmatmul.mubr.msk.bf16.gmra.mrb[172].mxu0 %vm874_vm1, %v11125_v7  ;;  %3644 = vmatmul.mubr.bf16.gmra.mrb[172].mxu1 %v11702_v15  ;;  %16087 = vst [vmem:[#allocation56_spill] sm:$0xff] %v11725_v43  ;;  %v1278_v13 = vpop.f32.mrb[6].mxu1 }
 0x17a   : > { %1928 = vmatprep.mubr.bf16.mxu0 %v16070_v59  ;;  %3653 = vmatprep.mubr.bf16.mxu1 %v11705_v44  ;;  %16088 = vst [vmem:[#allocation57_spill] sm:$0xff] %v11727_v54  ;;  %v11730_v52 = vadd.f32 %v1278_v13, %v11291_v58  ;;  %v11732_v7 = vpop.f32.mrb[7].mxu1 }
 0x17b   : > { %16090 = vst [vmem:[#allocation59_spill] sm:$0xff] %v11732_v7 }
 0x17c   : > { %v1194_v1 = vpop.f32.mrb[68].mxu0  ;;  %16089 = vst [vmem:[#allocation58_spill] sm:$0xff] %v11730_v52  ;;  %v11772_v52 = vld [vmem:[%s10989_s23 + $0xa0] ss:$16 sps:$4 sm:$0xff]  }
 0x17d   : > { %v11734_v63 = vpop.f32.mrb[69].mxu0  ;;  %v11745_v11 = vadd.f32 %v1194_v1, %v11291_v58 }
 0x17e   : > { %16091 = vst [vmem:[#allocation60_spill] sm:$0xff] %v11734_v63  ;;  %v1198_v20 = vpop.f32.mrb[70].mxu0  ;;  %v1284_v63 = vpop.f32.mrb[8].mxu1 }
 0x17f   : > { %16092 = vst [vmem:[#allocation61_spill] sm:$0xff] %v11745_v11  ;;  %v11748_v54 = vadd.f32 %v1198_v20, %v11291_v58  ;;  %v11750_v13 = vpop.f32.mrb[71].mxu0  ;;  %v11759_v1 = vpop.f32.mrb[9].mxu1  ;;  %v11762_v20 = vadd.f32 %v1284_v63, %v11291_v58 }
 0x180   : > { %16094 = vst [vmem:[#allocation63_spill] sm:$0xff] %v11750_v13  ;;  %16095 = vst [vmem:[#allocation64_spill] sm:$0xff] %v11759_v1  ;;  %v1288_v5 = vpop.f32.mrb[10].mxu1 }
 0x181   : > { %16093 = vst [vmem:[#allocation62_spill] sm:$0xff] %v11748_v54  ;;  %8378 = vmatmul.mubr.msk.bf16.gmra.mrb[176].mxu0 %vm874_vm1, %v11152_v14  ;;  %3654 = vmatmul.mubr.bf16.gmra.mrb[176].mxu1 %v11737_v12  ;;  %16096 = vst [vmem:[#allocation65_spill] sm:$0xff] %v11762_v20  ;;  %v11765_v43 = vadd.f32 %v1288_v5, %v11291_v58  ;;  %v11767_v7 = vpop.f32.mrb[11].mxu1  ;;  %v11775_v54 = vld [vmem:[%s10989_s23 + $0xc4] ss:$16 sps:$4 sm:$0xff]  }
 0x182   : > { %1938 = vmatprep.mubr.bf16.mxu0 %v16070_v59  ;;  %3663 = vmatprep.mubr.bf16.mxu1 %v11740_v60  ;;  %16098 = vst [vmem:[#allocation67_spill] sm:$0xff] %v11767_v7  ;;  %v1294_v7 = vpop.f32.mrb[12].mxu1 }
 0x183   : > { %16097 = vst [vmem:[#allocation66_spill] sm:$0xff] %v11765_v43 }
 0x184   : > { %v1204_v13 = vpop.f32.mrb[72].mxu0 }
 0x185   : > { %v11769_v14 = vpop.f32.mrb[73].mxu0  ;;  %v11778_v34 = vadd.f32 %v1204_v13, %v11291_v58 }
 0x186   : > { %16099 = vst [vmem:[#allocation68_spill] sm:$0xff] %v11769_v14  ;;  %v1208_v11 = vpop.f32.mrb[74].mxu0 }
 0x187   : > { %16100 = vst [vmem:[#allocation69_spill] sm:$0xff] %v11778_v34  ;;  %v11781_v63 = vadd.f32 %v1208_v11, %v11291_v58  ;;  %v11783_v1 = vpop.f32.mrb[75].mxu0  ;;  %v11795_v11 = vadd.f32 %v1294_v7, %v11291_v58  ;;  %v11810_v34 = vld [vmem:[%s10989_s23 + $0xe4] ss:$16 sps:$4 sm:$0xff]  }
 0x188   : > { %16102 = vst [vmem:[#allocation71_spill] sm:$0xff] %v11783_v1  ;;  %v11797_v1 = vpop.f32.mrb[13].mxu1 }
 0x189   : > { %16101 = vst [vmem:[#allocation70_spill] sm:$0xff] %v11781_v63  ;;  %8379 = vmatmul.mubr.msk.bf16.gmra.mrb[180].mxu0 %vm874_vm1, %v11173_v19  ;;  %3664 = vmatmul.mubr.bf16.gmra.mrb[180].mxu1 %v11772_v52  ;;  %16103 = vst [vmem:[#allocation72_spill] sm:$0xff] %v11795_v11  ;;  %v1298_v5 = vpop.f32.mrb[14].mxu1 }
 0x18a   : > { %1948 = vmatprep.mubr.bf16.mxu0 %v16070_v59  ;;  %3673 = vmatprep.mubr.bf16.mxu1 %v11775_v54  ;;  %16104 = vst [vmem:[#allocation73_spill] sm:$0xff] %v11797_v1  ;;  %v11800_v20 = vadd.f32 %v1298_v5, %v11291_v58  ;;  %v11802_v19 = vpop.f32.mrb[15].mxu1 }
 0x18b   : > { %16106 = vst [vmem:[#allocation75_spill] sm:$0xff] %v11802_v19 }
 0x18c   : > { %v1214_v14 = vpop.f32.mrb[76].mxu0  ;;  %16105 = vst [vmem:[#allocation74_spill] sm:$0xff] %v11800_v20  ;;  %v11842_v20 = vld [vmem:[%s10989_s23 + $0xe0] ss:$16 sps:$4 sm:$0xff]  }
 0x18d   : > { %v11804_v43 = vpop.f32.mrb[77].mxu0  ;;  %v11815_v63 = vadd.f32 %v1214_v14, %v11291_v58 }
 0x18e   : > { %16107 = vst [vmem:[#allocation76_spill] sm:$0xff] %v11804_v43  ;;  %v1218_v13 = vpop.f32.mrb[78].mxu0  ;;  %v1304_v43 = vpop.f32.mrb[16].mxu1 }
 0x18f   : > { %16108 = vst [vmem:[#allocation77_spill] sm:$0xff] %v11815_v63  ;;  %v11818_v1 = vadd.f32 %v1218_v13, %v11291_v58  ;;  %v11820_v5 = vpop.f32.mrb[79].mxu0  ;;  %v11829_v14 = vpop.f32.mrb[17].mxu1  ;;  %v11832_v13 = vadd.f32 %v1304_v43, %v11291_v58 }
 0x190   : > { %16110 = vst [vmem:[#allocation79_spill] sm:$0xff] %v11820_v5  ;;  %16111 = vst [vmem:[#allocation80_spill] sm:$0xff] %v11829_v14  ;;  %v1308_v7 = vpop.f32.mrb[18].mxu1 }
 0x191   : > { %16109 = vst [vmem:[#allocation78_spill] sm:$0xff] %v11818_v1  ;;  %8380 = vmatmul.mubr.msk.bf16.gmra.mrb[184].mxu0 %vm874_vm1, %v11194_v24  ;;  %3674 = vmatmul.mubr.bf16.gmra.mrb[184].mxu1 %v11807_v22  ;;  %16112 = vst [vmem:[#allocation81_spill] sm:$0xff] %v11832_v13  ;;  %v11835_v11 = vadd.f32 %v1308_v7, %v11291_v58  ;;  %v11837_v19 = vpop.f32.mrb[19].mxu1  ;;  %v11845_v1 = vld [vmem:[%s10989_s23 + $0x104] ss:$16 sps:$4 sm:$0xff]  }
 0x192   : > { %1958 = vmatprep.mubr.bf16.mxu0 %v16070_v59  ;;  %3683 = vmatprep.mubr.bf16.mxu1 %v11810_v34  ;;  %16114 = vst [vmem:[#allocation83_spill] sm:$0xff] %v11837_v19  ;;  %v1314_v19 = vpop.f32.mrb[20].mxu1 }
 0x193   : > { %16113 = vst [vmem:[#allocation82_spill] sm:$0xff] %v11835_v11 }
 0x194   : > { %v1224_v5 = vpop.f32.mrb[80].mxu0 }
 0x195   : > { %v11839_v24 = vpop.f32.mrb[81].mxu0  ;;  %v11848_v56 = vadd.f32 %v1224_v5, %v11291_v58 }
 0x196   : > { %16115 = vst [vmem:[#allocation84_spill] sm:$0xff] %v11839_v24  ;;  %v1228_v63 = vpop.f32.mrb[82].mxu0 }
 0x197   : > { %16116 = vst [vmem:[#allocation85_spill] sm:$0xff] %v11848_v56  ;;  %v11851_v43 = vadd.f32 %v1228_v63, %v11291_v58  ;;  %v11853_v14 = vpop.f32.mrb[83].mxu0  ;;  %v11865_v63 = vadd.f32 %v1314_v19, %v11291_v58  ;;  %v11880_v56 = vld [vmem:[%s10989_s23 + $0x124] ss:$16 sps:$4 sm:$0xff]  }
 0x198   : > { %16118 = vst [vmem:[#allocation87_spill] sm:$0xff] %v11853_v14  ;;  %v11867_v14 = vpop.f32.mrb[21].mxu1 }
 0x199   : > { %16117 = vst [vmem:[#allocation86_spill] sm:$0xff] %v11851_v43  ;;  %8381 = vmatmul.mubr.msk.bf16.gmra.mrb[188].mxu0 %vm874_vm1, %v11215_v29  ;;  %3684 = vmatmul.mubr.bf16.gmra.mrb[188].mxu1 %v11842_v20  ;;  %16119 = vst [vmem:[#allocation88_spill] sm:$0xff] %v11865_v63  ;;  %v1318_v7 = vpop.f32.mrb[22].mxu1 }
 0x19a   : > { %1968 = vmatprep.mubr.bf16.mxu0 %v16070_v59  ;;  %3693 = vmatprep.mubr.bf16.mxu1 %v11845_v1  ;;  %16120 = vst [vmem:[#allocation89_spill] sm:$0xff] %v11867_v14  ;;  %v11870_v13 = vadd.f32 %v1318_v7, %v11291_v58  ;;  %v11872_v29 = vpop.f32.mrb[23].mxu1 }
 0x19b   : > { %16122 = vst [vmem:[#allocation91_spill] sm:$0xff] %v11872_v29 }
 0x19c   : > { %v1234_v24 = vpop.f32.mrb[84].mxu0  ;;  %16121 = vst [vmem:[#allocation90_spill] sm:$0xff] %v11870_v13  ;;  %v11912_v13 = vld [vmem:[%s10989_s23 + $0x120] ss:$16 sps:$4 sm:$0xff]  }
 0x19d   : > { %v11874_v11 = vpop.f32.mrb[85].mxu0  ;;  %v11885_v43 = vadd.f32 %v1234_v24, %v11291_v58 }
 0x19e   : > { %16123 = vst [vmem:[#allocation92_spill] sm:$0xff] %v11874_v11  ;;  %v1238_v5 = vpop.f32.mrb[86].mxu0  ;;  %v1324_v11 = vpop.f32.mrb[24].mxu1 }
 0x19f   : > { %16124 = vst [vmem:[#allocation93_spill] sm:$0xff] %v11885_v43  ;;  %v11888_v14 = vadd.f32 %v1238_v5, %v11291_v58  ;;  %v11890_v7 = vpop.f32.mrb[87].mxu0  ;;  %v11899_v24 = vpop.f32.mrb[25].mxu1  ;;  %v11902_v5 = vadd.f32 %v1324_v11, %v11291_v58 }
 0x1a0   : > { %16126 = vst [vmem:[#allocation95_spill] sm:$0xff] %v11890_v7  ;;  %16127 = vst [vmem:[#allocation96_spill] sm:$0xff] %v11899_v24  ;;  %v1328_v19 = vpop.f32.mrb[26].mxu1 }
 0x1a1   : > { %16125 = vst [vmem:[#allocation94_spill] sm:$0xff] %v11888_v14  ;;  %8382 = vmatmul.mubr.msk.bf16.gmra.mrb[192].mxu0 %vm874_vm1, %v11435_v26  ;;  %3694 = vmatmul.mubr.bf16.gmra.mrb[192].mxu1 %v11877_v31  ;;  %16128 = vst [vmem:[#allocation97_spill] sm:$0xff] %v11902_v5  ;;  %v11905_v63 = vadd.f32 %v1328_v19, %v11291_v58  ;;  %v11907_v29 = vpop.f32.mrb[27].mxu1  ;;  %v11915_v14 = vld [vmem:[%s10989_s23 + $0x144] ss:$16 sps:$4 sm:$0xff]  }
 0x1a2   : > { %1978 = vmatprep.mubr.bf16.mxu0 %v16070_v59  ;;  %3703 = vmatprep.mubr.bf16.mxu1 %v11880_v56  ;;  %16130 = vst [vmem:[#allocation99_spill] sm:$0xff] %v11907_v29  ;;  %v1334_v29 = vpop.f32.mrb[28].mxu1 }
 0x1a3   : > { %16129 = vst [vmem:[#allocation98_spill] sm:$0xff] %v11905_v63 }
 0x1a4   : > { %v1244_v7 = vpop.f32.mrb[88].mxu0 }
 0x1a5   : > { %v11909_v26 = vpop.f32.mrb[89].mxu0  ;;  %v11918_v36 = vadd.f32 %v1244_v7, %v11291_v58 }
 0x1a6   : > { %16131 = vst [vmem:[#allocation100_spill] sm:$0xff] %v11909_v26  ;;  %v1248_v43 = vpop.f32.mrb[90].mxu0 }
 0x1a7   : > { %16132 = vst [vmem:[#allocation101_spill] sm:$0xff] %v11918_v36  ;;  %v11921_v11 = vadd.f32 %v1248_v43, %v11291_v58  ;;  %v11923_v24 = vpop.f32.mrb[91].mxu0  ;;  %v11935_v43 = vadd.f32 %v1334_v29, %v11291_v58  ;;  %v11950_v36 = vld [vmem:[%s10989_s23 + $0x164] ss:$16 sps:$4 sm:$0xff]  }
 0x1a8   : > { %16134 = vst [vmem:[#allocation103_spill] sm:$0xff] %v11923_v24  ;;  %v11937_v24 = vpop.f32.mrb[29].mxu1 }
 0x1a9   : > { %16133 = vst [vmem:[#allocation102_spill] sm:$0xff] %v11921_v11  ;;  %8383 = vmatmul.mubr.msk.bf16.gmra.mrb[196].mxu0 %vm874_vm1, %v11460_v49  ;;  %3704 = vmatmul.mubr.bf16.gmra.mrb[196].mxu1 %v11912_v13  ;;  %16135 = vst [vmem:[#allocation104_spill] sm:$0xff] %v11935_v43  ;;  %v1338_v19 = vpop.f32.mrb[30].mxu1 }
 0x1aa   : > { %1988 = vmatprep.mubr.bf16.mxu0 %v16070_v59  ;;  %3713 = vmatprep.mubr.bf16.mxu1 %v11915_v14  ;;  %16136 = vst [vmem:[#allocation105_spill] sm:$0xff] %v11937_v24  ;;  %v11940_v5 = vadd.f32 %v1338_v19, %v11291_v58  ;;  %v11942_v49 = vpop.f32.mrb[31].mxu1 }
 0x1ab   : > { %16138 = vst [vmem:[#allocation107_spill] sm:$0xff] %v11942_v49 }
 0x1ac   : > { %v1254_v26 = vpop.f32.mrb[92].mxu0  ;;  %16137 = vst [vmem:[#allocation106_spill] sm:$0xff] %v11940_v5 }
 0x1ad   : > { %v11944_v63 = vpop.f32.mrb[93].mxu0  ;;  %v11955_v24 = vadd.f32 %v1254_v26, %v11291_v58 }
 0x1ae   : > { %16139 = vst [vmem:[#allocation108_spill] sm:$0xff] %v11944_v63  ;;  %v1258_v7 = vpop.f32.mrb[94].mxu0  ;;  %v11967_v63 = vpop.f32.mrb[32].mxu1 }
 0x1af   : > { %16140 = vst [vmem:[#allocation109_spill] sm:$0xff] %v11955_v24  ;;  %v11958_v19 = vadd.f32 %v1258_v7, %v11291_v58  ;;  %v11960_v11 = vpop.f32.mrb[95].mxu0  ;;  %16143 = vst [vmem:[#allocation112_spill] sm:$0xff] %v11967_v63  ;;  %v11971_v26 = vpop.f32.mrb[33].mxu1  ;;  %v11987_v63 = vld [vmem:[%s10989_s23 + $0x184] ss:$16 sps:$4 sm:$0xff]  }
 0x1b0   : > { %16142 = vst [vmem:[#allocation111_spill] sm:$0xff] %v11960_v11  ;;  %16144 = vst [vmem:[#allocation113_spill] sm:$0xff] %v11971_v26  ;;  %v11973_v58 = vpop.f32.mrb[34].mxu1  ;;  %v11982_v11 = vld [vmem:[%s10989_s23 + $0x160] ss:$16 sps:$4 sm:$0xff]  }
 0x1b1   : > { %16141 = vst [vmem:[#allocation110_spill] sm:$0xff] %v11958_v19  ;;  %8384 = vmatmul.mubr.msk.bf16.gmra.mrb[200].mxu0 %vm874_vm1, %v11483_v38  ;;  %3714 = vmatmul.mubr.bf16.gmra.mrb[200].mxu1 %v11947_v46  ;;  %16145 = vst [vmem:[#allocation114_spill] sm:$0xff] %v11973_v58  ;;  %v11977_v29 = vpop.f32.mrb[35].mxu1  ;;  %v12054_v19 = vld [vmem:[%s10989_s23 + $0x1a0] ss:$16 sps:$4 sm:$0xff]  }
 0x1b2   : > { %1998 = vmatprep.mubr.bf16.mxu0 %v16070_v59  ;;  %3723 = vmatprep.mubr.bf16.mxu1 %v11950_v36  ;;  %16147 = vst [vmem:[#allocation116_spill] sm:$0xff] %v11977_v29 }
 0x1b4   : > { %v11975_v7 = vpop.f32.mrb[96].mxu0 }
 0x1b5   : > { %16146 = vst [vmem:[#allocation115_spill] sm:$0xff] %v11975_v7  ;;  %v11979_v49 = vpop.f32.mrb[97].mxu0  ;;  %v11994_v7 = vpop.f32.mrb[36].mxu1 }
 0x1b6   : > { %16148 = vst [vmem:[#allocation117_spill] sm:$0xff] %v11979_v49  ;;  %v11984_v38 = vpop.f32.mrb[98].mxu0  ;;  %16151 = vst [vmem:[#allocation120_spill] sm:$0xff] %v11994_v7  ;;  %v11998_v49 = vpop.f32.mrb[37].mxu1  ;;  %v12015_v7 = vld [vmem:[%s10989_s23 + $0x180] ss:$16 sps:$4 sm:$0xff]  }
 0x1b7   : > { %16149 = vst [vmem:[#allocation118_spill] sm:$0xff] %v11984_v38  ;;  %v11989_v43 = vpop.f32.mrb[99].mxu0  ;;  %16152 = vst [vmem:[#allocation121_spill] sm:$0xff] %v11998_v49  ;;  %v12000_v29 = vpop.f32.mrb[38].mxu1 }
 0x1b8   : > { %16150 = vst [vmem:[#allocation119_spill] sm:$0xff] %v11989_v43  ;;  %16153 = vst [vmem:[#allocation122_spill] sm:$0xff] %v12000_v29  ;;  %v10428_v43 = vld [vmem:[%s15974_s5 + $0x284] ss:$20 sps:$4 sm:$0xff]   ;;  %v12007_v26 = vpop.f32.mrb[39].mxu1 }
 0x1b9   : > { %8385 = vmatmul.mubr.msk.bf16.gmra.mrb[204].mxu0 %vm874_vm1, %v11508_v9  ;;  %3724 = vmatmul.mubr.bf16.gmra.mrb[204].mxu1 %v11982_v11  ;;  %16155 = vst [vmem:[#allocation124_spill] sm:$0xff] %v12007_v26  ;;  %v10426_v9 = vld [vmem:[%s15974_s5 + $0x280] ss:$20 sps:$4 sm:$0xff]   ;;  %v10432_v26 = vld [vmem:[%s15974_s5 + $0x2a8] ss:$20 sps:$4 sm:$0xff]  }
 0x1ba   : > { %2008 = vmatprep.mubr.bf16.mxu0 %v16070_v59  ;;  %3733 = vmatprep.mubr.bf16.mxu1 %v11987_v63  ;;  %v12020_v29 = vld [vmem:[%s10989_s23 + $0x1a4] ss:$16 sps:$4 sm:$0xff]  }
 0x1bb   : > { %3934 = vmatprep.subr.bf16.mxu1 %v10428_v43  ;;  %v12033_v43 = vpop.f32.mrb[40].mxu1 }
 0x1bc   : > { %v12005_v38 = vpop.f32.mrb[100].mxu0  ;;  %3935 = vmatpush1.bf16.msra.mxu1 %v10426_v9  ;;  %16159 = vst [vmem:[#allocation128_spill] sm:$0xff] %v12033_v43  ;;  %v12037_v9 = vpop.f32.mrb[41].mxu1  ;;  %v10435_v43 = vld [vmem:[%s15974_s5 + $0x2d0] ss:$20 sps:$4 sm:$0xff]  }
 0x1bd   : > { %16154 = vst [vmem:[#allocation123_spill] sm:$0xff] %v12005_v38  ;;  %v12012_v58 = vpop.f32.mrb[101].mxu0  ;;  %v10434_v38 = vld [vmem:[%s15974_s5 + $0x2ac] ss:$20 sps:$4 sm:$0xff]   ;;  %16160 = vst [vmem:[#allocation129_spill] sm:$0xff] %v12037_v9 }
 0x1be   : > { %16156 = vst [vmem:[#allocation125_spill] sm:$0xff] %v12012_v58  ;;  %v12017_v49 = vpop.f32.mrb[102].mxu0  ;;  %3936 = vmatprep.subr.bf16.mxu1 %v10434_v38  ;;  %v10437_v58 = vld [vmem:[%s15974_s5 + $0x2d4] ss:$20 sps:$4 sm:$0xff]  }
 0x1bf   : > { %16157 = vst [vmem:[#allocation126_spill] sm:$0xff] %v12017_v49  ;;  %v12022_v5 = vpop.f32.mrb[103].mxu0  ;;  %v12059_v9 = vld [vmem:[%s10989_s23 + $0x1c4] ss:$16 sps:$4 sm:$0xff]  }
 0x1c0   : > { %16158 = vst [vmem:[#allocation127_spill] sm:$0xff] %v12022_v5  ;;  %v12039_v5 = vpop.f32.mrb[42].mxu1  ;;  %3937 = vmatpush1.bf16.msra.mxu1 %v10432_v26  ;;  %v10443_v26 = vld [vmem:[%s15974_s5 + $0x2fc] ss:$20 sps:$4 sm:$0xff]  }
 0x1c1   : > { %8386 = vmatmul.mubr.msk.bf16.gmra.mrb[208].mxu0 %vm874_vm1, %v11531_v50  ;;  %3734 = vmatmul.mubr.bf16.gmra.mrb[208].mxu1 %v12015_v7  ;;  %16161 = vst [vmem:[#allocation130_spill] sm:$0xff] %v12039_v5  ;;  %v12046_v50 = vpop.f32.mrb[43].mxu1 }
 0x1c2   : > { %2018 = vmatprep.mubr.bf16.mxu0 %v16070_v59  ;;  %3743 = vmatprep.mubr.bf16.mxu1 %v12020_v29  ;;  %16163 = vst [vmem:[#allocation132_spill] sm:$0xff] %v12046_v50  ;;  %v10444_v50 = vld [vmem:[%s15974_s5 + $0x320] ss:$20 sps:$4 sm:$0xff]  }
 0x1c3   : > { %3938 = vmatprep.subr.bf16.mxu1 %v10437_v58  ;;  %v12072_v58 = vpop.f32.mrb[44].mxu1 }
 0x1c4   : > { %v12044_v49 = vpop.f32.mrb[104].mxu0  ;;  %3939 = vmatpush1.bf16.msra.mxu1 %v10435_v43  ;;  %16167 = vst [vmem:[#allocation136_spill] sm:$0xff] %v12072_v58 }
 0x1c5   : > { %16162 = vst [vmem:[#allocation131_spill] sm:$0xff] %v12044_v49  ;;  %v12051_v24 = vpop.f32.mrb[105].mxu0  ;;  %v10441_v49 = vld [vmem:[%s15974_s5 + $0x2f8] ss:$20 sps:$4 sm:$0xff]   ;;  %3940 = vmatprep.subr.bf16.mxu1 %v10443_v26 }
 0x1c6   : > { %16164 = vst [vmem:[#allocation133_spill] sm:$0xff] %v12051_v24  ;;  %v12056_v38 = vpop.f32.mrb[106].mxu0  ;;  %v10446_v24 = vld [vmem:[%s15974_s5 + $0x324] ss:$20 sps:$4 sm:$0xff]  }
 0x1c7   : > { %16165 = vst [vmem:[#allocation134_spill] sm:$0xff] %v12056_v38  ;;  %v12061_v5 = vpop.f32.mrb[107].mxu0 }
 0x1c8   : > { %16166 = vst [vmem:[#allocation135_spill] sm:$0xff] %v12061_v5  ;;  %v12076_v5 = vpop.f32.mrb[45].mxu1  ;;  %3941 = vmatpush1.bf16.msra.mxu1 %v10441_v49  ;;  %v10452_v49 = vld [vmem:[%s15974_s5 + $0x34c] ss:$20 sps:$4 sm:$0xff]  }
 0x1c9   : > { %8387 = vmatmul.mubr.msk.bf16.gmra.mrb[212].mxu0 %vm874_vm1, %v11556_v35  ;;  %3744 = vmatmul.mubr.bf16.gmra.mrb[212].mxu1 %v12054_v19  ;;  %16168 = vst [vmem:[#allocation137_spill] sm:$0xff] %v12076_v5  ;;  %v12078_v43 = vpop.f32.mrb[46].mxu1  ;;  %v12098_v5 = vld [vmem:[%s10989_s23 + $0x1e4] ss:$16 sps:$4 sm:$0xff]  }
 0x1ca   : > { %2028 = vmatprep.mubr.bf16.mxu0 %v16070_v59  ;;  %3753 = vmatprep.mubr.bf16.mxu1 %v12059_v9  ;;  %16169 = vst [vmem:[#allocation138_spill] sm:$0xff] %v12078_v43  ;;  %v12085_v35 = vpop.f32.mrb[47].mxu1 }
 0x1cb   : > { %16171 = vst [vmem:[#allocation140_spill] sm:$0xff] %v12085_v35  ;;  %3942 = vmatprep.subr.bf16.mxu1 %v10446_v24  ;;  %v12111_v24 = vpop.f32.mrb[48].mxu1  ;;  %v10456_v35 = vld [vmem:[%s15974_s5 + $0x370] ss:$20 sps:$4 sm:$0xff]  }
 0x1cc   : > { %v12083_v38 = vpop.f32.mrb[108].mxu0  ;;  %3943 = vmatpush1.bf16.msra.mxu1 %v10444_v50  ;;  %16175 = vst [vmem:[#allocation144_spill] sm:$0xff] %v12111_v24 }
 0x1cd   : > { %16170 = vst [vmem:[#allocation139_spill] sm:$0xff] %v12083_v38  ;;  %v12090_v58 = vpop.f32.mrb[109].mxu0  ;;  %v10450_v38 = vld [vmem:[%s15974_s5 + $0x348] ss:$20 sps:$4 sm:$0xff]   ;;  %3944 = vmatprep.subr.bf16.mxu1 %v10452_v49 }
 0x1ce   : > { %16172 = vst [vmem:[#allocation141_spill] sm:$0xff] %v12090_v58  ;;  %v12095_v26 = vpop.f32.mrb[110].mxu0  ;;  %v10458_v58 = vld [vmem:[%s15974_s5 + $0x374] ss:$20 sps:$4 sm:$0xff]  }
 0x1cf   : > { %16173 = vst [vmem:[#allocation142_spill] sm:$0xff] %v12095_v26  ;;  %v12100_v43 = vpop.f32.mrb[111].mxu0 }
 0x1d0   : > { %16174 = vst [vmem:[#allocation143_spill] sm:$0xff] %v12100_v43  ;;  %v12115_v43 = vpop.f32.mrb[49].mxu1  ;;  %3945 = vmatpush1.bf16.msra.mxu1 %v10450_v38  ;;  %v10464_v38 = vld [vmem:[%s15974_s5 + $0x39c] ss:$20 sps:$4 sm:$0xff]  }
 0x1d1   : > { %8388 = vmatmul.mubr.msk.bf16.gmra.mrb[216].mxu0 %vm874_vm1, %v11579_v8  ;;  %3754 = vmatmul.mubr.bf16.gmra.mrb[216].mxu1 %v12093_v10  ;;  %16176 = vst [vmem:[#allocation145_spill] sm:$0xff] %v12115_v43  ;;  %v12117_v50 = vpop.f32.mrb[50].mxu1  ;;  %v12137_v43 = vld [vmem:[%s10989_s23 + $0x204] ss:$16 sps:$4 sm:$0xff]  }
 0x1d2   : > { %2038 = vmatprep.mubr.bf16.mxu0 %v16070_v59  ;;  %3763 = vmatprep.mubr.bf16.mxu1 %v12098_v5  ;;  %16177 = vst [vmem:[#allocation146_spill] sm:$0xff] %v12117_v50  ;;  %v12124_v8 = vpop.f32.mrb[51].mxu1 }
 0x1d3   : > { %16179 = vst [vmem:[#allocation148_spill] sm:$0xff] %v12124_v8  ;;  %3946 = vmatprep.subr.bf16.mxu1 %v10458_v58  ;;  %v12150_v58 = vpop.f32.mrb[52].mxu1  ;;  %v10465_v8 = vld [vmem:[%s15974_s5 + $0x3c0] ss:$20 sps:$4 sm:$0xff]  }
 0x1d4   : > { %v12122_v26 = vpop.f32.mrb[112].mxu0  ;;  %3947 = vmatpush1.bf16.msra.mxu1 %v10456_v35  ;;  %16183 = vst [vmem:[#allocation152_spill] sm:$0xff] %v12150_v58 }
 0x1d5   : > { %16178 = vst [vmem:[#allocation147_spill] sm:$0xff] %v12122_v26  ;;  %v12129_v24 = vpop.f32.mrb[113].mxu0  ;;  %v10462_v26 = vld [vmem:[%s15974_s5 + $0x398] ss:$20 sps:$4 sm:$0xff]   ;;  %3948 = vmatprep.subr.bf16.mxu1 %v10464_v38 }
 0x1d6   : > { %16180 = vst [vmem:[#allocation149_spill] sm:$0xff] %v12129_v24  ;;  %v12134_v49 = vpop.f32.mrb[114].mxu0  ;;  %v10467_v24 = vld [vmem:[%s15974_s5 + $0x3c4] ss:$20 sps:$4 sm:$0xff]  }
 0x1d7   : > { %16181 = vst [vmem:[#allocation150_spill] sm:$0xff] %v12134_v49  ;;  %v12139_v50 = vpop.f32.mrb[115].mxu0 }
 0x1d8   : > { %16182 = vst [vmem:[#allocation151_spill] sm:$0xff] %v12139_v50  ;;  %v12154_v50 = vpop.f32.mrb[53].mxu1  ;;  %3949 = vmatpush1.bf16.msra.mxu1 %v10462_v26 }
 0x1d9   : > { %8389 = vmatmul.mubr.msk.bf16.gmra.mrb[220].mxu0 %vm874_vm1, %v11607_v6  ;;  %3764 = vmatmul.mubr.bf16.gmra.mrb[220].mxu1 %v12132_v53  ;;  %16184 = vst [vmem:[#allocation153_spill] sm:$0xff] %v12154_v50  ;;  %v12156_v35 = vpop.f32.mrb[54].mxu1  ;;  %v10381_v50 = vld [vmem:[%s15974_s5 + $0x288] ss:$20 sps:$4 sm:$0xff]  }
 0x1da   : > { %3773 = vmatprep.mubr.bf16.mxu1 %v12137_v43  ;;  %4319 = vmatprep.mubr.bf16.mxu0 %v11596_v25  ;;  %16185 = vst [vmem:[#allocation154_spill] sm:$0xff] %v12156_v35  ;;  %v12163_v6 = vpop.f32.mrb[55].mxu1  ;;  %v12171_v25 = vld [vmem:[%s10989_s23 + $0x200] ss:$16 sps:$4 sm:$0xff]   ;;  %v12179_v35 = vld [vmem:[%s10989_s23 + $0x224] ss:$16 sps:$4 sm:$0xff]  }
 0x1db   : > { %16187 = vst [vmem:[#allocation156_spill] sm:$0xff] %v12163_v6  ;;  %3950 = vmatprep.subr.bf16.mxu1 %v10467_v24  ;;  %v12188_v24 = vpop.f32.mrb[56].mxu1 }
 0x1dc   : > { %v12161_v49 = vpop.f32.mrb[116].mxu0  ;;  %3951 = vmatpush1.bf16.msra.mxu1 %v10465_v8  ;;  %16191 = vst [vmem:[#allocation160_spill] sm:$0xff] %v12188_v24  ;;  %v10410_v8 = vld [vmem:[%s15974_s5 + $0x2dc] ss:$20 sps:$4 sm:$0xff]  }
 0x1dd   : > { %16186 = vst [vmem:[#allocation155_spill] sm:$0xff] %v12161_v49  ;;  %v12168_v58 = vpop.f32.mrb[117].mxu0  ;;  %v10395_v49 = vld [vmem:[%s15974_s5 + $0x2b4] ss:$20 sps:$4 sm:$0xff]   ;;  %4993 = vmatprep.subr.bf16.mxu1 %v16070_v59  ;;  %v12210_v24 = vld [vmem:[%s10989_s23 + $0x220] ss:$16 sps:$4 sm:$0xff]  }
 0x1de   : > { %16188 = vst [vmem:[#allocation157_spill] sm:$0xff] %v12168_v58  ;;  %v12173_v38 = vpop.f32.mrb[118].mxu0  ;;  %v12194_v58 = vpop.f32.mrb[57].mxu1 }
 0x1df   : > { %16189 = vst [vmem:[#allocation158_spill] sm:$0xff] %v12173_v38  ;;  %v12181_v26 = vpop.f32.mrb[119].mxu0  ;;  %16192 = vst [vmem:[#allocation161_spill] sm:$0xff] %v12194_v58 }
 0x1e0   : > { %16190 = vst [vmem:[#allocation159_spill] sm:$0xff] %v12181_v26  ;;  %v10393_v26 = vld [vmem:[%s15974_s5 + $0x2b0] ss:$20 sps:$4 sm:$0xff]  }
 0x1e1   : > { %3774 = vmatmul.mubr.bf16.gmra.mrb[224].mxu1 %v12171_v25  ;;  %4320 = vmatmul.mubr.bf16.vlgmr.msra.gmra.mrb[224].mxu0 %v11620_v55  ;;  %v12200_v55 = vpop.f32.mrb[58].mxu1 }
 0x1e2   : > { %4641 = vmatpush1.bf16.msra.mxu0 %v10381_v50  ;;  %3783 = vmatprep.mubr.bf16.mxu1 %v12179_v35  ;;  %16193 = vst [vmem:[#allocation162_spill] sm:$0xff] %v12200_v55  ;;  %v12204_v50 = vpop.f32.mrb[59].mxu1  ;;  %v10408_v55 = vld [vmem:[%s15974_s5 + $0x2d8] ss:$20 sps:$4 sm:$0xff]  }
 0x1e3   : > { %4329 = vmatprep.mubr.bf16.mxu0 %v11623_v48  ;;  %4642 = vmatprep.subr.bf16.mxu0 %v10395_v49  ;;  %16195 = vst [vmem:[#allocation164_spill] sm:$0xff] %v12204_v50  ;;  %v12215_v48 = vld [vmem:[%s10989_s23 + $0x244] ss:$16 sps:$4 sm:$0xff]  }
 0x1e4   : > { %v12202_v38 = vpop.f32.mrb[120].mxu0 }
 0x1e5   : > { %16194 = vst [vmem:[#allocation163_spill] sm:$0xff] %v12202_v38  ;;  %v12207_v6 = vpop.f32.mrb[121].mxu0  ;;  %v10422_v38 = vld [vmem:[%s15974_s5 + $0x304] ss:$20 sps:$4 sm:$0xff]  }
 0x1e6   : > { %16196 = vst [vmem:[#allocation165_spill] sm:$0xff] %v12207_v6  ;;  %v12212_v58 = vpop.f32.mrb[122].mxu0  ;;  %4643 = vmatpush1.bf16.msra.mxu0 %v10393_v26  ;;  %v12227_v6 = vpop.f32.mrb[60].mxu1 }
 0x1e7   : > { %16197 = vst [vmem:[#allocation166_spill] sm:$0xff] %v12212_v58  ;;  %v12217_v49 = vpop.f32.mrb[123].mxu0  ;;  %4644 = vmatprep.subr.bf16.mxu0 %v10410_v8  ;;  %16199 = vst [vmem:[#allocation168_spill] sm:$0xff] %v12227_v6  ;;  %v12231_v26 = vpop.f32.mrb[61].mxu1  ;;  %v10420_v8 = vld [vmem:[%s15974_s5 + $0x300] ss:$20 sps:$4 sm:$0xff]  }
 0x1e8   : > { %16198 = vst [vmem:[#allocation167_spill] sm:$0xff] %v12217_v49  ;;  %16200 = vst [vmem:[#allocation169_spill] sm:$0xff] %v12231_v26  ;;  %v12236_v49 = vpop.f32.mrb[62].mxu1  ;;  %v12253_v26 = vld [vmem:[%s10989_s23 + $0x264] ss:$16 sps:$4 sm:$0xff]  }
 0x1e9   : > { %3784 = vmatmul.mubr.bf16.gmra.mrb[228].mxu1 %v12210_v24  ;;  %4330 = vmatmul.mubr.bf16.gmra.mrb[228].mxu0 %v11646_v3  ;;  %16201 = vst [vmem:[#allocation170_spill] sm:$0xff] %v12236_v49  ;;  %v10455_v3 = vld [vmem:[%s15974_s5 + $0x32c] ss:$20 sps:$4 sm:$0xff]   ;;  %v12243_v50 = vpop.f32.mrb[63].mxu1  ;;  %v12482_v49 = vld [vmem:[%s10989_s23 + $0x364] ss:$16 sps:$4 sm:$0xff]  }
 0x1ea   : > { %3793 = vmatprep.mubr.bf16.mxu1 %v12215_v48  ;;  %4339 = vmatprep.mubr.bf16.mxu0 %v11649_v57  ;;  %16203 = vst [vmem:[#allocation172_spill] sm:$0xff] %v12243_v50  ;;  %v12248_v57 = vld [vmem:[%s10989_s23 + $0x240] ss:$16 sps:$4 sm:$0xff]  }
 0x1eb   : > { %4645 = vmatpush1.bf16.msra.mxu0 %v10408_v55 }
 0x1ec   : > { %v12238_v58 = vpop.f32.mrb[124].mxu0  ;;  %4646 = vmatprep.subr.bf16.mxu0 %v10422_v38  ;;  %v10453_v38 = vld [vmem:[%s15974_s5 + $0x328] ss:$20 sps:$4 sm:$0xff]  }
 0x1ed   : > { %16202 = vst [vmem:[#allocation171_spill] sm:$0xff] %v12238_v58  ;;  %v12245_v6 = vpop.f32.mrb[125].mxu0  ;;  %v10478_v58 = vld [vmem:[%s15974_s5 + $0x354] ss:$20 sps:$4 sm:$0xff]  }
 0x1ee   : > { %16204 = vst [vmem:[#allocation173_spill] sm:$0xff] %v12245_v6  ;;  %v12250_v55 = vpop.f32.mrb[126].mxu0  ;;  %v12265_v6 = vpop.f32.mrb[64].mxu1 }
 0x1ef   : > { %16205 = vst [vmem:[#allocation174_spill] sm:$0xff] %v12250_v55  ;;  %v12255_v23 = vpop.f32.mrb[127].mxu0  ;;  %4647 = vmatpush1.bf16.msra.mxu0 %v10420_v8  ;;  %16207 = vst [vmem:[#allocation176_spill] sm:$0xff] %v12265_v6  ;;  %v12269_v8 = vpop.f32.mrb[65].mxu1  ;;  %v12283_v6 = vld [vmem:[%s10989_s23 + $0x260] ss:$16 sps:$4 sm:$0xff]  }
 0x1f0   : > { %16206 = vst [vmem:[#allocation175_spill] sm:$0xff] %v12255_v23  ;;  %4648 = vmatprep.subr.bf16.mxu0 %v10455_v3  ;;  %16208 = vst [vmem:[#allocation177_spill] sm:$0xff] %v12269_v8  ;;  %v10476_v3 = vld [vmem:[%s15974_s5 + $0x350] ss:$20 sps:$4 sm:$0xff]   ;;  %v12274_v23 = vpop.f32.mrb[66].mxu1 }
 0x1f1   : > { %3794 = vmatmul.mubr.bf16.gmra.mrb[232].mxu1 %v12248_v57  ;;  %4340 = vmatmul.mubr.bf16.gmra.mrb[232].mxu0 %v11669_v30  ;;  %16209 = vst [vmem:[#allocation178_spill] sm:$0xff] %v12274_v23  ;;  %v12278_v50 = vpop.f32.mrb[67].mxu1  ;;  %v12314_v23 = vld [vmem:[%s10989_s23 + $0x2a4] ss:$16 sps:$4 sm:$0xff]  }
 0x1f2   : > { %3803 = vmatprep.mubr.bf16.mxu1 %v12253_v26  ;;  %4349 = vmatprep.mubr.bf16.mxu0 %v11672_v39  ;;  %16211 = vst [vmem:[#allocation180_spill] sm:$0xff] %v12278_v50 }
 0x1f3   : > { %4649 = vmatpush1.bf16.msra.mxu0 %v10453_v38  ;;  %v12288_v38 = vld [vmem:[%s10989_s23 + $0x284] ss:$16 sps:$4 sm:$0xff]  }
 0x1f4   : > { %v12276_v55 = vpop.f32.mrb[128].mxu0  ;;  %4650 = vmatprep.subr.bf16.mxu0 %v10478_v58  ;;  %v12294_v58 = vpop.f32.mrb[68].mxu1 }
 0x1f5   : > { %16210 = vst [vmem:[#allocation179_spill] sm:$0xff] %v12276_v55  ;;  %v12280_v30 = vpop.f32.mrb[129].mxu0  ;;  %16215 = vst [vmem:[#allocation184_spill] sm:$0xff] %v12294_v58 }
 0x1f6   : > { %16212 = vst [vmem:[#allocation181_spill] sm:$0xff] %v12280_v30  ;;  %v12285_v39 = vpop.f32.mrb[130].mxu0  ;;  %v12298_v30 = vpop.f32.mrb[69].mxu1 }
 0x1f7   : > { %16213 = vst [vmem:[#allocation182_spill] sm:$0xff] %v12285_v39  ;;  %v12290_v8 = vpop.f32.mrb[131].mxu0  ;;  %4651 = vmatpush1.bf16.msra.mxu0 %v10476_v3  ;;  %16216 = vst [vmem:[#allocation185_spill] sm:$0xff] %v12298_v30  ;;  %v12300_v55 = vpop.f32.mrb[70].mxu1  ;;  %v12335_v30 = vld [vmem:[%s10989_s23 + $0x2a0] ss:$16 sps:$4 sm:$0xff]  }
 0x1f8   : > { %16214 = vst [vmem:[#allocation183_spill] sm:$0xff] %v12290_v8  ;;  %16217 = vst [vmem:[#allocation186_spill] sm:$0xff] %v12300_v55  ;;  %v12304_v50 = vpop.f32.mrb[71].mxu1  ;;  %v12309_v8 = vld [vmem:[%s10989_s23 + $0x280] ss:$16 sps:$4 sm:$0xff]  }
 0x1f9   : > { %3804 = vmatmul.mubr.bf16.gmra.mrb[236].mxu1 %v12283_v6  ;;  %4350 = vmatmul.mubr.bf16.gmra.mrb[236].mxu0 %v11702_v15  ;;  %16219 = vst [vmem:[#allocation188_spill] sm:$0xff] %v12304_v50 }
 0x1fa   : > { %3813 = vmatprep.mubr.bf16.mxu1 %v12288_v38  ;;  %4359 = vmatprep.mubr.bf16.mxu0 %v11705_v44  ;;  %v12320_v44 = vpop.f32.mrb[72].mxu1 }
 0x1fb   : > { %16223 = vst [vmem:[#allocation192_spill] sm:$0xff] %v12320_v44  ;;  %v12340_v44 = vld [vmem:[%s10989_s23 + $0x2c4] ss:$16 sps:$4 sm:$0xff]  }
 0x1fc   : > { %v12302_v39 = vpop.f32.mrb[132].mxu0 }
 0x1fd   : > { %16218 = vst [vmem:[#allocation187_spill] sm:$0xff] %v12302_v39  ;;  %v12306_v3 = vpop.f32.mrb[133].mxu0 }
 0x1fe   : > { %16220 = vst [vmem:[#allocation189_spill] sm:$0xff] %v12306_v3  ;;  %v12311_v15 = vpop.f32.mrb[134].mxu0  ;;  %v12324_v3 = vpop.f32.mrb[73].mxu1 }
 0x1ff   : > { %16221 = vst [vmem:[#allocation190_spill] sm:$0xff] %v12311_v15  ;;  %v12316_v58 = vpop.f32.mrb[135].mxu0  ;;  %16224 = vst [vmem:[#allocation193_spill] sm:$0xff] %v12324_v3  ;;  %v12326_v39 = vpop.f32.mrb[74].mxu1 }
 0x200   : > { %16222 = vst [vmem:[#allocation191_spill] sm:$0xff] %v12316_v58  ;;  %16225 = vst [vmem:[#allocation194_spill] sm:$0xff] %v12326_v39  ;;  %v12330_v50 = vpop.f32.mrb[75].mxu1  ;;  %v12372_v39 = vld [vmem:[%s10989_s23 + $0x2e4] ss:$16 sps:$4 sm:$0xff]  }
 0x201   : > { %3814 = vmatmul.mubr.bf16.gmra.mrb[240].mxu1 %v12309_v8  ;;  %4360 = vmatmul.mubr.bf16.gmra.mrb[240].mxu0 %v11737_v12  ;;  %16227 = vst [vmem:[#allocation196_spill] sm:$0xff] %v12330_v50  ;;  %v12357_v50 = vld [vmem:[%s10989_s23 + $0x2c0] ss:$16 sps:$4 sm:$0xff]  }
 0x202   : > { %3823 = vmatprep.mubr.bf16.mxu1 %v12314_v23  ;;  %4369 = vmatprep.mubr.bf16.mxu0 %v11740_v60  ;;  %v12346_v60 = vpop.f32.mrb[76].mxu1 }
 0x203   : > { %16231 = vst [vmem:[#allocation200_spill] sm:$0xff] %v12346_v60 }
 0x204   : > { %v12328_v15 = vpop.f32.mrb[136].mxu0 }
 0x205   : > { %16226 = vst [vmem:[#allocation195_spill] sm:$0xff] %v12328_v15  ;;  %v12332_v58 = vpop.f32.mrb[137].mxu0 }
 0x206   : > { %16228 = vst [vmem:[#allocation197_spill] sm:$0xff] %v12332_v58  ;;  %v12337_v12 = vpop.f32.mrb[138].mxu0  ;;  %v12350_v58 = vpop.f32.mrb[77].mxu1 }
 0x207   : > { %16229 = vst [vmem:[#allocation198_spill] sm:$0xff] %v12337_v12  ;;  %v12342_v55 = vpop.f32.mrb[139].mxu0  ;;  %16232 = vst [vmem:[#allocation201_spill] sm:$0xff] %v12350_v58  ;;  %v12352_v15 = vpop.f32.mrb[78].mxu1 }
 0x208   : > { %16230 = vst [vmem:[#allocation199_spill] sm:$0xff] %v12342_v55  ;;  %16233 = vst [vmem:[#allocation202_spill] sm:$0xff] %v12352_v15  ;;  %v12359_v3 = vpop.f32.mrb[79].mxu1 }
 0x209   : > { %3824 = vmatmul.mubr.bf16.gmra.mrb[244].mxu1 %v12335_v30  ;;  %4370 = vmatmul.mubr.bf16.gmra.mrb[244].mxu0 %v11772_v52  ;;  %16235 = vst [vmem:[#allocation204_spill] sm:$0xff] %v12359_v3  ;;  %v10489_v52 = vld [vmem:[%s15974_s5 + $0x378] ss:$20 sps:$4 sm:$0xff]  }
 0x20a   : > { %3833 = vmatprep.mubr.bf16.mxu1 %v12340_v44  ;;  %4379 = vmatprep.mubr.bf16.mxu0 %v11775_v54  ;;  %v10491_v54 = vld [vmem:[%s15974_s5 + $0x37c] ss:$20 sps:$4 sm:$0xff]  }
 0x20b   : > { %4652 = vmatprep.subr.bf16.mxu0 %v10491_v54  ;;  %v12393_v54 = vld [vmem:[%s10989_s23 + $0x2e0] ss:$16 sps:$4 sm:$0xff]  }
 0x20c   : > { %v12354_v12 = vpop.f32.mrb[140].mxu0  ;;  %4653 = vmatpush1.bf16.msra.mxu0 %v10489_v52 }
 0x20d   : > { %16234 = vst [vmem:[#allocation203_spill] sm:$0xff] %v12354_v12  ;;  %v12361_v55 = vpop.f32.mrb[141].mxu0 }
 0x20e   : > { %16236 = vst [vmem:[#allocation205_spill] sm:$0xff] %v12361_v55  ;;  %v12369_v58 = vpop.f32.mrb[142].mxu0  ;;  %v12378_v55 = vpop.f32.mrb[80].mxu1 }
 0x20f   : > { %16237 = vst [vmem:[#allocation206_spill] sm:$0xff] %v12369_v58  ;;  %v12374_v12 = vpop.f32.mrb[143].mxu0  ;;  %16239 = vst [vmem:[#allocation208_spill] sm:$0xff] %v12378_v55  ;;  %v12382_v3 = vpop.f32.mrb[81].mxu1 }
 0x210   : > { %16238 = vst [vmem:[#allocation207_spill] sm:$0xff] %v12374_v12  ;;  %16240 = vst [vmem:[#allocation209_spill] sm:$0xff] %v12382_v3  ;;  %v12384_v58 = vpop.f32.mrb[82].mxu1  ;;  %v12398_v12 = vld [vmem:[%s10989_s23 + $0x304] ss:$16 sps:$4 sm:$0xff]  }
 0x211   : > { %3834 = vmatmul.mubr.bf16.gmra.mrb[248].mxu1 %v12357_v50  ;;  %4380 = vmatmul.mubr.bf16.gmra.mrb[248].mxu0 %v11807_v22  ;;  %16241 = vst [vmem:[#allocation210_spill] sm:$0xff] %v12384_v58  ;;  %v12388_v60 = vpop.f32.mrb[83].mxu1  ;;  %v12419_v3 = vld [vmem:[%s10989_s23 + $0x300] ss:$16 sps:$4 sm:$0xff]   ;;  %v12424_v58 = vld [vmem:[%s10989_s23 + $0x324] ss:$16 sps:$4 sm:$0xff]  }
 0x212   : > { %3843 = vmatprep.mubr.bf16.mxu1 %v12372_v39  ;;  %4389 = vmatprep.mubr.bf16.mxu0 %v11810_v34  ;;  %16243 = vst [vmem:[#allocation212_spill] sm:$0xff] %v12388_v60  ;;  %v12404_v34 = vpop.f32.mrb[84].mxu1 }
 0x213   : > { %16247 = vst [vmem:[#allocation216_spill] sm:$0xff] %v12404_v34 }
 0x214   : > { %v12386_v15 = vpop.f32.mrb[144].mxu0 }
 0x215   : > { %16242 = vst [vmem:[#allocation211_spill] sm:$0xff] %v12386_v15  ;;  %v12390_v52 = vpop.f32.mrb[145].mxu0 }
 0x216   : > { %16244 = vst [vmem:[#allocation213_spill] sm:$0xff] %v12390_v52  ;;  %v12395_v22 = vpop.f32.mrb[146].mxu0  ;;  %v12408_v52 = vpop.f32.mrb[85].mxu1 }
 0x217   : > { %16245 = vst [vmem:[#allocation214_spill] sm:$0xff] %v12395_v22  ;;  %v12400_v55 = vpop.f32.mrb[147].mxu0  ;;  %16248 = vst [vmem:[#allocation217_spill] sm:$0xff] %v12408_v52  ;;  %v12410_v15 = vpop.f32.mrb[86].mxu1 }
 0x218   : > { %16246 = vst [vmem:[#allocation215_spill] sm:$0xff] %v12400_v55  ;;  %16249 = vst [vmem:[#allocation218_spill] sm:$0xff] %v12410_v15  ;;  %v12414_v22 = vpop.f32.mrb[87].mxu1 }
 0x219   : > { %3844 = vmatmul.mubr.bf16.gmra.mrb[252].mxu1 %v12393_v54  ;;  %4390 = vmatmul.mubr.bf16.gmra.mrb[252].mxu0 %v11842_v20  ;;  %16251 = vst [vmem:[#allocation220_spill] sm:$0xff] %v12414_v22 }
 0x21a   : > { %3853 = vmatprep.mubr.bf16.mxu1 %v12398_v12  ;;  %4399 = vmatprep.mubr.bf16.mxu0 %v11845_v1  ;;  %v12430_v1 = vpop.f32.mrb[88].mxu1 }
 0x21b   : > { %16255 = vst [vmem:[#allocation224_spill] sm:$0xff] %v12430_v1 }
 0x21c   : > { %v12412_v60 = vpop.f32.mrb[148].mxu0 }
 0x21d   : > { %16250 = vst [vmem:[#allocation219_spill] sm:$0xff] %v12412_v60  ;;  %v12416_v55 = vpop.f32.mrb[149].mxu0 }
 0x21e   : > { %16252 = vst [vmem:[#allocation221_spill] sm:$0xff] %v12416_v55  ;;  %v12421_v20 = vpop.f32.mrb[150].mxu0  ;;  %v12434_v55 = vpop.f32.mrb[89].mxu1 }
 0x21f   : > { %16253 = vst [vmem:[#allocation222_spill] sm:$0xff] %v12421_v20  ;;  %v12426_v34 = vpop.f32.mrb[151].mxu0  ;;  %16256 = vst [vmem:[#allocation225_spill] sm:$0xff] %v12434_v55  ;;  %v12436_v60 = vpop.f32.mrb[90].mxu1 }
 0x220   : > { %16254 = vst [vmem:[#allocation223_spill] sm:$0xff] %v12426_v34  ;;  %16257 = vst [vmem:[#allocation226_spill] sm:$0xff] %v12436_v60  ;;  %v12440_v20 = vpop.f32.mrb[91].mxu1  ;;  %v12445_v34 = vld [vmem:[%s10989_s23 + $0x320] ss:$16 sps:$4 sm:$0xff]  }
 0x221   : > { %3854 = vmatmul.mubr.bf16.gmra.mrb[0].mxu1 %v12419_v3  ;;  %4400 = vmatmul.mubr.bf16.gmra.mrb[0].mxu0 %v11877_v31  ;;  %16259 = vst [vmem:[#allocation228_spill] sm:$0xff] %v12440_v20  ;;  %v12450_v31 = vld [vmem:[%s10989_s23 + $0x344] ss:$16 sps:$4 sm:$0xff]   ;;  %v12477_v60 = vld [vmem:[%s10989_s23 + $0x340] ss:$16 sps:$4 sm:$0xff]  }
 0x222   : > { %3863 = vmatprep.mubr.bf16.mxu1 %v12424_v58  ;;  %4409 = vmatprep.mubr.bf16.mxu0 %v11880_v56  ;;  %v10504_v56 = vld [vmem:[%s15974_s5 + $0x3a0] ss:$20 sps:$4 sm:$0xff]  }
 0x224   : > { %v12438_v22 = vpop.f32.mrb[152].mxu0 }
 0x225   : > { %16258 = vst [vmem:[#allocation227_spill] sm:$0xff] %v12438_v22  ;;  %v12442_v52 = vpop.f32.mrb[153].mxu0  ;;  %v12462_v22 = vpop.f32.mrb[92].mxu1 }
 0x226   : > { %16260 = vst [vmem:[#allocation229_spill] sm:$0xff] %v12442_v52  ;;  %v12447_v15 = vpop.f32.mrb[154].mxu0  ;;  %v10506_v52 = vld [vmem:[%s15974_s5 + $0x3a4] ss:$20 sps:$4 sm:$0xff]   ;;  %16263 = vst [vmem:[#allocation232_spill] sm:$0xff] %v12462_v22 }
 0x227   : > { %16261 = vst [vmem:[#allocation230_spill] sm:$0xff] %v12447_v15  ;;  %v12452_v1 = vpop.f32.mrb[155].mxu0  ;;  %4654 = vmatprep.subr.bf16.mxu0 %v10506_v52 }
 0x228   : > { %16262 = vst [vmem:[#allocation231_spill] sm:$0xff] %v12452_v1  ;;  %v12466_v1 = vpop.f32.mrb[93].mxu1  ;;  %4655 = vmatpush1.bf16.msra.mxu0 %v10504_v56 }
 0x229   : > { %3864 = vmatmul.mubr.bf16.gmra.mrb[4].mxu1 %v12445_v34  ;;  %4410 = vmatmul.mubr.bf16.gmra.mrb[4].mxu0 %v11912_v13  ;;  %16264 = vst [vmem:[#allocation233_spill] sm:$0xff] %v12466_v1  ;;  %v12468_v15 = vpop.f32.mrb[94].mxu1  ;;  %v12508_v1 = vld [vmem:[%s10989_s23 + $0x384] ss:$16 sps:$4 sm:$0xff]  }
 0x22a   : > { %3873 = vmatprep.mubr.bf16.mxu1 %v12450_v31  ;;  %4419 = vmatprep.mubr.bf16.mxu0 %v11915_v14  ;;  %16265 = vst [vmem:[#allocation234_spill] sm:$0xff] %v12468_v15  ;;  %v12472_v20 = vpop.f32.mrb[95].mxu1  ;;  %v12566_v15 = vld [vmem:[%s10989_s23 + $0x3c4] ss:$16 sps:$4 sm:$0xff]  }
 0x22b   : > { %16267 = vst [vmem:[#allocation236_spill] sm:$0xff] %v12472_v20  ;;  %v12488_v52 = vpop.f32.mrb[96].mxu1  ;;  %v12503_v20 = vld [vmem:[%s10989_s23 + $0x360] ss:$16 sps:$4 sm:$0xff]  }
 0x22c   : > { %v12470_v13 = vpop.f32.mrb[156].mxu0  ;;  %16271 = vst [vmem:[#allocation240_spill] sm:$0xff] %v12488_v52  ;;  %v12492_v56 = vpop.f32.mrb[97].mxu1 }
 0x22d   : > { %16266 = vst [vmem:[#allocation235_spill] sm:$0xff] %v12470_v13  ;;  %v12474_v55 = vpop.f32.mrb[157].mxu0  ;;  %16272 = vst [vmem:[#allocation241_spill] sm:$0xff] %v12492_v56 }
 0x22e   : > { %16268 = vst [vmem:[#allocation237_spill] sm:$0xff] %v12474_v55  ;;  %v12479_v22 = vpop.f32.mrb[158].mxu0  ;;  %v12494_v55 = vpop.f32.mrb[98].mxu1 }
 0x22f   : > { %16269 = vst [vmem:[#allocation238_spill] sm:$0xff] %v12479_v22  ;;  %v12484_v14 = vpop.f32.mrb[159].mxu0  ;;  %16273 = vst [vmem:[#allocation242_spill] sm:$0xff] %v12494_v55  ;;  %v12498_v22 = vpop.f32.mrb[99].mxu1 }
 0x230   : > { %16270 = vst [vmem:[#allocation239_spill] sm:$0xff] %v12484_v14  ;;  %16275 = vst [vmem:[#allocation244_spill] sm:$0xff] %v12498_v22 }
 0x231   : > { %3874 = vmatmul.mubr.bf16.gmra.mrb[8].mxu1 %v12477_v60  ;;  %4420 = vmatmul.mubr.bf16.gmra.mrb[8].mxu0 %v11947_v46 }
 0x232   : > { %3883 = vmatprep.mubr.bf16.mxu1 %v12482_v49  ;;  %4429 = vmatprep.mubr.bf16.mxu0 %v11950_v36  ;;  %v12514_v36 = vpop.f32.mrb[100].mxu1 }
 0x233   : > { %16279 = vst [vmem:[#allocation248_spill] sm:$0xff] %v12514_v36 }
 0x234   : > { %v12496_v13 = vpop.f32.mrb[160].mxu0 }
 0x235   : > { %16274 = vst [vmem:[#allocation243_spill] sm:$0xff] %v12496_v13  ;;  %v12500_v14 = vpop.f32.mrb[161].mxu0 }
 0x236   : > { %16276 = vst [vmem:[#allocation245_spill] sm:$0xff] %v12500_v14  ;;  %v12505_v46 = vpop.f32.mrb[162].mxu0  ;;  %v12518_v14 = vpop.f32.mrb[101].mxu1 }
 0x237   : > { %16277 = vst [vmem:[#allocation246_spill] sm:$0xff] %v12505_v46  ;;  %v12510_v52 = vpop.f32.mrb[163].mxu0  ;;  %16280 = vst [vmem:[#allocation249_spill] sm:$0xff] %v12518_v14  ;;  %v12520_v13 = vpop.f32.mrb[102].mxu1 }
 0x238   : > { %16278 = vst [vmem:[#allocation247_spill] sm:$0xff] %v12510_v52  ;;  %16281 = vst [vmem:[#allocation250_spill] sm:$0xff] %v12520_v13  ;;  %v12524_v46 = vpop.f32.mrb[103].mxu1  ;;  %v12529_v52 = vld [vmem:[%s10989_s23 + $0x380] ss:$16 sps:$4 sm:$0xff]  }
 0x239   : > { %3884 = vmatmul.mubr.bf16.gmra.mrb[12].mxu1 %v12503_v20  ;;  %4430 = vmatmul.mubr.bf16.gmra.mrb[12].mxu0 %v11982_v11  ;;  %16283 = vst [vmem:[#allocation252_spill] sm:$0xff] %v12524_v46  ;;  %v12534_v11 = vld [vmem:[%s10989_s23 + $0x3a4] ss:$16 sps:$4 sm:$0xff]  }
 0x23a   : > { %3893 = vmatprep.mubr.bf16.mxu1 %v12508_v1  ;;  %4439 = vmatprep.mubr.bf16.mxu0 %v11987_v63  ;;  %v12540_v63 = vpop.f32.mrb[104].mxu1 }
 0x23b   : > { %16287 = vst [vmem:[#allocation256_spill] sm:$0xff] %v12540_v63  ;;  %v12561_v63 = vld [vmem:[%s10989_s23 + $0x3a0] ss:$16 sps:$4 sm:$0xff]  }
 0x23c   : > { %v12522_v22 = vpop.f32.mrb[164].mxu0 }
 0x23d   : > { %16282 = vst [vmem:[#allocation251_spill] sm:$0xff] %v12522_v22  ;;  %v12526_v56 = vpop.f32.mrb[165].mxu0 }
 0x23e   : > { %16284 = vst [vmem:[#allocation253_spill] sm:$0xff] %v12526_v56  ;;  %v12531_v55 = vpop.f32.mrb[166].mxu0  ;;  %v10516_v56 = vld [vmem:[%s15974_s5 + $0x3c8] ss:$20 sps:$4 sm:$0xff]  }
 0x23f   : > { %16285 = vst [vmem:[#allocation254_spill] sm:$0xff] %v12531_v55  ;;  %v12536_v36 = vpop.f32.mrb[167].mxu0  ;;  %v10518_v55 = vld [vmem:[%s15974_s5 + $0x3cc] ss:$20 sps:$4 sm:$0xff]  }
 0x240   : > { %16286 = vst [vmem:[#allocation255_spill] sm:$0xff] %v12536_v36  ;;  %v12550_v36 = vpop.f32.mrb[105].mxu1  ;;  %4656 = vmatprep.subr.bf16.mxu0 %v10518_v55 }
 0x241   : > { %3894 = vmatmul.mubr.bf16.gmra.mrb[16].mxu1 %v12529_v52  ;;  %4440 = vmatmul.mubr.bf16.gmra.mrb[16].mxu0 %v12015_v7  ;;  %16288 = vst [vmem:[#allocation257_spill] sm:$0xff] %v12550_v36  ;;  %v12552_v22 = vpop.f32.mrb[106].mxu1  ;;  %v12592_v36 = vld [vmem:[%s10989_s23 + $0x3e4] ss:$16 sps:$4 sm:$0xff]  }
 0x242   : > { %3903 = vmatprep.mubr.bf16.mxu1 %v12534_v11  ;;  %4449 = vmatprep.mubr.bf16.mxu0 %v12020_v29  ;;  %16289 = vst [vmem:[#allocation258_spill] sm:$0xff] %v12552_v22  ;;  %v12556_v46 = vpop.f32.mrb[107].mxu1 }
 0x243   : > { %16291 = vst [vmem:[#allocation260_spill] sm:$0xff] %v12556_v46  ;;  %4657 = vmatpush1.bf16.msra.mxu0 %v10516_v56  ;;  %v12572_v55 = vpop.f32.mrb[108].mxu1  ;;  %v12587_v46 = vld [vmem:[%s10989_s23 + $0x3c0] ss:$16 sps:$4 sm:$0xff]  }
 0x244   : > { %v12554_v7 = vpop.f32.mrb[168].mxu0  ;;  %16295 = vst [vmem:[#allocation264_spill] sm:$0xff] %v12572_v55  ;;  %v12576_v56 = vpop.f32.mrb[109].mxu1 }
 0x245   : > { %16290 = vst [vmem:[#allocation259_spill] sm:$0xff] %v12554_v7  ;;  %v12558_v14 = vpop.f32.mrb[169].mxu0  ;;  %16296 = vst [vmem:[#allocation265_spill] sm:$0xff] %v12576_v56 }
 0x246   : > { %16292 = vst [vmem:[#allocation261_spill] sm:$0xff] %v12558_v14  ;;  %v12563_v13 = vpop.f32.mrb[170].mxu0  ;;  %v12578_v14 = vpop.f32.mrb[110].mxu1 }
 0x247   : > { %16293 = vst [vmem:[#allocation262_spill] sm:$0xff] %v12563_v13  ;;  %v12568_v29 = vpop.f32.mrb[171].mxu0  ;;  %16297 = vst [vmem:[#allocation266_spill] sm:$0xff] %v12578_v14  ;;  %v12582_v13 = vpop.f32.mrb[111].mxu1 }
 0x248   : > { %16294 = vst [vmem:[#allocation263_spill] sm:$0xff] %v12568_v29  ;;  %16299 = vst [vmem:[#allocation268_spill] sm:$0xff] %v12582_v13 }
 0x249   : > { %3904 = vmatmul.mubr.bf16.gmra.mrb[20].mxu1 %v12561_v63  ;;  %4450 = vmatmul.mubr.bf16.gmra.mrb[20].mxu0 %v12054_v19 }
 0x24a   : > { %3913 = vmatprep.mubr.bf16.mxu1 %v12566_v15  ;;  %4459 = vmatprep.mubr.bf16.mxu0 %v12059_v9  ;;  %v12598_v9 = vpop.f32.mrb[112].mxu1 }
 0x24b   : > { %16303 = vst [vmem:[#allocation272_spill] sm:$0xff] %v12598_v9  ;;  %v12618_v9 = vld [vmem:[%s10989_s23 + $0xc] ss:$16 sps:$4 sm:$0xff]  }
 0x24c   : > { %v12580_v7 = vpop.f32.mrb[172].mxu0 }
 0x24d   : > { %16298 = vst [vmem:[#allocation267_spill] sm:$0xff] %v12580_v7  ;;  %v12584_v29 = vpop.f32.mrb[173].mxu0 }
 0x24e   : > { %16300 = vst [vmem:[#allocation269_spill] sm:$0xff] %v12584_v29  ;;  %v12589_v19 = vpop.f32.mrb[174].mxu0  ;;  %v12602_v29 = vpop.f32.mrb[113].mxu1 }
 0x24f   : > { %16301 = vst [vmem:[#allocation270_spill] sm:$0xff] %v12589_v19  ;;  %v12594_v22 = vpop.f32.mrb[175].mxu0  ;;  %16304 = vst [vmem:[#allocation273_spill] sm:$0xff] %v12602_v29  ;;  %v12604_v7 = vpop.f32.mrb[114].mxu1  ;;  %v12640_v29 = vld [vmem:[%s10989_s23 + $0x8] ss:$16 sps:$4 sm:$0xff]  }
 0x250   : > { %16302 = vst [vmem:[#allocation271_spill] sm:$0xff] %v12594_v22  ;;  %16305 = vst [vmem:[#allocation274_spill] sm:$0xff] %v12604_v7  ;;  %v12608_v19 = vpop.f32.mrb[115].mxu1  ;;  %v12613_v22 = vld [vmem:[%s10989_s23 + $0x3e0] ss:$16 sps:$4 sm:$0xff]  }
 0x251   : > { %3914 = vmatmul.mubr.bf16.gmra.mrb[24].mxu1 %v12587_v46  ;;  %4460 = vmatmul.mubr.bf16.gmra.mrb[24].mxu0 %v12093_v10  ;;  %16307 = vst [vmem:[#allocation276_spill] sm:$0xff] %v12608_v19  ;;  %v12645_v7 = vld [vmem:[%s10989_s23 + $0x2c] ss:$16 sps:$4 sm:$0xff]  }
 0x252   : > { %3923 = vmatprep.mubr.bf16.mxu1 %v12592_v36  ;;  %4469 = vmatprep.mubr.bf16.mxu0 %v12098_v5  ;;  %v12624_v5 = vpop.f32.mrb[116].mxu1 }
 0x253   : > { %16311 = vst [vmem:[#allocation280_spill] sm:$0xff] %v12624_v5 }
 0x254   : > { %v12606_v13 = vpop.f32.mrb[176].mxu0 }
 0x255   : > { %16306 = vst [vmem:[#allocation275_spill] sm:$0xff] %v12606_v13  ;;  %v12610_v56 = vpop.f32.mrb[177].mxu0 }
 0x256   : > { %16308 = vst [vmem:[#allocation277_spill] sm:$0xff] %v12610_v56  ;;  %v12615_v10 = vpop.f32.mrb[178].mxu0  ;;  %v12629_v56 = vpop.f32.mrb[117].mxu1 }
 0x257   : > { %16309 = vst [vmem:[#allocation278_spill] sm:$0xff] %v12615_v10  ;;  %v12620_v14 = vpop.f32.mrb[179].mxu0  ;;  %16312 = vst [vmem:[#allocation281_spill] sm:$0xff] %v12629_v56  ;;  %v12631_v10 = vpop.f32.mrb[118].mxu1  ;;  %v12673_v56 = vld [vmem:[%s10989_s23 + $0x28] ss:$16 sps:$4 sm:$0xff]  }
 0x258   : > { %16310 = vst [vmem:[#allocation279_spill] sm:$0xff] %v12620_v14  ;;  %16313 = vst [vmem:[#allocation282_spill] sm:$0xff] %v12631_v10  ;;  %v12635_v19 = vpop.f32.mrb[119].mxu1  ;;  %v12678_v10 = vld [vmem:[%s10989_s23 + $0x4c] ss:$16 sps:$4 sm:$0xff]  }
 0x259   : > { %3924 = vmatmul.mubr.bf16.gmra.mrb[28].mxu1 %v12613_v22  ;;  %4470 = vmatmul.mubr.bf16.gmra.mrb[28].mxu0 %v12132_v53  ;;  %16315 = vst [vmem:[#allocation284_spill] sm:$0xff] %v12635_v19 }
 0x25a   : > { %8643 = vmatprep.mubr.msk.bf16.mxu1 %vm3484_vm2, %v12618_v9  ;;  %4479 = vmatprep.mubr.bf16.mxu0 %v12137_v43  ;;  %v12654_v43 = vld [vmem:[%s15973_s4] sm:$0xff]  }
 0x25b   : > { %9048 = vmatprep.subr.bf16.mxu0 %v12654_v43 }
 0x25c   : > { %v12633_v13 = vpop.f32.mrb[180].mxu0 }
 0x25d   : > { %16314 = vst [vmem:[#allocation283_spill] sm:$0xff] %v12633_v13  ;;  %v12637_v14 = vpop.f32.mrb[181].mxu0 }
 0x25e   : > { %16316 = vst [vmem:[#allocation285_spill] sm:$0xff] %v12637_v14  ;;  %v12642_v53 = vpop.f32.mrb[182].mxu0  ;;  %v12656_v14 = vpop.f32.mrb[120].mxu1 }
 0x25f   : > { %16317 = vst [vmem:[#allocation286_spill] sm:$0xff] %v12642_v53  ;;  %v12647_v5 = vpop.f32.mrb[183].mxu0  ;;  %16319 = vst [vmem:[#allocation288_spill] sm:$0xff] %v12656_v14  ;;  %v12661_v53 = vpop.f32.mrb[121].mxu1 }
 0x260   : > { %16318 = vst [vmem:[#allocation287_spill] sm:$0xff] %v12647_v5  ;;  %16320 = vst [vmem:[#allocation289_spill] sm:$0xff] %v12661_v53  ;;  %v12664_v5 = vpop.f32.mrb[122].mxu1 }
 0x261   : > { %3967 = vmatmul.mubr.bf16.vlgmr.msra.gmra.mrb[160].mxu1 %v12640_v29  ;;  %4480 = vmatmul.mubr.bf16.gmra.mrb[32].mxu0 %v12171_v25  ;;  %16321 = vst [vmem:[#allocation290_spill] sm:$0xff] %v12664_v5  ;;  %v12668_v25 = vpop.f32.mrb[123].mxu1  ;;  %v12700_v5 = vld [vmem:[%s10989_s23 + $0x48] ss:$16 sps:$4 sm:$0xff]  }
 0x262   : > { %8644 = vmatprep.mubr.msk.bf16.mxu1 %vm3484_vm2, %v12645_v7  ;;  %4489 = vmatprep.mubr.bf16.mxu0 %v12179_v35  ;;  %16323 = vst [vmem:[#allocation292_spill] sm:$0xff] %v12668_v25  ;;  %v12684_v53 = vpop.f32.mrb[124].mxu1 }
 0x263   : > { %16327 = vst [vmem:[#allocation296_spill] sm:$0xff] %v12684_v53  ;;  %v12705_v53 = vld [vmem:[%s10989_s23 + $0x6c] ss:$16 sps:$4 sm:$0xff]  }
 0x264   : > { %v12666_v13 = vpop.f32.mrb[184].mxu0 }
 0x265   : > { %16322 = vst [vmem:[#allocation291_spill] sm:$0xff] %v12666_v13  ;;  %v12670_v19 = vpop.f32.mrb[185].mxu0 }
 0x266   : > { %16324 = vst [vmem:[#allocation293_spill] sm:$0xff] %v12670_v19  ;;  %v12675_v14 = vpop.f32.mrb[186].mxu0  ;;  %v12689_v19 = vpop.f32.mrb[125].mxu1 }
 0x267   : > { %16325 = vst [vmem:[#allocation294_spill] sm:$0xff] %v12675_v14  ;;  %v12680_v35 = vpop.f32.mrb[187].mxu0  ;;  %16328 = vst [vmem:[#allocation297_spill] sm:$0xff] %v12689_v19  ;;  %v12691_v13 = vpop.f32.mrb[126].mxu1  ;;  %v12727_v19 = vld [vmem:[%s10989_s23 + $0x68] ss:$16 sps:$4 sm:$0xff]  }
 0x268   : > { %16326 = vst [vmem:[#allocation295_spill] sm:$0xff] %v12680_v35  ;;  %16329 = vst [vmem:[#allocation298_spill] sm:$0xff] %v12691_v13  ;;  %v12695_v25 = vpop.f32.mrb[127].mxu1 }
 0x269   : > { %3977 = vmatmul.mubr.bf16.gmra.mrb[164].mxu1 %v12673_v56  ;;  %4490 = vmatmul.mubr.bf16.gmra.mrb[36].mxu0 %v12210_v24  ;;  %16331 = vst [vmem:[#allocation300_spill] sm:$0xff] %v12695_v25 }
 0x26a   : > { %8645 = vmatprep.mubr.msk.bf16.mxu1 %vm3484_vm2, %v12678_v10  ;;  %4499 = vmatprep.mubr.bf16.mxu0 %v12215_v48  ;;  %v12711_v48 = vpop.f32.mrb[128].mxu1 }
 0x26b   : > { %16335 = vst [vmem:[#allocation304_spill] sm:$0xff] %v12711_v48  ;;  %v12732_v48 = vld [vmem:[%s10989_s23 + $0x8c] ss:$16 sps:$4 sm:$0xff]  }
 0x26c   : > { %v12693_v14 = vpop.f32.mrb[188].mxu0 }
 0x26d   : > { %16330 = vst [vmem:[#allocation299_spill] sm:$0xff] %v12693_v14  ;;  %v12697_v35 = vpop.f32.mrb[189].mxu0 }
 0x26e   : > { %16332 = vst [vmem:[#allocation301_spill] sm:$0xff] %v12697_v35  ;;  %v12702_v24 = vpop.f32.mrb[190].mxu0  ;;  %v12716_v35 = vpop.f32.mrb[129].mxu1 }
 0x26f   : > { %16333 = vst [vmem:[#allocation302_spill] sm:$0xff] %v12702_v24  ;;  %v12707_v55 = vpop.f32.mrb[191].mxu0  ;;  %16336 = vst [vmem:[#allocation305_spill] sm:$0xff] %v12716_v35  ;;  %v12718_v14 = vpop.f32.mrb[130].mxu1  ;;  %v12754_v35 = vld [vmem:[%s10989_s23 + $0x88] ss:$16 sps:$4 sm:$0xff]  }
 0x270   : > { %16334 = vst [vmem:[#allocation303_spill] sm:$0xff] %v12707_v55  ;;  %16337 = vst [vmem:[#allocation306_spill] sm:$0xff] %v12718_v14  ;;  %v12722_v25 = vpop.f32.mrb[131].mxu1  ;;  %v12759_v14 = vld [vmem:[%s10989_s23 + $0xac] ss:$16 sps:$4 sm:$0xff]  }
 0x271   : > { %3987 = vmatmul.mubr.bf16.gmra.mrb[168].mxu1 %v12700_v5  ;;  %4500 = vmatmul.mubr.bf16.gmra.mrb[40].mxu0 %v12248_v57  ;;  %16339 = vst [vmem:[#allocation308_spill] sm:$0xff] %v12722_v25 }
 0x272   : > { %8646 = vmatprep.mubr.msk.bf16.mxu1 %vm3484_vm2, %v12705_v53  ;;  %4509 = vmatprep.mubr.bf16.mxu0 %v12253_v26  ;;  %v12738_v26 = vpop.f32.mrb[132].mxu1 }
 0x273   : > { %16343 = vst [vmem:[#allocation312_spill] sm:$0xff] %v12738_v26 }
 0x274   : > { %v12720_v24 = vpop.f32.mrb[192].mxu0 }
 0x275   : > { %16338 = vst [vmem:[#allocation307_spill] sm:$0xff] %v12720_v24  ;;  %v12724_v55 = vpop.f32.mrb[193].mxu0 }
 0x276   : > { %16340 = vst [vmem:[#allocation309_spill] sm:$0xff] %v12724_v55  ;;  %v12729_v57 = vpop.f32.mrb[194].mxu0  ;;  %v12743_v55 = vpop.f32.mrb[133].mxu1 }
 0x277   : > { %16341 = vst [vmem:[#allocation310_spill] sm:$0xff] %v12729_v57  ;;  %v12734_v13 = vpop.f32.mrb[195].mxu0  ;;  %16344 = vst [vmem:[#allocation313_spill] sm:$0xff] %v12743_v55  ;;  %v12745_v24 = vpop.f32.mrb[134].mxu1  ;;  %v12781_v55 = vld [vmem:[%s10989_s23 + $0xa8] ss:$16 sps:$4 sm:$0xff]  }
 0x278   : > { %16342 = vst [vmem:[#allocation311_spill] sm:$0xff] %v12734_v13  ;;  %16345 = vst [vmem:[#allocation314_spill] sm:$0xff] %v12745_v24  ;;  %v12749_v25 = vpop.f32.mrb[135].mxu1 }
 0x279   : > { %3997 = vmatmul.mubr.bf16.gmra.mrb[172].mxu1 %v12727_v19  ;;  %4510 = vmatmul.mubr.bf16.gmra.mrb[44].mxu0 %v12283_v6  ;;  %16347 = vst [vmem:[#allocation316_spill] sm:$0xff] %v12749_v25 }
 0x27a   : > { %8647 = vmatprep.mubr.msk.bf16.mxu1 %vm3484_vm2, %v12732_v48  ;;  %4519 = vmatprep.mubr.bf16.mxu0 %v12288_v38  ;;  %v12765_v38 = vpop.f32.mrb[136].mxu1 }
 0x27b   : > { %16351 = vst [vmem:[#allocation320_spill] sm:$0xff] %v12765_v38  ;;  %v12786_v38 = vld [vmem:[%s10989_s23 + $0xcc] ss:$16 sps:$4 sm:$0xff]  }
 0x27c   : > { %v12747_v57 = vpop.f32.mrb[196].mxu0 }
 0x27d   : > { %16346 = vst [vmem:[#allocation315_spill] sm:$0xff] %v12747_v57  ;;  %v12751_v13 = vpop.f32.mrb[197].mxu0 }
 0x27e   : > { %16348 = vst [vmem:[#allocation317_spill] sm:$0xff] %v12751_v13  ;;  %v12756_v6 = vpop.f32.mrb[198].mxu0  ;;  %v12770_v13 = vpop.f32.mrb[137].mxu1 }
 0x27f   : > { %16349 = vst [vmem:[#allocation318_spill] sm:$0xff] %v12756_v6  ;;  %v12761_v26 = vpop.f32.mrb[199].mxu0  ;;  %16352 = vst [vmem:[#allocation321_spill] sm:$0xff] %v12770_v13  ;;  %v12772_v57 = vpop.f32.mrb[138].mxu1  ;;  %v12808_v13 = vld [vmem:[%s10989_s23 + $0xc8] ss:$16 sps:$4 sm:$0xff]  }
 0x280   : > { %16350 = vst [vmem:[#allocation319_spill] sm:$0xff] %v12761_v26  ;;  %16353 = vst [vmem:[#allocation322_spill] sm:$0xff] %v12772_v57  ;;  %v12776_v25 = vpop.f32.mrb[139].mxu1  ;;  %v12813_v57 = vld [vmem:[%s10989_s23 + $0xec] ss:$16 sps:$4 sm:$0xff]  }
 0x281   : > { %4007 = vmatmul.mubr.bf16.gmra.mrb[176].mxu1 %v12754_v35  ;;  %4520 = vmatmul.mubr.bf16.gmra.mrb[48].mxu0 %v12309_v8  ;;  %16355 = vst [vmem:[#allocation324_spill] sm:$0xff] %v12776_v25 }
 0x282   : > { %8648 = vmatprep.mubr.msk.bf16.mxu1 %vm3484_vm2, %v12759_v14  ;;  %4529 = vmatprep.mubr.bf16.mxu0 %v12314_v23  ;;  %v12792_v23 = vpop.f32.mrb[140].mxu1 }
 0x283   : > { %16359 = vst [vmem:[#allocation328_spill] sm:$0xff] %v12792_v23 }
 0x284   : > { %v12774_v6 = vpop.f32.mrb[200].mxu0 }
 0x285   : > { %16354 = vst [vmem:[#allocation323_spill] sm:$0xff] %v12774_v6  ;;  %v12778_v26 = vpop.f32.mrb[201].mxu0 }
 0x286   : > { %16356 = vst [vmem:[#allocation325_spill] sm:$0xff] %v12778_v26  ;;  %v12783_v8 = vpop.f32.mrb[202].mxu0  ;;  %v12797_v26 = vpop.f32.mrb[141].mxu1 }
 0x287   : > { %16357 = vst [vmem:[#allocation326_spill] sm:$0xff] %v12783_v8  ;;  %v12788_v24 = vpop.f32.mrb[203].mxu0  ;;  %16360 = vst [vmem:[#allocation329_spill] sm:$0xff] %v12797_v26  ;;  %v12799_v6 = vpop.f32.mrb[142].mxu1  ;;  %v12835_v26 = vld [vmem:[%s10989_s23 + $0xe8] ss:$16 sps:$4 sm:$0xff]  }
 0x288   : > { %16358 = vst [vmem:[#allocation327_spill] sm:$0xff] %v12788_v24  ;;  %16361 = vst [vmem:[#allocation330_spill] sm:$0xff] %v12799_v6  ;;  %v12803_v25 = vpop.f32.mrb[143].mxu1 }
 0x289   : > { %4017 = vmatmul.mubr.bf16.gmra.mrb[180].mxu1 %v12781_v55  ;;  %4530 = vmatmul.mubr.bf16.gmra.mrb[52].mxu0 %v12335_v30  ;;  %16363 = vst [vmem:[#allocation332_spill] sm:$0xff] %v12803_v25 }
 0x28a   : > { %8649 = vmatprep.mubr.msk.bf16.mxu1 %vm3484_vm2, %v12786_v38  ;;  %4539 = vmatprep.mubr.bf16.mxu0 %v12340_v44  ;;  %v12819_v44 = vpop.f32.mrb[144].mxu1 }
 0x28b   : > { %16367 = vst [vmem:[#allocation336_spill] sm:$0xff] %v12819_v44  ;;  %v12840_v44 = vld [vmem:[%s10989_s23 + $0x10c] ss:$16 sps:$4 sm:$0xff]  }
 0x28c   : > { %v12801_v8 = vpop.f32.mrb[204].mxu0 }
 0x28d   : > { %16362 = vst [vmem:[#allocation331_spill] sm:$0xff] %v12801_v8  ;;  %v12805_v24 = vpop.f32.mrb[205].mxu0 }
 0x28e   : > { %16364 = vst [vmem:[#allocation333_spill] sm:$0xff] %v12805_v24  ;;  %v12810_v30 = vpop.f32.mrb[206].mxu0  ;;  %v12824_v24 = vpop.f32.mrb[145].mxu1 }
 0x28f   : > { %16365 = vst [vmem:[#allocation334_spill] sm:$0xff] %v12810_v30  ;;  %v12815_v23 = vpop.f32.mrb[207].mxu0  ;;  %16368 = vst [vmem:[#allocation337_spill] sm:$0xff] %v12824_v24  ;;  %v12826_v8 = vpop.f32.mrb[146].mxu1  ;;  %v12862_v24 = vld [vmem:[%s10989_s23 + $0x108] ss:$16 sps:$4 sm:$0xff]  }
 0x290   : > { %16366 = vst [vmem:[#allocation335_spill] sm:$0xff] %v12815_v23  ;;  %16369 = vst [vmem:[#allocation338_spill] sm:$0xff] %v12826_v8  ;;  %v12830_v25 = vpop.f32.mrb[147].mxu1  ;;  %v12867_v8 = vld [vmem:[%s10989_s23 + $0x12c] ss:$16 sps:$4 sm:$0xff]  }
 0x291   : > { %4027 = vmatmul.mubr.bf16.gmra.mrb[184].mxu1 %v12808_v13  ;;  %4540 = vmatmul.mubr.bf16.gmra.mrb[56].mxu0 %v12357_v50  ;;  %16371 = vst [vmem:[#allocation340_spill] sm:$0xff] %v12830_v25 }
 0x292   : > { %8650 = vmatprep.mubr.msk.bf16.mxu1 %vm3484_vm2, %v12813_v57  ;;  %4549 = vmatprep.mubr.bf16.mxu0 %v12372_v39  ;;  %v12846_v39 = vpop.f32.mrb[148].mxu1 }
 0x293   : > { %16375 = vst [vmem:[#allocation344_spill] sm:$0xff] %v12846_v39 }
 0x294   : > { %v12828_v30 = vpop.f32.mrb[208].mxu0 }
 0x295   : > { %16370 = vst [vmem:[#allocation339_spill] sm:$0xff] %v12828_v30  ;;  %v12832_v23 = vpop.f32.mrb[209].mxu0 }
 0x296   : > { %16372 = vst [vmem:[#allocation341_spill] sm:$0xff] %v12832_v23  ;;  %v12837_v50 = vpop.f32.mrb[210].mxu0  ;;  %v12851_v23 = vpop.f32.mrb[149].mxu1 }
 0x297   : > { %16373 = vst [vmem:[#allocation342_spill] sm:$0xff] %v12837_v50  ;;  %v12842_v6 = vpop.f32.mrb[211].mxu0  ;;  %16376 = vst [vmem:[#allocation345_spill] sm:$0xff] %v12851_v23  ;;  %v12853_v30 = vpop.f32.mrb[150].mxu1  ;;  %v12889_v23 = vld [vmem:[%s10989_s23 + $0x128] ss:$16 sps:$4 sm:$0xff]  }
 0x298   : > { %16374 = vst [vmem:[#allocation343_spill] sm:$0xff] %v12842_v6  ;;  %16377 = vst [vmem:[#allocation346_spill] sm:$0xff] %v12853_v30  ;;  %v12857_v25 = vpop.f32.mrb[151].mxu1 }
 0x299   : > { %4037 = vmatmul.mubr.bf16.gmra.mrb[188].mxu1 %v12835_v26  ;;  %4550 = vmatmul.mubr.bf16.gmra.mrb[60].mxu0 %v12393_v54  ;;  %16379 = vst [vmem:[#allocation348_spill] sm:$0xff] %v12857_v25 }
 0x29a   : > { %8651 = vmatprep.mubr.msk.bf16.mxu1 %vm3484_vm2, %v12840_v44  ;;  %4559 = vmatprep.mubr.bf16.mxu0 %v12398_v12  ;;  %v12873_v12 = vpop.f32.mrb[152].mxu1 }
 0x29b   : > { %16383 = vst [vmem:[#allocation352_spill] sm:$0xff] %v12873_v12  ;;  %v12894_v12 = vld [vmem:[%s10989_s23 + $0x14c] ss:$16 sps:$4 sm:$0xff]  }
 0x29c   : > { %v12855_v50 = vpop.f32.mrb[212].mxu0 }
 0x29d   : > { %16378 = vst [vmem:[#allocation347_spill] sm:$0xff] %v12855_v50  ;;  %v12859_v6 = vpop.f32.mrb[213].mxu0 }
 0x29e   : > { %16380 = vst [vmem:[#allocation349_spill] sm:$0xff] %v12859_v6  ;;  %v12864_v54 = vpop.f32.mrb[214].mxu0  ;;  %v12878_v6 = vpop.f32.mrb[153].mxu1 }
 0x29f   : > { %16381 = vst [vmem:[#allocation350_spill] sm:$0xff] %v12864_v54  ;;  %v12869_v39 = vpop.f32.mrb[215].mxu0  ;;  %16384 = vst [vmem:[#allocation353_spill] sm:$0xff] %v12878_v6  ;;  %v12880_v50 = vpop.f32.mrb[154].mxu1 }
 0x2a0   : > { %16382 = vst [vmem:[#allocation351_spill] sm:$0xff] %v12869_v39  ;;  %16385 = vst [vmem:[#allocation354_spill] sm:$0xff] %v12880_v50  ;;  %v12884_v25 = vpop.f32.mrb[155].mxu1  ;;  %v12921_v50 = vld [vmem:[%s10989_s23 + $0x16c] ss:$16 sps:$4 sm:$0xff]  }
 0x2a1   : > { %4047 = vmatmul.mubr.bf16.gmra.mrb[192].mxu1 %v12862_v24  ;;  %4560 = vmatmul.mubr.bf16.gmra.mrb[64].mxu0 %v12419_v3  ;;  %16387 = vst [vmem:[#allocation356_spill] sm:$0xff] %v12884_v25 }
 0x2a2   : > { %8652 = vmatprep.mubr.msk.bf16.mxu1 %vm3484_vm2, %v12867_v8  ;;  %4569 = vmatprep.mubr.bf16.mxu0 %v12424_v58  ;;  %v12900_v58 = vpop.f32.mrb[156].mxu1 }
 0x2a3   : > { %16391 = vst [vmem:[#allocation360_spill] sm:$0xff] %v12900_v58 }
 0x2a4   : > { %v12882_v54 = vpop.f32.mrb[216].mxu0 }
 0x2a5   : > { %16386 = vst [vmem:[#allocation355_spill] sm:$0xff] %v12882_v54  ;;  %v12886_v39 = vpop.f32.mrb[217].mxu0 }
 0x2a6   : > { %16388 = vst [vmem:[#allocation357_spill] sm:$0xff] %v12886_v39  ;;  %v12891_v3 = vpop.f32.mrb[218].mxu0  ;;  %v12905_v39 = vpop.f32.mrb[157].mxu1 }
 0x2a7   : > { %16389 = vst [vmem:[#allocation358_spill] sm:$0xff] %v12891_v3  ;;  %v12896_v30 = vpop.f32.mrb[219].mxu0  ;;  %16392 = vst [vmem:[#allocation361_spill] sm:$0xff] %v12905_v39  ;;  %v12907_v3 = vpop.f32.mrb[158].mxu1 }
 0x2a8   : > { %16390 = vst [vmem:[#allocation359_spill] sm:$0xff] %v12896_v30  ;;  %16393 = vst [vmem:[#allocation362_spill] sm:$0xff] %v12907_v3  ;;  %v12911_v30 = vpop.f32.mrb[159].mxu1  ;;  %v13231_v3 = vld [vmem:[%s10989_s23 + $0x3ac] ss:$16 sps:$4 sm:$0xff]  }
 0x2a9   : > { %4057 = vmatmul.mubr.bf16.gmra.mrb[196].mxu1 %v12889_v23  ;;  %4570 = vmatmul.mubr.bf16.gmra.mrb[68].mxu0 %v12445_v34  ;;  %16395 = vst [vmem:[#allocation364_spill] sm:$0xff] %v12911_v30  ;;  %v12916_v34 = vld [vmem:[%s10989_s23 + $0x148] ss:$16 sps:$4 sm:$0xff]  }
 0x2aa   : > { %8653 = vmatprep.mubr.msk.bf16.mxu1 %vm3484_vm2, %v12894_v12  ;;  %4579 = vmatprep.mubr.bf16.mxu0 %v12450_v31  ;;  %v12931_v31 = vld [vmem:[%s10989_s23 + $0x168] ss:$16 sps:$4 sm:$0xff]  }
 0x2ab   : > { %v13226_v30 = vld [vmem:[%s10989_s23 + $0x388] ss:$16 sps:$4 sm:$0xff]  }
 0x2ac   : > { %v12909_v54 = vpop.f32.mrb[220].mxu0 }
 0x2ad   : > { %16394 = vst [vmem:[#allocation363_spill] sm:$0xff] %v12909_v54  ;;  %v12913_v25 = vpop.f32.mrb[221].mxu0  ;;  %v13052_v54 = vld [vmem:[%s10989_s23 + $0x228] ss:$16 sps:$4 sm:$0xff]  }
 0x2ae   : > { %16396 = vst [vmem:[#allocation365_spill] sm:$0xff] %v12913_v25  ;;  %v12918_v6 = vpop.f32.mrb[222].mxu0  ;;  %v12934_v25 = vld [vmem:[%s10989_s23 + $0x18c] ss:$16 sps:$4 sm:$0xff]  }
 0x2af   : > { %16397 = vst [vmem:[#allocation366_spill] sm:$0xff] %v12918_v6  ;;  %v12923_v58 = vpop.f32.mrb[223].mxu0  ;;  %v10567_v6 = vld [vmem:[%s15974_s5 + $0x10] ss:$20 sps:$4 sm:$0xff]  }
 0x2b0   : > { %16398 = vst [vmem:[#allocation367_spill] sm:$0xff] %v12923_v58  ;;  %4994 = vmatpush1.bf16.msra.mxu1 %v10567_v6  ;;  %v12952_v58 = vld [vmem:[%s10989_s23 + $0x1ac] ss:$16 sps:$4 sm:$0xff]   ;;  %v12968_v6 = vld [vmem:[%s10989_s23 + $0x1a8] ss:$16 sps:$4 sm:$0xff]  }
 0x2b1   : > { %4067 = vmatmul.mubr.bf16.gmra.mrb[200].mxu1 %v12916_v34  ;;  %4580 = vmatmul.mubr.bf16.gmra.mrb[72].mxu0 %v12477_v60  ;;  %v12949_v60 = vld [vmem:[%s10989_s23 + $0x188] ss:$16 sps:$4 sm:$0xff]  }
 0x2b2   : > { %8654 = vmatprep.mubr.msk.bf16.mxu1 %vm3484_vm2, %v12921_v50  ;;  %4589 = vmatprep.mubr.bf16.mxu0 %v12482_v49  ;;  %v10568_v49 = vld [vmem:[%s15974_s5 + $0x38] ss:$20 sps:$4 sm:$0xff]  }
 0x2b3   : > { %4995 = vmatprep.subr.bf16.mxu1 %v16070_v59 }
 0x2b4   : > { %4996 = vmatpush1.bf16.msra.mxu1 %v10568_v49  ;;  %v12971_v49 = vld [vmem:[%s10989_s23 + $0x1cc] ss:$16 sps:$4 sm:$0xff]  }
 0x2b5   : > { %4997 = vmatprep.subr.bf16.mxu1 %v16070_v59 }
 0x2b9   : > { %4077 = vmatmul.mubr.bf16.gmra.mrb[204].mxu1 %v12931_v31  ;;  %4590 = vmatmul.mubr.bf16.gmra.mrb[76].mxu0 %v12503_v20  ;;  %v10573_v20 = vld [vmem:[%s15974_s5 + $0x60] ss:$20 sps:$4 sm:$0xff]  }
 0x2ba   : > { %8655 = vmatprep.mubr.msk.bf16.mxu1 %vm3484_vm2, %v12934_v25  ;;  %4599 = vmatprep.mubr.bf16.mxu0 %v12508_v1  ;;  %v10574_v1 = vld [vmem:[%s15974_s5 + $0x88] ss:$20 sps:$4 sm:$0xff]  }
 0x2bb   : > { %4998 = vmatpush1.bf16.msra.mxu1 %v10573_v20  ;;  %v12987_v20 = vld [vmem:[%s10989_s23 + $0x1c8] ss:$16 sps:$4 sm:$0xff]  }
 0x2bc   : > { %4999 = vmatprep.subr.bf16.mxu1 %v16070_v59 }
 0x2bf   : > { %5000 = vmatpush1.bf16.msra.mxu1 %v10574_v1  ;;  %v12990_v1 = vld [vmem:[%s10989_s23 + $0x1ec] ss:$16 sps:$4 sm:$0xff]  }
 0x2c0   : > { %5001 = vmatprep.subr.bf16.mxu1 %v16070_v59 }
 0x2c1   : > { %4087 = vmatmul.mubr.bf16.gmra.mrb[208].mxu1 %v12949_v60  ;;  %4600 = vmatmul.mubr.bf16.gmra.mrb[80].mxu0 %v12529_v52  ;;  %v10578_v52 = vld [vmem:[%s15974_s5 + $0xb0] ss:$20 sps:$4 sm:$0xff]  }
 0x2c2   : > { %8656 = vmatprep.mubr.msk.bf16.mxu1 %vm3484_vm2, %v12952_v58  ;;  %4609 = vmatprep.mubr.bf16.mxu0 %v12534_v11  ;;  %v10579_v11 = vld [vmem:[%s15974_s5 + $0xd8] ss:$20 sps:$4 sm:$0xff]  }
 0x2c3   : > { %5002 = vmatpush1.bf16.msra.mxu1 %v10578_v52  ;;  %v13006_v52 = vld [vmem:[%s10989_s23 + $0x1e8] ss:$16 sps:$4 sm:$0xff]  }
 0x2c4   : > { %5003 = vmatprep.subr.bf16.mxu1 %v16070_v59 }
 0x2c7   : > { %5004 = vmatpush1.bf16.msra.mxu1 %v10579_v11  ;;  %v13009_v11 = vld [vmem:[%s10989_s23 + $0x20c] ss:$16 sps:$4 sm:$0xff]  }
 0x2c8   : > { %5005 = vmatprep.subr.bf16.mxu1 %v16070_v59 }
 0x2c9   : > { %4097 = vmatmul.mubr.bf16.gmra.mrb[212].mxu1 %v12968_v6  ;;  %4610 = vmatmul.mubr.bf16.gmra.mrb[84].mxu0 %v12561_v63  ;;  %v10583_v63 = vld [vmem:[%s15974_s5 + $0x100] ss:$20 sps:$4 sm:$0xff]  }
 0x2ca   : > { %8657 = vmatprep.mubr.msk.bf16.mxu1 %vm3484_vm2, %v12971_v49  ;;  %4619 = vmatprep.mubr.bf16.mxu0 %v12566_v15  ;;  %v10584_v15 = vld [vmem:[%s15974_s5 + $0x128] ss:$20 sps:$4 sm:$0xff]  }
 0x2cb   : > { %5006 = vmatpush1.bf16.msra.mxu1 %v10583_v63  ;;  %v13026_v63 = vld [vmem:[%s10989_s23 + $0x208] ss:$16 sps:$4 sm:$0xff]  }
 0x2cc   : > { %5007 = vmatprep.subr.bf16.mxu1 %v16070_v59 }
 0x2cf   : > { %5008 = vmatpush1.bf16.msra.mxu1 %v10584_v15  ;;  %v13029_v15 = vld [vmem:[%s10989_s23 + $0x22c] ss:$16 sps:$4 sm:$0xff]  }
 0x2d0   : > { %5009 = vmatprep.subr.bf16.mxu1 %v16070_v59 }
 0x2d1   : > { %4107 = vmatmul.mubr.bf16.gmra.mrb[216].mxu1 %v12987_v20  ;;  %4620 = vmatmul.mubr.bf16.gmra.mrb[88].mxu0 %v12587_v46  ;;  %v10588_v46 = vld [vmem:[%s15974_s5 + $0x150] ss:$20 sps:$4 sm:$0xff]  }
 0x2d2   : > { %8658 = vmatprep.mubr.msk.bf16.mxu1 %vm3484_vm2, %v12990_v1  ;;  %4629 = vmatprep.mubr.bf16.mxu0 %v12592_v36  ;;  %v10589_v36 = vld [vmem:[%s15974_s5 + $0x178] ss:$20 sps:$4 sm:$0xff]  }
 0x2d3   : > { %5010 = vmatpush1.bf16.msra.mxu1 %v10588_v46  ;;  %v10557_v46 = vld [vmem:[%s15973_s4 + $0x10] sm:$0xff]  }
 0x2d4   : > { %5011 = vmatprep.subr.bf16.mxu1 %v16070_v59 }
 0x2d7   : > { %5012 = vmatpush1.bf16.msra.mxu1 %v10589_v36  ;;  %v10592_v36 = vld [vmem:[%s15974_s5 + $0x1c8] ss:$20 sps:$4 sm:$0xff]  }
 0x2d8   : > { %5013 = vmatprep.subr.bf16.mxu1 %v16070_v59 }
 0x2d9   : > { %4117 = vmatmul.mubr.bf16.gmra.mrb[220].mxu1 %v13006_v52  ;;  %4630 = vmatmul.mubr.bf16.gmra.mrb[92].mxu0 %v12613_v22  ;;  %v10544_v22 = vld [vmem:[%s15973_s4 + $0x8] sm:$0xff]  }
 0x2da   : > { %8659 = vmatprep.mubr.msk.bf16.mxu1 %vm3484_vm2, %v13009_v11  ;;  %8675 = vmatprep.mubr.msk.bf16.mxu0 %vm3484_vm2, %v12618_v9  ;;  %v10591_v9 = vld [vmem:[%s15974_s5 + $0x1a0] ss:$20 sps:$4 sm:$0xff]  }
 0x2db   : > { %5014 = vmatpush1.bf16.msra.mxu1 %v10591_v9  ;;  %v10594_v9 = vld [vmem:[%s15974_s5 + $0x218] ss:$20 sps:$4 sm:$0xff]  }
 0x2dc   : > { %5015 = vmatprep.subr.bf16.mxu1 %v16070_v59 }
 0x2df   : > { %5016 = vmatpush1.bf16.msra.mxu1 %v10592_v36  ;;  %v10596_v36 = vld [vmem:[%s15974_s5 + $0x268] ss:$20 sps:$4 sm:$0xff]  }
 0x2e0   : > { %5017 = vmatprep.subr.bf16.mxu1 %v16070_v59 }
 0x2e1   : > { %4127 = vmatmul.mubr.bf16.gmra.mrb[224].mxu1 %v13026_v63  ;;  %4673 = vmatmul.mubr.bf16.vlgmr.msra.gmra.mrb[224].mxu0 %v12640_v29  ;;  %v13056_v29 = vld [vmem:[%s10989_s23 + $0x24c] ss:$16 sps:$4 sm:$0xff]  }
 0x2e2   : > { %9049 = vmatpush3.bf16.msra.mxu0 %v12654_v43  ;;  %8660 = vmatprep.mubr.msk.bf16.mxu1 %vm3484_vm2, %v13029_v15  ;;  %v10593_v43 = vld [vmem:[%s15974_s5 + $0x1f0] ss:$20 sps:$4 sm:$0xff]  }
 0x2e3   : > { %8676 = vmatprep.mubr.msk.bf16.mxu0 %vm3484_vm2, %v12645_v7  ;;  %9050 = vmatprep.subr.bf16.mxu0 %v10544_v22  ;;  %v10572_v7 = vld [vmem:[%s15973_s4 + $0x18] sm:$0xff]  }
 0x2e4   : > { %5018 = vmatpush1.bf16.msra.mxu1 %v10593_v43  ;;  %v13115_v43 = vld [vmem:[%s10989_s23 + $0x2ac] ss:$16 sps:$4 sm:$0xff]  }
 0x2e5   : > { %5019 = vmatprep.subr.bf16.mxu1 %v16070_v59 }
 0x2e6   : > { %9051 = vmatpush3.bf16.msra.mxu0 %v10544_v22  ;;  %v10590_v22 = vld [vmem:[%s15973_s4 + $0x20] sm:$0xff]  }
 0x2e7   : > { %9052 = vmatprep.subr.bf16.mxu0 %v10557_v46 }
 0x2e8   : > { %5020 = vmatpush1.bf16.msra.mxu1 %v10594_v9  ;;  %v13154_v9 = vld [vmem:[%s10989_s23 + $0x30c] ss:$16 sps:$4 sm:$0xff]  }
 0x2e9   : > { %4137 = vmatmul.mubr.bf16.gmra.mrb[228].mxu1 %v13052_v54  ;;  %4683 = vmatmul.mubr.bf16.gmra.mrb[228].mxu0 %v12673_v56  ;;  %v13078_v56 = vld [vmem:[%s10989_s23 + $0x248] ss:$16 sps:$4 sm:$0xff]  }
 0x2ea   : > { %8661 = vmatprep.mubr.msk.bf16.mxu1 %vm3484_vm2, %v13056_v29  ;;  %8677 = vmatprep.mubr.msk.bf16.mxu0 %vm3484_vm2, %v12678_v10  ;;  %v13082_v10 = vld [vmem:[%s10989_s23 + $0x26c] ss:$16 sps:$4 sm:$0xff]  }
 0x2eb   : > { %9053 = vmatpush3.bf16.msra.mxu0 %v10557_v46  ;;  %v10595_v46 = vld [vmem:[%s15974_s5 + $0x240] ss:$20 sps:$4 sm:$0xff]   ;;  %5021 = vmatprep.subr.bf16.mxu1 %v16070_v59 }
 0x2ec   : > { %9054 = vmatprep.subr.bf16.mxu0 %v10572_v7  ;;  %5022 = vmatpush1.bf16.msra.mxu1 %v10595_v46 }
 0x2ed   : > { %5023 = vmatprep.subr.bf16.mxu1 %v16070_v59 }
 0x2ef   : > { %9055 = vmatpush3.bf16.msra.mxu0 %v10572_v7  ;;  %v13098_v7 = vld [vmem:[%s10989_s23 + $0x268] ss:$16 sps:$4 sm:$0xff]  }
 0x2f0   : > { %9056 = vmatprep.subr.bf16.mxu0 %v10590_v22  ;;  %5024 = vmatpush1.bf16.msra.mxu1 %v10596_v36 }
 0x2f1   : > { %4147 = vmatmul.mubr.bf16.gmra.mrb[232].mxu1 %v13078_v56  ;;  %4693 = vmatmul.mubr.bf16.gmra.mrb[232].mxu0 %v12700_v5  ;;  %v13102_v5 = vld [vmem:[%s10989_s23 + $0x28c] ss:$16 sps:$4 sm:$0xff]  }
 0x2f2   : > { %8662 = vmatprep.mubr.msk.bf16.mxu1 %vm3484_vm2, %v13082_v10  ;;  %8678 = vmatprep.mubr.msk.bf16.mxu0 %vm3484_vm2, %v12705_v53  ;;  %v13112_v53 = vld [vmem:[%s10989_s23 + $0x288] ss:$16 sps:$4 sm:$0xff]  }
 0x2f3   : > { %9057 = vmatpush3.bf16.msra.mxu0 %v10590_v22  ;;  %5282 = vmatprep.subr.bf16.mxu1 %v16070_v59  ;;  %v13130_v22 = vld [vmem:[%s10989_s23 + $0x2cc] ss:$16 sps:$4 sm:$0xff]  }
 0x2f9   : > { %4157 = vmatmul.mubr.bf16.gmra.mrb[236].mxu1 %v13098_v7  ;;  %4703 = vmatmul.mubr.bf16.gmra.mrb[236].mxu0 %v12727_v19  ;;  %v10597_v19 = vld [vmem:[%s15973_s4 + $0x28] sm:$0xff]  }
 0x2fa   : > { %8663 = vmatprep.mubr.msk.bf16.mxu1 %vm3484_vm2, %v13102_v5  ;;  %8679 = vmatprep.mubr.msk.bf16.mxu0 %vm3484_vm2, %v12732_v48  ;;  %v13127_v48 = vld [vmem:[%s10989_s23 + $0x2a8] ss:$16 sps:$4 sm:$0xff]  }
 0x2fb   : > { %9058 = vmatprep.subr.bf16.mxu0 %v10597_v19 }
 0x2fc   : > { %9059 = vmatpush3.bf16.msra.mxu0 %v10597_v19  ;;  %v13211_v19 = vld [vmem:[%s10989_s23 + $0x38c] ss:$16 sps:$4 sm:$0xff]  }
 0x301   : > { %4167 = vmatmul.mubr.bf16.gmra.mrb[240].mxu1 %v13112_v53  ;;  %4713 = vmatmul.mubr.bf16.gmra.mrb[240].mxu0 %v12754_v35  ;;  %v13142_v35 = vld [vmem:[%s10989_s23 + $0x2ec] ss:$16 sps:$4 sm:$0xff]  }
 0x302   : > { %8664 = vmatprep.mubr.msk.bf16.mxu1 %vm3484_vm2, %v13115_v43  ;;  %8680 = vmatprep.mubr.msk.bf16.mxu0 %vm3484_vm2, %v12759_v14  ;;  %v13139_v14 = vld [vmem:[%s10989_s23 + $0x2c8] ss:$16 sps:$4 sm:$0xff]  }
 0x309   : > { %4177 = vmatmul.mubr.bf16.gmra.mrb[244].mxu1 %v13127_v48  ;;  %4723 = vmatmul.mubr.bf16.gmra.mrb[244].mxu0 %v12781_v55  ;;  %v13151_v55 = vld [vmem:[%s10989_s23 + $0x2e8] ss:$16 sps:$4 sm:$0xff]  }
 0x30a   : > { %8665 = vmatprep.mubr.msk.bf16.mxu1 %vm3484_vm2, %v13130_v22  ;;  %8681 = vmatprep.mubr.msk.bf16.mxu0 %vm3484_vm2, %v12786_v38  ;;  %v13178_v38 = vld [vmem:[%s10989_s23 + $0x328] ss:$16 sps:$4 sm:$0xff]  }
 0x311   : > { %4187 = vmatmul.mubr.bf16.gmra.mrb[248].mxu1 %v13139_v14  ;;  %4733 = vmatmul.mubr.bf16.gmra.mrb[248].mxu0 %v12808_v13  ;;  %v13163_v13 = vld [vmem:[%s10989_s23 + $0x308] ss:$16 sps:$4 sm:$0xff]  }
 0x312   : > { %8666 = vmatprep.mubr.msk.bf16.mxu1 %vm3484_vm2, %v13142_v35  ;;  %8682 = vmatprep.mubr.msk.bf16.mxu0 %vm3484_vm2, %v12813_v57  ;;  %v13166_v57 = vld [vmem:[%s10989_s23 + $0x32c] ss:$16 sps:$4 sm:$0xff]  }
 0x319   : > { %4197 = vmatmul.mubr.bf16.gmra.mrb[252].mxu1 %v13151_v55  ;;  %4743 = vmatmul.mubr.bf16.gmra.mrb[252].mxu0 %v12835_v26  ;;  %v10598_v26 = vld [vmem:[%s15973_s4 + $0x30] sm:$0xff]  }
 0x31a   : > { %8667 = vmatprep.mubr.msk.bf16.mxu1 %vm3484_vm2, %v13154_v9  ;;  %8683 = vmatprep.mubr.msk.bf16.mxu0 %vm3484_vm2, %v12840_v44  ;;  %v13181_v44 = vld [vmem:[%s10989_s23 + $0x34c] ss:$16 sps:$4 sm:$0xff]  }
 0x31b   : > { %9060 = vmatprep.subr.bf16.mxu0 %v10598_v26 }
 0x31c   : > { %9061 = vmatpush3.bf16.msra.mxu0 %v10598_v26 }
 0x321   : > { %4207 = vmatmul.mubr.bf16.gmra.mrb[0].mxu1 %v13163_v13  ;;  %4753 = vmatmul.mubr.bf16.gmra.mrb[0].mxu0 %v12862_v24  ;;  %v13190_v24 = vld [vmem:[%s10989_s23 + $0x348] ss:$16 sps:$4 sm:$0xff]  }
 0x322   : > { %8668 = vmatprep.mubr.msk.bf16.mxu1 %vm3484_vm2, %v13166_v57  ;;  %8684 = vmatprep.mubr.msk.bf16.mxu0 %vm3484_vm2, %v12867_v8  ;;  %v13193_v8 = vld [vmem:[%s10989_s23 + $0x36c] ss:$16 sps:$4 sm:$0xff]  }
 0x329   : > { %4217 = vmatmul.mubr.bf16.gmra.mrb[4].mxu1 %v13178_v38  ;;  %4763 = vmatmul.mubr.bf16.gmra.mrb[4].mxu0 %v12889_v23 }
 0x32a   : > { %8669 = vmatprep.mubr.msk.bf16.mxu1 %vm3484_vm2, %v13181_v44  ;;  %8685 = vmatprep.mubr.msk.bf16.mxu0 %vm3484_vm2, %v12894_v12  ;;  %v13206_v12 = vld [vmem:[%s10989_s23 + $0x368] ss:$16 sps:$4 sm:$0xff]  }
 0x331   : > { %4227 = vmatmul.mubr.bf16.gmra.mrb[8].mxu1 %v13190_v24  ;;  %4773 = vmatmul.mubr.bf16.gmra.mrb[8].mxu0 %v12916_v34 }
 0x332   : > { %8670 = vmatprep.mubr.msk.bf16.mxu1 %vm3484_vm2, %v13193_v8  ;;  %8686 = vmatprep.mubr.msk.bf16.mxu0 %vm3484_vm2, %v12921_v50 }
 0x334   : > { %v13201_v23 = vpop.f32.mrb[160].mxu1 }
 0x335   : > { %v13203_v46 = vpop.f32.mrb[161].mxu1 }
 0x336   : > { %16399 = vst [vmem:[#allocation368_spill] sm:$0xff] %v13203_v46  ;;  %v13208_v36 = vpop.f32.mrb[162].mxu1  ;;  %v13249_v46 = vld [vmem:[%s10989_s23 + $0x3a8] ss:$16 sps:$4 sm:$0xff]  }
 0x337   : > { %16400 = vst [vmem:[#allocation369_spill] sm:$0xff] %v13208_v36  ;;  %v13213_v26 = vpop.f32.mrb[163].mxu1 }
 0x338   : > { %16401 = vst [vmem:[#allocation370_spill] sm:$0xff] %v13213_v26 }
 0x339   : > { %4237 = vmatmul.mubr.bf16.gmra.mrb[12].mxu1 %v13206_v12  ;;  %4783 = vmatmul.mubr.bf16.gmra.mrb[12].mxu0 %v12931_v31 }
 0x33a   : > { %8671 = vmatprep.mubr.msk.bf16.mxu1 %vm3484_vm2, %v13211_v19  ;;  %8687 = vmatprep.mubr.msk.bf16.mxu0 %vm3484_vm2, %v12934_v25  ;;  %v10599_v25 = vld [vmem:[%s15973_s4 + $0x38] sm:$0xff]  }
 0x33b   : > { %9062 = vmatprep.subr.bf16.mxu0 %v10599_v25 }
 0x33c   : > { %v13221_v50 = vpop.f32.mrb[164].mxu1  ;;  %9063 = vmatpush3.bf16.msra.mxu0 %v10599_v25 }
 0x33d   : > { %v13223_v34 = vpop.f32.mrb[165].mxu1 }
 0x33e   : > { %16402 = vst [vmem:[#allocation371_spill] sm:$0xff] %v13223_v34  ;;  %v13228_v39 = vpop.f32.mrb[166].mxu1  ;;  %v13254_v34 = vld [vmem:[%s10989_s23 + $0x3cc] ss:$16 sps:$4 sm:$0xff]  }
 0x33f   : > { %v13233_v26 = vpop.f32.mrb[167].mxu1 }
 0x340   : > { %16403 = vst [vmem:[#allocation372_spill] sm:$0xff] %v13233_v26 }
 0x341   : > { %4247 = vmatmul.mubr.bf16.gmra.mrb[16].mxu1 %v13226_v30  ;;  %4793 = vmatmul.mubr.bf16.gmra.mrb[16].mxu0 %v12949_v60 }
 0x342   : > { %8672 = vmatprep.mubr.msk.bf16.mxu1 %vm3484_vm2, %v13231_v3  ;;  %8688 = vmatprep.mubr.msk.bf16.mxu0 %vm3484_vm2, %v12952_v58 }
 0x344   : > { %v13244_v31 = vpop.f32.mrb[168].mxu1 }
 0x345   : > { %16404 = vst [vmem:[#allocation373_spill] sm:$0xff] %v13244_v31  ;;  %v13246_v26 = vpop.f32.mrb[169].mxu1 }
 0x346   : > { %16405 = vst [vmem:[#allocation374_spill] sm:$0xff] %v13246_v26  ;;  %v13251_v60 = vpop.f32.mrb[170].mxu1  ;;  %v13269_v26 = vld [vmem:[%s10989_s23 + $0x3c8] ss:$16 sps:$4 sm:$0xff]  }
 0x347   : > { %16406 = vst [vmem:[#allocation375_spill] sm:$0xff] %v13251_v60  ;;  %v13256_v36 = vpop.f32.mrb[171].mxu1 }
 0x348   : > { %16407 = vst [vmem:[#allocation376_spill] sm:$0xff] %v13256_v36  ;;  %v13274_v36 = vld [vmem:[%s10989_s23 + $0x3ec] ss:$16 sps:$4 sm:$0xff]  }
 0x349   : > { %4257 = vmatmul.mubr.bf16.gmra.mrb[20].mxu1 %v13249_v46  ;;  %4803 = vmatmul.mubr.bf16.gmra.mrb[20].mxu0 %v12968_v6 }
 0x34a   : > { %8673 = vmatprep.mubr.msk.bf16.mxu1 %vm3484_vm2, %v13254_v34  ;;  %8689 = vmatprep.mubr.msk.bf16.mxu0 %vm3484_vm2, %v12971_v49 }
 0x34c   : > { %v13264_v58 = vpop.f32.mrb[172].mxu1 }
 0x34d   : > { %v13266_v25 = vpop.f32.mrb[173].mxu1 }
 0x34e   : > { %16408 = vst [vmem:[#allocation377_spill] sm:$0xff] %v13266_v25  ;;  %v13271_v60 = vpop.f32.mrb[174].mxu1  ;;  %v13289_v25 = vld [vmem:[%s10989_s23 + $0x3e8] ss:$16 sps:$4 sm:$0xff]  }
 0x34f   : > { %16409 = vst [vmem:[#allocation378_spill] sm:$0xff] %v13271_v60  ;;  %v13276_v31 = vpop.f32.mrb[175].mxu1 }
 0x350   : > { %16410 = vst [vmem:[#allocation379_spill] sm:$0xff] %v13276_v31 }
 0x351   : > { %4267 = vmatmul.mubr.bf16.gmra.mrb[24].mxu1 %v13269_v26  ;;  %4813 = vmatmul.mubr.bf16.gmra.mrb[24].mxu0 %v12987_v20  ;;  %v10659_v20 = vld [vmem:[%s10989_s23 + $0x4] ss:$16 sps:$4 sm:$0xff]  }
 0x352   : > { %8674 = vmatprep.mubr.msk.bf16.mxu1 %vm3484_vm2, %v13274_v36  ;;  %8690 = vmatprep.mubr.msk.bf16.mxu0 %vm3484_vm2, %v12990_v1 }
 0x354   : > { %v13284_v6 = vpop.f32.mrb[176].mxu1 }
 0x355   : > { %16411 = vst [vmem:[#allocation380_spill] sm:$0xff] %v13284_v6  ;;  %v13286_v49 = vpop.f32.mrb[177].mxu1 }
 0x356   : > { %16412 = vst [vmem:[#allocation381_spill] sm:$0xff] %v13286_v49  ;;  %v13291_v60 = vpop.f32.mrb[178].mxu1 }
 0x357   : > { %16413 = vst [vmem:[#allocation382_spill] sm:$0xff] %v13291_v60  ;;  %v13293_v31 = vpop.f32.mrb[179].mxu1 }
 0x358   : > { %16414 = vst [vmem:[#allocation383_spill] sm:$0xff] %v13293_v31  ;;  %v10660_v31 = vld [vmem:[%s10989_s23] ss:$16 sps:$4 sm:$0xff]  }
 0x359   : > { %4277 = vmatmul.mubr.bf16.gmra.mrb[28].mxu1 %v13289_v25  ;;  %4823 = vmatmul.mubr.bf16.gmra.mrb[28].mxu0 %v13006_v52  ;;  %v10661_v52 = vld [vmem:[%s10989_s23 + $0x24] ss:$16 sps:$4 sm:$0xff]  }
 0x35a   : > { %8691 = vmatprep.mubr.msk.bf16.mxu0 %vm3484_vm2, %v13009_v11  ;;  %5025 = vmatprep.mubr.bf16.mxu1 %v10659_v20 }
 0x35c   : > { %v13300_v1 = vpop.f32.mrb[180].mxu1 }
 0x35d   : > { %v13302_v49 = vpop.f32.mrb[181].mxu1 }
 0x35e   : > { %16415 = vst [vmem:[#allocation384_spill] sm:$0xff] %v13302_v49  ;;  %v13304_v6 = vpop.f32.mrb[182].mxu1 }
 0x35f   : > { %16416 = vst [vmem:[#allocation385_spill] sm:$0xff] %v13304_v6  ;;  %v13306_v60 = vpop.f32.mrb[183].mxu1 }
 0x360   : > { %16417 = vst [vmem:[#allocation386_spill] sm:$0xff] %v13306_v60 }
 0x361   : > { %4833 = vmatmul.mubr.bf16.gmra.mrb[32].mxu0 %v13026_v63  ;;  %5026 = vmatmul.mubr.bf16.vlgmr.msra.gmra.mrb[32].mxu1 %v10660_v31  ;;  %v10662_v63 = vld [vmem:[%s10989_s23 + $0x20] ss:$16 sps:$4 sm:$0xff]  }
 0x362   : > { %8692 = vmatprep.mubr.msk.bf16.mxu0 %vm3484_vm2, %v13029_v15  ;;  %5033 = vmatprep.mubr.bf16.mxu1 %v10661_v52  ;;  %v10663_v15 = vld [vmem:[%s10989_s23 + $0x44] ss:$16 sps:$4 sm:$0xff]  }
 0x364   : > { %v13313_v11 = vpop.f32.mrb[184].mxu1 }
 0x365   : > { %v13315_v20 = vpop.f32.mrb[185].mxu1 }
 0x366   : > { %16418 = vst [vmem:[#allocation387_spill] sm:$0xff] %v13315_v20  ;;  %v13317_v49 = vpop.f32.mrb[186].mxu1 }
 0x367   : > { %v13319_v6 = vpop.f32.mrb[187].mxu1 }
 0x368   : > { %16419 = vst [vmem:[#allocation388_spill] sm:$0xff] %v13319_v6 }
 0x369   : > { %4843 = vmatmul.mubr.bf16.gmra.mrb[36].mxu0 %v13052_v54  ;;  %5034 = vmatmul.mubr.bf16.gmra.mrb[36].mxu1 %v10662_v63  ;;  %v10664_v54 = vld [vmem:[%s10989_s23 + $0x40] ss:$16 sps:$4 sm:$0xff]  }
 0x36a   : > { %8693 = vmatprep.mubr.msk.bf16.mxu0 %vm3484_vm2, %v13056_v29  ;;  %5041 = vmatprep.mubr.bf16.mxu1 %v10663_v15  ;;  %v10665_v29 = vld [vmem:[%s10989_s23 + $0x64] ss:$16 sps:$4 sm:$0xff]  }
 0x36c   : > { %v13326_v31 = vpop.f32.mrb[188].mxu1 }
 0x36d   : > { %v13328_v52 = vpop.f32.mrb[189].mxu1 }
 0x36e   : > { %16420 = vst [vmem:[#allocation389_spill] sm:$0xff] %v13328_v52  ;;  %v13330_v20 = vpop.f32.mrb[190].mxu1 }
 0x36f   : > { %v13332_v60 = vpop.f32.mrb[191].mxu1 }
 0x370   : > { %16421 = vst [vmem:[#allocation390_spill] sm:$0xff] %v13332_v60 }
 0x371   : > { %4853 = vmatmul.mubr.bf16.gmra.mrb[40].mxu0 %v13078_v56  ;;  %5042 = vmatmul.mubr.bf16.gmra.mrb[40].mxu1 %v10664_v54  ;;  %v10666_v56 = vld [vmem:[%s10989_s23 + $0x60] ss:$16 sps:$4 sm:$0xff]  }
 0x372   : > { %8694 = vmatprep.mubr.msk.bf16.mxu0 %vm3484_vm2, %v13082_v10  ;;  %5049 = vmatprep.mubr.bf16.mxu1 %v10665_v29  ;;  %v10667_v10 = vld [vmem:[%s10989_s23 + $0x84] ss:$16 sps:$4 sm:$0xff]  }
 0x374   : > { %v13339_v63 = vpop.f32.mrb[192].mxu1 }
 0x375   : > { %v13341_v15 = vpop.f32.mrb[193].mxu1 }
 0x376   : > { %16422 = vst [vmem:[#allocation391_spill] sm:$0xff] %v13341_v15  ;;  %v13343_v6 = vpop.f32.mrb[194].mxu1 }
 0x377   : > { %v13345_v52 = vpop.f32.mrb[195].mxu1 }
 0x378   : > { %16423 = vst [vmem:[#allocation392_spill] sm:$0xff] %v13345_v52 }
 0x379   : > { %4863 = vmatmul.mubr.bf16.gmra.mrb[44].mxu0 %v13098_v7  ;;  %5050 = vmatmul.mubr.bf16.gmra.mrb[44].mxu1 %v10666_v56  ;;  %v10668_v7 = vld [vmem:[%s10989_s23 + $0x80] ss:$16 sps:$4 sm:$0xff]  }
 0x37a   : > { %8695 = vmatprep.mubr.msk.bf16.mxu0 %vm3484_vm2, %v13102_v5  ;;  %5057 = vmatprep.mubr.bf16.mxu1 %v10667_v10  ;;  %v10669_v5 = vld [vmem:[%s10989_s23 + $0xa4] ss:$16 sps:$4 sm:$0xff]  }
 0x37c   : > { %v13352_v54 = vpop.f32.mrb[196].mxu1 }
 0x37d   : > { %v13354_v29 = vpop.f32.mrb[197].mxu1 }
 0x37e   : > { %16424 = vst [vmem:[#allocation393_spill] sm:$0xff] %v13354_v29  ;;  %v13356_v15 = vpop.f32.mrb[198].mxu1 }
 0x37f   : > { %v13358_v60 = vpop.f32.mrb[199].mxu1 }
 0x380   : > { %16425 = vst [vmem:[#allocation394_spill] sm:$0xff] %v13358_v60 }
 0x381   : > { %4873 = vmatmul.mubr.bf16.gmra.mrb[48].mxu0 %v13112_v53  ;;  %5058 = vmatmul.mubr.bf16.gmra.mrb[48].mxu1 %v10668_v7  ;;  %v10670_v53 = vld [vmem:[%s10989_s23 + $0xa0] ss:$16 sps:$4 sm:$0xff]  }
 0x382   : > { %8696 = vmatprep.mubr.msk.bf16.mxu0 %vm3484_vm2, %v13115_v43  ;;  %5065 = vmatprep.mubr.bf16.mxu1 %v10669_v5  ;;  %v10671_v43 = vld [vmem:[%s10989_s23 + $0xc4] ss:$16 sps:$4 sm:$0xff]  }
 0x384   : > { %v13365_v56 = vpop.f32.mrb[200].mxu1 }
 0x385   : > { %v13367_v10 = vpop.f32.mrb[201].mxu1 }
 0x386   : > { %16426 = vst [vmem:[#allocation395_spill] sm:$0xff] %v13367_v10  ;;  %v13369_v52 = vpop.f32.mrb[202].mxu1 }
 0x387   : > { %v13371_v29 = vpop.f32.mrb[203].mxu1 }
 0x388   : > { %16427 = vst [vmem:[#allocation396_spill] sm:$0xff] %v13371_v29 }
 0x389   : > { %4883 = vmatmul.mubr.bf16.gmra.mrb[52].mxu0 %v13127_v48  ;;  %5066 = vmatmul.mubr.bf16.gmra.mrb[52].mxu1 %v10670_v53  ;;  %v10672_v48 = vld [vmem:[%s10989_s23 + $0xc0] ss:$16 sps:$4 sm:$0xff]  }
 0x38a   : > { %8697 = vmatprep.mubr.msk.bf16.mxu0 %vm3484_vm2, %v13130_v22  ;;  %5073 = vmatprep.mubr.bf16.mxu1 %v10671_v43  ;;  %v10673_v22 = vld [vmem:[%s10989_s23 + $0xe4] ss:$16 sps:$4 sm:$0xff]  }
 0x38c   : > { %v13378_v7 = vpop.f32.mrb[204].mxu1 }
 0x38d   : > { %v13380_v5 = vpop.f32.mrb[205].mxu1 }
 0x38e   : > { %16428 = vst [vmem:[#allocation397_spill] sm:$0xff] %v13380_v5  ;;  %v13382_v10 = vpop.f32.mrb[206].mxu1 }
 0x38f   : > { %v13384_v60 = vpop.f32.mrb[207].mxu1 }
 0x390   : > { %16429 = vst [vmem:[#allocation398_spill] sm:$0xff] %v13384_v60 }
 0x391   : > { %4893 = vmatmul.mubr.bf16.gmra.mrb[56].mxu0 %v13139_v14  ;;  %5074 = vmatmul.mubr.bf16.gmra.mrb[56].mxu1 %v10672_v48  ;;  %v10674_v14 = vld [vmem:[%s10989_s23 + $0xe0] ss:$16 sps:$4 sm:$0xff]  }
 0x392   : > { %8698 = vmatprep.mubr.msk.bf16.mxu0 %vm3484_vm2, %v13142_v35  ;;  %5081 = vmatprep.mubr.bf16.mxu1 %v10673_v22  ;;  %v10675_v35 = vld [vmem:[%s10989_s23 + $0x104] ss:$16 sps:$4 sm:$0xff]  }
 0x394   : > { %v13391_v53 = vpop.f32.mrb[208].mxu1 }
 0x395   : > { %v13393_v43 = vpop.f32.mrb[209].mxu1 }
 0x396   : > { %16430 = vst [vmem:[#allocation399_spill] sm:$0xff] %v13393_v43  ;;  %v13395_v29 = vpop.f32.mrb[210].mxu1 }
 0x397   : > { %v13397_v5 = vpop.f32.mrb[211].mxu1 }
 0x398   : > { %16431 = vst [vmem:[#allocation400_spill] sm:$0xff] %v13397_v5 }
 0x399   : > { %4903 = vmatmul.mubr.bf16.gmra.mrb[60].mxu0 %v13151_v55  ;;  %5082 = vmatmul.mubr.bf16.gmra.mrb[60].mxu1 %v10674_v14  ;;  %v10676_v55 = vld [vmem:[%s10989_s23 + $0x100] ss:$16 sps:$4 sm:$0xff]  }
 0x39a   : > { %8699 = vmatprep.mubr.msk.bf16.mxu0 %vm3484_vm2, %v13154_v9  ;;  %5089 = vmatprep.mubr.bf16.mxu1 %v10675_v35  ;;  %v10677_v9 = vld [vmem:[%s10989_s23 + $0x124] ss:$16 sps:$4 sm:$0xff]  }
 0x39c   : > { %v13404_v48 = vpop.f32.mrb[212].mxu1 }
 0x39d   : > { %v13406_v22 = vpop.f32.mrb[213].mxu1 }
 0x39e   : > { %16432 = vst [vmem:[#allocation401_spill] sm:$0xff] %v13406_v22  ;;  %v13408_v43 = vpop.f32.mrb[214].mxu1 }
 0x39f   : > { %v13410_v60 = vpop.f32.mrb[215].mxu1 }
 0x3a0   : > { %16433 = vst [vmem:[#allocation402_spill] sm:$0xff] %v13410_v60 }
 0x3a1   : > { %4913 = vmatmul.mubr.bf16.gmra.mrb[64].mxu0 %v13163_v13  ;;  %5090 = vmatmul.mubr.bf16.gmra.mrb[64].mxu1 %v10676_v55  ;;  %v10678_v13 = vld [vmem:[%s10989_s23 + $0x120] ss:$16 sps:$4 sm:$0xff]  }
 0x3a2   : > { %8700 = vmatprep.mubr.msk.bf16.mxu0 %vm3484_vm2, %v13166_v57  ;;  %5097 = vmatprep.mubr.bf16.mxu1 %v10677_v9  ;;  %v10679_v57 = vld [vmem:[%s10989_s23 + $0x144] ss:$16 sps:$4 sm:$0xff]  }
 0x3a4   : > { %v13417_v14 = vpop.f32.mrb[216].mxu1 }
 0x3a5   : > { %v13419_v35 = vpop.f32.mrb[217].mxu1 }
 0x3a6   : > { %16434 = vst [vmem:[#allocation403_spill] sm:$0xff] %v13419_v35  ;;  %v13421_v5 = vpop.f32.mrb[218].mxu1 }
 0x3a7   : > { %16435 = vst [vmem:[#allocation404_spill] sm:$0xff] %v13421_v5  ;;  %v13423_v22 = vpop.f32.mrb[219].mxu1 }
 0x3a8   : > { %16436 = vst [vmem:[#allocation405_spill] sm:$0xff] %v13423_v22  ;;  %v10680_v22 = vld [vmem:[%s10989_s23 + $0x140] ss:$16 sps:$4 sm:$0xff]  }
 0x3a9   : > { %4923 = vmatmul.mubr.bf16.gmra.mrb[68].mxu0 %v13178_v38  ;;  %5098 = vmatmul.mubr.bf16.gmra.mrb[68].mxu1 %v10678_v13  ;;  %v10681_v38 = vld [vmem:[%s10989_s23 + $0x164] ss:$16 sps:$4 sm:$0xff]  }
 0x3aa   : > { %8701 = vmatprep.mubr.msk.bf16.mxu0 %vm3484_vm2, %v13181_v44  ;;  %5105 = vmatprep.mubr.bf16.mxu1 %v10679_v57 }
 0x3ac   : > { %v13430_v55 = vpop.f32.mrb[220].mxu1 }
 0x3ad   : > { %v13432_v9 = vpop.f32.mrb[221].mxu1 }
 0x3ae   : > { %16437 = vst [vmem:[#allocation406_spill] sm:$0xff] %v13432_v9  ;;  %v13434_v60 = vpop.f32.mrb[222].mxu1 }
 0x3af   : > { %v13436_v35 = vpop.f32.mrb[223].mxu1 }
 0x3b0   : > { %16438 = vst [vmem:[#allocation407_spill] sm:$0xff] %v13436_v35 }
 0x3b1   : > { %4933 = vmatmul.mubr.bf16.gmra.mrb[72].mxu0 %v13190_v24  ;;  %5106 = vmatmul.mubr.bf16.gmra.mrb[72].mxu1 %v10680_v22 }
 0x3b2   : > { %8702 = vmatprep.mubr.msk.bf16.mxu0 %vm3484_vm2, %v13193_v8  ;;  %5113 = vmatprep.mubr.bf16.mxu1 %v10681_v38  ;;  %v10682_v8 = vld [vmem:[%s10989_s23 + $0x160] ss:$16 sps:$4 sm:$0xff]   ;;  %v10683_v38 = vld [vmem:[%s10989_s23 + $0x184] ss:$16 sps:$4 sm:$0xff]  }
 0x3b4   : > { %v13443_v44 = vpop.f32.mrb[224].mxu1  ;;  %v13445_v13 = vpop.f32.mrb[224].mxu0 }
 0x3b5   : > { %16439 = vst [vmem:[#allocation408_spill] sm:$0xff] %v13445_v13  ;;  %v13447_v57 = vpop.f32.mrb[225].mxu1  ;;  %v13449_v9 = vpop.f32.mrb[225].mxu0 }
 0x3b6   : > { %16440 = vst [vmem:[#allocation409_spill] sm:$0xff] %v13447_v57  ;;  %16441 = vst [vmem:[#allocation410_spill] sm:$0xff] %v13449_v9  ;;  %v13451_v35 = vpop.f32.mrb[226].mxu1  ;;  %v13453_v5 = vpop.f32.mrb[226].mxu0 }
 0x3b7   : > { %16442 = vst [vmem:[#allocation411_spill] sm:$0xff] %v13453_v5  ;;  %v13455_v24 = vpop.f32.mrb[227].mxu1  ;;  %v13457_v22 = vpop.f32.mrb[227].mxu0 }
 0x3b8   : > { %16443 = vst [vmem:[#allocation412_spill] sm:$0xff] %v13455_v24  ;;  %16444 = vst [vmem:[#allocation413_spill] sm:$0xff] %v13457_v22 }
 0x3b9   : > { %4943 = vmatmul.mubr.bf16.gmra.mrb[76].mxu0 %v13206_v12  ;;  %5114 = vmatmul.mubr.bf16.gmra.mrb[76].mxu1 %v10682_v8 }
 0x3ba   : > { %8703 = vmatprep.mubr.msk.bf16.mxu0 %vm3484_vm2, %v13211_v19  ;;  %5121 = vmatprep.mubr.bf16.mxu1 %v10683_v38  ;;  %v13483_v19 = vld [vmem:[%s15973_s4 + $0x40] sm:$0xff]  }
 0x3bb   : > { %v10684_v38 = vld [vmem:[%s10989_s23 + $0x180] ss:$16 sps:$4 sm:$0xff]   ;;  %9128 = vmatprep.subr.bf16.mxu0 %v13483_v19 }
 0x3bc   : > { %v13464_v9 = vpop.f32.mrb[228].mxu1  ;;  %v13466_v13 = vpop.f32.mrb[228].mxu0 }
 0x3bd   : > { %16445 = vst [vmem:[#allocation414_spill] sm:$0xff] %v13466_v13  ;;  %v13468_v5 = vpop.f32.mrb[229].mxu1  ;;  %v13470_v24 = vpop.f32.mrb[229].mxu0 }
 0x3be   : > { %16446 = vst [vmem:[#allocation415_spill] sm:$0xff] %v13468_v5  ;;  %16447 = vst [vmem:[#allocation416_spill] sm:$0xff] %v13470_v24  ;;  %v13472_v22 = vpop.f32.mrb[230].mxu1  ;;  %v13474_v12 = vpop.f32.mrb[230].mxu0  ;;  %v10685_v24 = vld [vmem:[%s10989_s23 + $0x1a4] ss:$16 sps:$4 sm:$0xff]  }
 0x3bf   : > { %16448 = vst [vmem:[#allocation417_spill] sm:$0xff] %v13474_v12  ;;  %v13476_v57 = vpop.f32.mrb[231].mxu1  ;;  %v13478_v8 = vpop.f32.mrb[231].mxu0 }
 0x3c0   : > { %16449 = vst [vmem:[#allocation418_spill] sm:$0xff] %v13476_v57  ;;  %16450 = vst [vmem:[#allocation419_spill] sm:$0xff] %v13478_v8 }
 0x3c1   : > { %4953 = vmatmul.mubr.bf16.gmra.mrb[80].mxu0 %v13226_v30  ;;  %5122 = vmatmul.mubr.bf16.gmra.mrb[80].mxu1 %v10684_v38 }
 0x3c2   : > { %8704 = vmatprep.mubr.msk.bf16.mxu0 %vm3484_vm2, %v13231_v3  ;;  %5129 = vmatprep.mubr.bf16.mxu1 %v10685_v24  ;;  %v10686_v24 = vld [vmem:[%s10989_s23 + $0x1a0] ss:$16 sps:$4 sm:$0xff]  }
 0x3c4   : > { %v13491_v12 = vpop.f32.mrb[232].mxu1  ;;  %v13493_v8 = vpop.f32.mrb[232].mxu0 }
 0x3c5   : > { %16451 = vst [vmem:[#allocation420_spill] sm:$0xff] %v13493_v8  ;;  %v13495_v13 = vpop.f32.mrb[233].mxu1  ;;  %v13497_v57 = vpop.f32.mrb[233].mxu0  ;;  %v10687_v8 = vld [vmem:[%s10989_s23 + $0x1c4] ss:$16 sps:$4 sm:$0xff]  }
 0x3c6   : > { %16452 = vst [vmem:[#allocation421_spill] sm:$0xff] %v13495_v13  ;;  %16453 = vst [vmem:[#allocation422_spill] sm:$0xff] %v13497_v57  ;;  %v13499_v30 = vpop.f32.mrb[234].mxu1  ;;  %v13501_v5 = vpop.f32.mrb[234].mxu0 }
 0x3c7   : > { %16454 = vst [vmem:[#allocation423_spill] sm:$0xff] %v13499_v30  ;;  %16455 = vst [vmem:[#allocation424_spill] sm:$0xff] %v13501_v5  ;;  %v13503_v38 = vpop.f32.mrb[235].mxu1  ;;  %v13505_v3 = vpop.f32.mrb[235].mxu0 }
 0x3c8   : > { %16456 = vst [vmem:[#allocation425_spill] sm:$0xff] %v13503_v38  ;;  %16457 = vst [vmem:[#allocation426_spill] sm:$0xff] %v13505_v3 }
 0x3c9   : > { %4963 = vmatmul.mubr.bf16.gmra.mrb[84].mxu0 %v13249_v46  ;;  %5130 = vmatmul.mubr.bf16.gmra.mrb[84].mxu1 %v10686_v24 }
 0x3ca   : > { %8705 = vmatprep.mubr.msk.bf16.mxu0 %vm3484_vm2, %v13254_v34  ;;  %5137 = vmatprep.mubr.bf16.mxu1 %v10687_v8  ;;  %v10688_v34 = vld [vmem:[%s10989_s23 + $0x1c0] ss:$16 sps:$4 sm:$0xff]   ;;  %v10689_v8 = vld [vmem:[%s10989_s23 + $0x1e4] ss:$16 sps:$4 sm:$0xff]  }
 0x3cc   : > { %v13512_v57 = vpop.f32.mrb[236].mxu1  ;;  %v13514_v13 = vpop.f32.mrb[236].mxu0 }
 0x3cd   : > { %16458 = vst [vmem:[#allocation427_spill] sm:$0xff] %v13514_v13  ;;  %v13516_v5 = vpop.f32.mrb[237].mxu1  ;;  %v13518_v38 = vpop.f32.mrb[237].mxu0 }
 0x3ce   : > { %16459 = vst [vmem:[#allocation428_spill] sm:$0xff] %v13516_v5  ;;  %16460 = vst [vmem:[#allocation429_spill] sm:$0xff] %v13518_v38  ;;  %v13520_v3 = vpop.f32.mrb[238].mxu1  ;;  %v13522_v30 = vpop.f32.mrb[238].mxu0  ;;  %v10602_v38 = vld [vmem:[%s15974_s5 + $0x290] ss:$20 sps:$4 sm:$0xff]  }
 0x3cf   : > { %16461 = vst [vmem:[#allocation430_spill] sm:$0xff] %v13522_v30  ;;  %v13524_v46 = vpop.f32.mrb[239].mxu1  ;;  %v13526_v24 = vpop.f32.mrb[239].mxu0  ;;  %5283 = vmatpush1.bf16.msra.mxu1 %v10602_v38  ;;  %v10603_v5 = vld [vmem:[%s15974_s5 + $0x2b8] ss:$20 sps:$4 sm:$0xff]   ;;  %v16470_v38 = vpack.c.bf16 %v11305_v4, %v11302_v2 }
 0x3d0   : > { %16462 = vst [vmem:[#allocation431_spill] sm:$0xff] %v13524_v46  ;;  %16463 = vst [vmem:[#allocation432_spill] sm:$0xff] %v13526_v24  ;;  %5284 = vmatprep.subr.bf16.mxu1 %v16070_v59 }
 0x3d1   : > { %4973 = vmatmul.mubr.bf16.gmra.mrb[88].mxu0 %v13269_v26  ;;  %5138 = vmatmul.mubr.bf16.gmra.mrb[88].mxu1 %v10688_v34 }
 0x3d2   : > { %8706 = vmatprep.mubr.msk.bf16.mxu0 %vm3484_vm2, %v13274_v36  ;;  %5145 = vmatprep.mubr.bf16.mxu1 %v10689_v8 }
 0x3d3   : > { %5285 = vmatpush1.bf16.msra.mxu1 %v10603_v5 }
 0x3d4   : > { %v13536_v30 = vpop.f32.mrb[240].mxu1  ;;  %v13538_v13 = vpop.f32.mrb[240].mxu0  ;;  %5286 = vmatprep.subr.bf16.mxu1 %v16070_v59 }
 0x3d5   : > { %16464 = vst [vmem:[#allocation433_spill] sm:$0xff] %v13538_v13  ;;  %v13540_v24 = vpop.f32.mrb[241].mxu1  ;;  %v13542_v26 = vpop.f32.mrb[241].mxu0  ;;  %v10690_v13 = vld [vmem:[%s10989_s23 + $0x1e0] ss:$16 sps:$4 sm:$0xff]  }
 0x3d6   : > { %16465 = vst [vmem:[#allocation434_spill] sm:$0xff] %v13540_v24  ;;  %16466 = vst [vmem:[#allocation435_spill] sm:$0xff] %v13542_v26  ;;  %v13544_v34 = vpop.f32.mrb[242].mxu1  ;;  %v13546_v36 = vpop.f32.mrb[242].mxu0  ;;  %v10691_v26 = vld [vmem:[%s10989_s23 + $0x204] ss:$16 sps:$4 sm:$0xff]  }
 0x3d7   : > { %16467 = vst [vmem:[#allocation436_spill] sm:$0xff] %v13546_v36  ;;  %v13549_v8 = vpop.f32.mrb[243].mxu1  ;;  %v13551_v46 = vpop.f32.mrb[243].mxu0 }
 0x3d8   : > { %16468 = vst [vmem:[#allocation437_spill] sm:$0xff] %v13549_v8  ;;  %16469 = vst [vmem:[#allocation438_spill] sm:$0xff] %v13551_v46  ;;  %v10604_v46 = vld [vmem:[%s15974_s5 + $0x2e0] ss:$20 sps:$4 sm:$0xff]  }
 0x3d9   : > { %4983 = vmatmul.mubr.bf16.gmra.mrb[92].mxu0 %v13289_v25  ;;  %5146 = vmatmul.mubr.bf16.gmra.mrb[92].mxu1 %v10690_v13 }
 0x3da   : > { %9064 = vmatprep.mubr.bf16.mxu0 %v16470_v38  ;;  %5153 = vmatprep.mubr.bf16.mxu1 %v10691_v26  ;;  %v10606_v38 = vld [vmem:[%s15974_s5 + $0x308] ss:$20 sps:$4 sm:$0xff]  }
 0x3db   : > { %5287 = vmatpush1.bf16.msra.mxu1 %v10604_v46  ;;  %v10693_v46 = vld [vmem:[%s10989_s23 + $0x224] ss:$16 sps:$4 sm:$0xff]  }
 0x3dc   : > { %v13565_v36 = vpop.f32.mrb[244].mxu1  ;;  %v13567_v8 = vpop.f32.mrb[244].mxu0  ;;  %5288 = vmatprep.subr.bf16.mxu1 %v16070_v59 }
 0x3dd   : > { %16471 = vst [vmem:[#allocation439_spill] sm:$0xff] %v13567_v8  ;;  %v13570_v25 = vpop.f32.mrb[245].mxu1  ;;  %v13572_v13 = vpop.f32.mrb[245].mxu0  ;;  %v10601_v8 = vld [vmem:[%s15973_s4 + $0x48] sm:$0xff]  }
 0x3de   : > { %16472 = vst [vmem:[#allocation440_spill] sm:$0xff] %v13570_v25  ;;  %16473 = vst [vmem:[#allocation441_spill] sm:$0xff] %v13572_v13  ;;  %v13574_v2 = vpop.f32.mrb[246].mxu1  ;;  %v13576_v4 = vpop.f32.mrb[246].mxu0  ;;  %v16477_v13 = vpack.c.bf16 %v11335_v18, %v11332_v17  ;;  %v10605_v17 = vld [vmem:[%s15973_s4 + $0x50] sm:$0xff]  }
 0x3df   : > { %16474 = vst [vmem:[#allocation442_spill] sm:$0xff] %v13576_v4  ;;  %v13578_v5 = vpop.f32.mrb[247].mxu1  ;;  %v13580_v26 = vpop.f32.mrb[247].mxu0  ;;  %v10692_v4 = vld [vmem:[%s10989_s23 + $0x200] ss:$16 sps:$4 sm:$0xff]   ;;  %5289 = vmatpush1.bf16.msra.mxu1 %v10606_v38  ;;  %v16485_v38 = vpack.c.bf16 %v11386_v42, %v11383_v41 }
 0x3e0   : > { %16475 = vst [vmem:[#allocation443_spill] sm:$0xff] %v13578_v5  ;;  %16476 = vst [vmem:[#allocation444_spill] sm:$0xff] %v13580_v26  ;;  %v16478_v26 = vpack.c.bf16 %v11365_v33, %v11362_v32  ;;  %v10607_v5 = vld [vmem:[%s15974_s5 + $0x330] ss:$20 sps:$4 sm:$0xff]   ;;  %5290 = vmatprep.subr.bf16.mxu1 %v16070_v59 }
 0x3e1   : > { %9065 = vmatmul.mubr.bf16.vlgmr.msra.gmra.mrb[96].mxu0 %v16477_v13  ;;  %5154 = vmatmul.mubr.bf16.gmra.mrb[96].mxu1 %v10692_v4 }
 0x3e2   : > { %9068 = vmatprep.mubr.bf16.mxu0 %v16478_v26  ;;  %5161 = vmatprep.mubr.bf16.mxu1 %v10693_v46  ;;  %v10608_v26 = vld [vmem:[%s15974_s5 + $0x358] ss:$20 sps:$4 sm:$0xff]   ;;  %v10694_v46 = vld [vmem:[%s10989_s23 + $0x220] ss:$16 sps:$4 sm:$0xff]  }
 0x3e3   : > { %9129 = vmatpush3.bf16.msra.mxu0 %v13483_v19  ;;  %5291 = vmatpush1.bf16.msra.mxu1 %v10607_v5 }
 0x3e4   : > { %v13601_v24 = vpop.f32.mrb[248].mxu1  ;;  %v13603_v25 = vpop.f32.mrb[248].mxu0  ;;  %9130 = vmatprep.subr.bf16.mxu0 %v10601_v8  ;;  %5292 = vmatprep.subr.bf16.mxu1 %v16070_v59 }
 0x3e5   : > { %16479 = vst [vmem:[#allocation445_spill] sm:$0xff] %v13603_v25  ;;  %v13609_v18 = vpop.f32.mrb[249].mxu1  ;;  %v13611_v32 = vpop.f32.mrb[249].mxu0 }
 0x3e6   : > { %16480 = vst [vmem:[#allocation446_spill] sm:$0xff] %v13609_v18  ;;  %16481 = vst [vmem:[#allocation447_spill] sm:$0xff] %v13611_v32  ;;  %v13613_v33 = vpop.f32.mrb[250].mxu1  ;;  %v13615_v19 = vpop.f32.mrb[250].mxu0  ;;  %v16486_v32 = vpack.c.bf16 %v11410_v0, %v11407_v62 }
 0x3e7   : > { %16482 = vst [vmem:[#allocation448_spill] sm:$0xff] %v13615_v19  ;;  %v13617_v13 = vpop.f32.mrb[251].mxu1  ;;  %v13619_v4 = vpop.f32.mrb[251].mxu0  ;;  %9131 = vmatpush3.bf16.msra.mxu0 %v10601_v8  ;;  %5293 = vmatpush1.bf16.msra.mxu1 %v10608_v26  ;;  %v10609_v8 = vld [vmem:[%s15974_s5 + $0x380] ss:$20 sps:$4 sm:$0xff]  }
 0x3e8   : > { %16483 = vst [vmem:[#allocation449_spill] sm:$0xff] %v13617_v13  ;;  %16484 = vst [vmem:[#allocation450_spill] sm:$0xff] %v13619_v4  ;;  %9132 = vmatprep.subr.bf16.mxu0 %v10605_v17  ;;  %v10695_v4 = vld [vmem:[%s10989_s23 + $0x244] ss:$16 sps:$4 sm:$0xff]   ;;  %5294 = vmatprep.subr.bf16.mxu1 %v16070_v59  ;;  %v10611_v26 = vld [vmem:[%s15974_s5 + $0x3a8] ss:$20 sps:$4 sm:$0xff]  }
 0x3e9   : > { %9069 = vmatmul.mubr.bf16.gmra.mrb[100].mxu0 %v16485_v38  ;;  %5162 = vmatmul.mubr.bf16.gmra.mrb[100].mxu1 %v10694_v46  ;;  %v16493_v38 = vpack.c.bf16 %v11428_v21, %v11425_v16  ;;  %v10696_v46 = vld [vmem:[%s10989_s23 + $0x240] ss:$16 sps:$4 sm:$0xff]  }
 0x3ea   : > { %9072 = vmatprep.mubr.bf16.mxu0 %v16486_v32  ;;  %5169 = vmatprep.mubr.bf16.mxu1 %v10695_v4  ;;  %v10610_v4 = vld [vmem:[%s15973_s4 + $0x58] sm:$0xff]  }
 0x3eb   : > { %9133 = vmatpush3.bf16.msra.mxu0 %v10605_v17  ;;  %5295 = vmatpush1.bf16.msra.mxu1 %v10609_v8  ;;  %v10697_v8 = vld [vmem:[%s10989_s23 + $0x264] ss:$16 sps:$4 sm:$0xff]  }
 0x3ec   : > { %v13636_v5 = vpop.f32.mrb[252].mxu1  ;;  %v13638_v19 = vpop.f32.mrb[252].mxu0  ;;  %5296 = vmatprep.subr.bf16.mxu1 %v16070_v59  ;;  %9134 = vmatprep.subr.bf16.mxu0 %v10610_v4 }
 0x3ed   : > { %16487 = vst [vmem:[#allocation451_spill] sm:$0xff] %v13638_v19  ;;  %v13641_v41 = vpop.f32.mrb[253].mxu1  ;;  %v13643_v42 = vpop.f32.mrb[253].mxu0  ;;  %v10702_v19 = vld [vmem:[%s10989_s23 + $0x2a0] ss:$16 sps:$4 sm:$0xff]  }
 0x3ee   : > { %16488 = vst [vmem:[#allocation452_spill] sm:$0xff] %v13641_v41  ;;  %16489 = vst [vmem:[#allocation453_spill] sm:$0xff] %v13643_v42  ;;  %v13645_v62 = vpop.f32.mrb[254].mxu1  ;;  %v13647_v0 = vpop.f32.mrb[254].mxu0  ;;  %v10612_v42 = vld [vmem:[%s15974_s5 + $0x3d0] ss:$20 sps:$4 sm:$0xff]  }
 0x3ef   : > { %16490 = vst [vmem:[#allocation454_spill] sm:$0xff] %v13647_v0  ;;  %v13649_v17 = vpop.f32.mrb[255].mxu1  ;;  %v13651_v32 = vpop.f32.mrb[255].mxu0  ;;  %5297 = vmatpush1.bf16.msra.mxu1 %v10611_v26  ;;  %9135 = vmatpush3.bf16.msra.mxu0 %v10610_v4  ;;  %v10698_v4 = vld [vmem:[%s10989_s23 + $0x260] ss:$16 sps:$4 sm:$0xff]  }
 0x3f0   : > { %16491 = vst [vmem:[#allocation455_spill] sm:$0xff] %v13649_v17  ;;  %16492 = vst [vmem:[#allocation456_spill] sm:$0xff] %v13651_v32  ;;  %v16494_v32 = vpack.c.bf16 %v11455_v47, %v11452_v40  ;;  %5298 = vmatprep.subr.bf16.mxu1 %v16070_v59  ;;  %v16503_v59 = vpack.c.bf16 %v11503_v61, %v11500_v51  ;;  %v10613_v61 = vld [vmem:[%s15973_s4 + $0x60] sm:$0xff]   ;;  %v16510_v51 = vpack.c.bf16 %v11524_v37, %v11521_v45 }
 0x3f1   : > { %9073 = vmatmul.mubr.bf16.gmra.mrb[104].mxu0 %v16493_v38  ;;  %5170 = vmatmul.mubr.bf16.gmra.mrb[104].mxu1 %v10696_v46  ;;  %v16502_v46 = vpack.c.bf16 %v11476_v28, %v11473_v27  ;;  %v10710_v41 = vld [vmem:[%s10989_s23 + $0x320] ss:$16 sps:$4 sm:$0xff]  }
 0x3f2   : > { %9076 = vmatprep.mubr.bf16.mxu0 %v16494_v32  ;;  %5177 = vmatprep.mubr.bf16.mxu1 %v10697_v8  ;;  %v10699_v8 = vld [vmem:[%s10989_s23 + $0x284] ss:$16 sps:$4 sm:$0xff]  }
 0x3f3   : > { %5299 = vmatpush1.bf16.msra.mxu1 %v10612_v42  ;;  %9136 = vmatprep.subr.bf16.mxu0 %v10613_v61 }
 0x3f4   : > { %v13671_v0 = vpop.f32.mrb[0].mxu1  ;;  %v13673_v16 = vpop.f32.mrb[0].mxu0  ;;  %9137 = vmatpush3.bf16.msra.mxu0 %v10613_v61  ;;  %v16525_v61 = vld [vmem:[#allocation34_spill] sm:$0xff] }
 0x3f5   : > { %16495 = vst [vmem:[#allocation457_spill] sm:$0xff] %v13673_v16  ;;  %v13676_v21 = vpop.f32.mrb[1].mxu1  ;;  %v13678_v40 = vpop.f32.mrb[1].mxu0 }
 0x3f6   : > { %16496 = vst [vmem:[#allocation458_spill] sm:$0xff] %v13676_v21  ;;  %16497 = vst [vmem:[#allocation459_spill] sm:$0xff] %v13678_v40  ;;  %v13680_v47 = vpop.f32.mrb[2].mxu1  ;;  %v13682_v32 = vpop.f32.mrb[2].mxu0 }
 0x3f7   : > { %16498 = vst [vmem:[#allocation460_spill] sm:$0xff] %v13680_v47  ;;  %16499 = vst [vmem:[#allocation461_spill] sm:$0xff] %v13682_v32  ;;  %v13684_v26 = vpop.f32.mrb[3].mxu1  ;;  %v13686_v38 = vpop.f32.mrb[3].mxu0  ;;  %v10747_v47 = vld [vmem:[%s10989_s23 + $0x168] ss:$16 sps:$4 sm:$0xff]  }
 0x3f8   : > { %16500 = vst [vmem:[#allocation462_spill] sm:$0xff] %v13684_v26  ;;  %16501 = vst [vmem:[#allocation463_spill] sm:$0xff] %v13686_v38 }
 0x3f9   : > { %9077 = vmatmul.mubr.bf16.gmra.mrb[108].mxu0 %v16502_v46  ;;  %5178 = vmatmul.mubr.bf16.gmra.mrb[108].mxu1 %v10698_v4 }
 0x3fa   : > { %9080 = vmatprep.mubr.bf16.mxu0 %v16503_v59  ;;  %5185 = vmatprep.mubr.bf16.mxu1 %v10699_v8  ;;  %v10700_v59 = vld [vmem:[%s10989_s23 + $0x280] ss:$16 sps:$4 sm:$0xff]  }
 0x3fb   : > { %v16511_v8 = vld [vmem:[#allocation26_spill] sm:$0xff] }
 0x3fc   : > { %v13696_v40 = vpop.f32.mrb[4].mxu1  ;;  %v13698_v32 = vpop.f32.mrb[4].mxu0 }
 0x3fd   : > { %16504 = vst [vmem:[#allocation464_spill] sm:$0xff] %v13698_v32  ;;  %v13700_v38 = vpop.f32.mrb[5].mxu1  ;;  %v13702_v42 = vpop.f32.mrb[5].mxu0 }
 0x3fe   : > { %16505 = vst [vmem:[#allocation465_spill] sm:$0xff] %v13700_v38  ;;  %16506 = vst [vmem:[#allocation466_spill] sm:$0xff] %v13702_v42  ;;  %v13704_v27 = vpop.f32.mrb[6].mxu1  ;;  %v13706_v28 = vpop.f32.mrb[6].mxu0  ;;  %v16512_v42 = vld [vmem:[#allocation25_spill] sm:$0xff] }
 0x3ff   : > { %16507 = vst [vmem:[#allocation467_spill] sm:$0xff] %v13706_v28  ;;  %v13708_v46 = vpop.f32.mrb[7].mxu1  ;;  %v13710_v4 = vpop.f32.mrb[7].mxu0  ;;  %v16513_v16 = vpack.c.bf16 %v16511_v8, %v16512_v42  ;;  %v10701_v28 = vld [vmem:[%s10989_s23 + $0x2a4] ss:$16 sps:$4 sm:$0xff]   ;;  %v16522_v42 = vld [vmem:[#allocation30_spill] sm:$0xff] }
 0x400   : > { %16508 = vst [vmem:[#allocation468_spill] sm:$0xff] %v13708_v46  ;;  %16509 = vst [vmem:[#allocation469_spill] sm:$0xff] %v13710_v4  ;;  %v10706_v38 = vld [vmem:[%s10989_s23 + $0x2e0] ss:$16 sps:$4 sm:$0xff]  }
 0x401   : > { %9081 = vmatmul.mubr.bf16.gmra.mrb[112].mxu0 %v16510_v51  ;;  %5186 = vmatmul.mubr.bf16.gmra.mrb[112].mxu1 %v10700_v59 }
 0x402   : > { %9084 = vmatprep.mubr.bf16.mxu0 %v16513_v16  ;;  %5193 = vmatprep.mubr.bf16.mxu1 %v10701_v28  ;;  %v16523_v28 = vld [vmem:[#allocation29_spill] sm:$0xff] }
 0x403   : > { %v16524_v8 = vpack.c.bf16 %v16522_v42, %v16523_v28 }
 0x404   : > { %v13723_v4 = vpop.f32.mrb[8].mxu1  ;;  %v13725_v32 = vpop.f32.mrb[8].mxu0 }
 0x405   : > { %16514 = vst [vmem:[#allocation26_spill] sm:$0xff] %v13723_v4  ;;  %16515 = vst [vmem:[#allocation25_spill] sm:$0xff] %v13725_v32  ;;  %v13727_v25 = vpop.f32.mrb[9].mxu1  ;;  %v13729_v37 = vpop.f32.mrb[9].mxu0  ;;  %v16526_v32 = vld [vmem:[#allocation33_spill] sm:$0xff] }
 0x406   : > { %16516 = vst [vmem:[#allocation470_spill] sm:$0xff] %v13727_v25  ;;  %16517 = vst [vmem:[#allocation471_spill] sm:$0xff] %v13729_v37  ;;  %v13731_v45 = vpop.f32.mrb[10].mxu1  ;;  %v13733_v51 = vpop.f32.mrb[10].mxu0  ;;  %v16527_v25 = vpack.c.bf16 %v16525_v61, %v16526_v32  ;;  %v10703_v37 = vld [vmem:[%s10989_s23 + $0x2c4] ss:$16 sps:$4 sm:$0xff]  }
 0x407   : > { %16518 = vst [vmem:[#allocation472_spill] sm:$0xff] %v13731_v45  ;;  %16519 = vst [vmem:[#allocation473_spill] sm:$0xff] %v13733_v51  ;;  %v13735_v59 = vpop.f32.mrb[11].mxu1  ;;  %v13737_v16 = vpop.f32.mrb[11].mxu0  ;;  %v16536_v32 = vld [vmem:[#allocation38_spill] sm:$0xff] }
 0x408   : > { %16520 = vst [vmem:[#allocation474_spill] sm:$0xff] %v13735_v59  ;;  %16521 = vst [vmem:[#allocation475_spill] sm:$0xff] %v13737_v16 }
 0x409   : > { %9085 = vmatmul.mubr.bf16.gmra.mrb[116].mxu0 %v16524_v8  ;;  %5194 = vmatmul.mubr.bf16.gmra.mrb[116].mxu1 %v10702_v19 }
 0x40a   : > { %9088 = vmatprep.mubr.bf16.mxu0 %v16527_v25  ;;  %5201 = vmatprep.mubr.bf16.mxu1 %v10703_v37  ;;  %v10614_v25 = vld [vmem:[%s15973_s4 + $0x68] sm:$0xff]   ;;  %v16537_v37 = vld [vmem:[#allocation37_spill] sm:$0xff] }
 0x40b   : > { %v16538_v61 = vpack.c.bf16 %v16536_v32, %v16537_v37  ;;  %9138 = vmatprep.subr.bf16.mxu0 %v10614_v25 }
 0x40c   : > { %v13747_v26 = vpop.f32.mrb[12].mxu1  ;;  %v13749_v51 = vpop.f32.mrb[12].mxu0  ;;  %9139 = vmatpush3.bf16.msra.mxu0 %v10614_v25  ;;  %v16553_v25 = vld [vmem:[#allocation54_spill] sm:$0xff] }
 0x40d   : > { %16528 = vst [vmem:[#allocation30_spill] sm:$0xff] %v13747_v26  ;;  %16529 = vst [vmem:[#allocation29_spill] sm:$0xff] %v13749_v51  ;;  %v13751_v59 = vpop.f32.mrb[13].mxu1  ;;  %v13753_v16 = vpop.f32.mrb[13].mxu0  ;;  %v10704_v51 = vld [vmem:[%s10989_s23 + $0x2c0] ss:$16 sps:$4 sm:$0xff]  }
 0x40e   : > { %16530 = vst [vmem:[#allocation34_spill] sm:$0xff] %v13751_v59  ;;  %16531 = vst [vmem:[#allocation33_spill] sm:$0xff] %v13753_v16  ;;  %v13755_v42 = vpop.f32.mrb[14].mxu1  ;;  %v13757_v28 = vpop.f32.mrb[14].mxu0  ;;  %v16539_v16 = vld [vmem:[#allocation42_spill] sm:$0xff]  ;;  %v16540_v59 = vld [vmem:[#allocation41_spill] sm:$0xff] }
 0x40f   : > { %16532 = vst [vmem:[#allocation476_spill] sm:$0xff] %v13755_v42  ;;  %16533 = vst [vmem:[#allocation477_spill] sm:$0xff] %v13757_v28  ;;  %v13759_v19 = vpop.f32.mrb[15].mxu1  ;;  %v13761_v8 = vpop.f32.mrb[15].mxu0  ;;  %v16541_v46 = vpack.c.bf16 %v16539_v16, %v16540_v59  ;;  %v10705_v28 = vld [vmem:[%s10989_s23 + $0x2e4] ss:$16 sps:$4 sm:$0xff]  }
 0x410   : > { %16534 = vst [vmem:[#allocation478_spill] sm:$0xff] %v13759_v19  ;;  %16535 = vst [vmem:[#allocation479_spill] sm:$0xff] %v13761_v8  ;;  %v16550_v59 = vld [vmem:[#allocation46_spill] sm:$0xff]  ;;  %v16551_v16 = vld [vmem:[#allocation45_spill] sm:$0xff] }
 0x411   : > { %9089 = vmatmul.mubr.bf16.gmra.mrb[120].mxu0 %v16538_v61  ;;  %5202 = vmatmul.mubr.bf16.gmra.mrb[120].mxu1 %v10704_v51 }
 0x412   : > { %9092 = vmatprep.mubr.bf16.mxu0 %v16541_v46  ;;  %5209 = vmatprep.mubr.bf16.mxu1 %v10705_v28  ;;  %v16552_v28 = vpack.c.bf16 %v16550_v59, %v16551_v16 }
 0x414   : > { %v13774_v8 = vpop.f32.mrb[16].mxu1  ;;  %v13776_v19 = vpop.f32.mrb[16].mxu0 }
 0x415   : > { %16542 = vst [vmem:[#allocation38_spill] sm:$0xff] %v13774_v8  ;;  %16543 = vst [vmem:[#allocation37_spill] sm:$0xff] %v13776_v19  ;;  %v13778_v21 = vpop.f32.mrb[17].mxu1  ;;  %v13780_v32 = vpop.f32.mrb[17].mxu0  ;;  %v16554_v19 = vld [vmem:[#allocation53_spill] sm:$0xff] }
 0x416   : > { %16544 = vst [vmem:[#allocation42_spill] sm:$0xff] %v13778_v21  ;;  %16545 = vst [vmem:[#allocation41_spill] sm:$0xff] %v13780_v32  ;;  %v13782_v37 = vpop.f32.mrb[18].mxu1  ;;  %v13784_v51 = vpop.f32.mrb[18].mxu0  ;;  %v16555_v21 = vpack.c.bf16 %v16553_v25, %v16554_v19  ;;  %v10707_v32 = vld [vmem:[%s10989_s23 + $0x304] ss:$16 sps:$4 sm:$0xff]  }
 0x417   : > { %16546 = vst [vmem:[#allocation480_spill] sm:$0xff] %v13782_v37  ;;  %16547 = vst [vmem:[#allocation481_spill] sm:$0xff] %v13784_v51  ;;  %v13786_v61 = vpop.f32.mrb[19].mxu1  ;;  %v13788_v46 = vpop.f32.mrb[19].mxu0  ;;  %v16564_v19 = vld [vmem:[#allocation62_spill] sm:$0xff] }
 0x418   : > { %16548 = vst [vmem:[#allocation482_spill] sm:$0xff] %v13786_v61  ;;  %16549 = vst [vmem:[#allocation483_spill] sm:$0xff] %v13788_v46 }
 0x419   : > { %9093 = vmatmul.mubr.bf16.gmra.mrb[124].mxu0 %v16552_v28  ;;  %5210 = vmatmul.mubr.bf16.gmra.mrb[124].mxu1 %v10706_v38 }
 0x41a   : > { %9096 = vmatprep.mubr.bf16.mxu0 %v16555_v21  ;;  %5217 = vmatprep.mubr.bf16.mxu1 %v10707_v32  ;;  %v10615_v21 = vld [vmem:[%s15973_s4 + $0x70] sm:$0xff]  }
 0x41b   : > { %v16565_v32 = vld [vmem:[#allocation61_spill] sm:$0xff]  ;;  %9140 = vmatprep.subr.bf16.mxu0 %v10615_v21 }
 0x41c   : > { %v13798_v13 = vpop.f32.mrb[20].mxu1  ;;  %v13800_v51 = vpop.f32.mrb[20].mxu0  ;;  %v16566_v25 = vpack.c.bf16 %v16564_v19, %v16565_v32  ;;  %9141 = vmatpush3.bf16.msra.mxu0 %v10615_v21  ;;  %v16581_v21 = vld [vmem:[#allocation86_spill] sm:$0xff] }
 0x41d   : > { %16556 = vst [vmem:[#allocation46_spill] sm:$0xff] %v13798_v13  ;;  %16557 = vst [vmem:[#allocation45_spill] sm:$0xff] %v13800_v51  ;;  %v13802_v61 = vpop.f32.mrb[21].mxu1  ;;  %v13804_v46 = vpop.f32.mrb[21].mxu0  ;;  %v10708_v51 = vld [vmem:[%s10989_s23 + $0x300] ss:$16 sps:$4 sm:$0xff]  }
 0x41e   : > { %16558 = vst [vmem:[#allocation54_spill] sm:$0xff] %v13802_v61  ;;  %16559 = vst [vmem:[#allocation53_spill] sm:$0xff] %v13804_v46  ;;  %v13806_v59 = vpop.f32.mrb[22].mxu1  ;;  %v13808_v16 = vpop.f32.mrb[22].mxu0  ;;  %v16567_v46 = vld [vmem:[#allocation70_spill] sm:$0xff]  ;;  %v16568_v61 = vld [vmem:[#allocation69_spill] sm:$0xff] }
 0x41f   : > { %16560 = vst [vmem:[#allocation484_spill] sm:$0xff] %v13806_v59  ;;  %16561 = vst [vmem:[#allocation485_spill] sm:$0xff] %v13808_v16  ;;  %v13810_v38 = vpop.f32.mrb[23].mxu1  ;;  %v13812_v28 = vpop.f32.mrb[23].mxu0  ;;  %v16569_v17 = vpack.c.bf16 %v16567_v46, %v16568_v61  ;;  %v10709_v16 = vld [vmem:[%s10989_s23 + $0x324] ss:$16 sps:$4 sm:$0xff]  }
 0x420   : > { %16562 = vst [vmem:[#allocation486_spill] sm:$0xff] %v13810_v38  ;;  %16563 = vst [vmem:[#allocation487_spill] sm:$0xff] %v13812_v28  ;;  %v16578_v61 = vld [vmem:[#allocation78_spill] sm:$0xff]  ;;  %v16579_v46 = vld [vmem:[#allocation77_spill] sm:$0xff] }
 0x421   : > { %9097 = vmatmul.mubr.bf16.gmra.mrb[128].mxu0 %v16566_v25  ;;  %5218 = vmatmul.mubr.bf16.gmra.mrb[128].mxu1 %v10708_v51 }
 0x422   : > { %9100 = vmatprep.mubr.bf16.mxu0 %v16569_v17  ;;  %5225 = vmatprep.mubr.bf16.mxu1 %v10709_v16  ;;  %v16580_v16 = vpack.c.bf16 %v16578_v61, %v16579_v46 }
 0x424   : > { %v13825_v28 = vpop.f32.mrb[24].mxu1  ;;  %v13827_v38 = vpop.f32.mrb[24].mxu0 }
 0x425   : > { %16570 = vst [vmem:[#allocation62_spill] sm:$0xff] %v13825_v28  ;;  %16571 = vst [vmem:[#allocation61_spill] sm:$0xff] %v13827_v38  ;;  %v13829_v18 = vpop.f32.mrb[25].mxu1  ;;  %v13831_v19 = vpop.f32.mrb[25].mxu0  ;;  %v16582_v38 = vld [vmem:[#allocation85_spill] sm:$0xff] }
 0x426   : > { %16572 = vst [vmem:[#allocation70_spill] sm:$0xff] %v13829_v18  ;;  %16573 = vst [vmem:[#allocation69_spill] sm:$0xff] %v13831_v19  ;;  %v13833_v32 = vpop.f32.mrb[26].mxu1  ;;  %v13835_v51 = vpop.f32.mrb[26].mxu0  ;;  %v16583_v18 = vpack.c.bf16 %v16581_v21, %v16582_v38  ;;  %v10711_v19 = vld [vmem:[%s10989_s23 + $0x344] ss:$16 sps:$4 sm:$0xff]  }
 0x427   : > { %16574 = vst [vmem:[#allocation488_spill] sm:$0xff] %v13833_v32  ;;  %16575 = vst [vmem:[#allocation489_spill] sm:$0xff] %v13835_v51  ;;  %v13837_v25 = vpop.f32.mrb[27].mxu1  ;;  %v13839_v17 = vpop.f32.mrb[27].mxu0 }
 0x428   : > { %16576 = vst [vmem:[#allocation490_spill] sm:$0xff] %v13837_v25  ;;  %16577 = vst [vmem:[#allocation491_spill] sm:$0xff] %v13839_v17 }
 0x429   : > { %9101 = vmatmul.mubr.bf16.gmra.mrb[132].mxu0 %v16580_v16  ;;  %5226 = vmatmul.mubr.bf16.gmra.mrb[132].mxu1 %v10710_v41  ;;  %v16593_v16 = vld [vmem:[#allocation93_spill] sm:$0xff] }
 0x42a   : > { %9104 = vmatprep.mubr.bf16.mxu0 %v16583_v18  ;;  %5233 = vmatprep.mubr.bf16.mxu1 %v10711_v19  ;;  %v10616_v18 = vld [vmem:[%s15973_s4 + $0x78] sm:$0xff]  }
 0x42b   : > { %v16592_v19 = vld [vmem:[#allocation94_spill] sm:$0xff]  ;;  %9142 = vmatprep.subr.bf16.mxu0 %v10616_v18 }
 0x42c   : > { %v13849_v32 = vpop.f32.mrb[28].mxu1  ;;  %v13851_v51 = vpop.f32.mrb[28].mxu0  ;;  %v16594_v21 = vpack.c.bf16 %v16592_v19, %v16593_v16  ;;  %9143 = vmatpush3.bf16.msra.mxu0 %v10616_v18  ;;  %v16602_v16 = vld [vmem:[#allocation110_spill] sm:$0xff] }
 0x42d   : > { %16584 = vst [vmem:[#allocation78_spill] sm:$0xff] %v13849_v32  ;;  %16585 = vst [vmem:[#allocation77_spill] sm:$0xff] %v13851_v51  ;;  %v13853_v25 = vpop.f32.mrb[29].mxu1  ;;  %v13855_v17 = vpop.f32.mrb[29].mxu0  ;;  %v10712_v51 = vld [vmem:[%s10989_s23 + $0x340] ss:$16 sps:$4 sm:$0xff]  }
 0x42e   : > { %16586 = vst [vmem:[#allocation86_spill] sm:$0xff] %v13853_v25  ;;  %16587 = vst [vmem:[#allocation85_spill] sm:$0xff] %v13855_v17  ;;  %v13857_v61 = vpop.f32.mrb[30].mxu1  ;;  %v13859_v46 = vpop.f32.mrb[30].mxu0  ;;  %v16595_v17 = vld [vmem:[#allocation102_spill] sm:$0xff]  ;;  %v16596_v25 = vld [vmem:[#allocation101_spill] sm:$0xff] }
 0x42f   : > { %16588 = vst [vmem:[#allocation492_spill] sm:$0xff] %v13857_v61  ;;  %16589 = vst [vmem:[#allocation493_spill] sm:$0xff] %v13859_v46  ;;  %v13861_v41 = vpop.f32.mrb[31].mxu1  ;;  %v13863_v38 = vpop.f32.mrb[31].mxu0  ;;  %v16597_v61 = vpack.c.bf16 %v16595_v17, %v16596_v25  ;;  %v10713_v46 = vld [vmem:[%s10989_s23 + $0x364] ss:$16 sps:$4 sm:$0xff]  }
 0x430   : > { %16590 = vst [vmem:[#allocation494_spill] sm:$0xff] %v13861_v41  ;;  %16591 = vst [vmem:[#allocation495_spill] sm:$0xff] %v13863_v38  ;;  %v10714_v25 = vld [vmem:[%s10989_s23 + $0x360] ss:$16 sps:$4 sm:$0xff]  }
 0x431   : > { %9105 = vmatmul.mubr.bf16.gmra.mrb[136].mxu0 %v16594_v21  ;;  %5234 = vmatmul.mubr.bf16.gmra.mrb[136].mxu1 %v10712_v51  ;;  %v16603_v51 = vld [vmem:[#allocation109_spill] sm:$0xff]  ;;  %v16605_v17 = vld [vmem:[#allocation50_spill] sm:$0xff] }
 0x432   : > { %9108 = vmatprep.mubr.bf16.mxu0 %v16597_v61  ;;  %5241 = vmatprep.mubr.bf16.mxu1 %v10713_v46  ;;  %v16604_v21 = vpack.c.bf16 %v16602_v16, %v16603_v51  ;;  %v16606_v61 = vld [vmem:[#allocation49_spill] sm:$0xff]  ;;  %v16612_v16 = vld [vmem:[#allocation58_spill] sm:$0xff]  ;;  %v16613_v51 = vld [vmem:[#allocation56_spill] sm:$0xff] }
 0x433   : > { %v16607_v46 = vpack.c.bf16 %v16605_v17, %v16606_v61  ;;  %v16615_v17 = vld [vmem:[#allocation66_spill] sm:$0xff]  ;;  %v16616_v61 = vld [vmem:[#allocation65_spill] sm:$0xff] }
 0x434   : > { %v13876_v41 = vpop.f32.mrb[32].mxu0 }
 0x435   : > { %16598 = vst [vmem:[#allocation94_spill] sm:$0xff] %v13876_v41  ;;  %v13878_v38 = vpop.f32.mrb[33].mxu0  ;;  %v10715_v41 = vld [vmem:[%s10989_s23 + $0x384] ss:$16 sps:$4 sm:$0xff]  }
 0x436   : > { %16599 = vst [vmem:[#allocation93_spill] sm:$0xff] %v13878_v38  ;;  %v13880_v28 = vpop.f32.mrb[34].mxu0 }
 0x437   : > { %16600 = vst [vmem:[#allocation102_spill] sm:$0xff] %v13880_v28  ;;  %v13882_v19 = vpop.f32.mrb[35].mxu0 }
 0x438   : > { %16601 = vst [vmem:[#allocation101_spill] sm:$0xff] %v13882_v19 }
 0x439   : > { %9109 = vmatmul.mubr.bf16.gmra.mrb[140].mxu0 %v16604_v21  ;;  %5242 = vmatmul.mubr.bf16.gmra.mrb[140].mxu1 %v10714_v25  ;;  %v16614_v21 = vpack.c.bf16 %v16612_v16, %v16613_v51  ;;  %v10716_v25 = vld [vmem:[%s10989_s23 + $0x380] ss:$16 sps:$4 sm:$0xff]  }
 0x43a   : > { %9112 = vmatprep.mubr.bf16.mxu0 %v16607_v46  ;;  %5249 = vmatprep.mubr.bf16.mxu1 %v10715_v41  ;;  %v16617_v46 = vpack.c.bf16 %v16615_v17, %v16616_v61  ;;  %v10717_v41 = vld [vmem:[%s10989_s23 + $0x3a4] ss:$16 sps:$4 sm:$0xff]   ;;  %v16622_v16 = vld [vmem:[#allocation74_spill] sm:$0xff]  ;;  %v16623_v51 = vld [vmem:[#allocation72_spill] sm:$0xff] }
 0x43b   : > { %v16625_v17 = vld [vmem:[#allocation82_spill] sm:$0xff]  ;;  %v16626_v61 = vld [vmem:[#allocation81_spill] sm:$0xff] }
 0x43c   : > { %v13892_v18 = vpop.f32.mrb[36].mxu0 }
 0x43d   : > { %16608 = vst [vmem:[#allocation110_spill] sm:$0xff] %v13892_v18  ;;  %v13894_v38 = vpop.f32.mrb[37].mxu0 }
 0x43e   : > { %16609 = vst [vmem:[#allocation109_spill] sm:$0xff] %v13894_v38  ;;  %v13896_v28 = vpop.f32.mrb[38].mxu0 }
 0x43f   : > { %16610 = vst [vmem:[#allocation50_spill] sm:$0xff] %v13896_v28  ;;  %v13898_v19 = vpop.f32.mrb[39].mxu0 }
 0x440   : > { %16611 = vst [vmem:[#allocation49_spill] sm:$0xff] %v13898_v19 }
 0x441   : > { %9113 = vmatmul.mubr.bf16.gmra.mrb[144].mxu0 %v16614_v21  ;;  %5250 = vmatmul.mubr.bf16.gmra.mrb[144].mxu1 %v10716_v25  ;;  %v16624_v21 = vpack.c.bf16 %v16622_v16, %v16623_v51  ;;  %v10718_v25 = vld [vmem:[%s10989_s23 + $0x3a0] ss:$16 sps:$4 sm:$0xff]  }
 0x442   : > { %9116 = vmatprep.mubr.bf16.mxu0 %v16617_v46  ;;  %5257 = vmatprep.mubr.bf16.mxu1 %v10717_v41  ;;  %v16627_v46 = vpack.c.bf16 %v16625_v17, %v16626_v61  ;;  %v10719_v41 = vld [vmem:[%s10989_s23 + $0x3c4] ss:$16 sps:$4 sm:$0xff]   ;;  %v16632_v16 = vld [vmem:[#allocation90_spill] sm:$0xff]  ;;  %v16633_v51 = vld [vmem:[#allocation88_spill] sm:$0xff] }
 0x443   : > { %v16635_v17 = vld [vmem:[#allocation98_spill] sm:$0xff]  ;;  %v16636_v61 = vld [vmem:[#allocation97_spill] sm:$0xff] }
 0x444   : > { %v13908_v18 = vpop.f32.mrb[40].mxu0 }
 0x445   : > { %16618 = vst [vmem:[#allocation58_spill] sm:$0xff] %v13908_v18  ;;  %v13910_v38 = vpop.f32.mrb[41].mxu0 }
 0x446   : > { %16619 = vst [vmem:[#allocation56_spill] sm:$0xff] %v13910_v38  ;;  %v13912_v28 = vpop.f32.mrb[42].mxu0 }
 0x447   : > { %16620 = vst [vmem:[#allocation66_spill] sm:$0xff] %v13912_v28  ;;  %v13914_v19 = vpop.f32.mrb[43].mxu0 }
 0x448   : > { %16621 = vst [vmem:[#allocation65_spill] sm:$0xff] %v13914_v19 }
 0x449   : > { %9117 = vmatmul.mubr.bf16.gmra.mrb[148].mxu0 %v16624_v21  ;;  %5258 = vmatmul.mubr.bf16.gmra.mrb[148].mxu1 %v10718_v25  ;;  %v16634_v21 = vpack.c.bf16 %v16632_v16, %v16633_v51  ;;  %v10720_v25 = vld [vmem:[%s10989_s23 + $0x3c0] ss:$16 sps:$4 sm:$0xff]  }
 0x44a   : > { %9120 = vmatprep.mubr.bf16.mxu0 %v16627_v46  ;;  %5265 = vmatprep.mubr.bf16.mxu1 %v10719_v41  ;;  %v16637_v46 = vpack.c.bf16 %v16635_v17, %v16636_v61  ;;  %v10721_v41 = vld [vmem:[%s10989_s23 + $0x3e4] ss:$16 sps:$4 sm:$0xff]   ;;  %v16642_v16 = vld [vmem:[#allocation106_spill] sm:$0xff]  ;;  %v16643_v51 = vld [vmem:[#allocation104_spill] sm:$0xff] }
 0x44b   : > { %v10723_v17 = vld [vmem:[%s10989_s23 + $0xc] ss:$16 sps:$4 sm:$0xff]  }
 0x44c   : > { %v13924_v18 = vpop.f32.mrb[44].mxu0 }
 0x44d   : > { %16628 = vst [vmem:[#allocation74_spill] sm:$0xff] %v13924_v18  ;;  %v13926_v38 = vpop.f32.mrb[45].mxu0 }
 0x44e   : > { %16629 = vst [vmem:[#allocation72_spill] sm:$0xff] %v13926_v38  ;;  %v13928_v28 = vpop.f32.mrb[46].mxu0 }
 0x44f   : > { %16630 = vst [vmem:[#allocation82_spill] sm:$0xff] %v13928_v28  ;;  %v13930_v19 = vpop.f32.mrb[47].mxu0 }
 0x450   : > { %16631 = vst [vmem:[#allocation81_spill] sm:$0xff] %v13930_v19 }
 0x451   : > { %9121 = vmatmul.mubr.bf16.gmra.mrb[152].mxu0 %v16634_v21  ;;  %5266 = vmatmul.mubr.bf16.gmra.mrb[152].mxu1 %v10720_v25  ;;  %v16644_v21 = vpack.c.bf16 %v16642_v16, %v16643_v51  ;;  %v10722_v25 = vld [vmem:[%s10989_s23 + $0x3e0] ss:$16 sps:$4 sm:$0xff]   ;;  %v10725_v16 = vld [vmem:[%s10989_s23 + $0x2c] ss:$16 sps:$4 sm:$0xff]  }
 0x452   : > { %9124 = vmatprep.mubr.bf16.mxu0 %v16637_v46  ;;  %5273 = vmatprep.mubr.bf16.mxu1 %v10721_v41 }
 0x454   : > { %v13940_v38 = vpop.f32.mrb[48].mxu0 }
 0x455   : > { %16638 = vst [vmem:[#allocation90_spill] sm:$0xff] %v13940_v38  ;;  %v13942_v18 = vpop.f32.mrb[49].mxu0 }
 0x456   : > { %16639 = vst [vmem:[#allocation88_spill] sm:$0xff] %v13942_v18  ;;  %v13944_v28 = vpop.f32.mrb[50].mxu0 }
 0x457   : > { %16640 = vst [vmem:[#allocation98_spill] sm:$0xff] %v13944_v28  ;;  %v13946_v19 = vpop.f32.mrb[51].mxu0  ;;  %v10727_v28 = vld [vmem:[%s10989_s23 + $0x4c] ss:$16 sps:$4 sm:$0xff]  }
 0x458   : > { %16641 = vst [vmem:[#allocation97_spill] sm:$0xff] %v13946_v19  ;;  %v10724_v19 = vld [vmem:[%s10989_s23 + $0x8] ss:$16 sps:$4 sm:$0xff]  }
 0x459   : > { %9125 = vmatmul.mubr.bf16.gmra.mrb[156].mxu0 %v16644_v21  ;;  %5274 = vmatmul.mubr.bf16.gmra.mrb[156].mxu1 %v10722_v25 }
 0x45a   : > { %8707 = vmatprep.mubr.msk.bf16.mxu1 %vm3484_vm2, %v10723_v17 }
 0x45c   : > { %v13954_v61 = vpop.f32.mrb[52].mxu0 }
 0x45d   : > { %16645 = vst [vmem:[#allocation106_spill] sm:$0xff] %v13954_v61  ;;  %v13956_v46 = vpop.f32.mrb[53].mxu0  ;;  %v10744_v61 = vld [vmem:[%s10989_s23 + $0x148] ss:$16 sps:$4 sm:$0xff]  }
 0x45e   : > { %16646 = vst [vmem:[#allocation104_spill] sm:$0xff] %v13956_v46  ;;  %v13958_v41 = vpop.f32.mrb[54].mxu0  ;;  %v10726_v46 = vld [vmem:[%s10989_s23 + $0x28] ss:$16 sps:$4 sm:$0xff]  }
 0x45f   : > { %16647 = vst [vmem:[#allocation496_spill] sm:$0xff] %v13958_v41  ;;  %v13960_v18 = vpop.f32.mrb[55].mxu0 }
 0x460   : > { %16648 = vst [vmem:[#allocation497_spill] sm:$0xff] %v13960_v18 }
 0x461   : > { %5315 = vmatmul.mubr.bf16.vlgmr.msra.gmra.mrb[32].mxu1 %v10724_v19 }
 0x462   : > { %8708 = vmatprep.mubr.msk.bf16.mxu1 %vm3484_vm2, %v10725_v16 }
 0x464   : > { %v13965_v51 = vpop.f32.mrb[56].mxu0 }
 0x465   : > { %16649 = vst [vmem:[#allocation498_spill] sm:$0xff] %v13965_v51  ;;  %v13967_v21 = vpop.f32.mrb[57].mxu0 }
 0x466   : > { %16650 = vst [vmem:[#allocation499_spill] sm:$0xff] %v13967_v21  ;;  %v13969_v25 = vpop.f32.mrb[58].mxu0  ;;  %v10728_v21 = vld [vmem:[%s10989_s23 + $0x48] ss:$16 sps:$4 sm:$0xff]  }
 0x467   : > { %16651 = vst [vmem:[#allocation500_spill] sm:$0xff] %v13969_v25  ;;  %v13971_v17 = vpop.f32.mrb[59].mxu0  ;;  %v10729_v25 = vld [vmem:[%s10989_s23 + $0x6c] ss:$16 sps:$4 sm:$0xff]  }
 0x468   : > { %16652 = vst [vmem:[#allocation501_spill] sm:$0xff] %v13971_v17 }
 0x469   : > { %5323 = vmatmul.mubr.bf16.gmra.mrb[36].mxu1 %v10726_v46 }
 0x46a   : > { %8709 = vmatprep.mubr.msk.bf16.mxu1 %vm3484_vm2, %v10727_v28 }
 0x46c   : > { %v13976_v19 = vpop.f32.mrb[60].mxu0 }
 0x46d   : > { %16653 = vst [vmem:[#allocation502_spill] sm:$0xff] %v13976_v19  ;;  %v13978_v18 = vpop.f32.mrb[61].mxu0 }
 0x46e   : > { %16654 = vst [vmem:[#allocation503_spill] sm:$0xff] %v13978_v18  ;;  %v13980_v16 = vpop.f32.mrb[62].mxu0  ;;  %v10730_v18 = vld [vmem:[%s10989_s23 + $0x68] ss:$16 sps:$4 sm:$0xff]  }
 0x46f   : > { %16655 = vst [vmem:[#allocation504_spill] sm:$0xff] %v13980_v16  ;;  %v13982_v51 = vpop.f32.mrb[63].mxu0  ;;  %v10731_v16 = vld [vmem:[%s10989_s23 + $0x8c] ss:$16 sps:$4 sm:$0xff]  }
 0x470   : > { %16656 = vst [vmem:[#allocation505_spill] sm:$0xff] %v13982_v51 }
 0x471   : > { %5331 = vmatmul.mubr.bf16.gmra.mrb[40].mxu1 %v10728_v21 }
 0x472   : > { %8710 = vmatprep.mubr.msk.bf16.mxu1 %vm3484_vm2, %v10729_v25 }
 0x474   : > { %v13987_v46 = vpop.f32.mrb[64].mxu0 }
 0x475   : > { %16657 = vst [vmem:[#allocation506_spill] sm:$0xff] %v13987_v46  ;;  %v13989_v17 = vpop.f32.mrb[65].mxu0 }
 0x476   : > { %16658 = vst [vmem:[#allocation507_spill] sm:$0xff] %v13989_v17  ;;  %v13991_v28 = vpop.f32.mrb[66].mxu0  ;;  %v10732_v17 = vld [vmem:[%s10989_s23 + $0x88] ss:$16 sps:$4 sm:$0xff]  }
 0x477   : > { %16659 = vst [vmem:[#allocation508_spill] sm:$0xff] %v13991_v28  ;;  %v13993_v19 = vpop.f32.mrb[67].mxu0  ;;  %v10733_v28 = vld [vmem:[%s10989_s23 + $0xac] ss:$16 sps:$4 sm:$0xff]  }
 0x478   : > { %16660 = vst [vmem:[#allocation509_spill] sm:$0xff] %v13993_v19 }
 0x479   : > { %5339 = vmatmul.mubr.bf16.gmra.mrb[44].mxu1 %v10730_v18 }
 0x47a   : > { %8711 = vmatprep.mubr.msk.bf16.mxu1 %vm3484_vm2, %v10731_v16 }
 0x47c   : > { %v13998_v21 = vpop.f32.mrb[68].mxu0 }
 0x47d   : > { %16661 = vst [vmem:[#allocation510_spill] sm:$0xff] %v13998_v21  ;;  %v14000_v51 = vpop.f32.mrb[69].mxu0 }
 0x47e   : > { %16662 = vst [vmem:[#allocation511_spill] sm:$0xff] %v14000_v51  ;;  %v14002_v25 = vpop.f32.mrb[70].mxu0  ;;  %v10734_v51 = vld [vmem:[%s10989_s23 + $0xa8] ss:$16 sps:$4 sm:$0xff]  }
 0x47f   : > { %16663 = vst [vmem:[#allocation512_spill] sm:$0xff] %v14002_v25  ;;  %v14004_v46 = vpop.f32.mrb[71].mxu0  ;;  %v10735_v25 = vld [vmem:[%s10989_s23 + $0xcc] ss:$16 sps:$4 sm:$0xff]  }
 0x480   : > { %16664 = vst [vmem:[#allocation513_spill] sm:$0xff] %v14004_v46 }
 0x481   : > { %5347 = vmatmul.mubr.bf16.gmra.mrb[48].mxu1 %v10732_v17 }
 0x482   : > { %8712 = vmatprep.mubr.msk.bf16.mxu1 %vm3484_vm2, %v10733_v28 }
 0x484   : > { %v14009_v18 = vpop.f32.mrb[72].mxu0 }
 0x485   : > { %16665 = vst [vmem:[#allocation514_spill] sm:$0xff] %v14009_v18  ;;  %v14011_v19 = vpop.f32.mrb[73].mxu0 }
 0x486   : > { %16666 = vst [vmem:[#allocation515_spill] sm:$0xff] %v14011_v19  ;;  %v14013_v16 = vpop.f32.mrb[74].mxu0  ;;  %v10736_v19 = vld [vmem:[%s10989_s23 + $0xc8] ss:$16 sps:$4 sm:$0xff]  }
 0x487   : > { %16667 = vst [vmem:[#allocation516_spill] sm:$0xff] %v14013_v16  ;;  %v14015_v21 = vpop.f32.mrb[75].mxu0  ;;  %v10737_v16 = vld [vmem:[%s10989_s23 + $0xec] ss:$16 sps:$4 sm:$0xff]  }
 0x488   : > { %16668 = vst [vmem:[#allocation517_spill] sm:$0xff] %v14015_v21 }
 0x489   : > { %5355 = vmatmul.mubr.bf16.gmra.mrb[52].mxu1 %v10734_v51 }
 0x48a   : > { %8713 = vmatprep.mubr.msk.bf16.mxu1 %vm3484_vm2, %v10735_v25 }
 0x48c   : > { %v14020_v17 = vpop.f32.mrb[76].mxu0 }
 0x48d   : > { %16669 = vst [vmem:[#allocation518_spill] sm:$0xff] %v14020_v17  ;;  %v14022_v46 = vpop.f32.mrb[77].mxu0 }
 0x48e   : > { %16670 = vst [vmem:[#allocation519_spill] sm:$0xff] %v14022_v46  ;;  %v14024_v28 = vpop.f32.mrb[78].mxu0  ;;  %v10738_v46 = vld [vmem:[%s10989_s23 + $0xe8] ss:$16 sps:$4 sm:$0xff]  }
 0x48f   : > { %16671 = vst [vmem:[#allocation520_spill] sm:$0xff] %v14024_v28  ;;  %v14026_v18 = vpop.f32.mrb[79].mxu0  ;;  %v10739_v28 = vld [vmem:[%s10989_s23 + $0x10c] ss:$16 sps:$4 sm:$0xff]  }
 0x490   : > { %16672 = vst [vmem:[#allocation521_spill] sm:$0xff] %v14026_v18 }
 0x491   : > { %5363 = vmatmul.mubr.bf16.gmra.mrb[56].mxu1 %v10736_v19 }
 0x492   : > { %8714 = vmatprep.mubr.msk.bf16.mxu1 %vm3484_vm2, %v10737_v16 }
 0x494   : > { %v14031_v51 = vpop.f32.mrb[80].mxu0 }
 0x495   : > { %16673 = vst [vmem:[#allocation522_spill] sm:$0xff] %v14031_v51  ;;  %v14033_v21 = vpop.f32.mrb[81].mxu0 }
 0x496   : > { %16674 = vst [vmem:[#allocation523_spill] sm:$0xff] %v14033_v21  ;;  %v14035_v25 = vpop.f32.mrb[82].mxu0  ;;  %v14053_v21 = vld [vmem:[%s15973_s4 + $0x80] sm:$0xff]  }
 0x497   : > { %16675 = vst [vmem:[#allocation524_spill] sm:$0xff] %v14035_v25  ;;  %v14037_v17 = vpop.f32.mrb[83].mxu0  ;;  %9208 = vmatprep.subr.bf16.mxu0 %v14053_v21 }
 0x498   : > { %16676 = vst [vmem:[#allocation525_spill] sm:$0xff] %v14037_v17  ;;  %v10740_v17 = vld [vmem:[%s10989_s23 + $0x108] ss:$16 sps:$4 sm:$0xff]  }
 0x499   : > { %5371 = vmatmul.mubr.bf16.gmra.mrb[60].mxu1 %v10738_v46  ;;  %v10741_v46 = vld [vmem:[%s10989_s23 + $0x12c] ss:$16 sps:$4 sm:$0xff]  }
 0x49a   : > { %8715 = vmatprep.mubr.msk.bf16.mxu1 %vm3484_vm2, %v10739_v28 }
 0x49c   : > { %v14042_v19 = vpop.f32.mrb[84].mxu0 }
 0x49d   : > { %16677 = vst [vmem:[#allocation526_spill] sm:$0xff] %v14042_v19  ;;  %v14044_v18 = vpop.f32.mrb[85].mxu0  ;;  %v10743_v19 = vld [vmem:[%s10989_s23 + $0x14c] ss:$16 sps:$4 sm:$0xff]  }
 0x49e   : > { %16678 = vst [vmem:[#allocation527_spill] sm:$0xff] %v14044_v18  ;;  %v14046_v16 = vpop.f32.mrb[86].mxu0 }
 0x49f   : > { %16679 = vst [vmem:[#allocation528_spill] sm:$0xff] %v14046_v16  ;;  %v14048_v51 = vpop.f32.mrb[87].mxu0  ;;  %v10742_v16 = vld [vmem:[%s10989_s23 + $0x128] ss:$16 sps:$4 sm:$0xff]  }
 0x4a0   : > { %16680 = vst [vmem:[#allocation529_spill] sm:$0xff] %v14048_v51 }
 0x4a1   : > { %5379 = vmatmul.mubr.bf16.gmra.mrb[64].mxu1 %v10740_v17 }
 0x4a2   : > { %8716 = vmatprep.mubr.msk.bf16.mxu1 %vm3484_vm2, %v10741_v46  ;;  %v2199_v46 = vld [vmem:[%s15975_s6] sm:$0x1f] }
 0x4a4   : > { %v14059_v28 = vpop.f32.mrb[88].mxu0 }
 0x4a5   : > { %16681 = vst [vmem:[#allocation530_spill] sm:$0xff] %v14059_v28  ;;  %v14061_v18 = vpop.f32.mrb[89].mxu0  ;;  %v16687_v28 = vld [vmem:[#allocation3_spill] sm:$0xff] }
 0x4a6   : > { %16682 = vst [vmem:[#allocation531_spill] sm:$0xff] %v14061_v18  ;;  %v14063_v25 = vpop.f32.mrb[90].mxu0  ;;  %v16028_v18 = vsub.s32 1, %v16687_v28 }
 0x4a7   : > { %16683 = vst [vmem:[#allocation532_spill] sm:$0xff] %v14063_v25  ;;  %v14065_v51 = vpop.f32.mrb[91].mxu0 }
 0x4a8   : > { %16684 = vst [vmem:[#allocation533_spill] sm:$0xff] %v14065_v51  ;;  %v16690_v51 = vsub.s32 0, %v16687_v28 }
 0x4a9   : > { %5387 = vmatmul.mubr.bf16.gmra.mrb[68].mxu1 %v10742_v16 }
 0x4aa   : > { %8717 = vmatprep.mubr.msk.bf16.mxu1 %vm3484_vm2, %v10743_v19  ;;  %v14084_v16 = vrot.slane %v2199_v46, %v16690_v51  ;;  %v10745_v19 = vld [vmem:[%s15972_s3] sm:$0x3f] }
 0x4ac   : > { %v14070_v17 = vpop.f32.mrb[92].mxu0  ;;  %v9456_v51 = vadd.f32 %v13201_v23, %v14084_v16  ;;  %v16694_v23 = vld [vmem:[#allocation7_spill] sm:$0xff] }
 0x4ad   : > { %16685 = vst [vmem:[#allocation534_spill] sm:$0xff] %v14070_v17  ;;  %v14075_v41 = vpop.f32.mrb[93].mxu0  ;;  %v14092_v17 = vrot.slane %v10745_v19, %v16028_v18  ;;  %v9462_v19 = vadd.f32 %v13228_v39, %v14084_v16  ;;  %v16692_v18 = vld [vmem:[#allocation4_spill] sm:$0xff] }
 0x4ae   : > { %16686 = vst [vmem:[#allocation535_spill] sm:$0xff] %v14075_v41  ;;  %v14078_v38 = vpop.f32.mrb[94].mxu0  ;;  %v10746_v41 = vld [vmem:[%s10989_s23 + $0x16c] ss:$16 sps:$4 sm:$0xff]  }
 0x4af   : > { %16688 = vst [vmem:[#allocation536_spill] sm:$0xff] %v14078_v38  ;;  %v14080_v25 = vpop.f32.mrb[95].mxu0  ;;  %v1041_v45 = vadd.f32 %v16694_v23, %v14092_v17 }
 0x4b0   : > { %16689 = vst [vmem:[#allocation537_spill] sm:$0xff] %v14080_v25  ;;  %v9460_v25 = vadd.f32 %v13221_v50, %v14084_v16  ;;  %v16693_v50 = vld [vmem:[#allocation369_spill] sm:$0xff] }
 0x4b1   : > { %5395 = vmatmul.mubr.bf16.gmra.mrb[72].mxu1 %v10744_v61  ;;  %v16691_v61 = vld [vmem:[#allocation6_spill] sm:$0xff]  ;;  %v9458_v8 = vadd.f32 %v16693_v50, %v14084_v16 }
 0x4b2   : > { %8718 = vmatprep.mubr.msk.bf16.mxu1 %vm3484_vm2, %v10746_v41  ;;  %v1037_v46 = vadd.f32 %v16691_v61, %v14092_v17  ;;  %v1027_v41 = vadd.f32 %v16692_v18, %v14092_v17 }
 0x4b4   : > { %v9066_v38 = vpop.f32.mrb[96].mxu0 }
 0x4b5   : > { %v5710_v32 = vadd.f32 %v9460_v25, %v9066_v38  ;;  %v5701_v37 = vpop.f32.mrb[97].mxu0  ;;  %v16695_v25 = vld [vmem:[#allocation5_spill] sm:$0xff] }
 0x4b6   : > { %v5702_v28 = vadd.f32 %v9456_v51, %v5701_v37  ;;  %v9067_v59 = vpop.f32.mrb[98].mxu0  ;;  %v1031_v4 = vadd.f32 %v16695_v25, %v14092_v17  ;;  %v10748_v37 = vld [vmem:[%s10989_s23 + $0x18c] ss:$16 sps:$4 sm:$0xff]  }
 0x4b7   : > { %v5958_v13 = vmul.f32 %v5710_v32, %v1037_v46  ;;  %v5713_v61 = vadd.f32 %v9462_v19, %v9067_v59  ;;  %v5704_v42 = vpop.f32.mrb[99].mxu0  ;;  %v9468_v32 = vadd.f32 %v13264_v58, %v14084_v16  ;;  %v16696_v59 = vld [vmem:[#allocation373_spill] sm:$0xff] }
 0x4b8   : > { %v5956_v38 = vmul.f32 %v5702_v28, %v1027_v41  ;;  %v5705_v39 = vadd.f32 %v9458_v8, %v5704_v42  ;;  %v9464_v19 = vadd.f32 %v16696_v59, %v14084_v16  ;;  %v16697_v41 = vld [vmem:[#allocation10_spill] sm:$0xff]  ;;  %v16702_v59 = vld [vmem:[#allocation9_spill] sm:$0xff] }
 0x4b9   : > { %v5959_v26 = vmul.f32 %v5713_v61, %v1041_v45  ;;  %5403 = vmatmul.mubr.bf16.gmra.mrb[76].mxu1 %v10747_v47  ;;  %v1057_v50 = vadd.f32 %v16697_v41, %v14092_v17  ;;  %v16698_v47 = vld [vmem:[#allocation378_spill] sm:$0xff]  ;;  %v16700_v61 = vld [vmem:[#allocation375_spill] sm:$0xff]  ;;  %v1051_v41 = vadd.f32 %v16702_v59, %v14092_v17 }
 0x4ba   : > { %v5957_v18 = vmul.f32 %v5705_v39, %v1031_v4  ;;  %8719 = vmatprep.mubr.msk.bf16.mxu1 %vm3484_vm2, %v10748_v37  ;;  %v9470_v4 = vadd.f32 %v16698_v47, %v14084_v16  ;;  %v16701_v39 = vld [vmem:[#allocation11_spill] sm:$0xff] }
 0x4bb   : > { %v6021_v51 = vpack.c.bf16 %v5959_v26, %v5958_v13  ;;  %v10618_v13 = vld [vmem:[%s15973_s4 + $0x88] sm:$0xff]  }
 0x4bc   : > { %v9070_v46 = vpop.f32.mrb[100].mxu0  ;;  %v6020_v28 = vpack.c.bf16 %v5957_v18, %v5956_v38  ;;  %v16699_v26 = vld [vmem:[#allocation8_spill] sm:$0xff]  ;;  %v9466_v38 = vadd.f32 %v16700_v61, %v14084_v16  ;;  %v1061_v18 = vadd.f32 %v16701_v39, %v14092_v17 }
 0x4bd   : > { %v5726_v42 = vadd.f32 %v9468_v32, %v9070_v46  ;;  %v5717_v45 = vpop.f32.mrb[101].mxu0  ;;  %v1047_v58 = vadd.f32 %v16699_v26, %v14092_v17 }
 0x4be   : > { %v5718_v8 = vadd.f32 %v9464_v19, %v5717_v45  ;;  %v9071_v23 = vpop.f32.mrb[102].mxu0  ;;  %9144 = vmatprep.mubr.bf16.mxu0 %v6020_v28  ;;  %v10749_v28 = vld [vmem:[%s10989_s23 + $0x188] ss:$16 sps:$4 sm:$0xff]   ;;  %v10750_v45 = vld [vmem:[%s10989_s23 + $0x1ac] ss:$16 sps:$4 sm:$0xff]  }
 0x4bf   : > { %v5962_v25 = vmul.f32 %v5726_v42, %v1057_v50  ;;  %v5729_v37 = vadd.f32 %v9470_v4, %v9071_v23  ;;  %v5720_v32 = vpop.f32.mrb[103].mxu0  ;;  %9145 = vmatmul.mubr.bf16.vlgmr.msra.gmra.mrb[160].mxu0 %v6021_v51  ;;  %v10619_v50 = vld [vmem:[%s15973_s4 + $0x90] sm:$0xff]   ;;  %v9476_v4 = vadd.f32 %v13300_v1, %v14084_v16  ;;  %v16704_v23 = vld [vmem:[#allocation14_spill] sm:$0xff] }
 0x4c0   : > { %v5960_v46 = vmul.f32 %v5718_v8, %v1047_v58  ;;  %v5721_v47 = vadd.f32 %v9466_v38, %v5720_v32  ;;  %9209 = vmatpush3.bf16.msra.mxu0 %v14053_v21  ;;  %v16703_v58 = vld [vmem:[#allocation380_spill] sm:$0xff]  ;;  %v1077_v61 = vadd.f32 %v16704_v23, %v14092_v17 }
 0x4c1   : > { %v5963_v19 = vmul.f32 %v5729_v37, %v1061_v18  ;;  %5411 = vmatmul.mubr.bf16.gmra.mrb[80].mxu1 %v10749_v28  ;;  %9210 = vmatprep.subr.bf16.mxu0 %v10618_v13  ;;  %v9472_v21 = vadd.f32 %v16703_v58, %v14084_v16  ;;  %v16705_v18 = vld [vmem:[#allocation385_spill] sm:$0xff]  ;;  %v16706_v1 = vld [vmem:[#allocation12_spill] sm:$0xff] }
 0x4c2   : > { %v5961_v42 = vmul.f32 %v5721_v47, %v1051_v41  ;;  %8720 = vmatprep.mubr.msk.bf16.mxu1 %vm3484_vm2, %v10750_v45  ;;  %v9478_v37 = vadd.f32 %v16705_v18, %v14084_v16  ;;  %v1067_v32 = vadd.f32 %v16706_v1, %v14092_v17 }
 0x4c3   : > { %v6023_v51 = vpack.c.bf16 %v5963_v19, %v5962_v25  ;;  %v10620_v25 = vld [vmem:[%s15973_s4 + $0x98] sm:$0xff]   ;;  %v16708_v19 = vld [vmem:[#allocation15_spill] sm:$0xff] }
 0x4c4   : > { %v9074_v26 = vpop.f32.mrb[104].mxu0  ;;  %v6022_v8 = vpack.c.bf16 %v5961_v42, %v5960_v46  ;;  %9211 = vmatpush3.bf16.msra.mxu0 %v10618_v13  ;;  %v16707_v13 = vld [vmem:[#allocation382_spill] sm:$0xff]  ;;  %v1081_v28 = vadd.f32 %v16708_v19, %v14092_v17 }
 0x4c5   : > { %v5742_v38 = vadd.f32 %v9476_v4, %v9074_v26  ;;  %v5733_v39 = vpop.f32.mrb[105].mxu0  ;;  %9212 = vmatprep.subr.bf16.mxu0 %v10619_v50  ;;  %v9474_v41 = vadd.f32 %v16707_v13, %v14084_v16  ;;  %v16709_v26 = vld [vmem:[#allocation13_spill] sm:$0xff] }
 0x4c6   : > { %v5734_v59 = vadd.f32 %v9472_v21, %v5733_v39  ;;  %v9075_v46 = vpop.f32.mrb[106].mxu0  ;;  %9148 = vmatprep.mubr.bf16.mxu0 %v6022_v8  ;;  %v1071_v58 = vadd.f32 %v16709_v26, %v14092_v17  ;;  %v10751_v39 = vld [vmem:[%s10989_s23 + $0x1a8] ss:$16 sps:$4 sm:$0xff]   ;;  %v10621_v8 = vld [vmem:[%s15973_s4 + $0xa0] sm:$0xff]  }
 0x4c7   : > { %v5966_v47 = vmul.f32 %v5742_v38, %v1077_v61  ;;  %v5745_v42 = vadd.f32 %v9478_v37, %v9075_v46  ;;  %v5736_v45 = vpop.f32.mrb[107].mxu0  ;;  %9149 = vmatmul.mubr.bf16.gmra.mrb[164].mxu0 %v6023_v51  ;;  %v10752_v38 = vld [vmem:[%s10989_s23 + $0x1cc] ss:$16 sps:$4 sm:$0xff]   ;;  %v9484_v51 = vadd.f32 %v13326_v31, %v14084_v16 }
 0x4c8   : > { %v5964_v4 = vmul.f32 %v5734_v59, %v1067_v32  ;;  %v5737_v23 = vadd.f32 %v9474_v41, %v5736_v45  ;;  %9213 = vmatpush3.bf16.msra.mxu0 %v10619_v50  ;;  %v9480_v50 = vadd.f32 %v13313_v11, %v14084_v16  ;;  %v16710_v32 = vld [vmem:[#allocation18_spill] sm:$0xff]  ;;  %v9486_v41 = vadd.f32 %v13330_v20, %v14084_v16 }
 0x4c9   : > { %v5967_v21 = vmul.f32 %v5745_v42, %v1081_v28  ;;  %5419 = vmatmul.mubr.bf16.gmra.mrb[84].mxu1 %v10751_v39  ;;  %9214 = vmatprep.subr.bf16.mxu0 %v10620_v25  ;;  %v1097_v59 = vadd.f32 %v16710_v32, %v14092_v17  ;;  %v9482_v11 = vadd.f32 %v13317_v49, %v14084_v16  ;;  %v16712_v42 = vld [vmem:[#allocation19_spill] sm:$0xff]  ;;  %v16714_v32 = vld [vmem:[#allocation22_spill] sm:$0xff] }
 0x4ca   : > { %v5965_v61 = vmul.f32 %v5737_v23, %v1071_v58  ;;  %8721 = vmatprep.mubr.msk.bf16.mxu1 %vm3484_vm2, %v10752_v38  ;;  %v1101_v45 = vadd.f32 %v16712_v42, %v14092_v17  ;;  %v16713_v58 = vld [vmem:[#allocation17_spill] sm:$0xff] }
 0x4cb   : > { %v6025_v18 = vpack.c.bf16 %v5967_v21, %v5966_v47  ;;  %v16711_v47 = vld [vmem:[#allocation16_spill] sm:$0xff]  ;;  %v1091_v23 = vadd.f32 %v16713_v58, %v14092_v17 }
 0x4cc   : > { %v9078_v37 = vpop.f32.mrb[108].mxu0  ;;  %v6024_v1 = vpack.c.bf16 %v5965_v61, %v5964_v4  ;;  %9215 = vmatpush3.bf16.msra.mxu0 %v10620_v25  ;;  %v1087_v19 = vadd.f32 %v16711_v47, %v14092_v17  ;;  %v10753_v61 = vld [vmem:[%s10989_s23 + $0x1c8] ss:$16 sps:$4 sm:$0xff]  }
 0x4cd   : > { %v5758_v46 = vadd.f32 %v9484_v51, %v9078_v37  ;;  %v5749_v13 = vpop.f32.mrb[109].mxu0  ;;  %9216 = vmatprep.subr.bf16.mxu0 %v10621_v8  ;;  %v10754_v51 = vld [vmem:[%s10989_s23 + $0x1ec] ss:$16 sps:$4 sm:$0xff]   ;;  %v9492_v37 = vadd.f32 %v13352_v54, %v14084_v16 }
 0x4ce   : > { %v5750_v31 = vadd.f32 %v9480_v50, %v5749_v13  ;;  %v9079_v28 = vpop.f32.mrb[110].mxu0  ;;  %9152 = vmatprep.mubr.bf16.mxu0 %v6024_v1  ;;  %v9494_v13 = vadd.f32 %v13356_v15, %v14084_v16  ;;  %v16715_v47 = vld [vmem:[#allocation20_spill] sm:$0xff] }
 0x4cf   : > { %v5970_v25 = vmul.f32 %v5758_v46, %v1097_v59  ;;  %v5761_v4 = vadd.f32 %v9486_v41, %v9079_v28  ;;  %v5752_v26 = vpop.f32.mrb[111].mxu0  ;;  %9153 = vmatmul.mubr.bf16.gmra.mrb[168].mxu0 %v6025_v18  ;;  %v9488_v18 = vadd.f32 %v13339_v63, %v14084_v16  ;;  %v1117_v59 = vadd.f32 %v16714_v32, %v14092_v17  ;;  %v10622_v41 = vld [vmem:[%s15973_s4 + $0xa8] sm:$0xff]  }
 0x4d0   : > { %v5968_v20 = vmul.f32 %v5750_v31, %v1087_v19  ;;  %v5753_v21 = vadd.f32 %v9482_v11, %v5752_v26  ;;  %9217 = vmatpush3.bf16.msra.mxu0 %v10621_v8  ;;  %v1107_v54 = vadd.f32 %v16715_v47, %v14092_v17  ;;  %v9490_v63 = vadd.f32 %v13343_v6, %v14084_v16  ;;  %v16716_v11 = vld [vmem:[#allocation23_spill] sm:$0xff] }
 0x4d1   : > { %v5971_v39 = vmul.f32 %v5761_v4, %v1101_v45  ;;  %5427 = vmatmul.mubr.bf16.gmra.mrb[88].mxu1 %v10753_v61  ;;  %9218 = vmatprep.subr.bf16.mxu0 %v10622_v41  ;;  %v16717_v4 = vld [vmem:[#allocation21_spill] sm:$0xff]  ;;  %v9500_v61 = vadd.f32 %v13378_v7, %v14084_v16  ;;  %v9502_v32 = vadd.f32 %v13382_v10, %v14084_v16  ;;  %v10623_v10 = vld [vmem:[%s15973_s4 + $0xc0] sm:$0xff]  }
 0x4d2   : > { %v5969_v38 = vmul.f32 %v5753_v21, %v1091_v23  ;;  %8722 = vmatprep.mubr.msk.bf16.mxu1 %vm3484_vm2, %v10754_v51  ;;  %v1111_v26 = vadd.f32 %v16717_v4, %v14092_v17  ;;  %v10755_v23 = vld [vmem:[%s10989_s23 + $0x1e8] ss:$16 sps:$4 sm:$0xff]   ;;  %v9496_v51 = vadd.f32 %v13365_v56, %v14084_v16  ;;  %v9498_v56 = vadd.f32 %v13369_v52, %v14084_v16 }
 0x4d3   : > { %v6027_v49 = vpack.c.bf16 %v5971_v39, %v5970_v25  ;;  %v1121_v25 = vadd.f32 %v16716_v11, %v14092_v17  ;;  %v10756_v39 = vld [vmem:[%s10989_s23 + $0x20c] ss:$16 sps:$4 sm:$0xff]   ;;  %9288 = vmatprep.subr.bf16.mxu1 %v10623_v10  ;;  %v9508_v4 = vadd.f32 %v13404_v48, %v14084_v16 }
 0x4d4   : > { %v9082_v50 = vpop.f32.mrb[112].mxu0  ;;  %v6026_v1 = vpack.c.bf16 %v5969_v38, %v5968_v20  ;;  %9219 = vmatpush3.bf16.msra.mxu0 %v10622_v41  ;;  %v16720_v41 = vld [vmem:[#allocation31_spill] sm:$0xff]  ;;  %9289 = vmatpush3.bf16.msra.mxu1 %v10623_v10  ;;  %v9512_v10 = vadd.f32 %v13417_v14, %v14084_v16 }
 0x4d5   : > { %v5774_v8 = vadd.f32 %v9492_v37, %v9082_v50  ;;  %v5765_v46 = vpop.f32.mrb[113].mxu0  ;;  %v16718_v37 = vld [vmem:[#allocation28_spill] sm:$0xff]  ;;  %v1141_v47 = vadd.f32 %v16720_v41, %v14092_v17 }
 0x4d6   : > { %v5766_v19 = vadd.f32 %v9488_v18, %v5765_v46  ;;  %v9083_v31 = vpop.f32.mrb[114].mxu0  ;;  %9156 = vmatprep.mubr.bf16.mxu0 %v6026_v1  ;;  %v1137_v50 = vadd.f32 %v16718_v37, %v14092_v17 }
 0x4d7   : > { %v5974_v28 = vmul.f32 %v5774_v8, %v1117_v59  ;;  %v5777_v15 = vadd.f32 %v9494_v13, %v9083_v31  ;;  %v5768_v42 = vpop.f32.mrb[115].mxu0  ;;  %9157 = vmatmul.mubr.bf16.gmra.mrb[172].mxu0 %v6027_v49  ;;  %v16719_v59 = vld [vmem:[#allocation24_spill] sm:$0xff] }
 0x4d8   : > { %v5972_v45 = vmul.f32 %v5766_v19, %v1107_v54  ;;  %v5769_v20 = vadd.f32 %v9490_v63, %v5768_v42  ;;  %v1127_v8 = vadd.f32 %v16719_v59, %v14092_v17  ;;  %v16721_v63 = vld [vmem:[#allocation27_spill] sm:$0xff]  ;;  %v10758_v42 = vld [vmem:[%s10989_s23 + $0x22c] ss:$16 sps:$4 sm:$0xff]  }
 0x4d9   : > { %v5975_v58 = vmul.f32 %v5777_v15, %v1121_v25  ;;  %5435 = vmatmul.mubr.bf16.gmra.mrb[92].mxu1 %v10755_v23  ;;  %v10757_v15 = vld [vmem:[%s10989_s23 + $0x208] ss:$16 sps:$4 sm:$0xff]  }
 0x4da   : > { %v5973_v21 = vmul.f32 %v5769_v20, %v1111_v26  ;;  %8723 = vmatprep.mubr.msk.bf16.mxu1 %vm3484_vm2, %v10756_v39  ;;  %v9504_v20 = vadd.f32 %v13391_v53, %v14084_v16  ;;  %v16722_v23 = vld [vmem:[#allocation36_spill] sm:$0xff]  ;;  %v9506_v53 = vadd.f32 %v13395_v29, %v14084_v16 }
 0x4db   : > { %v6029_v6 = vpack.c.bf16 %v5975_v58, %v5974_v28  ;;  %v1131_v28 = vadd.f32 %v16721_v63, %v14092_v17  ;;  %v16726_v63 = vld [vmem:[#allocation44_spill] sm:$0xff] }
 0x4dc   : > { %v9086_v38 = vpop.f32.mrb[116].mxu0  ;;  %v6028_v49 = vpack.c.bf16 %v5973_v21, %v5972_v45  ;;  %v1157_v21 = vadd.f32 %v16722_v23, %v14092_v17 }
 0x4dd   : > { %v5790_v18 = vadd.f32 %v9500_v61, %v9086_v38  ;;  %v5781_v1 = vpop.f32.mrb[117].mxu0  ;;  %v9510_v61 = vadd.f32 %v13408_v43, %v14084_v16  ;;  %v10624_v38 = vld [vmem:[%s15973_s4 + $0xb0] sm:$0xff]  }
 0x4de   : > { %v5782_v46 = vadd.f32 %v9496_v51, %v5781_v1  ;;  %v9087_v13 = vpop.f32.mrb[118].mxu0  ;;  %9160 = vmatprep.mubr.bf16.mxu0 %v6028_v49  ;;  %v16723_v51 = vld [vmem:[#allocation32_spill] sm:$0xff]  ;;  %9220 = vmatprep.subr.bf16.mxu0 %v10624_v38 }
 0x4df   : > { %v5978_v7 = vmul.f32 %v5790_v18, %v1137_v50  ;;  %v5793_v54 = vadd.f32 %v9502_v32, %v9087_v13  ;;  %v5784_v19 = vpop.f32.mrb[119].mxu0  ;;  %9161 = vmatmul.mubr.bf16.gmra.mrb[176].mxu0 %v6029_v6  ;;  %v1147_v48 = vadd.f32 %v16723_v51, %v14092_v17  ;;  %v16724_v18 = vld [vmem:[#allocation39_spill] sm:$0xff] }
 0x4e0   : > { %v5976_v31 = vmul.f32 %v5782_v46, %v1127_v8  ;;  %v5785_v11 = vadd.f32 %v9498_v56, %v5784_v19  ;;  %v1161_v1 = vadd.f32 %v16724_v18, %v14092_v17  ;;  %v16725_v8 = vld [vmem:[#allocation35_spill] sm:$0xff]  ;;  %9221 = vmatpush3.bf16.msra.mxu0 %v10624_v38 }
 0x4e1   : > { %v5979_v25 = vmul.f32 %v5793_v54, %v1141_v47  ;;  %5443 = vmatmul.mubr.bf16.gmra.mrb[96].mxu1 %v10757_v15  ;;  %v1151_v46 = vadd.f32 %v16725_v8, %v14092_v17  ;;  %v10760_v47 = vld [vmem:[%s10989_s23 + $0x24c] ss:$16 sps:$4 sm:$0xff]   ;;  %v9516_v54 = vadd.f32 %v13430_v55, %v14084_v16  ;;  %v9518_v15 = vadd.f32 %v13434_v60, %v14084_v16  ;;  %v16730_v60 = vld [vmem:[#allocation43_spill] sm:$0xff] }
 0x4e2   : > { %v5977_v52 = vmul.f32 %v5785_v11, %v1131_v28  ;;  %8724 = vmatprep.mubr.msk.bf16.mxu1 %vm3484_vm2, %v10758_v42  ;;  %v1177_v28 = vadd.f32 %v16726_v63, %v14092_v17  ;;  %v10761_v51 = vld [vmem:[%s10989_s23 + $0x248] ss:$16 sps:$4 sm:$0xff]  }
 0x4e3   : > { %v6031_v45 = vpack.c.bf16 %v5979_v25, %v5978_v7  ;;  %v10759_v7 = vld [vmem:[%s10989_s23 + $0x228] ss:$16 sps:$4 sm:$0xff]  }
 0x4e4   : > { %v9090_v26 = vpop.f32.mrb[120].mxu0  ;;  %v6030_v58 = vpack.c.bf16 %v5977_v52, %v5976_v31  ;;  %v16727_v52 = vld [vmem:[#allocation40_spill] sm:$0xff] }
 0x4e5   : > { %v5806_v39 = vadd.f32 %v9508_v4, %v9090_v26  ;;  %v5797_v6 = vpop.f32.mrb[121].mxu0  ;;  %v1167_v42 = vadd.f32 %v16727_v52, %v14092_v17  ;;  %v16728_v4 = vld [vmem:[#allocation404_spill] sm:$0xff]  ;;  %v9532_v52 = vadd.f32 %v13512_v57, %v14084_v16 }
 0x4e6   : > { %v5798_v49 = vadd.f32 %v9504_v20, %v5797_v6  ;;  %v9091_v37 = vpop.f32.mrb[122].mxu0  ;;  %9164 = vmatprep.mubr.bf16.mxu0 %v6030_v58  ;;  %v9514_v14 = vadd.f32 %v16728_v4, %v14084_v16  ;;  %v16729_v20 = vld [vmem:[#allocation47_spill] sm:$0xff]  ;;  %v1171_v6 = vadd.f32 %v16730_v60, %v14092_v17  ;;  %v16737_v57 = vld [vmem:[#allocation68_spill] sm:$0xff] }
 0x4e7   : > { %v5982_v50 = vmul.f32 %v5806_v39, %v1157_v21  ;;  %v5809_v43 = vadd.f32 %v9510_v61, %v9091_v37  ;;  %v5800_v32 = vpop.f32.mrb[123].mxu0  ;;  %9165 = vmatmul.mubr.bf16.gmra.mrb[180].mxu0 %v6031_v45  ;;  %v1181_v58 = vadd.f32 %v16729_v20, %v14092_v17  ;;  %v9524_v37 = vadd.f32 %v13464_v9, %v14084_v16 }
 0x4e8   : > { %v5980_v59 = vmul.f32 %v5798_v49, %v1147_v48  ;;  %v5801_v13 = vadd.f32 %v9506_v53, %v5800_v32  ;;  %v10762_v49 = vld [vmem:[%s10989_s23 + $0x26c] ss:$16 sps:$4 sm:$0xff]   ;;  %v9522_v9 = vadd.f32 %v13451_v35, %v14084_v16  ;;  %v1207_v60 = vadd.f32 %v16737_v57, %v14092_v17 }
 0x4e9   : > { %v5983_v56 = vmul.f32 %v5809_v43, %v1161_v1  ;;  %5451 = vmatmul.mubr.bf16.gmra.mrb[100].mxu1 %v10759_v7  ;;  %v9526_v43 = vadd.f32 %v13472_v22, %v14084_v16  ;;  %v16731_v32 = vld [vmem:[#allocation60_spill] sm:$0xff]  ;;  %v9546_v57 = vadd.f32 %v13613_v33, %v14084_v16 }
 0x4ea   : > { %v5981_v41 = vmul.f32 %v5801_v13, %v1151_v46  ;;  %8725 = vmatprep.mubr.msk.bf16.mxu1 %vm3484_vm2, %v10760_v47  ;;  %v10625_v13 = vld [vmem:[%s15973_s4 + $0xb8] sm:$0xff]   ;;  %v16733_v47 = vld [vmem:[#allocation63_spill] sm:$0xff] }
 0x4eb   : > { %v6033_v29 = vpack.c.bf16 %v5983_v56, %v5982_v50  ;;  %v9520_v50 = vadd.f32 %v13443_v44, %v14084_v16  ;;  %v16732_v56 = vld [vmem:[#allocation52_spill] sm:$0xff]  ;;  %9222 = vmatprep.subr.bf16.mxu0 %v10625_v13 }
 0x4ec   : > { %v9094_v19 = vpop.f32.mrb[124].mxu0  ;;  %v6032_v31 = vpack.c.bf16 %v5981_v41, %v5980_v59  ;;  %v1197_v59 = vadd.f32 %v16731_v32, %v14092_v17  ;;  %v1187_v44 = vadd.f32 %v16732_v56, %v14092_v17  ;;  %9223 = vmatpush3.bf16.msra.mxu0 %v10625_v13  ;;  %v10766_v32 = vld [vmem:[%s10989_s23 + $0x2ac] ss:$16 sps:$4 sm:$0xff]   ;;  %v9542_v56 = vadd.f32 %v13574_v2, %v14084_v16 }
 0x4ed   : > { %v5822_v11 = vadd.f32 %v9516_v54, %v9094_v19  ;;  %v5813_v25 = vpop.f32.mrb[125].mxu0 }
 0x4ee   : > { %v5814_v45 = vadd.f32 %v9512_v10, %v5813_v25  ;;  %v9095_v55 = vpop.f32.mrb[126].mxu0  ;;  %9168 = vmatprep.mubr.bf16.mxu0 %v6032_v31  ;;  %v16734_v31 = vld [vmem:[#allocation55_spill] sm:$0xff] }
 0x4ef   : > { %v5986_v26 = vmul.f32 %v5822_v11, %v1177_v28  ;;  %v5825_v23 = vadd.f32 %v9518_v15, %v9095_v55  ;;  %v5816_v21 = vpop.f32.mrb[127].mxu0  ;;  %9169 = vmatmul.mubr.bf16.gmra.mrb[184].mxu0 %v6033_v29  ;;  %v1201_v29 = vadd.f32 %v16733_v47, %v14092_v17  ;;  %v1191_v35 = vadd.f32 %v16734_v31, %v14092_v17  ;;  %v10763_v11 = vld [vmem:[%s10989_s23 + $0x268] ss:$16 sps:$4 sm:$0xff]   ;;  %v10764_v15 = vld [vmem:[%s10989_s23 + $0x28c] ss:$16 sps:$4 sm:$0xff]  }
 0x4f0   : > { %v5984_v39 = vmul.f32 %v5814_v45, %v1167_v42  ;;  %v5817_v61 = vadd.f32 %v9514_v14, %v5816_v21  ;;  %v9528_v45 = vadd.f32 %v13491_v12, %v14084_v16  ;;  %v9534_v14 = vadd.f32 %v13520_v3, %v14084_v16  ;;  %v16736_v21 = vld [vmem:[#allocation423_spill] sm:$0xff] }
 0x4f1   : > { %v5987_v38 = vmul.f32 %v5825_v23, %v1181_v58  ;;  %5459 = vmatmul.mubr.bf16.gmra.mrb[104].mxu1 %v10761_v51  ;;  %v9538_v47 = vadd.f32 %v13544_v34, %v14084_v16 }
 0x4f2   : > { %v5985_v48 = vmul.f32 %v5817_v61, %v1171_v6  ;;  %8726 = vmatprep.mubr.msk.bf16.mxu1 %vm3484_vm2, %v10762_v49 }
 0x4f3   : > { %v6035_v53 = vpack.c.bf16 %v5987_v38, %v5986_v26  ;;  %v16735_v26 = vld [vmem:[#allocation76_spill] sm:$0xff]  ;;  %v16738_v38 = vld [vmem:[#allocation79_spill] sm:$0xff] }
 0x4f4   : > { %v9098_v18 = vpop.f32.mrb[128].mxu0  ;;  %v6034_v1 = vpack.c.bf16 %v5985_v48, %v5984_v39  ;;  %v1217_v20 = vadd.f32 %v16735_v26, %v14092_v17  ;;  %v9530_v39 = vadd.f32 %v16736_v21, %v14084_v16  ;;  %v1221_v3 = vadd.f32 %v16738_v38, %v14092_v17 }
 0x4f5   : > { %v5838_v8 = vadd.f32 %v9524_v37, %v9098_v18  ;;  %v5829_v46 = vpop.f32.mrb[129].mxu0  ;;  %v16739_v37 = vld [vmem:[#allocation71_spill] sm:$0xff] }
 0x4f6   : > { %v5830_v7 = vadd.f32 %v9520_v50, %v5829_v46  ;;  %v9099_v41 = vpop.f32.mrb[130].mxu0  ;;  %9172 = vmatprep.mubr.bf16.mxu0 %v6034_v1  ;;  %v10765_v1 = vld [vmem:[%s10989_s23 + $0x288] ss:$16 sps:$4 sm:$0xff]   ;;  %v9536_v46 = vadd.f32 %v13536_v30, %v14084_v16 }
 0x4f7   : > { %v5990_v22 = vmul.f32 %v5838_v8, %v1197_v59  ;;  %v5841_v54 = vadd.f32 %v9526_v43, %v9099_v41  ;;  %v5832_v19 = vpop.f32.mrb[131].mxu0  ;;  %9173 = vmatmul.mubr.bf16.gmra.mrb[188].mxu0 %v6035_v53  ;;  %v1211_v53 = vadd.f32 %v16739_v37, %v14092_v17  ;;  %v9540_v59 = vadd.f32 %v13565_v36, %v14084_v16  ;;  %v16741_v36 = vld [vmem:[#allocation84_spill] sm:$0xff] }
 0x4f8   : > { %v5988_v10 = vmul.f32 %v5830_v7, %v1187_v44  ;;  %v5833_v63 = vadd.f32 %v9522_v9, %v5832_v19  ;;  %v16740_v44 = vld [vmem:[#allocation92_spill] sm:$0xff] }
 0x4f9   : > { %v5991_v28 = vmul.f32 %v5841_v54, %v1201_v29  ;;  %5467 = vmatmul.mubr.bf16.gmra.mrb[108].mxu1 %v10763_v11  ;;  %v1237_v7 = vadd.f32 %v16740_v44, %v14092_v17  ;;  %v1227_v29 = vadd.f32 %v16741_v36, %v14092_v17 }
 0x4fa   : > { %v5989_v25 = vmul.f32 %v5833_v63, %v1191_v35  ;;  %8727 = vmatprep.mubr.msk.bf16.mxu1 %vm3484_vm2, %v10764_v15  ;;  %v10767_v15 = vld [vmem:[%s10989_s23 + $0x2a8] ss:$16 sps:$4 sm:$0xff]  }
 0x4fb   : > { %v6037_v42 = vpack.c.bf16 %v5991_v28, %v5990_v22  ;;  %v16743_v28 = vld [vmem:[#allocation87_spill] sm:$0xff] }
 0x4fc   : > { %v9102_v55 = vpop.f32.mrb[132].mxu0  ;;  %v6036_v4 = vpack.c.bf16 %v5989_v25, %v5988_v10  ;;  %v16742_v10 = vld [vmem:[#allocation95_spill] sm:$0xff]  ;;  %v1231_v11 = vadd.f32 %v16743_v28, %v14092_v17 }
 0x4fd   : > { %v5854_v58 = vadd.f32 %v9532_v52, %v9102_v55  ;;  %v5845_v23 = vpop.f32.mrb[133].mxu0  ;;  %v1241_v2 = vadd.f32 %v16742_v10, %v14092_v17  ;;  %v16752_v10 = vld [vmem:[#allocation51_spill] sm:$0xff] }
 0x4fe   : > { %v5846_v6 = vadd.f32 %v9528_v45, %v5845_v23  ;;  %v9103_v12 = vpop.f32.mrb[134].mxu0  ;;  %9176 = vmatprep.mubr.bf16.mxu0 %v6036_v4  ;;  %v9548_v45 = vadd.f32 %v13636_v5, %v14084_v16  ;;  %v9544_v4 = vadd.f32 %v13601_v24, %v14084_v16  ;;  %v16745_v5 = vld [vmem:[#allocation100_spill] sm:$0xff] }
 0x4ff   : > { %v5994_v61 = vmul.f32 %v5854_v58, %v1217_v20  ;;  %v5857_v51 = vadd.f32 %v9534_v14, %v9103_v12  ;;  %v5848_v48 = vpop.f32.mrb[135].mxu0  ;;  %9177 = vmatmul.mubr.bf16.gmra.mrb[192].mxu0 %v6037_v42  ;;  %v10768_v42 = vld [vmem:[%s10989_s23 + $0x2cc] ss:$16 sps:$4 sm:$0xff]   ;;  %v9550_v20 = vadd.f32 %v13645_v62, %v14084_v16 }
 0x500   : > { %v5992_v49 = vmul.f32 %v5846_v6, %v1207_v60  ;;  %v5849_v50 = vadd.f32 %v9530_v39, %v5848_v48  ;;  %v16744_v58 = vld [vmem:[#allocation108_spill] sm:$0xff]  ;;  %v1247_v60 = vadd.f32 %v16745_v5, %v14092_v17  ;;  %v16747_v48 = vld [vmem:[#allocation103_spill] sm:$0xff] }
 0x501   : > { %v5995_v18 = vmul.f32 %v5857_v51, %v1221_v3  ;;  %5475 = vmatmul.mubr.bf16.gmra.mrb[112].mxu1 %v10765_v1  ;;  %v1257_v23 = vadd.f32 %v16744_v58, %v14092_v17  ;;  %v9556_v1 = vadd.f32 %v13696_v40, %v14084_v16  ;;  %v16750_v40 = vld [vmem:[#allocation48_spill] sm:$0xff] }
 0x502   : > { %v5993_v43 = vmul.f32 %v5849_v50, %v1211_v53  ;;  %8728 = vmatprep.mubr.msk.bf16.mxu1 %vm3484_vm2, %v10766_v32  ;;  %v10769_v53 = vld [vmem:[%s10989_s23 + $0x2c8] ss:$16 sps:$4 sm:$0xff]   ;;  %v9552_v32 = vadd.f32 %v13671_v0, %v14084_v16 }
 0x503   : > { %v6039_v8 = vpack.c.bf16 %v5995_v18, %v5994_v61  ;;  %v16746_v61 = vld [vmem:[#allocation111_spill] sm:$0xff]  ;;  %v10770_v18 = vld [vmem:[%s10989_s23 + $0x2ec] ss:$16 sps:$4 sm:$0xff]  }
 0x504   : > { %v9106_v13 = vpop.f32.mrb[136].mxu0  ;;  %v6038_v9 = vpack.c.bf16 %v5993_v43, %v5992_v49  ;;  %v1261_v62 = vadd.f32 %v16746_v61, %v14092_v17  ;;  %v1251_v49 = vadd.f32 %v16747_v48, %v14092_v17  ;;  %v16759_v61 = vld [vmem:[#allocation75_spill] sm:$0xff] }
 0x505   : > { %v5870_v41 = vadd.f32 %v9540_v59, %v9106_v13  ;;  %v5861_v22 = vpop.f32.mrb[137].mxu0  ;;  %v16748_v13 = vld [vmem:[#allocation57_spill] sm:$0xff]  ;;  %v16760_v48 = vld [vmem:[#allocation67_spill] sm:$0xff] }
 0x506   : > { %v5862_v54 = vadd.f32 %v9536_v46, %v5861_v22  ;;  %v9107_v30 = vpop.f32.mrb[138].mxu0  ;;  %9180 = vmatprep.mubr.bf16.mxu0 %v6038_v9  ;;  %v9558_v46 = vadd.f32 %v13704_v27, %v14084_v16  ;;  %v1277_v9 = vadd.f32 %v16748_v13, %v14092_v17  ;;  %v1267_v22 = vadd.f32 %v16750_v40, %v14092_v17 }
 0x507   : > { %v5998_v19 = vmul.f32 %v5870_v41, %v1237_v7  ;;  %v5873_v31 = vadd.f32 %v9542_v56, %v9107_v30  ;;  %v5864_v35 = vpop.f32.mrb[139].mxu0  ;;  %9181 = vmatmul.mubr.bf16.gmra.mrb[196].mxu0 %v6039_v8  ;;  %v16749_v7 = vld [vmem:[#allocation460_spill] sm:$0xff] }
 0x508   : > { %v5996_v63 = vmul.f32 %v5862_v54, %v1227_v29  ;;  %v5865_v25 = vadd.f32 %v9538_v47, %v5864_v35  ;;  %v9554_v41 = vadd.f32 %v16749_v7, %v14084_v16  ;;  %v16751_v29 = vld [vmem:[#allocation59_spill] sm:$0xff] }
 0x509   : > { %v5999_v34 = vmul.f32 %v5873_v31, %v1241_v2  ;;  %5483 = vmatmul.mubr.bf16.gmra.mrb[116].mxu1 %v10767_v15  ;;  %v1281_v27 = vadd.f32 %v16751_v29, %v14092_v17  ;;  %v1271_v2 = vadd.f32 %v16752_v10, %v14092_v17 }
 0x50a   : > { %v5997_v52 = vmul.f32 %v5865_v25, %v1231_v11  ;;  %8729 = vmatprep.mubr.msk.bf16.mxu1 %vm3484_vm2, %v10768_v42  ;;  %v10772_v11 = vld [vmem:[%s10989_s23 + $0x30c] ss:$16 sps:$4 sm:$0xff]  }
 0x50b   : > { %v6041_v55 = vpack.c.bf16 %v5999_v34, %v5998_v19  ;;  %v16753_v25 = vld [vmem:[#allocation30_spill] sm:$0xff] }
 0x50c   : > { %v9110_v14 = vpop.f32.mrb[140].mxu0  ;;  %v6040_v26 = vpack.c.bf16 %v5997_v52, %v5996_v63  ;;  %v10771_v63 = vld [vmem:[%s10989_s23 + $0x2e8] ss:$16 sps:$4 sm:$0xff]   ;;  %v9564_v34 = vadd.f32 %v16753_v25, %v14084_v16 }
 0x50d   : > { %v5886_v21 = vadd.f32 %v9548_v45, %v9110_v14  ;;  %v5877_v39 = vpop.f32.mrb[141].mxu0  ;;  %v16754_v52 = vld [vmem:[#allocation26_spill] sm:$0xff] }
 0x50e   : > { %v5878_v6 = vadd.f32 %v9544_v4, %v5877_v39  ;;  %v9111_v24 = vpop.f32.mrb[142].mxu0  ;;  %9184 = vmatprep.mubr.bf16.mxu0 %v6040_v26  ;;  %v9560_v42 = vadd.f32 %v16754_v52, %v14084_v16  ;;  %v16755_v4 = vld [vmem:[#allocation476_spill] sm:$0xff]  ;;  %v16756_v26 = vld [vmem:[#allocation73_spill] sm:$0xff]  ;;  %v16769_v52 = vld [vmem:[#allocation78_spill] sm:$0xff] }
 0x50f   : > { %v6002_v12 = vmul.f32 %v5886_v21, %v1257_v23  ;;  %v5889_v38 = vadd.f32 %v9550_v20, %v9111_v24  ;;  %v5880_v3 = vpop.f32.mrb[143].mxu0  ;;  %9185 = vmatmul.mubr.bf16.gmra.mrb[200].mxu0 %v6041_v55  ;;  %v9566_v14 = vadd.f32 %v16755_v4, %v14084_v16  ;;  %v1297_v20 = vadd.f32 %v16756_v26, %v14092_v17  ;;  %v16757_v21 = vld [vmem:[#allocation472_spill] sm:$0xff] }
 0x510   : > { %v6000_v51 = vmul.f32 %v5878_v6, %v1247_v60  ;;  %v5881_v37 = vadd.f32 %v9546_v57, %v5880_v3  ;;  %v9562_v39 = vadd.f32 %v16757_v21, %v14084_v16  ;;  %v16758_v57 = vld [vmem:[#allocation64_spill] sm:$0xff] }
 0x511   : > { %v6003_v33 = vmul.f32 %v5889_v38, %v1261_v62  ;;  %5491 = vmatmul.mubr.bf16.gmra.mrb[120].mxu1 %v10769_v53  ;;  %v1287_v5 = vadd.f32 %v16758_v57, %v14092_v17  ;;  %v10626_v24 = vld [vmem:[%s15973_s4 + $0xc8] sm:$0xff]   ;;  %v1301_v62 = vadd.f32 %v16759_v61, %v14092_v17 }
 0x512   : > { %v6001_v50 = vmul.f32 %v5881_v37, %v1251_v49  ;;  %8730 = vmatprep.mubr.msk.bf16.mxu1 %vm3484_vm2, %v10770_v18  ;;  %v1291_v49 = vadd.f32 %v16760_v48, %v14092_v17  ;;  %9290 = vmatprep.subr.bf16.mxu1 %v10626_v24  ;;  %v10773_v53 = vld [vmem:[%s10989_s23 + $0x308] ss:$16 sps:$4 sm:$0xff]   ;;  %v10774_v18 = vld [vmem:[%s10989_s23 + $0x32c] ss:$16 sps:$4 sm:$0xff]  }
 0x513   : > { %v6043_v43 = vpack.c.bf16 %v6003_v33, %v6002_v12  ;;  %9291 = vmatpush3.bf16.msra.mxu1 %v10626_v24  ;;  %v10775_v25 = vld [vmem:[%s10989_s23 + $0x328] ss:$16 sps:$4 sm:$0xff]  }
 0x514   : > { %v9114_v59 = vpop.f32.mrb[144].mxu0  ;;  %v6042_v8 = vpack.c.bf16 %v6001_v50, %v6000_v51 }
 0x515   : > { %v5902_v56 = vadd.f32 %v9556_v1, %v9114_v59  ;;  %v5893_v44 = vpop.f32.mrb[145].mxu0  ;;  %v16761_v1 = vld [vmem:[#allocation46_spill] sm:$0xff] }
 0x516   : > { %v5894_v47 = vadd.f32 %v9552_v32, %v5893_v44  ;;  %v9115_v0 = vpop.f32.mrb[146].mxu0  ;;  %9188 = vmatprep.mubr.bf16.mxu0 %v6042_v8  ;;  %v16762_v59 = vld [vmem:[#allocation38_spill] sm:$0xff]  ;;  %v16764_v44 = vld [vmem:[#allocation89_spill] sm:$0xff] }
 0x517   : > { %v6006_v36 = vmul.f32 %v5902_v56, %v1277_v9  ;;  %v5905_v54 = vadd.f32 %v9558_v46, %v9115_v0  ;;  %v5896_v30 = vpop.f32.mrb[147].mxu0  ;;  %9189 = vmatmul.mubr.bf16.gmra.mrb[204].mxu0 %v6043_v43  ;;  %v9572_v43 = vadd.f32 %v16761_v1, %v14084_v16  ;;  %v9568_v8 = vadd.f32 %v16762_v59, %v14084_v16  ;;  %v16763_v9 = vld [vmem:[#allocation484_spill] sm:$0xff] }
 0x518   : > { %v6004_v19 = vmul.f32 %v5894_v47, %v1267_v22  ;;  %v5897_v31 = vadd.f32 %v9554_v41, %v5896_v30  ;;  %v9574_v56 = vadd.f32 %v16763_v9, %v14084_v16  ;;  %v1317_v7 = vadd.f32 %v16764_v44, %v14092_v17  ;;  %v16765_v22 = vld [vmem:[#allocation480_spill] sm:$0xff]  ;;  %v16767_v30 = vld [vmem:[#allocation91_spill] sm:$0xff] }
 0x519   : > { %v6007_v35 = vmul.f32 %v5905_v54, %v1281_v27  ;;  %5499 = vmatmul.mubr.bf16.gmra.mrb[124].mxu1 %v10771_v63  ;;  %v9570_v47 = vadd.f32 %v16765_v22, %v14084_v16  ;;  %v16766_v0 = vld [vmem:[#allocation80_spill] sm:$0xff] }
 0x51a   : > { %v6005_v28 = vmul.f32 %v5897_v31, %v1271_v2  ;;  %8731 = vmatprep.mubr.msk.bf16.mxu1 %vm3484_vm2, %v10772_v11  ;;  %v10778_v1 = vld [vmem:[%s10989_s23 + $0x36c] ss:$16 sps:$4 sm:$0xff]   ;;  %v10781_v22 = vld [vmem:[%s10989_s23 + $0x388] ss:$16 sps:$4 sm:$0xff]  }
 0x51b   : > { %v6045_v15 = vpack.c.bf16 %v6007_v35, %v6006_v36  ;;  %v1307_v36 = vadd.f32 %v16766_v0, %v14092_v17  ;;  %v16768_v35 = vld [vmem:[#allocation83_spill] sm:$0xff]  ;;  %v10780_v9 = vld [vmem:[%s10989_s23 + $0x38c] ss:$16 sps:$4 sm:$0xff]  }
 0x51c   : > { %v9118_v45 = vpop.f32.mrb[148].mxu0  ;;  %v6044_v55 = vpack.c.bf16 %v6005_v28, %v6004_v19  ;;  %v1321_v19 = vadd.f32 %v16767_v30, %v14092_v17  ;;  %v1311_v63 = vadd.f32 %v16768_v35, %v14092_v17  ;;  %v10784_v30 = vld [vmem:[%s10989_s23 + $0x3cc] ss:$16 sps:$4 sm:$0xff]   ;;  %v10785_v35 = vld [vmem:[%s10989_s23 + $0x3c8] ss:$16 sps:$4 sm:$0xff]  }
 0x51d   : > { %v5918_v58 = vadd.f32 %v9564_v34, %v9118_v45  ;;  %v5909_v23 = vpop.f32.mrb[149].mxu0 }
 0x51e   : > { %v5910_v60 = vadd.f32 %v9560_v42, %v5909_v23  ;;  %v9119_v6 = vpop.f32.mrb[150].mxu0  ;;  %9192 = vmatprep.mubr.bf16.mxu0 %v6044_v55  ;;  %v9580_v42 = vadd.f32 %v16769_v52, %v14084_v16  ;;  %v16770_v55 = vld [vmem:[#allocation62_spill] sm:$0xff]  ;;  %v16772_v23 = vld [vmem:[#allocation105_spill] sm:$0xff] }
 0x51f   : > { %v6010_v12 = vmul.f32 %v5918_v58, %v1297_v20  ;;  %v5921_v38 = vadd.f32 %v9566_v14, %v9119_v6  ;;  %v5912_v3 = vpop.f32.mrb[151].mxu0  ;;  %9193 = vmatmul.mubr.bf16.gmra.mrb[208].mxu0 %v6045_v15  ;;  %v10776_v15 = vld [vmem:[%s10989_s23 + $0x34c] ss:$16 sps:$4 sm:$0xff]   ;;  %v9576_v4 = vadd.f32 %v16770_v55, %v14084_v16  ;;  %v1337_v21 = vadd.f32 %v16772_v23, %v14092_v17 }
 0x520   : > { %v6008_v51 = vmul.f32 %v5910_v60, %v1287_v5  ;;  %v5913_v37 = vadd.f32 %v9562_v39, %v5912_v3  ;;  %v16771_v20 = vld [vmem:[#allocation492_spill] sm:$0xff]  ;;  %v10628_v55 = vld [vmem:[%s15973_s4 + $0xd8] sm:$0xff]  }
 0x521   : > { %v6011_v33 = vmul.f32 %v5921_v38, %v1301_v62  ;;  %5507 = vmatmul.mubr.bf16.gmra.mrb[128].mxu1 %v10773_v53  ;;  %v9582_v58 = vadd.f32 %v16771_v20, %v14084_v16  ;;  %v16773_v5 = vld [vmem:[#allocation488_spill] sm:$0xff]  ;;  %v16775_v38 = vld [vmem:[#allocation107_spill] sm:$0xff] }
 0x522   : > { %v6009_v50 = vmul.f32 %v5913_v37, %v1291_v49  ;;  %8732 = vmatprep.mubr.msk.bf16.mxu1 %vm3484_vm2, %v10774_v18  ;;  %v9578_v60 = vadd.f32 %v16773_v5, %v14084_v16  ;;  %v16774_v6 = vld [vmem:[#allocation96_spill] sm:$0xff]  ;;  %v1341_v3 = vadd.f32 %v16775_v38, %v14092_v17  ;;  %v16776_v37 = vld [vmem:[#allocation99_spill] sm:$0xff] }
 0x523   : > { %v6047_v32 = vpack.c.bf16 %v6011_v33, %v6010_v12  ;;  %v1327_v24 = vadd.f32 %v16774_v6, %v14092_v17  ;;  %v1331_v33 = vadd.f32 %v16776_v37, %v14092_v17  ;;  %v10629_v38 = vld [vmem:[%s15973_s4 + $0xe0] sm:$0xff]  }
 0x524   : > { %v9122_v46 = vpop.f32.mrb[152].mxu0  ;;  %v6046_v13 = vpack.c.bf16 %v6009_v50, %v6008_v51  ;;  %v10777_v50 = vld [vmem:[%s10989_s23 + $0x348] ss:$16 sps:$4 sm:$0xff]  }
 0x525   : > { %v5934_v41 = vadd.f32 %v9572_v43, %v9122_v46  ;;  %v5925_v40 = vpop.f32.mrb[153].mxu0 }
 0x526   : > { %v5926_v29 = vadd.f32 %v9568_v8, %v5925_v40  ;;  %v9123_v27 = vpop.f32.mrb[154].mxu0  ;;  %9196 = vmatprep.mubr.bf16.mxu0 %v6046_v13  ;;  %v10779_v13 = vld [vmem:[%s10989_s23 + $0x368] ss:$16 sps:$4 sm:$0xff]  }
 0x527   : > { %v6014_v54 = vmul.f32 %v5934_v41, %v1317_v7  ;;  %v5937_v10 = vadd.f32 %v9574_v56, %v9123_v27  ;;  %v5928_v2 = vpop.f32.mrb[155].mxu0  ;;  %9197 = vmatmul.mubr.bf16.gmra.mrb[212].mxu0 %v6047_v32  ;;  %v10627_v41 = vld [vmem:[%s15973_s4 + $0xd0] sm:$0xff]  }
 0x528   : > { %v6012_v31 = vmul.f32 %v5926_v29, %v1307_v36  ;;  %v5929_v28 = vadd.f32 %v9570_v47, %v5928_v2  ;;  %9292 = vmatprep.subr.bf16.mxu1 %v10627_v41  ;;  %v10782_v47 = vld [vmem:[%s10989_s23 + $0x3ac] ss:$16 sps:$4 sm:$0xff]  }
 0x529   : > { %v6015_v11 = vmul.f32 %v5937_v10, %v1321_v19  ;;  %5515 = vmatmul.mubr.bf16.gmra.mrb[132].mxu1 %v10775_v25 }
 0x52a   : > { %v6013_v34 = vmul.f32 %v5929_v28, %v1311_v63  ;;  %8733 = vmatprep.mubr.msk.bf16.mxu1 %vm3484_vm2, %v10776_v15  ;;  %9293 = vmatpush3.bf16.msra.mxu1 %v10627_v41  ;;  %v10786_v63 = vld [vmem:[%s10989_s23 + $0x3ec] ss:$16 sps:$4 sm:$0xff]   ;;  %v10787_v15 = vld [vmem:[%s10989_s23 + $0x3e8] ss:$16 sps:$4 sm:$0xff]  }
 0x52b   : > { %v6049_v45 = vpack.c.bf16 %v6015_v11, %v6014_v54  ;;  %v10783_v54 = vld [vmem:[%s10989_s23 + $0x3a8] ss:$16 sps:$4 sm:$0xff]   ;;  %9294 = vmatprep.subr.bf16.mxu1 %v10628_v55 }
 0x52c   : > { %v9126_v14 = vpop.f32.mrb[156].mxu0  ;;  %v6048_v26 = vpack.c.bf16 %v6013_v34, %v6012_v31 }
 0x52d   : > { %v5950_v39 = vadd.f32 %v9580_v42, %v9126_v14  ;;  %v5941_v57 = vpop.f32.mrb[157].mxu0 }
 0x52e   : > { %v5942_v12 = vadd.f32 %v9576_v4, %v5941_v57  ;;  %v9127_v61 = vpop.f32.mrb[158].mxu0  ;;  %9200 = vmatprep.mubr.bf16.mxu0 %v6048_v26  ;;  %9295 = vmatpush3.bf16.msra.mxu1 %v10628_v55 }
 0x52f   : > { %v6018_v62 = vmul.f32 %v5950_v39, %v1337_v21  ;;  %v5953_v51 = vadd.f32 %v9582_v58, %v9127_v61  ;;  %v5944_v48 = vpop.f32.mrb[159].mxu0  ;;  %9201 = vmatmul.mubr.bf16.gmra.mrb[216].mxu0 %v6049_v45  ;;  %9296 = vmatprep.subr.bf16.mxu1 %v10629_v38 }
 0x530   : > { %v6016_v49 = vmul.f32 %v5942_v12, %v1327_v24  ;;  %v5945_v16 = vadd.f32 %v9578_v60, %v5944_v48 }
 0x531   : > { %v6019_v53 = vmul.f32 %v5953_v51, %v1341_v3  ;;  %5523 = vmatmul.mubr.bf16.gmra.mrb[136].mxu1 %v10777_v50 }
 0x532   : > { %v6017_v18 = vmul.f32 %v5945_v16, %v1331_v33  ;;  %8734 = vmatprep.mubr.msk.bf16.mxu1 %vm3484_vm2, %v10778_v1  ;;  %9297 = vmatpush3.bf16.msra.mxu1 %v10629_v38  ;;  %v16777_v33 = vld [vmem:[#allocation3_spill] sm:$0xff] }
 0x533   : > { %v6051_v43 = vpack.c.bf16 %v6019_v53, %v6018_v62  ;;  %v16030_v16 = vsub.s32 2, %v16777_v33  ;;  %v16778_v1 = vsub.s32 1, %v16777_v33 }
 0x534   : > { %v6050_v32 = vpack.c.bf16 %v6017_v18, %v6016_v49  ;;  %v14428_v59 = vpop.f32.mrb[32].mxu1  ;;  %v14500_v18 = vld [vmem:[%s15975_s6] sm:$0x1f] }
 0x535   : > { %v5318_v8 = vpop.f32.mrb[33].mxu1 }
 0x536   : > { %9204 = vmatprep.mubr.bf16.mxu0 %v6050_v32  ;;  %v14430_v46 = vpop.f32.mrb[34].mxu1 }
 0x537   : > { %9205 = vmatmul.mubr.bf16.gmra.mrb[220].mxu0 %v6051_v43  ;;  %v5321_v17 = vpop.f32.mrb[35].mxu1  ;;  %v14505_v43 = vrot.slane %v14500_v18, %v16778_v1 }
 0x538   : > { %v14512_v17 = vld [vmem:[%s15972_s3] sm:$0x3f] }
 0x539   : > { %5531 = vmatmul.mubr.bf16.gmra.mrb[140].mxu1 %v10779_v13  ;;  %v14517_v13 = vrot.slane %v14512_v17, %v16030_v16 }
 0x53a   : > { %8735 = vmatprep.mubr.msk.bf16.mxu1 %vm3484_vm2, %v10780_v9  ;;  %v16779_v9 = vld [vmem:[#allocation371_spill] sm:$0xff] }
 0x53c   : > { %v14435_v56 = vpop.f32.mrb[36].mxu1 }
 0x53d   : > { %v5326_v44 = vpop.f32.mrb[37].mxu1 }
 0x53e   : > { %v14437_v7 = vpop.f32.mrb[38].mxu1  ;;  %v9461_v44 = vadd.f32 %v16779_v9, %v14505_v43  ;;  %v16787_v9 = vld [vmem:[#allocation377_spill] sm:$0xff] }
 0x53f   : > { %v5329_v40 = vpop.f32.mrb[39].mxu1 }
 0x540   : > { %v16780_v40 = vld [vmem:[#allocation368_spill] sm:$0xff] }
 0x541   : > { %5539 = vmatmul.mubr.bf16.gmra.mrb[144].mxu1 %v10781_v22  ;;  %v9457_v22 = vadd.f32 %v16780_v40, %v14505_v43  ;;  %v16788_v40 = vld [vmem:[#allocation374_spill] sm:$0xff] }
 0x542   : > { %8736 = vmatprep.mubr.msk.bf16.mxu1 %vm3484_vm2, %v10782_v47  ;;  %v16781_v47 = vld [vmem:[#allocation120_spill] sm:$0xff] }
 0x544   : > { %v14445_v0 = vpop.f32.mrb[40].mxu1 }
 0x545   : > { %v5334_v36 = vpop.f32.mrb[41].mxu1 }
 0x546   : > { %v14447_v29 = vpop.f32.mrb[42].mxu1  ;;  %v1388_v36 = vadd.f32 %v16781_v47, %v14517_v13 }
 0x547   : > { %v5337_v27 = vpop.f32.mrb[43].mxu1 }
 0x549   : > { %5547 = vmatmul.mubr.bf16.gmra.mrb[148].mxu1 %v10783_v54 }
 0x54a   : > { %8737 = vmatprep.mubr.msk.bf16.mxu1 %vm3484_vm2, %v10784_v30  ;;  %v16782_v30 = vld [vmem:[#allocation372_spill] sm:$0xff] }
 0x54c   : > { %v14452_v19 = vpop.f32.mrb[44].mxu1 }
 0x54d   : > { %v5342_v10 = vpop.f32.mrb[45].mxu1 }
 0x54e   : > { %v14454_v2 = vpop.f32.mrb[46].mxu1  ;;  %v9463_v10 = vadd.f32 %v16782_v30, %v14505_v43 }
 0x54f   : > { %v5345_v31 = vpop.f32.mrb[47].mxu1 }
 0x550   : > { %v16783_v31 = vld [vmem:[#allocation112_spill] sm:$0xff] }
 0x551   : > { %5555 = vmatmul.mubr.bf16.gmra.mrb[152].mxu1 %v10785_v35  ;;  %v1378_v35 = vadd.f32 %v16783_v31, %v14517_v13 }
 0x552   : > { %8738 = vmatprep.mubr.msk.bf16.mxu1 %vm3484_vm2, %v10786_v63 }
 0x554   : > { %v14459_v28 = vpop.f32.mrb[48].mxu1 }
 0x555   : > { %v5350_v11 = vpop.f32.mrb[49].mxu1 }
 0x556   : > { %v14461_v25 = vpop.f32.mrb[50].mxu1 }
 0x557   : > { %v5353_v34 = vpop.f32.mrb[51].mxu1 }
 0x558   : > { %v16784_v34 = vld [vmem:[#allocation370_spill] sm:$0xff] }
 0x559   : > { %5563 = vmatmul.mubr.bf16.gmra.mrb[156].mxu1 %v10787_v15  ;;  %v9459_v15 = vadd.f32 %v16784_v34, %v14505_v43 }
 0x55c   : > { %v14464_v52 = vpop.f32.mrb[52].mxu1 }
 0x55d   : > { %v5358_v42 = vpop.f32.mrb[53].mxu1 }
 0x55e   : > { %v14466_v45 = vpop.f32.mrb[54].mxu1 }
 0x55f   : > { %v5361_v4 = vpop.f32.mrb[55].mxu1 }
 0x560   : > { %v16785_v4 = vld [vmem:[#allocation122_spill] sm:$0xff] }
 0x564   : > { %v14471_v14 = vpop.f32.mrb[56].mxu1 }
 0x565   : > { %v5366_v26 = vpop.f32.mrb[57].mxu1 }
 0x566   : > { %v14473_v20 = vpop.f32.mrb[58].mxu1  ;;  %v1392_v26 = vadd.f32 %v16785_v4, %v14517_v13 }
 0x567   : > { %v5369_v58 = vpop.f32.mrb[59].mxu1 }
 0x56c   : > { %v14475_v23 = vpop.f32.mrb[60].mxu1 }
 0x56d   : > { %v5374_v21 = vpop.f32.mrb[61].mxu1 }
 0x56e   : > { %v14477_v39 = vpop.f32.mrb[62].mxu1 }
 0x56f   : > { %v5377_v57 = vpop.f32.mrb[63].mxu1 }
 0x574   : > { %v14479_v5 = vpop.f32.mrb[64].mxu1 }
 0x575   : > { %v5382_v60 = vpop.f32.mrb[65].mxu1 }
 0x576   : > { %v14481_v6 = vpop.f32.mrb[66].mxu1  ;;  %v10630_v60 = vld [vmem:[%s15973_s4 + $0xe8] sm:$0xff]  }
 0x577   : > { %v5385_v24 = vpop.f32.mrb[67].mxu1  ;;  %9298 = vmatprep.subr.bf16.mxu1 %v10630_v60 }
 0x578   : > { %9299 = vmatpush3.bf16.msra.mxu1 %v10630_v60 }
 0x57c   : > { %v14483_v12 = vpop.f32.mrb[68].mxu1 }
 0x57d   : > { %v5390_v61 = vpop.f32.mrb[69].mxu1 }
 0x57e   : > { %v14485_v62 = vpop.f32.mrb[70].mxu1  ;;  %v16786_v61 = vld [vmem:[#allocation114_spill] sm:$0xff] }
 0x57f   : > { %v5393_v3 = vpop.f32.mrb[71].mxu1  ;;  %v1382_v38 = vadd.f32 %v16786_v61, %v14517_v13 }
 0x584   : > { %v14490_v51 = vpop.f32.mrb[72].mxu1 }
 0x585   : > { %v5398_v48 = vpop.f32.mrb[73].mxu1 }
 0x586   : > { %v14492_v49 = vpop.f32.mrb[74].mxu1 }
 0x587   : > { %v5401_v37 = vpop.f32.mrb[75].mxu1 }
 0x58c   : > { %v14495_v53 = vpop.f32.mrb[76].mxu1 }
 0x58d   : > { %v5406_v50 = vpop.f32.mrb[77].mxu1 }
 0x58e   : > { %v14507_v32 = vpop.f32.mrb[78].mxu1 }
 0x58f   : > { %v5409_v8 = vpop.f32.mrb[79].mxu1 }
 0x592   : > { %v9146_v41 = vpop.f32.mrb[160].mxu0 }
 0x593   : > { %v6160_v27 = vadd.f32 %v9461_v44, %v9146_v41  ;;  %v6151_v54 = vpop.f32.mrb[161].mxu0  ;;  %v9469_v44 = vadd.f32 %v16787_v9, %v14505_v43 }
 0x594   : > { %v6152_v63 = vadd.f32 %v9457_v22, %v6151_v54  ;;  %v9147_v11 = vpop.f32.mrb[162].mxu0  ;;  %v14531_v42 = vpop.f32.mrb[80].mxu1  ;;  %v9465_v22 = vadd.f32 %v16788_v40, %v14505_v43 }
 0x595   : > { %v6408_v55 = vmul.f32 %v6160_v27, %v1388_v36  ;;  %v6163_v58 = vadd.f32 %v9463_v10, %v9147_v11  ;;  %v6154_v21 = vpop.f32.mrb[163].mxu0  ;;  %v5414_v57 = vpop.f32.mrb[81].mxu1  ;;  %v16789_v36 = vld [vmem:[#allocation136_spill] sm:$0xff]  ;;  %v16790_v10 = vld [vmem:[#allocation379_spill] sm:$0xff] }
 0x596   : > { %v6406_v24 = vmul.f32 %v6152_v63, %v1378_v35  ;;  %v6155_v3 = vadd.f32 %v9459_v15, %v6154_v21  ;;  %v14540_v48 = vpop.f32.mrb[82].mxu1  ;;  %v1408_v27 = vadd.f32 %v16789_v36, %v14517_v13  ;;  %v9471_v31 = vadd.f32 %v16790_v10, %v14505_v43  ;;  %v16791_v35 = vld [vmem:[#allocation128_spill] sm:$0xff]  ;;  %v16796_v36 = vld [vmem:[#allocation381_spill] sm:$0xff] }
 0x597   : > { %v6409_v37 = vmul.f32 %v6163_v58, %v1392_v26  ;;  %v5417_v50 = vpop.f32.mrb[83].mxu1  ;;  %v1398_v63 = vadd.f32 %v16791_v35, %v14517_v13  ;;  %v16792_v15 = vld [vmem:[#allocation376_spill] sm:$0xff]  ;;  %v16793_v58 = vld [vmem:[#allocation138_spill] sm:$0xff] }
 0x598   : > { %v6407_v1 = vmul.f32 %v6155_v3, %v1382_v38  ;;  %v1412_v21 = vadd.f32 %v16793_v58, %v14517_v13  ;;  %v16794_v38 = vld [vmem:[#allocation130_spill] sm:$0xff]  ;;  %v16800_v58 = vld [vmem:[#allocation383_spill] sm:$0xff] }
 0x599   : > { %v6471_v8 = vpack.c.bf16 %v6409_v37, %v6408_v55  ;;  %v9467_v55 = vadd.f32 %v16792_v15, %v14505_v43  ;;  %v1402_v3 = vadd.f32 %v16794_v38, %v14517_v13 }
 0x59a   : > { %v9150_v41 = vpop.f32.mrb[164].mxu0  ;;  %v6470_v47 = vpack.c.bf16 %v6407_v1, %v6406_v24 }
 0x59b   : > { %v6176_v54 = vadd.f32 %v9469_v44, %v9150_v41  ;;  %v6167_v30 = vpop.f32.mrb[165].mxu0  ;;  %v10631_v44 = vld [vmem:[%s15973_s4 + $0xf0] sm:$0xff]  }
 0x59c   : > { %v6168_v11 = vadd.f32 %v9465_v22, %v6167_v30  ;;  %v9151_v34 = vpop.f32.mrb[166].mxu0  ;;  %9224 = vmatprep.mubr.bf16.mxu0 %v6470_v47  ;;  %v14554_v4 = vpop.f32.mrb[84].mxu1  ;;  %v16795_v22 = vld [vmem:[#allocation384_spill] sm:$0xff]  ;;  %9300 = vmatprep.subr.bf16.mxu1 %v10631_v44 }
 0x59d   : > { %v6412_v26 = vmul.f32 %v6176_v54, %v1408_v27  ;;  %v6179_v57 = vadd.f32 %v9471_v31, %v9151_v34  ;;  %v6170_v60 = vpop.f32.mrb[167].mxu0  ;;  %9225 = vmatmul.mubr.bf16.vlgmr.msra.gmra.mrb[224].mxu0 %v6471_v8  ;;  %v5422_v24 = vpop.f32.mrb[85].mxu1  ;;  %v9477_v47 = vadd.f32 %v16795_v22, %v14505_v43  ;;  %v9473_v27 = vadd.f32 %v16796_v36, %v14505_v43  ;;  %v16797_v30 = vld [vmem:[#allocation152_spill] sm:$0xff] }
 0x59e   : > { %v6410_v61 = vmul.f32 %v6168_v11, %v1398_v63  ;;  %v6171_v37 = vadd.f32 %v9467_v55, %v6170_v60  ;;  %v14560_v50 = vpop.f32.mrb[86].mxu1  ;;  %9301 = vmatpush3.bf16.msra.mxu1 %v10631_v44  ;;  %v1428_v10 = vadd.f32 %v16797_v30, %v14517_v13  ;;  %v16798_v63 = vld [vmem:[#allocation386_spill] sm:$0xff]  ;;  %v16799_v34 = vld [vmem:[#allocation144_spill] sm:$0xff] }
 0x59f   : > { %v6413_v1 = vmul.f32 %v6179_v57, %v1412_v21  ;;  %v5425_v9 = vpop.f32.mrb[87].mxu1  ;;  %v9479_v11 = vadd.f32 %v16798_v63, %v14505_v43  ;;  %v1418_v15 = vadd.f32 %v16799_v34, %v14517_v13  ;;  %v9475_v21 = vadd.f32 %v16800_v58, %v14505_v43  ;;  %v16801_v24 = vld [vmem:[#allocation154_spill] sm:$0xff]  ;;  %v16805_v63 = vld [vmem:[#allocation168_spill] sm:$0xff] }
 0x5a0   : > { %v6411_v41 = vmul.f32 %v6171_v37, %v1402_v3  ;;  %v16802_v9 = vld [vmem:[#allocation146_spill] sm:$0xff]  ;;  %v16807_v58 = vld [vmem:[#allocation160_spill] sm:$0xff] }
 0x5a1   : > { %v6473_v40 = vpack.c.bf16 %v6413_v1, %v6412_v26  ;;  %v1422_v44 = vadd.f32 %v16802_v9, %v14517_v13 }
 0x5a2   : > { %v9154_v8 = vpop.f32.mrb[168].mxu0  ;;  %v6472_v54 = vpack.c.bf16 %v6411_v41, %v6410_v61  ;;  %v1432_v61 = vadd.f32 %v16801_v24, %v14517_v13 }
 0x5a3   : > { %v6192_v31 = vadd.f32 %v9477_v47, %v9154_v8  ;;  %v6183_v35 = vpop.f32.mrb[169].mxu0 }
 0x5a4   : > { %v6184_v55 = vadd.f32 %v9473_v27, %v6183_v35  ;;  %v9155_v26 = vpop.f32.mrb[170].mxu0  ;;  %9228 = vmatprep.mubr.bf16.mxu0 %v6472_v54  ;;  %v14577_v57 = vpop.f32.mrb[88].mxu1  ;;  %v16803_v54 = vld [vmem:[#allocation389_spill] sm:$0xff] }
 0x5a5   : > { %v6416_v60 = vmul.f32 %v6192_v31, %v1428_v10  ;;  %v6195_v38 = vadd.f32 %v9479_v11, %v9155_v26  ;;  %v6186_v3 = vpop.f32.mrb[171].mxu0  ;;  %9229 = vmatmul.mubr.bf16.gmra.mrb[228].mxu0 %v6473_v40  ;;  %v5430_v37 = vpop.f32.mrb[89].mxu1  ;;  %v9485_v30 = vadd.f32 %v16803_v54, %v14505_v43  ;;  %v16804_v31 = vld [vmem:[#allocation387_spill] sm:$0xff]  ;;  %v1448_v11 = vadd.f32 %v16805_v63, %v14517_v13 }
 0x5a6   : > { %v6414_v1 = vmul.f32 %v6184_v55, %v1418_v15  ;;  %v6187_v41 = vadd.f32 %v9475_v21, %v6186_v3  ;;  %v14583_v22 = vpop.f32.mrb[90].mxu1  ;;  %v9481_v35 = vadd.f32 %v16804_v31, %v14505_v43  ;;  %v16806_v55 = vld [vmem:[#allocation390_spill] sm:$0xff]  ;;  %v1438_v21 = vadd.f32 %v16807_v58, %v14517_v13 }
 0x5a7   : > { %v6417_v47 = vmul.f32 %v6195_v38, %v1432_v61  ;;  %v5433_v8 = vpop.f32.mrb[91].mxu1  ;;  %v9487_v26 = vadd.f32 %v16806_v55, %v14505_v43  ;;  %v16808_v61 = vld [vmem:[#allocation388_spill] sm:$0xff]  ;;  %v16812_v55 = vld [vmem:[#allocation391_spill] sm:$0xff] }
 0x5a8   : > { %v6415_v36 = vmul.f32 %v6187_v41, %v1422_v44  ;;  %v9483_v38 = vadd.f32 %v16808_v61, %v14505_v43 }
 0x5a9   : > { %v6475_v27 = vpack.c.bf16 %v6417_v47, %v6416_v60 }
 0x5aa   : > { %v9158_v10 = vpop.f32.mrb[172].mxu0  ;;  %v6474_v40 = vpack.c.bf16 %v6415_v36, %v6414_v1  ;;  %v16809_v1 = vld [vmem:[#allocation170_spill] sm:$0xff] }
 0x5ab   : > { %v6208_v34 = vadd.f32 %v9485_v30, %v9158_v10  ;;  %v6199_v15 = vpop.f32.mrb[173].mxu0  ;;  %v1452_v9 = vadd.f32 %v16809_v1, %v14517_v13  ;;  %v16810_v36 = vld [vmem:[#allocation162_spill] sm:$0xff] }
 0x5ac   : > { %v6200_v60 = vadd.f32 %v9481_v35, %v6199_v15  ;;  %v9159_v24 = vpop.f32.mrb[174].mxu0  ;;  %9232 = vmatprep.mubr.bf16.mxu0 %v6474_v40  ;;  %v14597_v3 = vpop.f32.mrb[92].mxu1  ;;  %v1442_v54 = vadd.f32 %v16810_v36, %v14517_v13  ;;  %v10632_v40 = vld [vmem:[%s15973_s4 + $0xf8] sm:$0xff]  }
 0x5ad   : > { %v6420_v37 = vmul.f32 %v6208_v34, %v1448_v11  ;;  %v6211_v44 = vadd.f32 %v9487_v26, %v9159_v24  ;;  %v6202_v41 = vpop.f32.mrb[175].mxu0  ;;  %9233 = vmatmul.mubr.bf16.gmra.mrb[232].mxu0 %v6475_v27  ;;  %v5438_v47 = vpop.f32.mrb[93].mxu1  ;;  %v16811_v34 = vld [vmem:[#allocation393_spill] sm:$0xff]  ;;  %9302 = vmatprep.subr.bf16.mxu1 %v10632_v40  ;;  %v9489_v26 = vadd.f32 %v16812_v55, %v14505_v43 }
 0x5ae   : > { %v6418_v8 = vmul.f32 %v6200_v60, %v1438_v21  ;;  %v6203_v30 = vadd.f32 %v9483_v38, %v6202_v41  ;;  %v14603_v10 = vpop.f32.mrb[94].mxu1  ;;  %v9493_v15 = vadd.f32 %v16811_v34, %v14505_v43  ;;  %9303 = vmatpush3.bf16.msra.mxu1 %v10632_v40  ;;  %v16813_v21 = vld [vmem:[#allocation184_spill] sm:$0xff]  ;;  %v16814_v38 = vld [vmem:[#allocation394_spill] sm:$0xff] }
 0x5af   : > { %v6421_v31 = vmul.f32 %v6211_v44, %v1452_v9  ;;  %v5441_v35 = vpop.f32.mrb[95].mxu1  ;;  %v1468_v60 = vadd.f32 %v16813_v21, %v14517_v13  ;;  %v9495_v1 = vadd.f32 %v16814_v38, %v14505_v43  ;;  %v16816_v47 = vld [vmem:[#allocation392_spill] sm:$0xff] }
 0x5b0   : > { %v6419_v63 = vmul.f32 %v6203_v30, %v1442_v54  ;;  %v9491_v36 = vadd.f32 %v16816_v47, %v14505_v43  ;;  %v16817_v30 = vld [vmem:[#allocation186_spill] sm:$0xff] }
 0x5b1   : > { %v6477_v11 = vpack.c.bf16 %v6421_v31, %v6420_v37  ;;  %v16815_v37 = vld [vmem:[#allocation176_spill] sm:$0xff]  ;;  %v1472_v31 = vadd.f32 %v16817_v30, %v14517_v13 }
 0x5b2   : > { %v9162_v27 = vpop.f32.mrb[176].mxu0  ;;  %v6476_v58 = vpack.c.bf16 %v6419_v63, %v6418_v8  ;;  %v1458_v9 = vadd.f32 %v16815_v37, %v14517_v13 }
 0x5b3   : > { %v6224_v24 = vadd.f32 %v9493_v15, %v9162_v27  ;;  %v6215_v61 = vpop.f32.mrb[177].mxu0  ;;  %v16818_v15 = vld [vmem:[#allocation178_spill] sm:$0xff] }
 0x5b4   : > { %v6216_v44 = vadd.f32 %v9489_v26, %v6215_v61  ;;  %v9163_v41 = vpop.f32.mrb[178].mxu0  ;;  %9236 = vmatprep.mubr.bf16.mxu0 %v6476_v58  ;;  %v14620_v54 = vpop.f32.mrb[96].mxu1  ;;  %v1462_v27 = vadd.f32 %v16818_v15, %v14517_v13  ;;  %v16825_v15 = vld [vmem:[#allocation396_spill] sm:$0xff] }
 0x5b5   : > { %v6424_v8 = vmul.f32 %v6224_v24, %v1468_v60  ;;  %v6227_v35 = vadd.f32 %v9495_v1, %v9163_v41  ;;  %v6218_v40 = vpop.f32.mrb[179].mxu0  ;;  %9237 = vmatmul.mubr.bf16.gmra.mrb[236].mxu0 %v6477_v11  ;;  %v5446_v63 = vpop.f32.mrb[97].mxu1  ;;  %v16820_v60 = vld [vmem:[#allocation397_spill] sm:$0xff]  ;;  %v16821_v1 = vld [vmem:[#allocation395_spill] sm:$0xff] }
 0x5b6   : > { %v6422_v34 = vmul.f32 %v6216_v44, %v1458_v9  ;;  %v6219_v55 = vadd.f32 %v9491_v36, %v6218_v40  ;;  %v14626_v26 = vpop.f32.mrb[98].mxu1  ;;  %v9501_v24 = vadd.f32 %v16820_v60, %v14505_v43  ;;  %v9497_v41 = vadd.f32 %v16821_v1, %v14505_v43  ;;  %v16822_v9 = vld [vmem:[#allocation200_spill] sm:$0xff]  ;;  %v16823_v36 = vld [vmem:[#allocation398_spill] sm:$0xff] }
 0x5b7   : > { %16819 = vst [vmem:[#allocation6_spill] sm:$0xff] %v14626_v26  ;;  %v6425_v58 = vmul.f32 %v6227_v35, %v1472_v31  ;;  %v5449_v21 = vpop.f32.mrb[99].mxu1  ;;  %v1488_v44 = vadd.f32 %v16822_v9, %v14517_v13  ;;  %v9503_v40 = vadd.f32 %v16823_v36, %v14505_v43  ;;  %v16824_v31 = vld [vmem:[#allocation192_spill] sm:$0xff]  ;;  %v16827_v1 = vld [vmem:[#allocation194_spill] sm:$0xff] }
 0x5b8   : > { %v6423_v61 = vmul.f32 %v6219_v55, %v1462_v27  ;;  %v1478_v35 = vadd.f32 %v16824_v31, %v14517_v13  ;;  %v9499_v27 = vadd.f32 %v16825_v15, %v14505_v43  ;;  %v1482_v9 = vadd.f32 %v16827_v1, %v14517_v13 }
 0x5b9   : > { %v6479_v38 = vpack.c.bf16 %v6425_v58, %v6424_v8  ;;  %v16826_v58 = vld [vmem:[#allocation202_spill] sm:$0xff] }
 0x5ba   : > { %v9166_v37 = vpop.f32.mrb[180].mxu0  ;;  %v6478_v11 = vpack.c.bf16 %v6423_v61, %v6422_v34  ;;  %v1492_v21 = vadd.f32 %v16826_v58, %v14517_v13 }
 0x5bb   : > { %v6240_v47 = vadd.f32 %v9501_v24, %v9166_v37  ;;  %v6231_v30 = vpop.f32.mrb[181].mxu0 }
 0x5bc   : > { %v6232_v8 = vadd.f32 %v9497_v41, %v6231_v30  ;;  %v9167_v63 = vpop.f32.mrb[182].mxu0  ;;  %9240 = vmatprep.mubr.bf16.mxu0 %v6478_v11  ;;  %v14640_v55 = vpop.f32.mrb[100].mxu1 }
 0x5bd   : > { %v6428_v34 = vmul.f32 %v6240_v47, %v1488_v44  ;;  %v6243_v61 = vadd.f32 %v9503_v40, %v9167_v63  ;;  %v6234_v60 = vpop.f32.mrb[183].mxu0  ;;  %9241 = vmatmul.mubr.bf16.gmra.mrb[240].mxu0 %v6479_v38  ;;  %v5454_v24 = vpop.f32.mrb[101].mxu1  ;;  %v16829_v44 = vld [vmem:[#allocation401_spill] sm:$0xff]  ;;  %v16830_v40 = vld [vmem:[#allocation399_spill] sm:$0xff] }
 0x5be   : > { %v6426_v37 = vmul.f32 %v6232_v8, %v1478_v35  ;;  %v6235_v41 = vadd.f32 %v9499_v27, %v6234_v60  ;;  %v14646_v30 = vpop.f32.mrb[102].mxu1  ;;  %v9509_v47 = vadd.f32 %v16829_v44, %v14505_v43  ;;  %v9505_v63 = vadd.f32 %v16830_v40, %v14505_v43  ;;  %v16831_v35 = vld [vmem:[#allocation216_spill] sm:$0xff]  ;;  %v16832_v27 = vld [vmem:[#allocation402_spill] sm:$0xff] }
 0x5bf   : > { %16828 = vst [vmem:[#allocation4_spill] sm:$0xff] %v14646_v30  ;;  %v6429_v11 = vmul.f32 %v6243_v61, %v1492_v21  ;;  %v5457_v36 = vpop.f32.mrb[103].mxu1  ;;  %v1508_v8 = vadd.f32 %v16831_v35, %v14517_v13  ;;  %v9511_v60 = vadd.f32 %v16832_v27, %v14505_v43  ;;  %v16833_v21 = vld [vmem:[#allocation208_spill] sm:$0xff]  ;;  %v16837_v35 = vld [vmem:[#allocation210_spill] sm:$0xff] }
 0x5c0   : > { %v6427_v31 = vmul.f32 %v6235_v41, %v1482_v9  ;;  %v1498_v61 = vadd.f32 %v16833_v21, %v14517_v13  ;;  %v16834_v9 = vld [vmem:[#allocation400_spill] sm:$0xff]  ;;  %v16836_v36 = vld [vmem:[#allocation218_spill] sm:$0xff]  ;;  %v1502_v27 = vadd.f32 %v16837_v35, %v14517_v13 }
 0x5c1   : > { %v6481_v15 = vpack.c.bf16 %v6429_v11, %v6428_v34  ;;  %v9507_v41 = vadd.f32 %v16834_v9, %v14505_v43 }
 0x5c2   : > { %v9170_v16 = vpop.f32.mrb[184].mxu0  ;;  %v6480_v38 = vpack.c.bf16 %v6427_v31, %v6426_v37  ;;  %v1512_v31 = vadd.f32 %v16836_v36, %v14517_v13 }
 0x5c3   : > { %v6256_v58 = vadd.f32 %v9509_v47, %v9170_v16  ;;  %v6247_v24 = vpop.f32.mrb[185].mxu0 }
 0x5c4   : > { %v6248_v34 = vadd.f32 %v9505_v63, %v6247_v24  ;;  %v9171_v1 = vpop.f32.mrb[186].mxu0  ;;  %9244 = vmatprep.mubr.bf16.mxu0 %v6480_v38  ;;  %v14660_v11 = vpop.f32.mrb[104].mxu1 }
 0x5c5   : > { %16835 = vst [vmem:[#allocation369_spill] sm:$0xff] %v14660_v11  ;;  %v6432_v37 = vmul.f32 %v6256_v58, %v1508_v8  ;;  %v6259_v16 = vadd.f32 %v9511_v60, %v9171_v1  ;;  %v6250_v44 = vpop.f32.mrb[187].mxu0  ;;  %9245 = vmatmul.mubr.bf16.gmra.mrb[244].mxu0 %v6481_v15  ;;  %v5462_v47 = vpop.f32.mrb[105].mxu1  ;;  %v16839_v8 = vld [vmem:[#allocation406_spill] sm:$0xff]  ;;  %v16840_v60 = vld [vmem:[#allocation403_spill] sm:$0xff] }
 0x5c6   : > { %v6430_v40 = vmul.f32 %v6248_v34, %v1498_v61  ;;  %v6251_v63 = vadd.f32 %v9507_v41, %v6250_v44  ;;  %v14666_v24 = vpop.f32.mrb[106].mxu1  ;;  %v9517_v58 = vadd.f32 %v16839_v8, %v14505_v43  ;;  %v9513_v1 = vadd.f32 %v16840_v60, %v14505_v43  ;;  %v16841_v61 = vld [vmem:[#allocation232_spill] sm:$0xff]  ;;  %v16842_v41 = vld [vmem:[#allocation407_spill] sm:$0xff] }
 0x5c7   : > { %16838 = vst [vmem:[#allocation7_spill] sm:$0xff] %v14666_v24  ;;  %v6433_v38 = vmul.f32 %v6259_v16, %v1512_v31  ;;  %v5465_v21 = vpop.f32.mrb[107].mxu1  ;;  %v1528_v34 = vadd.f32 %v16841_v61, %v14517_v13  ;;  %v9519_v44 = vadd.f32 %v16842_v41, %v14505_v43  ;;  %v16843_v31 = vld [vmem:[#allocation224_spill] sm:$0xff]  ;;  %v16847_v61 = vld [vmem:[#allocation226_spill] sm:$0xff]  ;;  %v16849_v24 = vld [vmem:[#allocation415_spill] sm:$0xff] }
 0x5c8   : > { %v6431_v9 = vmul.f32 %v6251_v63, %v1502_v27  ;;  %v1518_v16 = vadd.f32 %v16843_v31, %v14517_v13  ;;  %v16844_v27 = vld [vmem:[#allocation405_spill] sm:$0xff]  ;;  %v16846_v21 = vld [vmem:[#allocation234_spill] sm:$0xff]  ;;  %v1522_v41 = vadd.f32 %v16847_v61, %v14517_v13 }
 0x5c9   : > { %v6483_v26 = vpack.c.bf16 %v6433_v38, %v6432_v37  ;;  %v9515_v63 = vadd.f32 %v16844_v27, %v14505_v43 }
 0x5ca   : > { %v9174_v11 = vpop.f32.mrb[188].mxu0  ;;  %v6482_v15 = vpack.c.bf16 %v6431_v9, %v6430_v40  ;;  %v1532_v9 = vadd.f32 %v16846_v21, %v14517_v13  ;;  %v16850_v21 = vld [vmem:[#allocation409_spill] sm:$0xff] }
 0x5cb   : > { %v6272_v36 = vadd.f32 %v9517_v58, %v9174_v11  ;;  %v6263_v47 = vpop.f32.mrb[189].mxu0 }
 0x5cc   : > { %v6264_v37 = vadd.f32 %v9513_v1, %v6263_v47  ;;  %v9175_v35 = vpop.f32.mrb[190].mxu0  ;;  %9248 = vmatprep.mubr.bf16.mxu0 %v6482_v15  ;;  %v14680_v38 = vpop.f32.mrb[108].mxu1 }
 0x5cd   : > { %16845 = vst [vmem:[#allocation5_spill] sm:$0xff] %v14680_v38  ;;  %v6436_v40 = vmul.f32 %v6272_v36, %v1528_v34  ;;  %v6275_v11 = vadd.f32 %v9519_v44, %v9175_v35  ;;  %v6266_v8 = vpop.f32.mrb[191].mxu0  ;;  %9249 = vmatmul.mubr.bf16.gmra.mrb[248].mxu0 %v6483_v26  ;;  %v5470_v58 = vpop.f32.mrb[109].mxu1  ;;  %v9525_v34 = vadd.f32 %v16849_v24, %v14505_v43 }
 0x5ce   : > { %v6434_v60 = vmul.f32 %v6264_v37, %v1518_v16  ;;  %v6267_v1 = vadd.f32 %v9515_v63, %v6266_v8  ;;  %v14686_v47 = vpop.f32.mrb[110].mxu1  ;;  %v9521_v44 = vadd.f32 %v16850_v21, %v14505_v43  ;;  %v16851_v16 = vld [vmem:[#allocation418_spill] sm:$0xff]  ;;  %v16852_v58 = vld [vmem:[#allocation248_spill] sm:$0xff] }
 0x5cf   : > { %16848 = vst [vmem:[#allocation373_spill] sm:$0xff] %v14686_v47  ;;  %v6437_v15 = vmul.f32 %v6275_v11, %v1532_v9  ;;  %v5473_v31 = vpop.f32.mrb[111].mxu1  ;;  %v9527_v37 = vadd.f32 %v16851_v16, %v14505_v43  ;;  %v1548_v63 = vadd.f32 %v16852_v58, %v14517_v13  ;;  %v16853_v9 = vld [vmem:[#allocation412_spill] sm:$0xff]  ;;  %v16857_v58 = vld [vmem:[#allocation242_spill] sm:$0xff] }
 0x5d0   : > { %v6435_v27 = vmul.f32 %v6267_v1, %v1522_v41  ;;  %v9523_v11 = vadd.f32 %v16853_v9, %v14505_v43  ;;  %v16854_v41 = vld [vmem:[#allocation240_spill] sm:$0xff]  ;;  %v16856_v31 = vld [vmem:[#allocation250_spill] sm:$0xff]  ;;  %v1542_v9 = vadd.f32 %v16857_v58, %v14517_v13 }
 0x5d1   : > { %v6485_v36 = vpack.c.bf16 %v6437_v15, %v6436_v40  ;;  %v1538_v24 = vadd.f32 %v16854_v41, %v14517_v13  ;;  %v16859_v41 = vld [vmem:[#allocation428_spill] sm:$0xff] }
 0x5d2   : > { %v9178_v35 = vpop.f32.mrb[192].mxu0  ;;  %v6484_v26 = vpack.c.bf16 %v6435_v27, %v6434_v60  ;;  %v1552_v27 = vadd.f32 %v16856_v31, %v14517_v13  ;;  %v16860_v31 = vld [vmem:[#allocation421_spill] sm:$0xff] }
 0x5d3   : > { %v6288_v8 = vadd.f32 %v9525_v34, %v9178_v35  ;;  %v6279_v61 = vpop.f32.mrb[193].mxu0 }
 0x5d4   : > { %v6280_v40 = vadd.f32 %v9521_v44, %v6279_v61  ;;  %v9179_v1 = vpop.f32.mrb[194].mxu0  ;;  %9252 = vmatprep.mubr.bf16.mxu0 %v6484_v26  ;;  %v14700_v15 = vpop.f32.mrb[112].mxu1 }
 0x5d5   : > { %16855 = vst [vmem:[#allocation10_spill] sm:$0xff] %v14700_v15  ;;  %v6440_v60 = vmul.f32 %v6288_v8, %v1548_v63  ;;  %v6291_v21 = vadd.f32 %v9527_v37, %v9179_v1  ;;  %v6282_v16 = vpop.f32.mrb[195].mxu0  ;;  %9253 = vmatmul.mubr.bf16.gmra.mrb[252].mxu0 %v6485_v36  ;;  %v5478_v34 = vpop.f32.mrb[113].mxu1  ;;  %v9533_v63 = vadd.f32 %v16859_v41, %v14505_v43 }
 0x5d6   : > { %v6438_v35 = vmul.f32 %v6280_v40, %v1538_v24  ;;  %v6283_v47 = vadd.f32 %v9523_v11, %v6282_v16  ;;  %v14706_v38 = vpop.f32.mrb[114].mxu1  ;;  %v9529_v37 = vadd.f32 %v16860_v31, %v14505_v43  ;;  %v16861_v24 = vld [vmem:[#allocation431_spill] sm:$0xff]  ;;  %v16862_v34 = vld [vmem:[#allocation264_spill] sm:$0xff] }
 0x5d7   : > { %16858 = vst [vmem:[#allocation378_spill] sm:$0xff] %v14706_v38  ;;  %v6441_v44 = vmul.f32 %v6291_v21, %v1552_v27  ;;  %v5481_v61 = vpop.f32.mrb[115].mxu1  ;;  %v9535_v40 = vadd.f32 %v16861_v24, %v14505_v43  ;;  %v1568_v11 = vadd.f32 %v16862_v34, %v14517_v13  ;;  %v16863_v27 = vld [vmem:[#allocation425_spill] sm:$0xff]  ;;  %v16864_v21 = vld [vmem:[#allocation256_spill] sm:$0xff]  ;;  %v16867_v34 = vld [vmem:[#allocation258_spill] sm:$0xff] }
 0x5d8   : > { %v6439_v26 = vmul.f32 %v6283_v47, %v1542_v9  ;;  %v9531_v47 = vadd.f32 %v16863_v27, %v14505_v43  ;;  %v1558_v9 = vadd.f32 %v16864_v21, %v14517_v13  ;;  %v1562_v27 = vadd.f32 %v16867_v34, %v14517_v13  ;;  %v16869_v21 = vld [vmem:[#allocation440_spill] sm:$0xff] }
 0x5d9   : > { %v6487_v8 = vpack.c.bf16 %v6441_v44, %v6440_v60 }
 0x5da   : > { %v9182_v1 = vpop.f32.mrb[196].mxu0  ;;  %v6486_v36 = vpack.c.bf16 %v6439_v26, %v6438_v35  ;;  %v16866_v26 = vld [vmem:[#allocation266_spill] sm:$0xff] }
 0x5db   : > { %v6304_v16 = vadd.f32 %v9533_v63, %v9182_v1  ;;  %v6295_v58 = vpop.f32.mrb[197].mxu0  ;;  %v1572_v41 = vadd.f32 %v16866_v26, %v14517_v13  ;;  %v16870_v26 = vld [vmem:[#allocation434_spill] sm:$0xff] }
 0x5dc   : > { %v6296_v60 = vadd.f32 %v9529_v37, %v6295_v58  ;;  %v9183_v44 = vpop.f32.mrb[198].mxu0  ;;  %9256 = vmatprep.mubr.bf16.mxu0 %v6486_v36  ;;  %v14720_v61 = vpop.f32.mrb[116].mxu1 }
 0x5dd   : > { %16865 = vst [vmem:[#allocation8_spill] sm:$0xff] %v14720_v61  ;;  %v6444_v35 = vmul.f32 %v6304_v16, %v1568_v11  ;;  %v6307_v31 = vadd.f32 %v9535_v40, %v9183_v44  ;;  %v6298_v24 = vpop.f32.mrb[199].mxu0  ;;  %9257 = vmatmul.mubr.bf16.gmra.mrb[0].mxu0 %v6487_v8  ;;  %v5486_v63 = vpop.f32.mrb[117].mxu1  ;;  %v9541_v11 = vadd.f32 %v16869_v21, %v14505_v43 }
 0x5de   : > { %v6442_v1 = vmul.f32 %v6296_v60, %v1558_v9  ;;  %v6299_v38 = vadd.f32 %v9531_v47, %v6298_v24  ;;  %v14726_v15 = vpop.f32.mrb[118].mxu1  ;;  %v9537_v40 = vadd.f32 %v16870_v26, %v14505_v43  ;;  %v16871_v9 = vld [vmem:[#allocation443_spill] sm:$0xff]  ;;  %v16872_v63 = vld [vmem:[#allocation280_spill] sm:$0xff] }
 0x5df   : > { %16868 = vst [vmem:[#allocation375_spill] sm:$0xff] %v14726_v15  ;;  %v6445_v37 = vmul.f32 %v6307_v31, %v1572_v41  ;;  %v5489_v58 = vpop.f32.mrb[119].mxu1  ;;  %v9543_v60 = vadd.f32 %v16871_v9, %v14505_v43  ;;  %v1588_v47 = vadd.f32 %v16872_v63, %v14517_v13  ;;  %v16873_v41 = vld [vmem:[#allocation437_spill] sm:$0xff]  ;;  %v16874_v31 = vld [vmem:[#allocation272_spill] sm:$0xff]  ;;  %v16877_v63 = vld [vmem:[#allocation274_spill] sm:$0xff] }
 0x5e0   : > { %v6443_v36 = vmul.f32 %v6299_v38, %v1562_v27  ;;  %v9539_v38 = vadd.f32 %v16873_v41, %v14505_v43  ;;  %v1578_v27 = vadd.f32 %v16874_v31, %v14517_v13  ;;  %v1582_v41 = vadd.f32 %v16877_v63, %v14517_v13  ;;  %v16879_v31 = vld [vmem:[#allocation452_spill] sm:$0xff] }
 0x5e1   : > { %v6489_v16 = vpack.c.bf16 %v6445_v37, %v6444_v35 }
 0x5e2   : > { %v9186_v44 = vpop.f32.mrb[200].mxu0  ;;  %v6488_v8 = vpack.c.bf16 %v6443_v36, %v6442_v1  ;;  %v16876_v36 = vld [vmem:[#allocation282_spill] sm:$0xff] }
 0x5e3   : > { %v6320_v24 = vadd.f32 %v9541_v11, %v9186_v44  ;;  %v6311_v34 = vpop.f32.mrb[201].mxu0  ;;  %v1592_v21 = vadd.f32 %v16876_v36, %v14517_v13  ;;  %v16880_v36 = vld [vmem:[#allocation446_spill] sm:$0xff] }
 0x5e4   : > { %v6312_v35 = vadd.f32 %v9537_v40, %v6311_v34  ;;  %v9187_v37 = vpop.f32.mrb[202].mxu0  ;;  %9260 = vmatprep.mubr.bf16.mxu0 %v6488_v8  ;;  %v14740_v58 = vpop.f32.mrb[120].mxu1 }
 0x5e5   : > { %16875 = vst [vmem:[#allocation11_spill] sm:$0xff] %v14740_v58  ;;  %v6448_v1 = vmul.f32 %v6320_v24, %v1588_v47  ;;  %v6323_v26 = vadd.f32 %v9543_v60, %v9187_v37  ;;  %v6314_v9 = vpop.f32.mrb[203].mxu0  ;;  %9261 = vmatmul.mubr.bf16.gmra.mrb[4].mxu0 %v6489_v16  ;;  %v5494_v11 = vpop.f32.mrb[121].mxu1  ;;  %v9549_v47 = vadd.f32 %v16879_v31, %v14505_v43 }
 0x5e6   : > { %v6446_v44 = vmul.f32 %v6312_v35, %v1578_v27  ;;  %v6315_v15 = vadd.f32 %v9539_v38, %v6314_v9  ;;  %v14746_v61 = vpop.f32.mrb[122].mxu1  ;;  %v9545_v60 = vadd.f32 %v16880_v36, %v14505_v43  ;;  %v16881_v27 = vld [vmem:[#allocation455_spill] sm:$0xff]  ;;  %v16882_v11 = vld [vmem:[#allocation296_spill] sm:$0xff] }
 0x5e7   : > { %16878 = vst [vmem:[#allocation9_spill] sm:$0xff] %v14746_v61  ;;  %v6449_v40 = vmul.f32 %v6323_v26, %v1592_v21  ;;  %v5497_v34 = vpop.f32.mrb[123].mxu1  ;;  %v9551_v35 = vadd.f32 %v16881_v27, %v14505_v43  ;;  %v1608_v38 = vadd.f32 %v16882_v11, %v14517_v13  ;;  %v16883_v21 = vld [vmem:[#allocation449_spill] sm:$0xff]  ;;  %v16884_v26 = vld [vmem:[#allocation288_spill] sm:$0xff]  ;;  %v16887_v11 = vld [vmem:[#allocation290_spill] sm:$0xff] }
 0x5e8   : > { %v6447_v8 = vmul.f32 %v6315_v15, %v1582_v41  ;;  %v9547_v15 = vadd.f32 %v16883_v21, %v14505_v43  ;;  %v1598_v41 = vadd.f32 %v16884_v26, %v14517_v13  ;;  %v1602_v21 = vadd.f32 %v16887_v11, %v14517_v13  ;;  %v16889_v26 = vld [vmem:[#allocation465_spill] sm:$0xff] }
 0x5e9   : > { %v6491_v24 = vpack.c.bf16 %v6449_v40, %v6448_v1 }
 0x5ea   : > { %v9190_v37 = vpop.f32.mrb[204].mxu0  ;;  %v6490_v16 = vpack.c.bf16 %v6447_v8, %v6446_v44  ;;  %v16886_v8 = vld [vmem:[#allocation298_spill] sm:$0xff] }
 0x5eb   : > { %v6336_v9 = vadd.f32 %v9549_v47, %v9190_v37  ;;  %v6327_v63 = vpop.f32.mrb[205].mxu0  ;;  %v1612_v31 = vadd.f32 %v16886_v8, %v14517_v13  ;;  %v16890_v8 = vld [vmem:[#allocation458_spill] sm:$0xff] }
 0x5ec   : > { %v6328_v1 = vadd.f32 %v9545_v60, %v6327_v63  ;;  %v9191_v40 = vpop.f32.mrb[206].mxu0  ;;  %9264 = vmatprep.mubr.bf16.mxu0 %v6490_v16  ;;  %v14760_v34 = vpop.f32.mrb[124].mxu1 }
 0x5ed   : > { %16885 = vst [vmem:[#allocation380_spill] sm:$0xff] %v14760_v34  ;;  %v6452_v44 = vmul.f32 %v6336_v9, %v1608_v38  ;;  %v6339_v36 = vadd.f32 %v9551_v35, %v9191_v40  ;;  %v6330_v27 = vpop.f32.mrb[207].mxu0  ;;  %9265 = vmatmul.mubr.bf16.gmra.mrb[8].mxu0 %v6491_v24  ;;  %v5502_v47 = vpop.f32.mrb[125].mxu1  ;;  %v9557_v38 = vadd.f32 %v16889_v26, %v14505_v43 }
 0x5ee   : > { %v6450_v37 = vmul.f32 %v6328_v1, %v1598_v41  ;;  %v6331_v61 = vadd.f32 %v9547_v15, %v6330_v27  ;;  %v14766_v58 = vpop.f32.mrb[126].mxu1  ;;  %v9553_v35 = vadd.f32 %v16890_v8, %v14505_v43  ;;  %v16891_v41 = vld [vmem:[#allocation468_spill] sm:$0xff] }
 0x5ef   : > { %16888 = vst [vmem:[#allocation14_spill] sm:$0xff] %v14766_v58  ;;  %v6453_v60 = vmul.f32 %v6339_v36, %v1612_v31  ;;  %v5505_v63 = vpop.f32.mrb[127].mxu1  ;;  %v9559_v1 = vadd.f32 %v16891_v41, %v14505_v43  ;;  %v16892_v47 = vld [vmem:[#allocation312_spill] sm:$0xff]  ;;  %v16893_v31 = vld [vmem:[#allocation462_spill] sm:$0xff] }
 0x5f0   : > { %v6451_v16 = vmul.f32 %v6331_v61, %v1602_v21  ;;  %v1628_v15 = vadd.f32 %v16892_v47, %v14517_v13  ;;  %v9555_v61 = vadd.f32 %v16893_v31, %v14505_v43  ;;  %v16894_v36 = vld [vmem:[#allocation304_spill] sm:$0xff]  ;;  %v16897_v47 = vld [vmem:[#allocation306_spill] sm:$0xff] }
 0x5f1   : > { %v6493_v9 = vpack.c.bf16 %v6453_v60, %v6452_v44  ;;  %v1618_v21 = vadd.f32 %v16894_v36, %v14517_v13  ;;  %v1622_v31 = vadd.f32 %v16897_v47, %v14517_v13  ;;  %v16899_v36 = vld [vmem:[#allocation34_spill] sm:$0xff] }
 0x5f2   : > { %v9194_v40 = vpop.f32.mrb[208].mxu0  ;;  %v6492_v24 = vpack.c.bf16 %v6451_v16, %v6450_v37  ;;  %v16896_v16 = vld [vmem:[#allocation314_spill] sm:$0xff] }
 0x5f3   : > { %v6352_v27 = vadd.f32 %v9557_v38, %v9194_v40  ;;  %v6343_v11 = vpop.f32.mrb[209].mxu0  ;;  %v1632_v26 = vadd.f32 %v16896_v16, %v14517_v13  ;;  %v16900_v16 = vld [vmem:[#allocation470_spill] sm:$0xff] }
 0x5f4   : > { %v6344_v44 = vadd.f32 %v9553_v35, %v6343_v11  ;;  %v9195_v60 = vpop.f32.mrb[210].mxu0  ;;  %9268 = vmatprep.mubr.bf16.mxu0 %v6492_v24  ;;  %v14780_v63 = vpop.f32.mrb[128].mxu1 }
 0x5f5   : > { %16895 = vst [vmem:[#allocation385_spill] sm:$0xff] %v14780_v63  ;;  %v6456_v37 = vmul.f32 %v6352_v27, %v1628_v15  ;;  %v6355_v8 = vadd.f32 %v9559_v1, %v9195_v60  ;;  %v6346_v41 = vpop.f32.mrb[211].mxu0  ;;  %9269 = vmatmul.mubr.bf16.gmra.mrb[12].mxu0 %v6493_v9  ;;  %v5510_v38 = vpop.f32.mrb[129].mxu1  ;;  %v9565_v15 = vadd.f32 %v16899_v36, %v14505_v43 }
 0x5f6   : > { %v6454_v40 = vmul.f32 %v6344_v44, %v1618_v21  ;;  %v6347_v58 = vadd.f32 %v9555_v61, %v6346_v41  ;;  %v14786_v34 = vpop.f32.mrb[130].mxu1  ;;  %v9561_v1 = vadd.f32 %v16900_v16, %v14505_v43  ;;  %v16901_v21 = vld [vmem:[#allocation478_spill] sm:$0xff]  ;;  %v16902_v38 = vld [vmem:[#allocation328_spill] sm:$0xff] }
 0x5f7   : > { %16898 = vst [vmem:[#allocation12_spill] sm:$0xff] %v14786_v34  ;;  %v6457_v35 = vmul.f32 %v6355_v8, %v1632_v26  ;;  %v5513_v11 = vpop.f32.mrb[131].mxu1  ;;  %v9567_v44 = vadd.f32 %v16901_v21, %v14505_v43  ;;  %v1648_v61 = vadd.f32 %v16902_v38, %v14517_v13  ;;  %v16903_v26 = vld [vmem:[#allocation474_spill] sm:$0xff]  ;;  %v16904_v8 = vld [vmem:[#allocation320_spill] sm:$0xff] }
 0x5f8   : > { %v6455_v24 = vmul.f32 %v6347_v58, %v1622_v31  ;;  %v9563_v58 = vadd.f32 %v16903_v26, %v14505_v43  ;;  %v1638_v31 = vadd.f32 %v16904_v8, %v14517_v13  ;;  %v16907_v38 = vld [vmem:[#allocation322_spill] sm:$0xff] }
 0x5f9   : > { %v6495_v27 = vpack.c.bf16 %v6457_v35, %v6456_v37  ;;  %v1642_v26 = vadd.f32 %v16907_v38, %v14517_v13  ;;  %v16909_v8 = vld [vmem:[#allocation54_spill] sm:$0xff] }
 0x5fa   : > { %v9198_v60 = vpop.f32.mrb[212].mxu0  ;;  %v6494_v9 = vpack.c.bf16 %v6455_v24, %v6454_v40  ;;  %v16906_v24 = vld [vmem:[#allocation330_spill] sm:$0xff] }
 0x5fb   : > { %v6368_v41 = vadd.f32 %v9565_v15, %v9198_v60  ;;  %v6359_v47 = vpop.f32.mrb[213].mxu0  ;;  %v1652_v36 = vadd.f32 %v16906_v24, %v14517_v13  ;;  %v16910_v24 = vld [vmem:[#allocation42_spill] sm:$0xff] }
 0x5fc   : > { %v6360_v37 = vadd.f32 %v9561_v1, %v6359_v47  ;;  %v9199_v35 = vpop.f32.mrb[214].mxu0  ;;  %9272 = vmatprep.mubr.bf16.mxu0 %v6494_v9  ;;  %v14800_v11 = vpop.f32.mrb[132].mxu1 }
 0x5fd   : > { %16905 = vst [vmem:[#allocation382_spill] sm:$0xff] %v14800_v11  ;;  %v6460_v40 = vmul.f32 %v6368_v41, %v1648_v61  ;;  %v6371_v16 = vadd.f32 %v9567_v44, %v9199_v35  ;;  %v6362_v21 = vpop.f32.mrb[215].mxu0  ;;  %9273 = vmatmul.mubr.bf16.gmra.mrb[16].mxu0 %v6495_v27  ;;  %v5518_v15 = vpop.f32.mrb[133].mxu1  ;;  %v9573_v61 = vadd.f32 %v16909_v8, %v14505_v43 }
 0x5fe   : > { %v6458_v60 = vmul.f32 %v6360_v37, %v1638_v31  ;;  %v6363_v34 = vadd.f32 %v9563_v58, %v6362_v21  ;;  %v14806_v63 = vpop.f32.mrb[134].mxu1  ;;  %v9569_v44 = vadd.f32 %v16910_v24, %v14505_v43  ;;  %v16911_v31 = vld [vmem:[#allocation486_spill] sm:$0xff]  ;;  %v16912_v15 = vld [vmem:[#allocation344_spill] sm:$0xff] }
 0x5ff   : > { %16908 = vst [vmem:[#allocation15_spill] sm:$0xff] %v14806_v63  ;;  %v6461_v1 = vmul.f32 %v6371_v16, %v1652_v36  ;;  %v5521_v47 = vpop.f32.mrb[135].mxu1  ;;  %v9575_v37 = vadd.f32 %v16911_v31, %v14505_v43  ;;  %v1668_v58 = vadd.f32 %v16912_v15, %v14517_v13  ;;  %v16913_v36 = vld [vmem:[#allocation482_spill] sm:$0xff]  ;;  %v16914_v16 = vld [vmem:[#allocation336_spill] sm:$0xff] }
 0x600   : > { %v6459_v9 = vmul.f32 %v6363_v34, %v1642_v26  ;;  %v9571_v34 = vadd.f32 %v16913_v36, %v14505_v43  ;;  %v1658_v26 = vadd.f32 %v16914_v16, %v14517_v13  ;;  %v16917_v15 = vld [vmem:[#allocation338_spill] sm:$0xff] }
 0x601   : > { %v6497_v41 = vpack.c.bf16 %v6461_v1, %v6460_v40  ;;  %v1662_v36 = vadd.f32 %v16917_v15, %v14517_v13  ;;  %v16919_v16 = vld [vmem:[#allocation86_spill] sm:$0xff] }
 0x602   : > { %v9202_v35 = vpop.f32.mrb[216].mxu0  ;;  %v6496_v27 = vpack.c.bf16 %v6459_v9, %v6458_v60  ;;  %v16916_v9 = vld [vmem:[#allocation346_spill] sm:$0xff] }
 0x603   : > { %v6384_v21 = vadd.f32 %v9573_v61, %v9202_v35  ;;  %v6375_v38 = vpop.f32.mrb[217].mxu0  ;;  %v1672_v8 = vadd.f32 %v16916_v9, %v14517_v13  ;;  %v16920_v9 = vld [vmem:[#allocation70_spill] sm:$0xff] }
 0x604   : > { %v6376_v40 = vadd.f32 %v9569_v44, %v6375_v38  ;;  %v9203_v1 = vpop.f32.mrb[218].mxu0  ;;  %9276 = vmatprep.mubr.bf16.mxu0 %v6496_v27  ;;  %v14820_v47 = vpop.f32.mrb[136].mxu1 }
 0x605   : > { %16915 = vst [vmem:[#allocation13_spill] sm:$0xff] %v14820_v47  ;;  %v6464_v60 = vmul.f32 %v6384_v21, %v1668_v58  ;;  %v6387_v24 = vadd.f32 %v9575_v37, %v9203_v1  ;;  %v6378_v31 = vpop.f32.mrb[219].mxu0  ;;  %9277 = vmatmul.mubr.bf16.gmra.mrb[20].mxu0 %v6497_v41  ;;  %v5526_v61 = vpop.f32.mrb[137].mxu1  ;;  %v9581_v58 = vadd.f32 %v16919_v16, %v14505_v43 }
 0x606   : > { %v6462_v35 = vmul.f32 %v6376_v40, %v1658_v26  ;;  %v6379_v63 = vadd.f32 %v9571_v34, %v6378_v31  ;;  %v14826_v11 = vpop.f32.mrb[138].mxu1  ;;  %v9577_v37 = vadd.f32 %v16920_v9, %v14505_v43  ;;  %v16921_v26 = vld [vmem:[#allocation494_spill] sm:$0xff]  ;;  %v16922_v61 = vld [vmem:[#allocation360_spill] sm:$0xff] }
 0x607   : > { %16918 = vst [vmem:[#allocation18_spill] sm:$0xff] %v14826_v11  ;;  %v6465_v44 = vmul.f32 %v6387_v24, %v1672_v8  ;;  %v5529_v38 = vpop.f32.mrb[139].mxu1  ;;  %v9583_v40 = vadd.f32 %v16921_v26, %v14505_v43  ;;  %v1688_v34 = vadd.f32 %v16922_v61, %v14517_v13  ;;  %v16923_v8 = vld [vmem:[#allocation490_spill] sm:$0xff]  ;;  %v16924_v24 = vld [vmem:[#allocation352_spill] sm:$0xff] }
 0x608   : > { %v6463_v27 = vmul.f32 %v6379_v63, %v1662_v36  ;;  %v9579_v63 = vadd.f32 %v16923_v8, %v14505_v43  ;;  %v1678_v36 = vadd.f32 %v16924_v24, %v14517_v13  ;;  %v16927_v61 = vld [vmem:[#allocation354_spill] sm:$0xff] }
 0x609   : > { %v6499_v21 = vpack.c.bf16 %v6465_v44, %v6464_v60  ;;  %v1682_v43 = vadd.f32 %v16927_v61, %v14517_v13  ;;  %v16031_v61 = vsub.s32 3, %v16777_v33 }
 0x60a   : > { %v9206_v1 = vpop.f32.mrb[220].mxu0  ;;  %v6498_v41 = vpack.c.bf16 %v6463_v27, %v6462_v35  ;;  %v16926_v27 = vld [vmem:[#allocation362_spill] sm:$0xff] }
 0x60b   : > { %v6400_v31 = vadd.f32 %v9581_v58, %v9206_v1  ;;  %v6391_v15 = vpop.f32.mrb[221].mxu0  ;;  %v1692_v16 = vadd.f32 %v16926_v27, %v14517_v13 }
 0x60c   : > { %v6392_v60 = vadd.f32 %v9577_v37, %v6391_v15  ;;  %v9207_v44 = vpop.f32.mrb[222].mxu0  ;;  %9280 = vmatprep.mubr.bf16.mxu0 %v6498_v41  ;;  %v14840_v38 = vpop.f32.mrb[140].mxu1 }
 0x60d   : > { %16925 = vst [vmem:[#allocation16_spill] sm:$0xff] %v14840_v38  ;;  %v6468_v35 = vmul.f32 %v6400_v31, %v1688_v34  ;;  %v6403_v9 = vadd.f32 %v9583_v40, %v9207_v44  ;;  %v6394_v26 = vpop.f32.mrb[223].mxu0  ;;  %9281 = vmatmul.mubr.bf16.gmra.mrb[24].mxu0 %v6499_v21  ;;  %v5534_v58 = vpop.f32.mrb[141].mxu1 }
 0x60e   : > { %v6466_v1 = vmul.f32 %v6392_v60, %v1678_v36  ;;  %v6395_v8 = vadd.f32 %v9579_v63, %v6394_v26  ;;  %v14846_v11 = vpop.f32.mrb[142].mxu1 }
 0x60f   : > { %16928 = vst [vmem:[#allocation19_spill] sm:$0xff] %v14846_v11  ;;  %v6469_v37 = vmul.f32 %v6403_v9, %v1692_v16  ;;  %v5537_v15 = vpop.f32.mrb[143].mxu1 }
 0x610   : > { %v6467_v41 = vmul.f32 %v6395_v8, %v1682_v43  ;;  %v16937_v43 = vsub.s32 2, %v16777_v33  ;;  %v14879_v15 = vrot.slane %v14512_v17, %v16031_v61  ;;  %v16942_v17 = vld [vmem:[#allocation113_spill] sm:$0xff] }
 0x611   : > { %v6501_v24 = vpack.c.bf16 %v6469_v37, %v6468_v35  ;;  %v10634_v37 = vld [vmem:[%s15973_s4 + $0x108] sm:$0xff]  }
 0x612   : > { %v6500_v47 = vpack.c.bf16 %v6467_v41, %v6466_v1  ;;  %v10633_v1 = vld [vmem:[%s15973_s4 + $0x100] sm:$0xff]   ;;  %v14871_v8 = vrot.slane %v14500_v18, %v16937_v43  ;;  %v16940_v18 = vld [vmem:[#allocation121_spill] sm:$0xff] }
 0x613   : > { %9368 = vmatprep.subr.bf16.mxu0 %v10633_v1  ;;  %v16938_v41 = vld [vmem:[#allocation414_spill] sm:$0xff] }
 0x614   : > { %9284 = vmatprep.mubr.bf16.mxu0 %v6500_v47  ;;  %v14848_v34 = vpop.f32.mrb[144].mxu1  ;;  %9369 = vmatpush3.bf16.msra.mxu0 %v10633_v1  ;;  %v1380_v1 = vadd.f32 %v16942_v17, %v14879_v15 }
 0x615   : > { %16929 = vst [vmem:[#allocation17_spill] sm:$0xff] %v14848_v34  ;;  %9285 = vmatmul.mubr.bf16.gmra.mrb[28].mxu0 %v6501_v24  ;;  %v5542_v40 = vpop.f32.mrb[145].mxu1  ;;  %9370 = vmatprep.subr.bf16.mxu0 %v10634_v37  ;;  %v9588_v24 = vadd.f32 %v16938_v41, %v14871_v8  ;;  %v16943_v41 = vld [vmem:[#allocation411_spill] sm:$0xff]  ;;  %v16964_v34 = vld [vmem:[#allocation169_spill] sm:$0xff] }
 0x616   : > { %v14850_v31 = vpop.f32.mrb[146].mxu1 }
 0x617   : > { %16930 = vst [vmem:[#allocation22_spill] sm:$0xff] %v14850_v31  ;;  %v5545_v21 = vpop.f32.mrb[147].mxu1 }
 0x618   : > { %9371 = vmatpush3.bf16.msra.mxu0 %v10634_v37  ;;  %v16939_v21 = vld [vmem:[#allocation408_spill] sm:$0xff]  ;;  %v9586_v37 = vadd.f32 %v16943_v41, %v14871_v8 }
 0x61c   : > { %v14852_v36 = vpop.f32.mrb[148].mxu1 }
 0x61d   : > { %16931 = vst [vmem:[#allocation20_spill] sm:$0xff] %v14852_v36  ;;  %v5550_v60 = vpop.f32.mrb[149].mxu1 }
 0x61e   : > { %v14854_v13 = vpop.f32.mrb[150].mxu1  ;;  %v9584_v60 = vadd.f32 %v16939_v21, %v14871_v8 }
 0x61f   : > { %16932 = vst [vmem:[#allocation23_spill] sm:$0xff] %v14854_v13  ;;  %v5553_v63 = vpop.f32.mrb[151].mxu1 }
 0x620   : > { %v1390_v63 = vadd.f32 %v16940_v18, %v14879_v15 }
 0x624   : > { %v14856_v44 = vpop.f32.mrb[152].mxu1 }
 0x625   : > { %16933 = vst [vmem:[#allocation21_spill] sm:$0xff] %v14856_v44  ;;  %v5558_v27 = vpop.f32.mrb[153].mxu1 }
 0x626   : > { %v14858_v16 = vpop.f32.mrb[154].mxu1 }
 0x627   : > { %16934 = vst [vmem:[#allocation28_spill] sm:$0xff] %v14858_v16  ;;  %v5561_v35 = vpop.f32.mrb[155].mxu1 }
 0x62c   : > { %v14860_v47 = vpop.f32.mrb[156].mxu1 }
 0x62d   : > { %16935 = vst [vmem:[#allocation24_spill] sm:$0xff] %v14860_v47  ;;  %v5566_v9 = vpop.f32.mrb[157].mxu1 }
 0x62e   : > { %v14862_v26 = vpop.f32.mrb[158].mxu1  ;;  %v16941_v9 = vld [vmem:[#allocation417_spill] sm:$0xff] }
 0x62f   : > { %16936 = vst [vmem:[#allocation31_spill] sm:$0xff] %v14862_v26  ;;  %v5569_v58 = vpop.f32.mrb[159].mxu1  ;;  %v16944_v26 = vld [vmem:[#allocation124_spill] sm:$0xff] }
 0x630   : > { %v9590_v58 = vadd.f32 %v16941_v9, %v14871_v8  ;;  %v1394_v21 = vadd.f32 %v16944_v26, %v14879_v15 }
 0x670   : > { %v9226_v40 = vpop.f32.mrb[224].mxu0 }
 0x671   : > { %v6610_v27 = vadd.f32 %v9588_v24, %v9226_v40  ;;  %v6601_v35 = vpop.f32.mrb[225].mxu0  ;;  %v10635_v24 = vld [vmem:[%s15973_s4 + $0x110] sm:$0xff]   ;;  %v10636_v40 = vld [vmem:[%s15973_s4 + $0x118] sm:$0xff]  }
 0x672   : > { %v6602_v43 = vadd.f32 %v9584_v60, %v6601_v35  ;;  %v9227_v61 = vpop.f32.mrb[226].mxu0  ;;  %v16945_v60 = vld [vmem:[#allocation116_spill] sm:$0xff]  ;;  %9372 = vmatprep.subr.bf16.mxu0 %v10635_v24 }
 0x673   : > { %v6858_v16 = vmul.f32 %v6610_v27, %v1390_v63  ;;  %v6613_v44 = vadd.f32 %v9590_v58, %v9227_v61  ;;  %v6604_v47 = vpop.f32.mrb[227].mxu0  ;;  %v1384_v35 = vadd.f32 %v16945_v60, %v14879_v15  ;;  %9373 = vmatpush3.bf16.msra.mxu0 %v10635_v24  ;;  %v16946_v61 = vld [vmem:[#allocation427_spill] sm:$0xff]  ;;  %v16950_v60 = vld [vmem:[#allocation129_spill] sm:$0xff] }
 0x674   : > { %v6856_v18 = vmul.f32 %v6602_v43, %v1380_v1  ;;  %v6605_v9 = vadd.f32 %v9586_v37, %v6604_v47  ;;  %v9596_v27 = vadd.f32 %v16946_v61, %v14871_v8  ;;  %9374 = vmatprep.subr.bf16.mxu0 %v10636_v40  ;;  %v10637_v58 = vld [vmem:[%s15973_s4 + $0x120] sm:$0xff]   ;;  %v16947_v1 = vld [vmem:[#allocation420_spill] sm:$0xff]  ;;  %v16948_v47 = vld [vmem:[#allocation137_spill] sm:$0xff] }
 0x675   : > { %v6859_v17 = vmul.f32 %v6613_v44, %v1394_v21  ;;  %v9592_v43 = vadd.f32 %v16947_v1, %v14871_v8  ;;  %v1410_v44 = vadd.f32 %v16948_v47, %v14879_v15  ;;  %v16951_v61 = vld [vmem:[#allocation424_spill] sm:$0xff] }
 0x676   : > { %v6857_v63 = vmul.f32 %v6605_v9, %v1384_v35  ;;  %v1400_v35 = vadd.f32 %v16950_v60, %v14879_v15  ;;  %v9594_v13 = vadd.f32 %v16951_v61, %v14871_v8 }
 0x677   : > { %v6921_v26 = vpack.c.bf16 %v6859_v17, %v6858_v16  ;;  %v16949_v16 = vld [vmem:[#allocation430_spill] sm:$0xff]  ;;  %9375 = vmatpush3.bf16.msra.mxu0 %v10636_v40 }
 0x678   : > { %v9230_v41 = vpop.f32.mrb[228].mxu0  ;;  %v6920_v31 = vpack.c.bf16 %v6857_v63, %v6856_v18  ;;  %v9598_v24 = vadd.f32 %v16949_v16, %v14871_v8  ;;  %v16952_v18 = vld [vmem:[#allocation140_spill] sm:$0xff]  ;;  %9376 = vmatprep.subr.bf16.mxu0 %v10637_v58 }
 0x679   : > { %v6626_v37 = vadd.f32 %v9596_v27, %v9230_v41  ;;  %v6617_v21 = vpop.f32.mrb[229].mxu0  ;;  %v1414_v63 = vadd.f32 %v16952_v18, %v14879_v15  ;;  %v10638_v41 = vld [vmem:[%s15973_s4 + $0x128] sm:$0xff]   ;;  %v16956_v18 = vld [vmem:[#allocation153_spill] sm:$0xff] }
 0x67a   : > { %v6618_v9 = vadd.f32 %v9592_v43, %v6617_v21  ;;  %v9231_v17 = vpop.f32.mrb[230].mxu0  ;;  %9304 = vmatprep.mubr.bf16.mxu1 %v6920_v31  ;;  %v16953_v43 = vld [vmem:[#allocation132_spill] sm:$0xff] }
 0x67b   : > { %v6862_v1 = vmul.f32 %v6626_v37, %v1410_v44  ;;  %v6629_v47 = vadd.f32 %v9598_v24, %v9231_v17  ;;  %v6620_v27 = vpop.f32.mrb[231].mxu0  ;;  %9305 = vmatmul.mubr.bf16.vlgmr.msra.gmra.mrb[160].mxu1 %v6921_v26  ;;  %v1404_v31 = vadd.f32 %v16953_v43, %v14879_v15  ;;  %9377 = vmatpush3.bf16.msra.mxu0 %v10637_v58  ;;  %v16954_v44 = vld [vmem:[#allocation439_spill] sm:$0xff]  ;;  %v10639_v26 = vld [vmem:[%s15973_s4 + $0x130] sm:$0xff]   ;;  %v16957_v58 = vld [vmem:[#allocation442_spill] sm:$0xff] }
 0x67c   : > { %v6860_v16 = vmul.f32 %v6618_v9, %v1400_v35  ;;  %v6621_v21 = vadd.f32 %v9594_v13, %v6620_v27  ;;  %v9604_v37 = vadd.f32 %v16954_v44, %v14871_v8  ;;  %9378 = vmatprep.subr.bf16.mxu0 %v10638_v41  ;;  %v16955_v17 = vld [vmem:[#allocation433_spill] sm:$0xff]  ;;  %v1430_v13 = vadd.f32 %v16956_v18, %v14879_v15 }
 0x67d   : > { %v6863_v60 = vmul.f32 %v6629_v47, %v1414_v63  ;;  %v9600_v35 = vadd.f32 %v16955_v17, %v14871_v8  ;;  %v16958_v27 = vld [vmem:[#allocation145_spill] sm:$0xff] }
 0x67e   : > { %v6861_v61 = vmul.f32 %v6621_v21, %v1404_v31  ;;  %v1420_v43 = vadd.f32 %v16958_v27, %v14879_v15 }
 0x67f   : > { %v6923_v40 = vpack.c.bf16 %v6863_v60, %v6862_v1  ;;  %v9606_v1 = vadd.f32 %v16957_v58, %v14871_v8  ;;  %v16959_v60 = vld [vmem:[#allocation436_spill] sm:$0xff]  ;;  %9379 = vmatpush3.bf16.msra.mxu0 %v10638_v41 }
 0x680   : > { %v9234_v24 = vpop.f32.mrb[232].mxu0  ;;  %v6922_v9 = vpack.c.bf16 %v6861_v61, %v6860_v16  ;;  %v9602_v44 = vadd.f32 %v16959_v60, %v14871_v8  ;;  %v16960_v16 = vld [vmem:[#allocation156_spill] sm:$0xff]  ;;  %9380 = vmatprep.subr.bf16.mxu0 %v10639_v26 }
 0x681   : > { %v6642_v63 = vadd.f32 %v9604_v37, %v9234_v24  ;;  %v6633_v47 = vpop.f32.mrb[233].mxu0  ;;  %v1434_v61 = vadd.f32 %v16960_v16, %v14879_v15  ;;  %v10640_v24 = vld [vmem:[%s15973_s4 + $0x138] sm:$0xff]  }
 0x682   : > { %v6634_v31 = vadd.f32 %v9600_v35, %v6633_v47  ;;  %v9235_v21 = vpop.f32.mrb[234].mxu0  ;;  %9308 = vmatprep.mubr.bf16.mxu1 %v6922_v9  ;;  %v16961_v35 = vld [vmem:[#allocation148_spill] sm:$0xff] }
 0x683   : > { %v6866_v17 = vmul.f32 %v6642_v63, %v1430_v13  ;;  %v6645_v18 = vadd.f32 %v9606_v1, %v9235_v21  ;;  %v6636_v37 = vpop.f32.mrb[235].mxu0  ;;  %9309 = vmatmul.mubr.bf16.gmra.mrb[164].mxu1 %v6923_v40  ;;  %v1424_v9 = vadd.f32 %v16961_v35, %v14879_v15  ;;  %9381 = vmatpush3.bf16.msra.mxu0 %v10639_v26  ;;  %v16962_v13 = vld [vmem:[#allocation451_spill] sm:$0xff]  ;;  %v16963_v40 = vld [vmem:[#allocation445_spill] sm:$0xff]  ;;  %v16967_v35 = vld [vmem:[#allocation448_spill] sm:$0xff] }
 0x684   : > { %v6864_v58 = vmul.f32 %v6634_v31, %v1420_v43  ;;  %v6637_v47 = vadd.f32 %v9602_v44, %v6636_v37  ;;  %v9612_v63 = vadd.f32 %v16962_v13, %v14871_v8  ;;  %9382 = vmatprep.subr.bf16.mxu0 %v10640_v24  ;;  %v9608_v21 = vadd.f32 %v16963_v40, %v14871_v8  ;;  %v16965_v44 = vld [vmem:[#allocation454_spill] sm:$0xff]  ;;  %v16966_v26 = vld [vmem:[#allocation161_spill] sm:$0xff] }
 0x685   : > { %v6867_v27 = vmul.f32 %v6645_v18, %v1434_v61  ;;  %v1450_v43 = vadd.f32 %v16964_v34, %v14879_v15  ;;  %v9614_v61 = vadd.f32 %v16965_v44, %v14871_v8 }
 0x686   : > { %v6865_v60 = vmul.f32 %v6637_v47, %v1424_v9  ;;  %v9610_v9 = vadd.f32 %v16967_v35, %v14871_v8 }
 0x687   : > { %v6925_v41 = vpack.c.bf16 %v6867_v27, %v6866_v17  ;;  %v1440_v17 = vadd.f32 %v16966_v26, %v14879_v15  ;;  %9383 = vmatpush3.bf16.msra.mxu0 %v10640_v24  ;;  %v16971_v24 = vld [vmem:[#allocation457_spill] sm:$0xff] }
 0x688   : > { %v9238_v1 = vpop.f32.mrb[236].mxu0  ;;  %v6924_v16 = vpack.c.bf16 %v6865_v60, %v6864_v58  ;;  %v16968_v58 = vld [vmem:[#allocation172_spill] sm:$0xff] }
 0x689   : > { %v6658_v31 = vadd.f32 %v9612_v63, %v9238_v1  ;;  %v6649_v36 = vpop.f32.mrb[237].mxu0  ;;  %v1454_v27 = vadd.f32 %v16968_v58, %v14879_v15  ;;  %v16969_v63 = vld [vmem:[#allocation164_spill] sm:$0xff] }
 0x68a   : > { %v6650_v18 = vadd.f32 %v9608_v21, %v6649_v36  ;;  %v9239_v37 = vpop.f32.mrb[238].mxu0  ;;  %9312 = vmatprep.mubr.bf16.mxu1 %v6924_v16  ;;  %v1444_v1 = vadd.f32 %v16969_v63, %v14879_v15  ;;  %v16970_v16 = vld [vmem:[#allocation464_spill] sm:$0xff] }
 0x68b   : > { %v6870_v47 = vmul.f32 %v6658_v31, %v1450_v43  ;;  %v6661_v34 = vadd.f32 %v9614_v61, %v9239_v37  ;;  %v6652_v60 = vpop.f32.mrb[239].mxu0  ;;  %9313 = vmatmul.mubr.bf16.gmra.mrb[168].mxu1 %v6925_v41  ;;  %v9620_v26 = vadd.f32 %v16970_v16, %v14871_v8  ;;  %v9616_v43 = vadd.f32 %v16971_v24, %v14871_v8  ;;  %v16972_v61 = vld [vmem:[#allocation185_spill] sm:$0xff] }
 0x68c   : > { %v6868_v13 = vmul.f32 %v6650_v18, %v1440_v17  ;;  %v6653_v40 = vadd.f32 %v9610_v9, %v6652_v60  ;;  %v1470_v37 = vadd.f32 %v16972_v61, %v14879_v15  ;;  %v16973_v18 = vld [vmem:[#allocation467_spill] sm:$0xff]  ;;  %v16974_v9 = vld [vmem:[#allocation177_spill] sm:$0xff] }
 0x68d   : > { %v6871_v44 = vmul.f32 %v6661_v34, %v1454_v27  ;;  %v9622_v58 = vadd.f32 %v16973_v18, %v14871_v8  ;;  %v1460_v27 = vadd.f32 %v16974_v9, %v14879_v15  ;;  %v16975_v60 = vld [vmem:[#allocation461_spill] sm:$0xff] }
 0x68e   : > { %v6869_v36 = vmul.f32 %v6653_v40, %v1444_v1  ;;  %v9618_v63 = vadd.f32 %v16975_v60, %v14871_v8 }
 0x68f   : > { %v6927_v21 = vpack.c.bf16 %v6871_v44, %v6870_v47 }
 0x690   : > { %v9242_v35 = vpop.f32.mrb[240].mxu0  ;;  %v6926_v31 = vpack.c.bf16 %v6869_v36, %v6868_v13  ;;  %v16976_v13 = vld [vmem:[#allocation188_spill] sm:$0xff] }
 0x691   : > { %v6674_v41 = vadd.f32 %v9620_v26, %v9242_v35  ;;  %v6665_v17 = vpop.f32.mrb[241].mxu0  ;;  %v1474_v40 = vadd.f32 %v16976_v13, %v14879_v15  ;;  %v16977_v26 = vld [vmem:[#allocation180_spill] sm:$0xff] }
 0x692   : > { %v6666_v47 = vadd.f32 %v9616_v43, %v6665_v17  ;;  %v9243_v34 = vpop.f32.mrb[242].mxu0  ;;  %9316 = vmatprep.mubr.bf16.mxu1 %v6926_v31  ;;  %v1464_v35 = vadd.f32 %v16977_v26, %v14879_v15  ;;  %v16978_v31 = vld [vmem:[#allocation29_spill] sm:$0xff] }
 0x693   : > { %v6874_v1 = vmul.f32 %v6674_v41, %v1470_v37  ;;  %v6677_v44 = vadd.f32 %v9622_v58, %v9243_v34  ;;  %v6668_v36 = vpop.f32.mrb[243].mxu0  ;;  %9317 = vmatmul.mubr.bf16.gmra.mrb[172].mxu1 %v6927_v21  ;;  %v9628_v17 = vadd.f32 %v16978_v31, %v14871_v8  ;;  %v16979_v37 = vld [vmem:[#allocation25_spill] sm:$0xff] }
 0x694   : > { %v6872_v16 = vmul.f32 %v6666_v47, %v1460_v27  ;;  %v6669_v24 = vadd.f32 %v9618_v63, %v6668_v36  ;;  %v9624_v41 = vadd.f32 %v16979_v37, %v14871_v8  ;;  %v16980_v58 = vld [vmem:[#allocation201_spill] sm:$0xff] }
 0x695   : > { %v6875_v61 = vmul.f32 %v6677_v44, %v1474_v40  ;;  %v1490_v34 = vadd.f32 %v16980_v58, %v14879_v15  ;;  %v16981_v47 = vld [vmem:[#allocation477_spill] sm:$0xff] }
 0x696   : > { %v6873_v18 = vmul.f32 %v6669_v24, %v1464_v35  ;;  %v9630_v13 = vadd.f32 %v16981_v47, %v14871_v8  ;;  %v16982_v63 = vld [vmem:[#allocation193_spill] sm:$0xff] }
 0x697   : > { %v6929_v43 = vpack.c.bf16 %v6875_v61, %v6874_v1  ;;  %v1480_v40 = vadd.f32 %v16982_v63, %v14879_v15  ;;  %v16983_v36 = vld [vmem:[#allocation473_spill] sm:$0xff] }
 0x698   : > { %v9246_v9 = vpop.f32.mrb[244].mxu0  ;;  %v6928_v60 = vpack.c.bf16 %v6873_v18, %v6872_v16  ;;  %v9626_v26 = vadd.f32 %v16983_v36, %v14871_v8  ;;  %v16984_v16 = vld [vmem:[#allocation204_spill] sm:$0xff] }
 0x699   : > { %v6690_v21 = vadd.f32 %v9628_v17, %v9246_v9  ;;  %v6681_v27 = vpop.f32.mrb[245].mxu0  ;;  %v1494_v24 = vadd.f32 %v16984_v16, %v14879_v15  ;;  %v16985_v17 = vld [vmem:[#allocation196_spill] sm:$0xff] }
 0x69a   : > { %v6682_v1 = vadd.f32 %v9624_v41, %v6681_v27  ;;  %v9247_v44 = vpop.f32.mrb[246].mxu0  ;;  %9320 = vmatprep.mubr.bf16.mxu1 %v6928_v60  ;;  %v1484_v9 = vadd.f32 %v16985_v17, %v14879_v15  ;;  %v16986_v60 = vld [vmem:[#allocation45_spill] sm:$0xff] }
 0x69b   : > { %v6878_v35 = vmul.f32 %v6690_v21, %v1490_v34  ;;  %v6693_v61 = vadd.f32 %v9630_v13, %v9247_v44  ;;  %v6684_v18 = vpop.f32.mrb[247].mxu0  ;;  %9321 = vmatmul.mubr.bf16.gmra.mrb[176].mxu1 %v6929_v43  ;;  %v9636_v27 = vadd.f32 %v16986_v60, %v14871_v8  ;;  %v16987_v34 = vld [vmem:[#allocation37_spill] sm:$0xff] }
 0x69c   : > { %v6876_v31 = vmul.f32 %v6682_v1, %v1480_v40  ;;  %v6685_v37 = vadd.f32 %v9626_v26, %v6684_v18  ;;  %v9632_v21 = vadd.f32 %v16987_v34, %v14871_v8  ;;  %v16988_v13 = vld [vmem:[#allocation217_spill] sm:$0xff] }
 0x69d   : > { %v6879_v58 = vmul.f32 %v6693_v61, %v1494_v24  ;;  %v1510_v44 = vadd.f32 %v16988_v13, %v14879_v15  ;;  %v16989_v1 = vld [vmem:[#allocation485_spill] sm:$0xff] }
 0x69e   : > { %v6877_v47 = vmul.f32 %v6685_v37, %v1484_v9  ;;  %v9638_v16 = vadd.f32 %v16989_v1, %v14871_v8  ;;  %v16990_v26 = vld [vmem:[#allocation209_spill] sm:$0xff] }
 0x69f   : > { %v6931_v41 = vpack.c.bf16 %v6879_v58, %v6878_v35  ;;  %v1500_v24 = vadd.f32 %v16990_v26, %v14879_v15  ;;  %v16991_v18 = vld [vmem:[#allocation481_spill] sm:$0xff] }
 0x6a0   : > { %v9250_v63 = vpop.f32.mrb[248].mxu0  ;;  %v6930_v36 = vpack.c.bf16 %v6877_v47, %v6876_v31  ;;  %v9634_v17 = vadd.f32 %v16991_v18, %v14871_v8  ;;  %v16992_v31 = vld [vmem:[#allocation220_spill] sm:$0xff] }
 0x6a1   : > { %v6706_v43 = vadd.f32 %v9636_v27, %v9250_v63  ;;  %v6697_v40 = vpop.f32.mrb[249].mxu0  ;;  %v1514_v37 = vadd.f32 %v16992_v31, %v14879_v15  ;;  %v16993_v27 = vld [vmem:[#allocation212_spill] sm:$0xff] }
 0x6a2   : > { %v6698_v35 = vadd.f32 %v9632_v21, %v6697_v40  ;;  %v9251_v61 = vpop.f32.mrb[250].mxu0  ;;  %9324 = vmatprep.mubr.bf16.mxu1 %v6930_v36  ;;  %v1504_v63 = vadd.f32 %v16993_v27, %v14879_v15  ;;  %v16994_v36 = vld [vmem:[#allocation77_spill] sm:$0xff] }
 0x6a3   : > { %v6882_v9 = vmul.f32 %v6706_v43, %v1510_v44  ;;  %v6709_v58 = vadd.f32 %v9638_v16, %v9251_v61  ;;  %v6700_v47 = vpop.f32.mrb[251].mxu0  ;;  %9325 = vmatmul.mubr.bf16.gmra.mrb[180].mxu1 %v6931_v41  ;;  %v9644_v40 = vadd.f32 %v16994_v36, %v14871_v8  ;;  %v16995_v44 = vld [vmem:[#allocation61_spill] sm:$0xff] }
 0x6a4   : > { %v6880_v60 = vmul.f32 %v6698_v35, %v1500_v24  ;;  %v6701_v34 = vadd.f32 %v9634_v17, %v6700_v47  ;;  %v9640_v43 = vadd.f32 %v16995_v44, %v14871_v8  ;;  %v16996_v16 = vld [vmem:[#allocation233_spill] sm:$0xff] }
 0x6a5   : > { %v6883_v13 = vmul.f32 %v6709_v58, %v1514_v37  ;;  %v1530_v61 = vadd.f32 %v16996_v16, %v14879_v15  ;;  %v16997_v35 = vld [vmem:[#allocation493_spill] sm:$0xff] }
 0x6a6   : > { %v6881_v1 = vmul.f32 %v6701_v34, %v1504_v63  ;;  %v9646_v31 = vadd.f32 %v16997_v35, %v14871_v8  ;;  %v16998_v17 = vld [vmem:[#allocation225_spill] sm:$0xff] }
 0x6a7   : > { %v6933_v21 = vpack.c.bf16 %v6883_v13, %v6882_v9  ;;  %v1520_v37 = vadd.f32 %v16998_v17, %v14879_v15  ;;  %v16999_v47 = vld [vmem:[#allocation489_spill] sm:$0xff] }
 0x6a8   : > { %v9254_v26 = vpop.f32.mrb[252].mxu0  ;;  %v6932_v18 = vpack.c.bf16 %v6881_v1, %v6880_v60  ;;  %v9642_v27 = vadd.f32 %v16999_v47, %v14871_v8  ;;  %v17000_v60 = vld [vmem:[#allocation236_spill] sm:$0xff] }
 0x6a9   : > { %v6722_v41 = vadd.f32 %v9644_v40, %v9254_v26  ;;  %v6713_v24 = vpop.f32.mrb[253].mxu0  ;;  %v1534_v34 = vadd.f32 %v17000_v60, %v14879_v15  ;;  %v17001_v40 = vld [vmem:[#allocation228_spill] sm:$0xff] }
 0x6aa   : > { %v6714_v9 = vadd.f32 %v9640_v43, %v6713_v24  ;;  %v9255_v58 = vpop.f32.mrb[254].mxu0  ;;  %9328 = vmatprep.mubr.bf16.mxu1 %v6932_v18  ;;  %v1524_v26 = vadd.f32 %v17001_v40, %v14879_v15  ;;  %v17002_v18 = vld [vmem:[#allocation110_spill] sm:$0xff] }
 0x6ab   : > { %v6886_v63 = vmul.f32 %v6722_v41, %v1530_v61  ;;  %v6725_v13 = vadd.f32 %v9646_v31, %v9255_v58  ;;  %v6716_v1 = vpop.f32.mrb[255].mxu0  ;;  %9329 = vmatmul.mubr.bf16.gmra.mrb[184].mxu1 %v6933_v21  ;;  %v9652_v24 = vadd.f32 %v17002_v18, %v14871_v8  ;;  %v17003_v61 = vld [vmem:[#allocation94_spill] sm:$0xff]  ;;  %v17004_v31 = vld [vmem:[#allocation249_spill] sm:$0xff] }
 0x6ac   : > { %v6884_v36 = vmul.f32 %v6714_v9, %v1520_v37  ;;  %v6717_v44 = vadd.f32 %v9642_v27, %v6716_v1  ;;  %v9648_v41 = vadd.f32 %v17003_v61, %v14871_v8  ;;  %v1550_v58 = vadd.f32 %v17004_v31, %v14879_v15  ;;  %v17005_v9 = vld [vmem:[#allocation50_spill] sm:$0xff]  ;;  %v17006_v27 = vld [vmem:[#allocation241_spill] sm:$0xff] }
 0x6ad   : > { %v6887_v16 = vmul.f32 %v6725_v13, %v1534_v34  ;;  %v9654_v60 = vadd.f32 %v17005_v9, %v14871_v8  ;;  %v1540_v34 = vadd.f32 %v17006_v27, %v14879_v15  ;;  %v17007_v1 = vld [vmem:[#allocation102_spill] sm:$0xff] }
 0x6ae   : > { %v6885_v35 = vmul.f32 %v6717_v44, %v1524_v26  ;;  %v9650_v40 = vadd.f32 %v17007_v1, %v14871_v8 }
 0x6af   : > { %v6935_v43 = vpack.c.bf16 %v6887_v16, %v6886_v63 }
 0x6b0   : > { %v9258_v17 = vpop.f32.mrb[0].mxu0  ;;  %v6934_v47 = vpack.c.bf16 %v6885_v35, %v6884_v36  ;;  %v17008_v36 = vld [vmem:[#allocation252_spill] sm:$0xff] }
 0x6b1   : > { %v6738_v21 = vadd.f32 %v9652_v24, %v9258_v17  ;;  %v6729_v37 = vpop.f32.mrb[1].mxu0  ;;  %v1554_v44 = vadd.f32 %v17008_v36, %v14879_v15  ;;  %v17009_v24 = vld [vmem:[#allocation244_spill] sm:$0xff] }
 0x6b2   : > { %v6730_v63 = vadd.f32 %v9648_v41, %v6729_v37  ;;  %v9259_v13 = vpop.f32.mrb[2].mxu0  ;;  %9332 = vmatprep.mubr.bf16.mxu1 %v6934_v47  ;;  %v1544_v17 = vadd.f32 %v17009_v24, %v14879_v15  ;;  %v17010_v47 = vld [vmem:[#allocation74_spill] sm:$0xff] }
 0x6b3   : > { %v6890_v26 = vmul.f32 %v6738_v21, %v1550_v58  ;;  %v6741_v16 = vadd.f32 %v9654_v60, %v9259_v13  ;;  %v6732_v35 = vpop.f32.mrb[3].mxu0  ;;  %9333 = vmatmul.mubr.bf16.gmra.mrb[188].mxu1 %v6935_v43  ;;  %v9660_v37 = vadd.f32 %v17010_v47, %v14871_v8  ;;  %v17011_v58 = vld [vmem:[#allocation58_spill] sm:$0xff]  ;;  %v17012_v60 = vld [vmem:[#allocation265_spill] sm:$0xff] }
 0x6b4   : > { %v6888_v18 = vmul.f32 %v6730_v63, %v1540_v34  ;;  %v6733_v61 = vadd.f32 %v9650_v40, %v6732_v35  ;;  %v9656_v21 = vadd.f32 %v17011_v58, %v14871_v8  ;;  %v1570_v13 = vadd.f32 %v17012_v60, %v14879_v15  ;;  %v17013_v63 = vld [vmem:[#allocation82_spill] sm:$0xff]  ;;  %v17014_v40 = vld [vmem:[#allocation257_spill] sm:$0xff] }
 0x6b5   : > { %v6891_v31 = vmul.f32 %v6741_v16, %v1554_v44  ;;  %v9662_v36 = vadd.f32 %v17013_v63, %v14871_v8  ;;  %v1560_v44 = vadd.f32 %v17014_v40, %v14879_v15  ;;  %v17015_v35 = vld [vmem:[#allocation66_spill] sm:$0xff] }
 0x6b6   : > { %v6889_v9 = vmul.f32 %v6733_v61, %v1544_v17  ;;  %v9658_v24 = vadd.f32 %v17015_v35, %v14871_v8 }
 0x6b7   : > { %v6937_v41 = vpack.c.bf16 %v6891_v31, %v6890_v26 }
 0x6b8   : > { %v9262_v27 = vpop.f32.mrb[4].mxu0  ;;  %v6936_v1 = vpack.c.bf16 %v6889_v9, %v6888_v18  ;;  %v17016_v18 = vld [vmem:[#allocation268_spill] sm:$0xff] }
 0x6b9   : > { %v6754_v43 = vadd.f32 %v9660_v37, %v9262_v27  ;;  %v6745_v34 = vpop.f32.mrb[5].mxu0  ;;  %v1574_v61 = vadd.f32 %v17016_v18, %v14879_v15  ;;  %v17017_v37 = vld [vmem:[#allocation260_spill] sm:$0xff] }
 0x6ba   : > { %v6746_v26 = vadd.f32 %v9656_v21, %v6745_v34  ;;  %v9263_v16 = vpop.f32.mrb[6].mxu0  ;;  %9336 = vmatprep.mubr.bf16.mxu1 %v6936_v1  ;;  %v1564_v27 = vadd.f32 %v17017_v37, %v14879_v15  ;;  %v17018_v1 = vld [vmem:[#allocation106_spill] sm:$0xff] }
 0x6bb   : > { %v6894_v17 = vmul.f32 %v6754_v43, %v1570_v13  ;;  %v6757_v31 = vadd.f32 %v9662_v36, %v9263_v16  ;;  %v6748_v9 = vpop.f32.mrb[7].mxu0  ;;  %9337 = vmatmul.mubr.bf16.gmra.mrb[192].mxu1 %v6937_v41  ;;  %v9668_v34 = vadd.f32 %v17018_v1, %v14871_v8  ;;  %v17019_v13 = vld [vmem:[#allocation90_spill] sm:$0xff]  ;;  %v17020_v36 = vld [vmem:[#allocation281_spill] sm:$0xff] }
 0x6bc   : > { %v6892_v47 = vmul.f32 %v6746_v26, %v1560_v44  ;;  %v6749_v58 = vadd.f32 %v9658_v24, %v6748_v9  ;;  %v9664_v43 = vadd.f32 %v17019_v13, %v14871_v8  ;;  %v1590_v16 = vadd.f32 %v17020_v36, %v14879_v15  ;;  %v17021_v26 = vld [vmem:[#allocation496_spill] sm:$0xff]  ;;  %v17022_v24 = vld [vmem:[#allocation273_spill] sm:$0xff]  ;;  %v17023_v9 = vld [vmem:[#allocation98_spill] sm:$0xff] }
 0x6bd   : > { %v6895_v60 = vmul.f32 %v6757_v31, %v1574_v61  ;;  %v9670_v18 = vadd.f32 %v17021_v26, %v14871_v8  ;;  %v1580_v61 = vadd.f32 %v17022_v24, %v14879_v15  ;;  %v9666_v37 = vadd.f32 %v17023_v9, %v14871_v8 }
 0x6be   : > { %v6893_v63 = vmul.f32 %v6749_v58, %v1564_v27 }
 0x6bf   : > { %v6939_v21 = vpack.c.bf16 %v6895_v60, %v6894_v17 }
 0x6c0   : > { %v9266_v40 = vpop.f32.mrb[8].mxu0  ;;  %v6938_v35 = vpack.c.bf16 %v6893_v63, %v6892_v47  ;;  %v17024_v47 = vld [vmem:[#allocation284_spill] sm:$0xff] }
 0x6c1   : > { %v6770_v41 = vadd.f32 %v9668_v34, %v9266_v40  ;;  %v6761_v44 = vpop.f32.mrb[9].mxu0  ;;  %v1594_v58 = vadd.f32 %v17024_v47, %v14879_v15  ;;  %v17025_v34 = vld [vmem:[#allocation276_spill] sm:$0xff] }
 0x6c2   : > { %v6762_v17 = vadd.f32 %v9664_v43, %v6761_v44  ;;  %v9267_v31 = vpop.f32.mrb[10].mxu0  ;;  %9340 = vmatprep.mubr.bf16.mxu1 %v6938_v35  ;;  %v1584_v40 = vadd.f32 %v17025_v34, %v14879_v15  ;;  %v17026_v35 = vld [vmem:[#allocation502_spill] sm:$0xff] }
 0x6c3   : > { %v6898_v27 = vmul.f32 %v6770_v41, %v1590_v16  ;;  %v6773_v60 = vadd.f32 %v9670_v18, %v9267_v31  ;;  %v6764_v63 = vpop.f32.mrb[11].mxu0  ;;  %9341 = vmatmul.mubr.bf16.gmra.mrb[196].mxu1 %v6939_v21  ;;  %v9676_v44 = vadd.f32 %v17026_v35, %v14871_v8  ;;  %v17027_v16 = vld [vmem:[#allocation498_spill] sm:$0xff]  ;;  %v17028_v18 = vld [vmem:[#allocation297_spill] sm:$0xff] }
 0x6c4   : > { %v6896_v1 = vmul.f32 %v6762_v17, %v1580_v61  ;;  %v6765_v13 = vadd.f32 %v9666_v37, %v6764_v63  ;;  %v9672_v41 = vadd.f32 %v17027_v16, %v14871_v8  ;;  %v1610_v31 = vadd.f32 %v17028_v18, %v14879_v15  ;;  %v17029_v17 = vld [vmem:[#allocation504_spill] sm:$0xff]  ;;  %v17030_v37 = vld [vmem:[#allocation289_spill] sm:$0xff] }
 0x6c5   : > { %v6899_v36 = vmul.f32 %v6773_v60, %v1594_v58  ;;  %v9678_v47 = vadd.f32 %v17029_v17, %v14871_v8  ;;  %v1600_v58 = vadd.f32 %v17030_v37, %v14879_v15  ;;  %v17031_v63 = vld [vmem:[#allocation500_spill] sm:$0xff] }
 0x6c6   : > { %v6897_v26 = vmul.f32 %v6765_v13, %v1584_v40  ;;  %v9674_v34 = vadd.f32 %v17031_v63, %v14871_v8 }
 0x6c7   : > { %v6941_v43 = vpack.c.bf16 %v6899_v36, %v6898_v27 }
 0x6c8   : > { %v9270_v24 = vpop.f32.mrb[12].mxu0  ;;  %v6940_v9 = vpack.c.bf16 %v6897_v26, %v6896_v1  ;;  %v17032_v1 = vld [vmem:[#allocation300_spill] sm:$0xff] }
 0x6c9   : > { %v6786_v21 = vadd.f32 %v9676_v44, %v9270_v24  ;;  %v6777_v61 = vpop.f32.mrb[13].mxu0  ;;  %v1614_v13 = vadd.f32 %v17032_v1, %v14879_v15  ;;  %v17033_v44 = vld [vmem:[#allocation292_spill] sm:$0xff] }
 0x6ca   : > { %v6778_v27 = vadd.f32 %v9672_v41, %v6777_v61  ;;  %v9271_v60 = vpop.f32.mrb[14].mxu0  ;;  %9344 = vmatprep.mubr.bf16.mxu1 %v6940_v9  ;;  %v1604_v24 = vadd.f32 %v17033_v44, %v14879_v15  ;;  %v17034_v9 = vld [vmem:[#allocation510_spill] sm:$0xff] }
 0x6cb   : > { %v6902_v40 = vmul.f32 %v6786_v21, %v1610_v31  ;;  %v6789_v36 = vadd.f32 %v9678_v47, %v9271_v60  ;;  %v6780_v26 = vpop.f32.mrb[15].mxu0  ;;  %9345 = vmatmul.mubr.bf16.gmra.mrb[200].mxu1 %v6941_v43  ;;  %v9684_v61 = vadd.f32 %v17034_v9, %v14871_v8  ;;  %v17035_v31 = vld [vmem:[#allocation506_spill] sm:$0xff]  ;;  %v17036_v47 = vld [vmem:[#allocation313_spill] sm:$0xff] }
 0x6cc   : > { %v6900_v35 = vmul.f32 %v6778_v27, %v1600_v58  ;;  %v6781_v16 = vadd.f32 %v9674_v34, %v6780_v26  ;;  %v9680_v21 = vadd.f32 %v17035_v31, %v14871_v8  ;;  %v1630_v60 = vadd.f32 %v17036_v47, %v14879_v15  ;;  %v17037_v27 = vld [vmem:[#allocation512_spill] sm:$0xff]  ;;  %v17038_v34 = vld [vmem:[#allocation305_spill] sm:$0xff] }
 0x6cd   : > { %v6903_v18 = vmul.f32 %v6789_v36, %v1614_v13  ;;  %v9686_v1 = vadd.f32 %v17037_v27, %v14871_v8  ;;  %v1620_v13 = vadd.f32 %v17038_v34, %v14879_v15  ;;  %v17039_v26 = vld [vmem:[#allocation508_spill] sm:$0xff] }
 0x6ce   : > { %v6901_v17 = vmul.f32 %v6781_v16, %v1604_v24  ;;  %v9682_v44 = vadd.f32 %v17039_v26, %v14871_v8 }
 0x6cf   : > { %v6943_v41 = vpack.c.bf16 %v6903_v18, %v6902_v40 }
 0x6d0   : > { %v9274_v37 = vpop.f32.mrb[16].mxu0  ;;  %v6942_v63 = vpack.c.bf16 %v6901_v17, %v6900_v35  ;;  %v17040_v35 = vld [vmem:[#allocation316_spill] sm:$0xff] }
 0x6d1   : > { %v6802_v43 = vadd.f32 %v9684_v61, %v9274_v37  ;;  %v6793_v58 = vpop.f32.mrb[17].mxu0  ;;  %v1634_v16 = vadd.f32 %v17040_v35, %v14879_v15  ;;  %v17041_v61 = vld [vmem:[#allocation308_spill] sm:$0xff] }
 0x6d2   : > { %v6794_v40 = vadd.f32 %v9680_v21, %v6793_v58  ;;  %v9275_v36 = vpop.f32.mrb[18].mxu0  ;;  %9348 = vmatprep.mubr.bf16.mxu1 %v6942_v63  ;;  %v1624_v37 = vadd.f32 %v17041_v61, %v14879_v15  ;;  %v17042_v63 = vld [vmem:[#allocation518_spill] sm:$0xff] }
 0x6d3   : > { %v6906_v24 = vmul.f32 %v6802_v43, %v1630_v60  ;;  %v6805_v18 = vadd.f32 %v9686_v1, %v9275_v36  ;;  %v6796_v17 = vpop.f32.mrb[19].mxu0  ;;  %9349 = vmatmul.mubr.bf16.gmra.mrb[204].mxu1 %v6943_v41  ;;  %v9692_v58 = vadd.f32 %v17042_v63, %v14871_v8  ;;  %v17043_v60 = vld [vmem:[#allocation514_spill] sm:$0xff]  ;;  %v17044_v1 = vld [vmem:[#allocation329_spill] sm:$0xff] }
 0x6d4   : > { %v6904_v9 = vmul.f32 %v6794_v40, %v1620_v13  ;;  %v6797_v31 = vadd.f32 %v9682_v44, %v6796_v17  ;;  %v9688_v43 = vadd.f32 %v17043_v60, %v14871_v8  ;;  %v1650_v36 = vadd.f32 %v17044_v1, %v14879_v15  ;;  %v17045_v40 = vld [vmem:[#allocation520_spill] sm:$0xff]  ;;  %v17046_v44 = vld [vmem:[#allocation321_spill] sm:$0xff] }
 0x6d5   : > { %v6907_v47 = vmul.f32 %v6805_v18, %v1634_v16  ;;  %v9694_v35 = vadd.f32 %v17045_v40, %v14871_v8  ;;  %v1640_v16 = vadd.f32 %v17046_v44, %v14879_v15  ;;  %v17047_v17 = vld [vmem:[#allocation516_spill] sm:$0xff] }
 0x6d6   : > { %v6905_v27 = vmul.f32 %v6797_v31, %v1624_v37  ;;  %v9690_v61 = vadd.f32 %v17047_v17, %v14871_v8 }
 0x6d7   : > { %v6945_v21 = vpack.c.bf16 %v6907_v47, %v6906_v24 }
 0x6d8   : > { %v9278_v34 = vpop.f32.mrb[20].mxu0  ;;  %v6944_v26 = vpack.c.bf16 %v6905_v27, %v6904_v9  ;;  %v17048_v9 = vld [vmem:[#allocation332_spill] sm:$0xff] }
 0x6d9   : > { %v6818_v41 = vadd.f32 %v9692_v58, %v9278_v34  ;;  %v6809_v13 = vpop.f32.mrb[21].mxu0  ;;  %v1654_v31 = vadd.f32 %v17048_v9, %v14879_v15  ;;  %v17049_v58 = vld [vmem:[#allocation324_spill] sm:$0xff] }
 0x6da   : > { %v6810_v24 = vadd.f32 %v9688_v43, %v6809_v13  ;;  %v9279_v18 = vpop.f32.mrb[22].mxu0  ;;  %9352 = vmatprep.mubr.bf16.mxu1 %v6944_v26  ;;  %v1644_v34 = vadd.f32 %v17049_v58, %v14879_v15  ;;  %v17050_v26 = vld [vmem:[#allocation526_spill] sm:$0xff] }
 0x6db   : > { %v6910_v37 = vmul.f32 %v6818_v41, %v1650_v36  ;;  %v6821_v47 = vadd.f32 %v9694_v35, %v9279_v18  ;;  %v6812_v27 = vpop.f32.mrb[23].mxu0  ;;  %9353 = vmatmul.mubr.bf16.gmra.mrb[208].mxu1 %v6945_v21  ;;  %v9700_v13 = vadd.f32 %v17050_v26, %v14871_v8  ;;  %v17051_v36 = vld [vmem:[#allocation522_spill] sm:$0xff]  ;;  %v17052_v35 = vld [vmem:[#allocation345_spill] sm:$0xff] }
 0x6dc   : > { %v6908_v63 = vmul.f32 %v6810_v24, %v1640_v16  ;;  %v6813_v60 = vadd.f32 %v9690_v61, %v6812_v27  ;;  %v9696_v41 = vadd.f32 %v17051_v36, %v14871_v8  ;;  %v1670_v18 = vadd.f32 %v17052_v35, %v14879_v15  ;;  %v17053_v24 = vld [vmem:[#allocation528_spill] sm:$0xff]  ;;  %v17054_v61 = vld [vmem:[#allocation337_spill] sm:$0xff] }
 0x6dd   : > { %v6911_v1 = vmul.f32 %v6821_v47, %v1654_v31  ;;  %v9702_v9 = vadd.f32 %v17053_v24, %v14871_v8  ;;  %v1660_v31 = vadd.f32 %v17054_v61, %v14879_v15  ;;  %v17055_v27 = vld [vmem:[#allocation524_spill] sm:$0xff] }
 0x6de   : > { %v6909_v40 = vmul.f32 %v6813_v60, %v1644_v34  ;;  %v9698_v58 = vadd.f32 %v17055_v27, %v14871_v8 }
 0x6df   : > { %v6947_v43 = vpack.c.bf16 %v6911_v1, %v6910_v37 }
 0x6e0   : > { %v9282_v44 = vpop.f32.mrb[24].mxu0  ;;  %v6946_v17 = vpack.c.bf16 %v6909_v40, %v6908_v63  ;;  %v17056_v63 = vld [vmem:[#allocation348_spill] sm:$0xff] }
 0x6e1   : > { %v6834_v21 = vadd.f32 %v9700_v13, %v9282_v44  ;;  %v6825_v16 = vpop.f32.mrb[25].mxu0  ;;  %v1674_v60 = vadd.f32 %v17056_v63, %v14879_v15  ;;  %v17057_v13 = vld [vmem:[#allocation340_spill] sm:$0xff] }
 0x6e2   : > { %v6826_v37 = vadd.f32 %v9696_v41, %v6825_v16  ;;  %v9283_v47 = vpop.f32.mrb[26].mxu0  ;;  %9356 = vmatprep.mubr.bf16.mxu1 %v6946_v17  ;;  %v1664_v44 = vadd.f32 %v17057_v13, %v14879_v15  ;;  %v17058_v17 = vld [vmem:[#allocation534_spill] sm:$0xff] }
 0x6e3   : > { %v6914_v34 = vmul.f32 %v6834_v21, %v1670_v18  ;;  %v6837_v1 = vadd.f32 %v9702_v9, %v9283_v47  ;;  %v6828_v40 = vpop.f32.mrb[27].mxu0  ;;  %9357 = vmatmul.mubr.bf16.gmra.mrb[212].mxu1 %v6947_v43  ;;  %v9708_v16 = vadd.f32 %v17058_v17, %v14871_v8  ;;  %v17059_v18 = vld [vmem:[#allocation530_spill] sm:$0xff]  ;;  %v17060_v9 = vld [vmem:[#allocation361_spill] sm:$0xff] }
 0x6e4   : > { %v6912_v26 = vmul.f32 %v6826_v37, %v1660_v31  ;;  %v6829_v36 = vadd.f32 %v9698_v58, %v6828_v40  ;;  %v9704_v21 = vadd.f32 %v17059_v18, %v14871_v8  ;;  %v1690_v47 = vadd.f32 %v17060_v9, %v14879_v15  ;;  %v17061_v37 = vld [vmem:[#allocation536_spill] sm:$0xff]  ;;  %v17062_v58 = vld [vmem:[#allocation353_spill] sm:$0xff] }
 0x6e5   : > { %v6915_v35 = vmul.f32 %v6837_v1, %v1674_v60  ;;  %v9710_v63 = vadd.f32 %v17061_v37, %v14871_v8  ;;  %v1680_v60 = vadd.f32 %v17062_v58, %v14879_v15  ;;  %v17063_v40 = vld [vmem:[#allocation532_spill] sm:$0xff] }
 0x6e6   : > { %v6913_v24 = vmul.f32 %v6829_v36, %v1664_v44  ;;  %v9706_v13 = vadd.f32 %v17063_v40, %v14871_v8  ;;  %v16032_v8 = vsub.s32 4, %v16777_v33  ;;  %v17069_v40 = vld [vmem:[#allocation123_spill] sm:$0xff] }
 0x6e7   : > { %v6949_v41 = vpack.c.bf16 %v6915_v35, %v6914_v34 }
 0x6e8   : > { %v9286_v61 = vpop.f32.mrb[28].mxu0  ;;  %v6948_v27 = vpack.c.bf16 %v6913_v24, %v6912_v26  ;;  %v17064_v26 = vld [vmem:[#allocation364_spill] sm:$0xff] }
 0x6e9   : > { %v6850_v43 = vadd.f32 %v9708_v16, %v9286_v61  ;;  %v6841_v31 = vpop.f32.mrb[29].mxu0  ;;  %v1694_v36 = vadd.f32 %v17064_v26, %v14879_v15  ;;  %v17065_v16 = vld [vmem:[#allocation356_spill] sm:$0xff] }
 0x6ea   : > { %v6842_v34 = vadd.f32 %v9704_v21, %v6841_v31  ;;  %v9287_v1 = vpop.f32.mrb[30].mxu0  ;;  %9360 = vmatprep.mubr.bf16.mxu1 %v6948_v27  ;;  %v1684_v61 = vadd.f32 %v17065_v16, %v14879_v15  ;;  %v15159_v27 = vld [vmem:[%s15975_s6] sm:$0x1f] }
 0x6eb   : > { %v6918_v44 = vmul.f32 %v6850_v43, %v1690_v47  ;;  %v6853_v35 = vadd.f32 %v9710_v63, %v9287_v1  ;;  %v6844_v24 = vpop.f32.mrb[31].mxu0  ;;  %9361 = vmatmul.mubr.bf16.gmra.mrb[216].mxu1 %v6949_v41  ;;  %v17066_v41 = vsub.s32 3, %v16777_v33  ;;  %v15169_v15 = vld [vmem:[%s15972_s3] sm:$0x3f]  ;;  %v17067_v63 = vld [vmem:[#allocation416_spill] sm:$0xff] }
 0x6ec   : > { %v6916_v17 = vmul.f32 %v6842_v34, %v1680_v60  ;;  %v6845_v18 = vadd.f32 %v9706_v13, %v6844_v24  ;;  %v15174_v43 = vrot.slane %v15169_v15, %v16032_v8  ;;  %v17068_v34 = vld [vmem:[#allocation410_spill] sm:$0xff]  ;;  %v17071_v24 = vld [vmem:[#allocation115_spill] sm:$0xff] }
 0x6ed   : > { %v6919_v9 = vmul.f32 %v6853_v35, %v1694_v36  ;;  %v15164_v47 = vrot.slane %v15159_v27, %v17066_v41  ;;  %v17070_v36 = vld [vmem:[#allocation419_spill] sm:$0xff] }
 0x6ee   : > { %v6917_v37 = vmul.f32 %v6845_v18, %v1684_v61  ;;  %v1741_v13 = vadd.f32 %v17069_v40, %v15174_v43  ;;  %v17072_v18 = vld [vmem:[#allocation413_spill] sm:$0xff] }
 0x6ef   : > { %v6951_v21 = vpack.c.bf16 %v6919_v9, %v6918_v44  ;;  %v9589_v58 = vadd.f32 %v17067_v63, %v15164_v47  ;;  %v9585_v1 = vadd.f32 %v17068_v34, %v15164_v47  ;;  %v9591_v35 = vadd.f32 %v17070_v36, %v15164_v47 }
 0x6f0   : > { %v6950_v31 = vpack.c.bf16 %v6917_v37, %v6916_v17  ;;  %v1731_v17 = vadd.f32 %v17071_v24, %v15174_v43  ;;  %v9587_v9 = vadd.f32 %v17072_v18, %v15164_v47  ;;  %v17073_v37 = vld [vmem:[#allocation126_spill] sm:$0xff] }
 0x6f1   : > { %v17076_v18 = vld [vmem:[#allocation422_spill] sm:$0xff] }
 0x6f2   : > { %9364 = vmatprep.mubr.bf16.mxu1 %v6950_v31  ;;  %v9593_v38 = vadd.f32 %v17076_v18, %v15164_v47 }
 0x6f3   : > { %9365 = vmatmul.mubr.bf16.gmra.mrb[220].mxu1 %v6951_v21  ;;  %v1745_v21 = vadd.f32 %v17073_v37, %v15174_v43  ;;  %v17078_v37 = vld [vmem:[#allocation432_spill] sm:$0xff] }
 0x74e   : > { %v9306_v60 = vpop.f32.mrb[160].mxu1 }
 0x74f   : > { %v7060_v44 = vadd.f32 %v9589_v58, %v9306_v60  ;;  %v7051_v26 = vpop.f32.mrb[161].mxu1  ;;  %v17074_v58 = vld [vmem:[#allocation118_spill] sm:$0xff] }
 0x750   : > { %v7052_v16 = vadd.f32 %v9585_v1, %v7051_v26  ;;  %v9307_v61 = vpop.f32.mrb[162].mxu1  ;;  %v1735_v60 = vadd.f32 %v17074_v58, %v15174_v43  ;;  %v17075_v1 = vld [vmem:[#allocation429_spill] sm:$0xff]  ;;  %v17081_v58 = vld [vmem:[#allocation142_spill] sm:$0xff] }
 0x751   : > { %v7308_v31 = vmul.f32 %v7060_v44, %v1741_v13  ;;  %v7063_v41 = vadd.f32 %v9591_v35, %v9307_v61  ;;  %v7054_v63 = vpop.f32.mrb[163].mxu1  ;;  %v9597_v26 = vadd.f32 %v17075_v1, %v15164_v47  ;;  %v17077_v13 = vld [vmem:[#allocation139_spill] sm:$0xff] }
 0x752   : > { %v7306_v34 = vmul.f32 %v7052_v16, %v1731_v17  ;;  %v7055_v40 = vadd.f32 %v9587_v9, %v7054_v63  ;;  %v1761_v44 = vadd.f32 %v17077_v13, %v15174_v43  ;;  %v9599_v17 = vadd.f32 %v17078_v37, %v15164_v47  ;;  %v17079_v16 = vld [vmem:[#allocation131_spill] sm:$0xff] }
 0x753   : > { %v7309_v36 = vmul.f32 %v7063_v41, %v1745_v21  ;;  %v1751_v9 = vadd.f32 %v17079_v16, %v15174_v43  ;;  %v17080_v41 = vld [vmem:[#allocation426_spill] sm:$0xff]  ;;  %v17084_v16 = vld [vmem:[#allocation435_spill] sm:$0xff] }
 0x754   : > { %v7307_v8 = vmul.f32 %v7055_v40, %v1735_v60  ;;  %v9595_v63 = vadd.f32 %v17080_v41, %v15164_v47  ;;  %v9601_v41 = vadd.f32 %v17084_v16, %v15164_v47 }
 0x755   : > { %v7371_v11 = vpack.c.bf16 %v7309_v36, %v7308_v31  ;;  %v17082_v36 = vld [vmem:[#allocation134_spill] sm:$0xff] }
 0x756   : > { %v9310_v24 = vpop.f32.mrb[164].mxu1  ;;  %v7370_v30 = vpack.c.bf16 %v7307_v8, %v7306_v34  ;;  %v1765_v8 = vadd.f32 %v17081_v58, %v15174_v43  ;;  %v1755_v1 = vadd.f32 %v17082_v36, %v15174_v43  ;;  %v17089_v36 = vld [vmem:[#allocation158_spill] sm:$0xff] }
 0x757   : > { %v7076_v35 = vadd.f32 %v9597_v26, %v9310_v24  ;;  %v7067_v61 = vpop.f32.mrb[165].mxu1 }
 0x758   : > { %v7068_v21 = vadd.f32 %v9593_v38, %v7067_v61  ;;  %v9311_v31 = vpop.f32.mrb[166].mxu1  ;;  %9384 = vmatprep.mubr.bf16.mxu0 %v7370_v30  ;;  %v17083_v30 = vld [vmem:[#allocation441_spill] sm:$0xff] }
 0x759   : > { %v7312_v60 = vmul.f32 %v7076_v35, %v1761_v44  ;;  %v7079_v34 = vadd.f32 %v9599_v17, %v9311_v31  ;;  %v7070_v40 = vpop.f32.mrb[167].mxu1  ;;  %9385 = vmatmul.mubr.bf16.vlgmr.msra.gmra.mrb[32].mxu0 %v7371_v11  ;;  %v9605_v61 = vadd.f32 %v17083_v30, %v15164_v47  ;;  %v17085_v44 = vld [vmem:[#allocation155_spill] sm:$0xff]  ;;  %v17086_v31 = vld [vmem:[#allocation444_spill] sm:$0xff] }
 0x75a   : > { %v7310_v26 = vmul.f32 %v7068_v21, %v1751_v9  ;;  %v7071_v24 = vadd.f32 %v9595_v63, %v7070_v40  ;;  %v1781_v35 = vadd.f32 %v17085_v44, %v15174_v43  ;;  %v9607_v9 = vadd.f32 %v17086_v31, %v15164_v47  ;;  %v17087_v21 = vld [vmem:[#allocation147_spill] sm:$0xff] }
 0x75b   : > { %v7313_v18 = vmul.f32 %v7079_v34, %v1765_v8  ;;  %v1771_v63 = vadd.f32 %v17087_v21, %v15174_v43  ;;  %v17088_v34 = vld [vmem:[#allocation438_spill] sm:$0xff]  ;;  %v17092_v21 = vld [vmem:[#allocation447_spill] sm:$0xff] }
 0x75c   : > { %v7311_v13 = vmul.f32 %v7071_v24, %v1755_v1  ;;  %v9603_v40 = vadd.f32 %v17088_v34, %v15164_v47  ;;  %v1785_v1 = vadd.f32 %v17089_v36, %v15174_v43  ;;  %v9609_v34 = vadd.f32 %v17092_v21, %v15164_v47 }
 0x75d   : > { %v7373_v38 = vpack.c.bf16 %v7313_v18, %v7312_v60 }
 0x75e   : > { %v9314_v37 = vpop.f32.mrb[168].mxu1  ;;  %v7372_v58 = vpack.c.bf16 %v7311_v13, %v7310_v26  ;;  %v17090_v13 = vld [vmem:[#allocation150_spill] sm:$0xff] }
 0x75f   : > { %v7092_v11 = vadd.f32 %v9605_v61, %v9314_v37  ;;  %v7083_v17 = vpop.f32.mrb[169].mxu1  ;;  %v1775_v30 = vadd.f32 %v17090_v13, %v15174_v43  ;;  %v17097_v13 = vld [vmem:[#allocation174_spill] sm:$0xff] }
 0x760   : > { %v7084_v8 = vadd.f32 %v9601_v41, %v7083_v17  ;;  %v9315_v60 = vpop.f32.mrb[170].mxu1  ;;  %9388 = vmatprep.mubr.bf16.mxu0 %v7372_v58  ;;  %v17091_v58 = vld [vmem:[#allocation453_spill] sm:$0xff] }
 0x761   : > { %v7316_v26 = vmul.f32 %v7092_v11, %v1781_v35  ;;  %v7095_v24 = vadd.f32 %v9607_v9, %v9315_v60  ;;  %v7086_v18 = vpop.f32.mrb[171].mxu1  ;;  %9389 = vmatmul.mubr.bf16.gmra.mrb[36].mxu0 %v7373_v38  ;;  %v9613_v17 = vadd.f32 %v17091_v58, %v15164_v47  ;;  %v17093_v35 = vld [vmem:[#allocation171_spill] sm:$0xff]  ;;  %v17094_v60 = vld [vmem:[#allocation456_spill] sm:$0xff] }
 0x762   : > { %v7314_v61 = vmul.f32 %v7084_v8, %v1771_v63  ;;  %v7087_v37 = vadd.f32 %v9603_v40, %v7086_v18  ;;  %v1801_v11 = vadd.f32 %v17093_v35, %v15174_v43  ;;  %v9615_v63 = vadd.f32 %v17094_v60, %v15164_v47  ;;  %v17095_v8 = vld [vmem:[#allocation163_spill] sm:$0xff] }
 0x763   : > { %v7317_v16 = vmul.f32 %v7095_v24, %v1785_v1  ;;  %v1791_v40 = vadd.f32 %v17095_v8, %v15174_v43  ;;  %v17096_v24 = vld [vmem:[#allocation450_spill] sm:$0xff]  ;;  %v17100_v8 = vld [vmem:[#allocation459_spill] sm:$0xff] }
 0x764   : > { %v7315_v44 = vmul.f32 %v7087_v37, %v1775_v30  ;;  %v9611_v18 = vadd.f32 %v17096_v24, %v15164_v47  ;;  %v1805_v30 = vadd.f32 %v17097_v13, %v15174_v43  ;;  %v9617_v24 = vadd.f32 %v17100_v8, %v15164_v47 }
 0x765   : > { %v7375_v41 = vpack.c.bf16 %v7317_v16, %v7316_v26 }
 0x766   : > { %v9318_v31 = vpop.f32.mrb[172].mxu1  ;;  %v7374_v36 = vpack.c.bf16 %v7315_v44, %v7314_v61  ;;  %v17098_v44 = vld [vmem:[#allocation166_spill] sm:$0xff] }
 0x767   : > { %v7108_v38 = vadd.f32 %v9613_v17, %v9318_v31  ;;  %v7099_v9 = vpop.f32.mrb[173].mxu1  ;;  %v1795_v58 = vadd.f32 %v17098_v44, %v15174_v43  ;;  %v17105_v44 = vld [vmem:[#allocation190_spill] sm:$0xff] }
 0x768   : > { %v7100_v1 = vadd.f32 %v9609_v34, %v7099_v9  ;;  %v9319_v26 = vpop.f32.mrb[174].mxu1  ;;  %9392 = vmatprep.mubr.bf16.mxu0 %v7374_v36  ;;  %v17099_v36 = vld [vmem:[#allocation466_spill] sm:$0xff] }
 0x769   : > { %v7320_v61 = vmul.f32 %v7108_v38, %v1801_v11  ;;  %v7111_v37 = vadd.f32 %v9615_v63, %v9319_v26  ;;  %v7102_v16 = vpop.f32.mrb[175].mxu1  ;;  %9393 = vmatmul.mubr.bf16.gmra.mrb[40].mxu0 %v7375_v41  ;;  %v9621_v9 = vadd.f32 %v17099_v36, %v15164_v47  ;;  %v17101_v11 = vld [vmem:[#allocation187_spill] sm:$0xff]  ;;  %v17102_v26 = vld [vmem:[#allocation469_spill] sm:$0xff] }
 0x76a   : > { %v7318_v17 = vmul.f32 %v7100_v1, %v1791_v40  ;;  %v7103_v31 = vadd.f32 %v9611_v18, %v7102_v16  ;;  %v1821_v38 = vadd.f32 %v17101_v11, %v15174_v43  ;;  %v9623_v40 = vadd.f32 %v17102_v26, %v15164_v47  ;;  %v17103_v1 = vld [vmem:[#allocation179_spill] sm:$0xff] }
 0x76b   : > { %v7321_v21 = vmul.f32 %v7111_v37, %v1805_v30  ;;  %v1811_v18 = vadd.f32 %v17103_v1, %v15174_v43  ;;  %v17104_v37 = vld [vmem:[#allocation463_spill] sm:$0xff] }
 0x76c   : > { %v7319_v35 = vmul.f32 %v7103_v31, %v1795_v58  ;;  %v9619_v16 = vadd.f32 %v17104_v37, %v15164_v47  ;;  %v1825_v58 = vadd.f32 %v17105_v44, %v15174_v43  ;;  %v17108_v1 = vld [vmem:[#allocation471_spill] sm:$0xff] }
 0x76d   : > { %v7377_v34 = vpack.c.bf16 %v7321_v21, %v7320_v61  ;;  %v9625_v37 = vadd.f32 %v17108_v1, %v15164_v47 }
 0x76e   : > { %v9322_v60 = vpop.f32.mrb[176].mxu1  ;;  %v7376_v13 = vpack.c.bf16 %v7319_v35, %v7318_v17  ;;  %v17106_v35 = vld [vmem:[#allocation182_spill] sm:$0xff] }
 0x76f   : > { %v7124_v41 = vadd.f32 %v9621_v9, %v9322_v60  ;;  %v7115_v63 = vpop.f32.mrb[177].mxu1  ;;  %v1815_v36 = vadd.f32 %v17106_v35, %v15174_v43  ;;  %v17113_v35 = vld [vmem:[#allocation206_spill] sm:$0xff] }
 0x770   : > { %v7116_v30 = vadd.f32 %v9617_v24, %v7115_v63  ;;  %v9323_v61 = vpop.f32.mrb[178].mxu1  ;;  %9396 = vmatprep.mubr.bf16.mxu0 %v7376_v13  ;;  %v17107_v13 = vld [vmem:[#allocation33_spill] sm:$0xff] }
 0x771   : > { %v7324_v17 = vmul.f32 %v7124_v41, %v1821_v38  ;;  %v7127_v31 = vadd.f32 %v9623_v40, %v9323_v61  ;;  %v7118_v21 = vpop.f32.mrb[179].mxu1  ;;  %9397 = vmatmul.mubr.bf16.gmra.mrb[44].mxu0 %v7377_v34  ;;  %v9629_v63 = vadd.f32 %v17107_v13, %v15164_v47  ;;  %v17109_v38 = vld [vmem:[#allocation203_spill] sm:$0xff] }
 0x772   : > { %v7322_v9 = vmul.f32 %v7116_v30, %v1811_v18  ;;  %v7119_v60 = vadd.f32 %v9619_v16, %v7118_v21  ;;  %v1841_v41 = vadd.f32 %v17109_v38, %v15174_v43  ;;  %v17110_v61 = vld [vmem:[#allocation479_spill] sm:$0xff] }
 0x773   : > { %v7325_v8 = vmul.f32 %v7127_v31, %v1825_v58  ;;  %v9631_v18 = vadd.f32 %v17110_v61, %v15164_v47  ;;  %v17111_v30 = vld [vmem:[#allocation195_spill] sm:$0xff] }
 0x774   : > { %v7323_v11 = vmul.f32 %v7119_v60, %v1815_v36  ;;  %v1831_v16 = vadd.f32 %v17111_v30, %v15174_v43  ;;  %v17112_v31 = vld [vmem:[#allocation475_spill] sm:$0xff]  ;;  %v1845_v36 = vadd.f32 %v17113_v35, %v15174_v43  ;;  %v17116_v30 = vld [vmem:[#allocation41_spill] sm:$0xff] }
 0x775   : > { %v7379_v24 = vpack.c.bf16 %v7325_v8, %v7324_v17  ;;  %v9627_v21 = vadd.f32 %v17112_v31, %v15164_v47  ;;  %v9633_v31 = vadd.f32 %v17116_v30, %v15164_v47 }
 0x776   : > { %v9326_v26 = vpop.f32.mrb[180].mxu1  ;;  %v7378_v44 = vpack.c.bf16 %v7323_v11, %v7322_v9  ;;  %v17114_v11 = vld [vmem:[#allocation198_spill] sm:$0xff] }
 0x777   : > { %v7140_v34 = vadd.f32 %v9629_v63, %v9326_v26  ;;  %v7131_v40 = vpop.f32.mrb[181].mxu1  ;;  %v1835_v13 = vadd.f32 %v17114_v11, %v15174_v43  ;;  %v17121_v11 = vld [vmem:[#allocation222_spill] sm:$0xff] }
 0x778   : > { %v7132_v58 = vadd.f32 %v9625_v37, %v7131_v40  ;;  %v9327_v17 = vpop.f32.mrb[182].mxu1  ;;  %9400 = vmatprep.mubr.bf16.mxu0 %v7378_v44  ;;  %v17115_v44 = vld [vmem:[#allocation53_spill] sm:$0xff] }
 0x779   : > { %v7328_v9 = vmul.f32 %v7140_v34, %v1841_v41  ;;  %v7143_v60 = vadd.f32 %v9631_v18, %v9327_v17  ;;  %v7134_v8 = vpop.f32.mrb[183].mxu1  ;;  %9401 = vmatmul.mubr.bf16.gmra.mrb[48].mxu0 %v7379_v24  ;;  %v9637_v40 = vadd.f32 %v17115_v44, %v15164_v47  ;;  %v17117_v41 = vld [vmem:[#allocation219_spill] sm:$0xff] }
 0x77a   : > { %v7326_v63 = vmul.f32 %v7132_v58, %v1831_v16  ;;  %v7135_v26 = vadd.f32 %v9627_v21, %v7134_v8  ;;  %v1861_v34 = vadd.f32 %v17117_v41, %v15174_v43  ;;  %v17118_v17 = vld [vmem:[#allocation487_spill] sm:$0xff] }
 0x77b   : > { %v7329_v1 = vmul.f32 %v7143_v60, %v1845_v36  ;;  %v9639_v16 = vadd.f32 %v17118_v17, %v15164_v47  ;;  %v17119_v58 = vld [vmem:[#allocation211_spill] sm:$0xff] }
 0x77c   : > { %v7327_v38 = vmul.f32 %v7135_v26, %v1835_v13  ;;  %v1851_v21 = vadd.f32 %v17119_v58, %v15174_v43  ;;  %v17120_v60 = vld [vmem:[#allocation483_spill] sm:$0xff]  ;;  %v1865_v13 = vadd.f32 %v17121_v11, %v15174_v43  ;;  %v17124_v58 = vld [vmem:[#allocation69_spill] sm:$0xff] }
 0x77d   : > { %v7381_v37 = vpack.c.bf16 %v7329_v1, %v7328_v9  ;;  %v9635_v8 = vadd.f32 %v17120_v60, %v15164_v47  ;;  %v9641_v60 = vadd.f32 %v17124_v58, %v15164_v47 }
 0x77e   : > { %v9330_v61 = vpop.f32.mrb[184].mxu1  ;;  %v7380_v35 = vpack.c.bf16 %v7327_v38, %v7326_v63  ;;  %v17122_v38 = vld [vmem:[#allocation214_spill] sm:$0xff] }
 0x77f   : > { %v7156_v24 = vadd.f32 %v9637_v40, %v9330_v61  ;;  %v7147_v18 = vpop.f32.mrb[185].mxu1  ;;  %v1855_v44 = vadd.f32 %v17122_v38, %v15174_v43  ;;  %v17129_v38 = vld [vmem:[#allocation238_spill] sm:$0xff] }
 0x780   : > { %v7148_v36 = vadd.f32 %v9633_v31, %v7147_v18  ;;  %v9331_v9 = vpop.f32.mrb[186].mxu1  ;;  %9404 = vmatprep.mubr.bf16.mxu0 %v7380_v35  ;;  %v17123_v35 = vld [vmem:[#allocation85_spill] sm:$0xff] }
 0x781   : > { %v7332_v63 = vmul.f32 %v7156_v24, %v1861_v34  ;;  %v7159_v26 = vadd.f32 %v9639_v16, %v9331_v9  ;;  %v7150_v1 = vpop.f32.mrb[187].mxu1  ;;  %9405 = vmatmul.mubr.bf16.gmra.mrb[52].mxu0 %v7381_v37  ;;  %v9645_v18 = vadd.f32 %v17123_v35, %v15164_v47  ;;  %v17125_v34 = vld [vmem:[#allocation235_spill] sm:$0xff] }
 0x782   : > { %v7330_v40 = vmul.f32 %v7148_v36, %v1851_v21  ;;  %v7151_v61 = vadd.f32 %v9635_v8, %v7150_v1  ;;  %v1881_v24 = vadd.f32 %v17125_v34, %v15174_v43  ;;  %v17126_v9 = vld [vmem:[#allocation495_spill] sm:$0xff] }
 0x783   : > { %v7333_v30 = vmul.f32 %v7159_v26, %v1865_v13  ;;  %v9647_v21 = vadd.f32 %v17126_v9, %v15164_v47  ;;  %v17127_v36 = vld [vmem:[#allocation227_spill] sm:$0xff] }
 0x784   : > { %v7331_v41 = vmul.f32 %v7151_v61, %v1855_v44  ;;  %v1871_v8 = vadd.f32 %v17127_v36, %v15174_v43  ;;  %v17128_v26 = vld [vmem:[#allocation491_spill] sm:$0xff]  ;;  %v1885_v44 = vadd.f32 %v17129_v38, %v15174_v43  ;;  %v17132_v36 = vld [vmem:[#allocation93_spill] sm:$0xff] }
 0x785   : > { %v7383_v31 = vpack.c.bf16 %v7333_v30, %v7332_v63  ;;  %v9643_v1 = vadd.f32 %v17128_v26, %v15164_v47  ;;  %v9649_v26 = vadd.f32 %v17132_v36, %v15164_v47 }
 0x786   : > { %v9334_v17 = vpop.f32.mrb[188].mxu1  ;;  %v7382_v11 = vpack.c.bf16 %v7331_v41, %v7330_v40  ;;  %v17130_v41 = vld [vmem:[#allocation230_spill] sm:$0xff] }
 0x787   : > { %v7172_v37 = vadd.f32 %v9645_v18, %v9334_v17  ;;  %v7163_v16 = vpop.f32.mrb[189].mxu1  ;;  %v1875_v35 = vadd.f32 %v17130_v41, %v15174_v43  ;;  %v17137_v41 = vld [vmem:[#allocation254_spill] sm:$0xff] }
 0x788   : > { %v7164_v13 = vadd.f32 %v9641_v60, %v7163_v16  ;;  %v9335_v63 = vpop.f32.mrb[190].mxu1  ;;  %9408 = vmatprep.mubr.bf16.mxu0 %v7382_v11  ;;  %v17131_v11 = vld [vmem:[#allocation109_spill] sm:$0xff] }
 0x789   : > { %v7336_v40 = vmul.f32 %v7172_v37, %v1881_v24  ;;  %v7175_v61 = vadd.f32 %v9647_v21, %v9335_v63  ;;  %v7166_v30 = vpop.f32.mrb[191].mxu1  ;;  %9409 = vmatmul.mubr.bf16.gmra.mrb[56].mxu0 %v7383_v31  ;;  %v9653_v16 = vadd.f32 %v17131_v11, %v15164_v47  ;;  %v17133_v24 = vld [vmem:[#allocation251_spill] sm:$0xff]  ;;  %v17134_v63 = vld [vmem:[#allocation49_spill] sm:$0xff] }
 0x78a   : > { %v7334_v18 = vmul.f32 %v7164_v13, %v1871_v8  ;;  %v7167_v17 = vadd.f32 %v9643_v1, %v7166_v30  ;;  %v1901_v37 = vadd.f32 %v17133_v24, %v15174_v43  ;;  %v9655_v8 = vadd.f32 %v17134_v63, %v15164_v47  ;;  %v17135_v13 = vld [vmem:[#allocation243_spill] sm:$0xff] }
 0x78b   : > { %v7337_v58 = vmul.f32 %v7175_v61, %v1885_v44  ;;  %v1891_v1 = vadd.f32 %v17135_v13, %v15174_v43  ;;  %v17136_v61 = vld [vmem:[#allocation101_spill] sm:$0xff]  ;;  %v17140_v13 = vld [vmem:[#allocation56_spill] sm:$0xff] }
 0x78c   : > { %v7335_v34 = vmul.f32 %v7167_v17, %v1875_v35  ;;  %v9651_v30 = vadd.f32 %v17136_v61, %v15164_v47  ;;  %v1905_v35 = vadd.f32 %v17137_v41, %v15174_v43  ;;  %v9657_v61 = vadd.f32 %v17140_v13, %v15164_v47 }
 0x78d   : > { %v7385_v60 = vpack.c.bf16 %v7337_v58, %v7336_v40 }
 0x78e   : > { %v9338_v9 = vpop.f32.mrb[192].mxu1  ;;  %v7384_v38 = vpack.c.bf16 %v7335_v34, %v7334_v18  ;;  %v17138_v34 = vld [vmem:[#allocation246_spill] sm:$0xff] }
 0x78f   : > { %v7188_v31 = vadd.f32 %v9653_v16, %v9338_v9  ;;  %v7179_v21 = vpop.f32.mrb[193].mxu1  ;;  %v1895_v11 = vadd.f32 %v17138_v34, %v15174_v43  ;;  %v17145_v34 = vld [vmem:[#allocation270_spill] sm:$0xff] }
 0x790   : > { %v7180_v44 = vadd.f32 %v9649_v26, %v7179_v21  ;;  %v9339_v40 = vpop.f32.mrb[194].mxu1  ;;  %9412 = vmatprep.mubr.bf16.mxu0 %v7384_v38  ;;  %v17139_v38 = vld [vmem:[#allocation72_spill] sm:$0xff] }
 0x791   : > { %v7340_v18 = vmul.f32 %v7188_v31, %v1901_v37  ;;  %v7191_v17 = vadd.f32 %v9655_v8, %v9339_v40  ;;  %v7182_v58 = vpop.f32.mrb[195].mxu1  ;;  %9413 = vmatmul.mubr.bf16.gmra.mrb[60].mxu0 %v7385_v60  ;;  %v9661_v21 = vadd.f32 %v17139_v38, %v15164_v47  ;;  %v17141_v37 = vld [vmem:[#allocation267_spill] sm:$0xff]  ;;  %v17142_v40 = vld [vmem:[#allocation81_spill] sm:$0xff] }
 0x792   : > { %v7338_v16 = vmul.f32 %v7180_v44, %v1891_v1  ;;  %v7183_v9 = vadd.f32 %v9651_v30, %v7182_v58  ;;  %v1921_v31 = vadd.f32 %v17141_v37, %v15174_v43  ;;  %v9663_v1 = vadd.f32 %v17142_v40, %v15164_v47  ;;  %v17143_v44 = vld [vmem:[#allocation259_spill] sm:$0xff] }
 0x793   : > { %v7341_v36 = vmul.f32 %v7191_v17, %v1905_v35  ;;  %v1911_v30 = vadd.f32 %v17143_v44, %v15174_v43  ;;  %v17144_v17 = vld [vmem:[#allocation65_spill] sm:$0xff]  ;;  %v17148_v44 = vld [vmem:[#allocation88_spill] sm:$0xff] }
 0x794   : > { %v7339_v24 = vmul.f32 %v7183_v9, %v1895_v11  ;;  %v9659_v58 = vadd.f32 %v17144_v17, %v15164_v47  ;;  %v1925_v11 = vadd.f32 %v17145_v34, %v15174_v43  ;;  %v9665_v17 = vadd.f32 %v17148_v44, %v15164_v47 }
 0x795   : > { %v7387_v26 = vpack.c.bf16 %v7341_v36, %v7340_v18 }
 0x796   : > { %v9342_v63 = vpop.f32.mrb[196].mxu1  ;;  %v7386_v41 = vpack.c.bf16 %v7339_v24, %v7338_v16  ;;  %v17146_v24 = vld [vmem:[#allocation262_spill] sm:$0xff] }
 0x797   : > { %v7204_v60 = vadd.f32 %v9661_v21, %v9342_v63  ;;  %v7195_v8 = vpop.f32.mrb[197].mxu1  ;;  %v1915_v38 = vadd.f32 %v17146_v24, %v15174_v43  ;;  %v17153_v24 = vld [vmem:[#allocation286_spill] sm:$0xff] }
 0x798   : > { %v7196_v35 = vadd.f32 %v9657_v61, %v7195_v8  ;;  %v9343_v18 = vpop.f32.mrb[198].mxu1  ;;  %9416 = vmatprep.mubr.bf16.mxu0 %v7386_v41  ;;  %v17147_v41 = vld [vmem:[#allocation104_spill] sm:$0xff] }
 0x799   : > { %v7344_v16 = vmul.f32 %v7204_v60, %v1921_v31  ;;  %v7207_v9 = vadd.f32 %v9663_v1, %v9343_v18  ;;  %v7198_v36 = vpop.f32.mrb[199].mxu1  ;;  %9417 = vmatmul.mubr.bf16.gmra.mrb[64].mxu0 %v7387_v26  ;;  %v9669_v8 = vadd.f32 %v17147_v41, %v15164_v47  ;;  %v17149_v31 = vld [vmem:[#allocation283_spill] sm:$0xff]  ;;  %v17150_v18 = vld [vmem:[#allocation497_spill] sm:$0xff] }
 0x79a   : > { %v7342_v21 = vmul.f32 %v7196_v35, %v1911_v30  ;;  %v7199_v63 = vadd.f32 %v9659_v58, %v7198_v36  ;;  %v1941_v60 = vadd.f32 %v17149_v31, %v15174_v43  ;;  %v9671_v30 = vadd.f32 %v17150_v18, %v15164_v47  ;;  %v17151_v35 = vld [vmem:[#allocation275_spill] sm:$0xff] }
 0x79b   : > { %v7345_v13 = vmul.f32 %v7207_v9, %v1925_v11  ;;  %v1931_v58 = vadd.f32 %v17151_v35, %v15174_v43  ;;  %v17152_v9 = vld [vmem:[#allocation97_spill] sm:$0xff]  ;;  %v17156_v35 = vld [vmem:[#allocation499_spill] sm:$0xff] }
 0x79c   : > { %v7343_v37 = vmul.f32 %v7199_v63, %v1915_v38  ;;  %v9667_v36 = vadd.f32 %v17152_v9, %v15164_v47  ;;  %v1945_v38 = vadd.f32 %v17153_v24, %v15174_v43  ;;  %v9673_v9 = vadd.f32 %v17156_v35, %v15164_v47 }
 0x79d   : > { %v7389_v61 = vpack.c.bf16 %v7345_v13, %v7344_v16 }
 0x79e   : > { %v9346_v40 = vpop.f32.mrb[200].mxu1  ;;  %v7388_v34 = vpack.c.bf16 %v7343_v37, %v7342_v21  ;;  %v17154_v37 = vld [vmem:[#allocation278_spill] sm:$0xff] }
 0x79f   : > { %v7220_v26 = vadd.f32 %v9669_v8, %v9346_v40  ;;  %v7211_v1 = vpop.f32.mrb[201].mxu1  ;;  %v1935_v41 = vadd.f32 %v17154_v37, %v15174_v43  ;;  %v17161_v37 = vld [vmem:[#allocation302_spill] sm:$0xff] }
 0x7a0   : > { %v7212_v11 = vadd.f32 %v9665_v17, %v7211_v1  ;;  %v9347_v16 = vpop.f32.mrb[202].mxu1  ;;  %9420 = vmatprep.mubr.bf16.mxu0 %v7388_v34  ;;  %v17155_v34 = vld [vmem:[#allocation503_spill] sm:$0xff] }
 0x7a1   : > { %v7348_v21 = vmul.f32 %v7220_v26, %v1941_v60  ;;  %v7223_v63 = vadd.f32 %v9671_v30, %v9347_v16  ;;  %v7214_v13 = vpop.f32.mrb[203].mxu1  ;;  %9421 = vmatmul.mubr.bf16.gmra.mrb[68].mxu0 %v7389_v61  ;;  %v9677_v1 = vadd.f32 %v17155_v34, %v15164_v47  ;;  %v17157_v60 = vld [vmem:[#allocation299_spill] sm:$0xff]  ;;  %v17158_v16 = vld [vmem:[#allocation505_spill] sm:$0xff] }
 0x7a2   : > { %v7346_v8 = vmul.f32 %v7212_v11, %v1931_v58  ;;  %v7215_v40 = vadd.f32 %v9667_v36, %v7214_v13  ;;  %v1961_v26 = vadd.f32 %v17157_v60, %v15174_v43  ;;  %v9679_v58 = vadd.f32 %v17158_v16, %v15164_v47  ;;  %v17159_v11 = vld [vmem:[#allocation291_spill] sm:$0xff] }
 0x7a3   : > { %v7349_v44 = vmul.f32 %v7223_v63, %v1945_v38  ;;  %v1951_v36 = vadd.f32 %v17159_v11, %v15174_v43  ;;  %v17160_v63 = vld [vmem:[#allocation501_spill] sm:$0xff]  ;;  %v17164_v11 = vld [vmem:[#allocation507_spill] sm:$0xff] }
 0x7a4   : > { %v7347_v31 = vmul.f32 %v7215_v40, %v1935_v41  ;;  %v9675_v13 = vadd.f32 %v17160_v63, %v15164_v47  ;;  %v1965_v41 = vadd.f32 %v17161_v37, %v15174_v43  ;;  %v9681_v63 = vadd.f32 %v17164_v11, %v15164_v47 }
 0x7a5   : > { %v7391_v17 = vpack.c.bf16 %v7349_v44, %v7348_v21 }
 0x7a6   : > { %v9350_v18 = vpop.f32.mrb[204].mxu1  ;;  %v7390_v24 = vpack.c.bf16 %v7347_v31, %v7346_v8  ;;  %v17162_v31 = vld [vmem:[#allocation294_spill] sm:$0xff] }
 0x7a7   : > { %v7236_v61 = vadd.f32 %v9677_v1, %v9350_v18  ;;  %v7227_v30 = vpop.f32.mrb[205].mxu1  ;;  %v1955_v34 = vadd.f32 %v17162_v31, %v15174_v43  ;;  %v17169_v31 = vld [vmem:[#allocation318_spill] sm:$0xff] }
 0x7a8   : > { %v7228_v38 = vadd.f32 %v9673_v9, %v7227_v30  ;;  %v9351_v21 = vpop.f32.mrb[206].mxu1  ;;  %9424 = vmatprep.mubr.bf16.mxu0 %v7390_v24  ;;  %v17163_v24 = vld [vmem:[#allocation511_spill] sm:$0xff] }
 0x7a9   : > { %v7352_v8 = vmul.f32 %v7236_v61, %v1961_v26  ;;  %v7239_v40 = vadd.f32 %v9679_v58, %v9351_v21  ;;  %v7230_v44 = vpop.f32.mrb[207].mxu1  ;;  %9425 = vmatmul.mubr.bf16.gmra.mrb[72].mxu0 %v7391_v17  ;;  %v9685_v30 = vadd.f32 %v17163_v24, %v15164_v47  ;;  %v17165_v26 = vld [vmem:[#allocation315_spill] sm:$0xff]  ;;  %v17166_v21 = vld [vmem:[#allocation513_spill] sm:$0xff] }
 0x7aa   : > { %v7350_v1 = vmul.f32 %v7228_v38, %v1951_v36  ;;  %v7231_v18 = vadd.f32 %v9675_v13, %v7230_v44  ;;  %v1981_v61 = vadd.f32 %v17165_v26, %v15174_v43  ;;  %v9687_v36 = vadd.f32 %v17166_v21, %v15164_v47  ;;  %v17167_v38 = vld [vmem:[#allocation307_spill] sm:$0xff] }
 0x7ab   : > { %v7353_v35 = vmul.f32 %v7239_v40, %v1965_v41  ;;  %v1971_v13 = vadd.f32 %v17167_v38, %v15174_v43  ;;  %v17168_v40 = vld [vmem:[#allocation509_spill] sm:$0xff]  ;;  %v17172_v38 = vld [vmem:[#allocation515_spill] sm:$0xff] }
 0x7ac   : > { %v7351_v60 = vmul.f32 %v7231_v18, %v1955_v34  ;;  %v9683_v44 = vadd.f32 %v17168_v40, %v15164_v47  ;;  %v1985_v34 = vadd.f32 %v17169_v31, %v15174_v43  ;;  %v9689_v40 = vadd.f32 %v17172_v38, %v15164_v47 }
 0x7ad   : > { %v7393_v9 = vpack.c.bf16 %v7353_v35, %v7352_v8 }
 0x7ae   : > { %v9354_v16 = vpop.f32.mrb[208].mxu1  ;;  %v7392_v37 = vpack.c.bf16 %v7351_v60, %v7350_v1  ;;  %v17170_v60 = vld [vmem:[#allocation310_spill] sm:$0xff] }
 0x7af   : > { %v7252_v17 = vadd.f32 %v9685_v30, %v9354_v16  ;;  %v7243_v58 = vpop.f32.mrb[209].mxu1  ;;  %v1975_v24 = vadd.f32 %v17170_v60, %v15174_v43  ;;  %v17177_v60 = vld [vmem:[#allocation334_spill] sm:$0xff] }
 0x7b0   : > { %v7244_v41 = vadd.f32 %v9681_v63, %v7243_v58  ;;  %v9355_v8 = vpop.f32.mrb[210].mxu1  ;;  %9428 = vmatprep.mubr.bf16.mxu0 %v7392_v37  ;;  %v17171_v37 = vld [vmem:[#allocation519_spill] sm:$0xff] }
 0x7b1   : > { %v7356_v1 = vmul.f32 %v7252_v17, %v1981_v61  ;;  %v7255_v18 = vadd.f32 %v9687_v36, %v9355_v8  ;;  %v7246_v35 = vpop.f32.mrb[211].mxu1  ;;  %9429 = vmatmul.mubr.bf16.gmra.mrb[76].mxu0 %v7393_v9  ;;  %v9693_v58 = vadd.f32 %v17171_v37, %v15164_v47  ;;  %v17173_v61 = vld [vmem:[#allocation331_spill] sm:$0xff]  ;;  %v17174_v8 = vld [vmem:[#allocation521_spill] sm:$0xff] }
 0x7b2   : > { %v7354_v30 = vmul.f32 %v7244_v41, %v1971_v13  ;;  %v7247_v16 = vadd.f32 %v9683_v44, %v7246_v35  ;;  %v2001_v17 = vadd.f32 %v17173_v61, %v15174_v43  ;;  %v9695_v13 = vadd.f32 %v17174_v8, %v15164_v47  ;;  %v17175_v41 = vld [vmem:[#allocation323_spill] sm:$0xff] }
 0x7b3   : > { %v7357_v11 = vmul.f32 %v7255_v18, %v1985_v34  ;;  %v1991_v44 = vadd.f32 %v17175_v41, %v15174_v43  ;;  %v17176_v18 = vld [vmem:[#allocation517_spill] sm:$0xff]  ;;  %v17180_v41 = vld [vmem:[#allocation523_spill] sm:$0xff] }
 0x7b4   : > { %v7355_v26 = vmul.f32 %v7247_v16, %v1975_v24  ;;  %v9691_v35 = vadd.f32 %v17176_v18, %v15164_v47  ;;  %v2005_v24 = vadd.f32 %v17177_v60, %v15174_v43  ;;  %v9697_v18 = vadd.f32 %v17180_v41, %v15164_v47 }
 0x7b5   : > { %v7395_v63 = vpack.c.bf16 %v7357_v11, %v7356_v1 }
 0x7b6   : > { %v9358_v21 = vpop.f32.mrb[212].mxu1  ;;  %v7394_v31 = vpack.c.bf16 %v7355_v26, %v7354_v30  ;;  %v17178_v26 = vld [vmem:[#allocation326_spill] sm:$0xff] }
 0x7b7   : > { %v7268_v9 = vadd.f32 %v9693_v58, %v9358_v21  ;;  %v7259_v36 = vpop.f32.mrb[213].mxu1  ;;  %v1995_v37 = vadd.f32 %v17178_v26, %v15174_v43  ;;  %v17185_v26 = vld [vmem:[#allocation350_spill] sm:$0xff] }
 0x7b8   : > { %v7260_v34 = vadd.f32 %v9689_v40, %v7259_v36  ;;  %v9359_v1 = vpop.f32.mrb[214].mxu1  ;;  %9432 = vmatprep.mubr.bf16.mxu0 %v7394_v31  ;;  %v17179_v31 = vld [vmem:[#allocation527_spill] sm:$0xff] }
 0x7b9   : > { %v7360_v30 = vmul.f32 %v7268_v9, %v2001_v17  ;;  %v7271_v16 = vadd.f32 %v9695_v13, %v9359_v1  ;;  %v7262_v11 = vpop.f32.mrb[215].mxu1  ;;  %9433 = vmatmul.mubr.bf16.gmra.mrb[80].mxu0 %v7395_v63  ;;  %v9701_v36 = vadd.f32 %v17179_v31, %v15164_v47  ;;  %v17181_v17 = vld [vmem:[#allocation347_spill] sm:$0xff]  ;;  %v17182_v1 = vld [vmem:[#allocation529_spill] sm:$0xff] }
 0x7ba   : > { %v7358_v58 = vmul.f32 %v7260_v34, %v1991_v44  ;;  %v7263_v21 = vadd.f32 %v9691_v35, %v7262_v11  ;;  %v2021_v9 = vadd.f32 %v17181_v17, %v15174_v43  ;;  %v9703_v44 = vadd.f32 %v17182_v1, %v15164_v47  ;;  %v17183_v34 = vld [vmem:[#allocation339_spill] sm:$0xff] }
 0x7bb   : > { %v7361_v38 = vmul.f32 %v7271_v16, %v2005_v24  ;;  %v2011_v35 = vadd.f32 %v17183_v34, %v15174_v43  ;;  %v17184_v16 = vld [vmem:[#allocation525_spill] sm:$0xff]  ;;  %v17188_v34 = vld [vmem:[#allocation531_spill] sm:$0xff] }
 0x7bc   : > { %v7359_v61 = vmul.f32 %v7263_v21, %v1995_v37  ;;  %v9699_v11 = vadd.f32 %v17184_v16, %v15164_v47  ;;  %v2025_v37 = vadd.f32 %v17185_v26, %v15174_v43  ;;  %v9705_v16 = vadd.f32 %v17188_v34, %v15164_v47 }
 0x7bd   : > { %v7397_v40 = vpack.c.bf16 %v7361_v38, %v7360_v30 }
 0x7be   : > { %v9362_v8 = vpop.f32.mrb[216].mxu1  ;;  %v7396_v60 = vpack.c.bf16 %v7359_v61, %v7358_v58  ;;  %v17186_v61 = vld [vmem:[#allocation342_spill] sm:$0xff] }
 0x7bf   : > { %v7284_v63 = vadd.f32 %v9701_v36, %v9362_v8  ;;  %v7275_v13 = vpop.f32.mrb[217].mxu1  ;;  %v2015_v31 = vadd.f32 %v17186_v61, %v15174_v43  ;;  %v17193_v61 = vld [vmem:[#allocation366_spill] sm:$0xff] }
 0x7c0   : > { %v7276_v24 = vadd.f32 %v9697_v18, %v7275_v13  ;;  %v9363_v30 = vpop.f32.mrb[218].mxu1  ;;  %9436 = vmatprep.mubr.bf16.mxu0 %v7396_v60  ;;  %v17187_v60 = vld [vmem:[#allocation535_spill] sm:$0xff] }
 0x7c1   : > { %v7364_v58 = vmul.f32 %v7284_v63, %v2021_v9  ;;  %v7287_v21 = vadd.f32 %v9703_v44, %v9363_v30  ;;  %v7278_v38 = vpop.f32.mrb[219].mxu1  ;;  %9437 = vmatmul.mubr.bf16.gmra.mrb[84].mxu0 %v7397_v40  ;;  %v9709_v13 = vadd.f32 %v17187_v60, %v15164_v47  ;;  %v17189_v9 = vld [vmem:[#allocation363_spill] sm:$0xff]  ;;  %v17190_v30 = vld [vmem:[#allocation537_spill] sm:$0xff] }
 0x7c2   : > { %v7362_v36 = vmul.f32 %v7276_v24, %v2011_v35  ;;  %v7279_v8 = vadd.f32 %v9699_v11, %v7278_v38  ;;  %v2041_v63 = vadd.f32 %v17189_v9, %v15174_v43  ;;  %v9711_v35 = vadd.f32 %v17190_v30, %v15164_v47  ;;  %v17191_v24 = vld [vmem:[#allocation355_spill] sm:$0xff] }
 0x7c3   : > { %v7365_v41 = vmul.f32 %v7287_v21, %v2025_v37  ;;  %v2031_v11 = vadd.f32 %v17191_v24, %v15174_v43  ;;  %v17192_v21 = vld [vmem:[#allocation533_spill] sm:$0xff] }
 0x7c4   : > { %v7363_v17 = vmul.f32 %v7279_v8, %v2015_v31  ;;  %v9707_v38 = vadd.f32 %v17192_v21, %v15164_v47  ;;  %v2045_v31 = vadd.f32 %v17193_v61, %v15174_v43  ;;  %v601_v47 = vsub.s32 5, %v16777_v33 }
 0x7c5   : > { %v7399_v18 = vpack.c.bf16 %v7365_v41, %v7364_v58 }
 0x7c6   : > { %v9366_v1 = vpop.f32.mrb[220].mxu1  ;;  %v7398_v26 = vpack.c.bf16 %v7363_v17, %v7362_v36  ;;  %v17194_v17 = vld [vmem:[#allocation358_spill] sm:$0xff] }
 0x7c7   : > { %v7300_v40 = vadd.f32 %v9709_v13, %v9366_v1  ;;  %v7291_v44 = vpop.f32.mrb[221].mxu1  ;;  %v2035_v60 = vadd.f32 %v17194_v17, %v15174_v43 }
 0x7c8   : > { %v7292_v37 = vadd.f32 %v9705_v16, %v7291_v44  ;;  %v9367_v58 = vpop.f32.mrb[222].mxu1  ;;  %9440 = vmatprep.mubr.bf16.mxu0 %v7398_v26  ;;  %v17195_v26 = vsub.s32 4, %v16777_v33 }
 0x7c9   : > { %v7368_v36 = vmul.f32 %v7300_v40, %v2041_v63  ;;  %v7303_v8 = vadd.f32 %v9711_v35, %v9367_v58  ;;  %v7294_v41 = vpop.f32.mrb[223].mxu1  ;;  %9441 = vmatmul.mubr.bf16.gmra.mrb[88].mxu0 %v7399_v18  ;;  %v15439_v18 = vrot.slane %v15169_v15, %v601_v47  ;;  %v17196_v35 = vld [vmem:[#allocation125_spill] sm:$0xff] }
 0x7ca   : > { %v7366_v13 = vmul.f32 %v7292_v37, %v2031_v11  ;;  %v7295_v1 = vadd.f32 %v9707_v38, %v7294_v41  ;;  %v15436_v63 = vrot.slane %v15159_v27, %v17195_v26  ;;  %v17197_v27 = vld [vmem:[#allocation117_spill] sm:$0xff]  ;;  %v17198_v38 = vld [vmem:[#allocation127_spill] sm:$0xff] }
 0x7cb   : > { %v7369_v34 = vmul.f32 %v7303_v8, %v2045_v31  ;;  %v1743_v24 = vadd.f32 %v17196_v35, %v15439_v18  ;;  %v1733_v58 = vadd.f32 %v17197_v27, %v15439_v18  ;;  %v1747_v61 = vadd.f32 %v17198_v38, %v15439_v18  ;;  %v17199_v8 = vld [vmem:[#allocation119_spill] sm:$0xff]  ;;  %v17200_v47 = vld [vmem:[#allocation141_spill] sm:$0xff] }
 0x7cc   : > { %v7367_v9 = vmul.f32 %v7295_v1, %v2035_v60  ;;  %v9714_v43 = vadd.f32 %v14435_v56, %v15436_v63  ;;  %v9712_v40 = vadd.f32 %v14428_v59, %v15436_v63  ;;  %v9715_v11 = vadd.f32 %v14437_v7, %v15436_v63  ;;  %v15456_v59 = vld [vmem:[%s15976_s7] ss:$0 sm:$0xff]  ;;  %v17202_v27 = vld [vmem:[#allocation143_spill] sm:$0xff] }
 0x7cd   : > { %v7401_v16 = vpack.c.bf16 %v7369_v34, %v7368_v36  ;;  %v9713_v15 = vadd.f32 %v14430_v46, %v15436_v63  ;;  %v1737_v41 = vadd.f32 %v17199_v8, %v15439_v18  ;;  %v1763_v26 = vadd.f32 %v17200_v47, %v15439_v18 }
 0x7ce   : > { %v7400_v44 = vpack.c.bf16 %v7367_v9, %v7366_v13  ;;  %v9718_v9 = vadd.f32 %v14452_v19, %v15436_v63  ;;  %v9717_v19 = vadd.f32 %v14447_v29, %v15436_v63  ;;  %v9722_v8 = vadd.f32 %v14464_v52, %v15436_v63 }
 0x7cf   : > { %v9721_v52 = vadd.f32 %v14461_v25, %v15436_v63 }
 0x7d0   : > { %9444 = vmatprep.mubr.bf16.mxu0 %v7400_v44 }
 0x7d1   : > { %9445 = vmatmul.mubr.bf16.gmra.mrb[92].mxu0 %v7401_v16  ;;  %v9716_v16 = vadd.f32 %v14445_v0, %v15436_v63 }
 0x82c   : > { %v9386_v30 = vpop.f32.mrb[32].mxu0 }
 0x82d   : > { %v7510_v33 = vadd.f32 %v9714_v43, %v9386_v30  ;;  %v7501_v37 = vpop.f32.mrb[33].mxu0  ;;  %v9719_v43 = vadd.f32 %v14454_v2, %v15436_v63 }
 0x82e   : > { %v7502_v21 = vadd.f32 %v9712_v40, %v7501_v37  ;;  %v9387_v56 = vpop.f32.mrb[34].mxu0 }
 0x82f   : > { %v7513_v31 = vadd.f32 %v9715_v11, %v9387_v56  ;;  %v7504_v7 = vpop.f32.mrb[35].mxu0  ;;  %v7758_v36 = vmul.f32 %v7510_v33, %v1743_v24  ;;  %v17201_v24 = vld [vmem:[#allocation133_spill] sm:$0xff]  ;;  %v17203_v56 = vld [vmem:[#allocation135_spill] sm:$0xff] }
 0x830   : > { %v7505_v17 = vadd.f32 %v9713_v15, %v7504_v7  ;;  %v7756_v60 = vmul.f32 %v7502_v21, %v1733_v58  ;;  %v1753_v11 = vadd.f32 %v17201_v24, %v15439_v18  ;;  %v1767_v58 = vadd.f32 %v17202_v27, %v15439_v18 }
 0x831   : > { %v7759_v13 = vmul.f32 %v7513_v31, %v1747_v61  ;;  %v7829_v46 = vmul.f32 %v15456_v59, %v7758_v36  ;;  %v1757_v38 = vadd.f32 %v17203_v56, %v15439_v18  ;;  %v17208_v56 = vld [vmem:[#allocation173_spill] sm:$0xff] }
 0x832   : > { %v7757_v1 = vmul.f32 %v7505_v17, %v1737_v41  ;;  %v7827_v34 = vmul.f32 %v15456_v59, %v7756_v60  ;;  %v9720_v17 = vadd.f32 %v14459_v28, %v15436_v63 }
 0x833   : > { %7895 = vadd.xlane.f32.xlu1 %v7829_v46  ;;  %v7830_v35 = vmul.f32 %v15456_v59, %v7759_v13  ;;  %v17204_v13 = vld [vmem:[#allocation157_spill] sm:$0xff] }
 0x834   : > { %v9390_v44 = vpop.f32.mrb[36].mxu0  ;;  %7891 = vadd.xlane.f32.xlu0 %v7827_v34  ;;  %v7828_v37 = vmul.f32 %v15456_v59, %v7757_v1  ;;  %v1783_v46 = vadd.f32 %v17204_v13, %v15439_v18  ;;  %v9723_v1 = vadd.f32 %v14466_v45, %v15436_v63 }
 0x835   : > { %v7526_v40 = vadd.f32 %v9718_v9, %v9390_v44  ;;  %v7517_v30 = vpop.f32.mrb[37].mxu0 }
 0x836   : > { %v7518_v33 = vadd.f32 %v9716_v16, %v7517_v30  ;;  %v9391_v0 = vpop.f32.mrb[38].mxu0  ;;  %v17205_v16 = vld [vmem:[#allocation149_spill] sm:$0xff] }
 0x837   : > { %v7762_v15 = vmul.f32 %v7526_v40, %v1763_v26  ;;  %v7529_v21 = vadd.f32 %v9719_v43, %v9391_v0  ;;  %7897 = vadd.xlane.f32.xlu1 %v7830_v35  ;;  %v7520_v2 = vpop.f32.mrb[39].mxu0  ;;  %v1773_v44 = vadd.f32 %v17205_v16, %v15439_v18  ;;  %v17206_v43 = vld [vmem:[#allocation159_spill] sm:$0xff] }
 0x838   : > { %v7760_v61 = vmul.f32 %v7518_v33, %v1753_v11  ;;  %v7521_v31 = vadd.f32 %v9717_v19, %v7520_v2  ;;  %7893 = vadd.xlane.f32.xlu0 %v7828_v37  ;;  %v1787_v40 = vadd.f32 %v17206_v43, %v15439_v18  ;;  %v17207_v11 = vld [vmem:[#allocation151_spill] sm:$0xff]  ;;  %v9728_v43 = vadd.f32 %v14479_v5, %v15436_v63 }
 0x839   : > { %v7763_v7 = vmul.f32 %v7529_v21, %v1767_v58  ;;  %v7833_v29 = vmul.f32 %v15456_v59, %v7762_v15  ;;  %v1777_v19 = vadd.f32 %v17207_v11, %v15439_v18  ;;  %v9726_v58 = vadd.f32 %v14475_v23, %v15436_v63 }
 0x83a   : > { %v7761_v36 = vmul.f32 %v7521_v31, %v1757_v38  ;;  %v7831_v28 = vmul.f32 %v15456_v59, %v7760_v61  ;;  %v9724_v21 = vadd.f32 %v14471_v14, %v15436_v63  ;;  %v1803_v38 = vadd.f32 %v17208_v56, %v15439_v18 }
 0x83b   : > { %v7834_v41 = vmul.f32 %v15456_v59, %v7763_v7  ;;  %v9727_v61 = vadd.f32 %v14477_v39, %v15436_v63  ;;  %v9725_v23 = vadd.f32 %v14473_v20, %v15436_v63 }
 0x83c   : > { %v9394_v60 = vpop.f32.mrb[40].mxu0  ;;  %7903 = vadd.xlane.f32.xlu0 %v7833_v29  ;;  %v7832_v45 = vmul.f32 %v15456_v59, %v7761_v36  ;;  %v17209_v29 = vld [vmem:[#allocation165_spill] sm:$0xff] }
 0x83d   : > { %v7542_v34 = vadd.f32 %v9722_v8, %v9394_v60  ;;  %7905 = vadd.xlane.f32.xlu1 %v7834_v41  ;;  %v7533_v9 = vpop.f32.mrb[41].mxu0  ;;  %v1793_v36 = vadd.f32 %v17209_v29, %v15439_v18  ;;  %v9734_v29 = vadd.f32 %v14495_v53, %v15436_v63  ;;  %v9733_v53 = vadd.f32 %v14492_v49, %v15436_v63 }
 0x83e   : > { %v7534_v47 = vadd.f32 %v9720_v17, %v7533_v9  ;;  %v9395_v26 = vpop.f32.mrb[42].mxu0  ;;  %v17210_v17 = vld [vmem:[#allocation175_spill] sm:$0xff] }
 0x83f   : > { %v7766_v30 = vmul.f32 %v7542_v34, %v1783_v46  ;;  %v7545_v35 = vadd.f32 %v9723_v1, %v9395_v26  ;;  %v7536_v24 = vpop.f32.mrb[43].mxu0  ;;  %v1807_v60 = vadd.f32 %v17210_v17, %v15439_v18  ;;  %v17211_v34 = vld [vmem:[#allocation167_spill] sm:$0xff]  ;;  %v9730_v26 = vadd.f32 %v14483_v12, %v15436_v63 }
 0x840   : > { %v7764_v33 = vmul.f32 %v7534_v47, %v1773_v44  ;;  %v7537_v0 = vadd.f32 %v9721_v52, %v7536_v24  ;;  %7899 = vadd.xlane.f32.xlu0 %v7831_v28  ;;  %v1797_v9 = vadd.f32 %v17211_v34, %v15439_v18  ;;  %v9731_v24 = vadd.f32 %v14485_v62, %v15436_v63 }
 0x841   : > { %v7767_v37 = vmul.f32 %v7545_v35, %v1787_v40  ;;  %7901 = vadd.xlane.f32.xlu1 %v7832_v45  ;;  %v7837_v25 = vmul.f32 %v15456_v59, %v7766_v30  ;;  %v17212_v30 = vld [vmem:[#allocation189_spill] sm:$0xff]  ;;  %v9729_v12 = vadd.f32 %v14481_v6, %v15436_v63  ;;  %v9735_v17 = vadd.f32 %v14507_v32, %v15436_v63 }
 0x842   : > { %v7765_v27 = vmul.f32 %v7537_v0, %v1777_v19  ;;  %v7835_v14 = vmul.f32 %v15456_v59, %v7764_v33  ;;  %v1823_v35 = vadd.f32 %v17212_v30, %v15439_v18  ;;  %v17213_v19 = vld [vmem:[#allocation181_spill] sm:$0xff] }
 0x843   : > { %v7838_v15 = vmul.f32 %v15456_v59, %v7767_v37  ;;  %v1813_v33 = vadd.f32 %v17213_v19, %v15439_v18  ;;  %v17220_v19 = vld [vmem:[#allocation221_spill] sm:$0xff] }
 0x844   : > { %v9398_v2 = vpop.f32.mrb[44].mxu0  ;;  %7911 = vadd.xlane.f32.xlu0 %v7837_v25  ;;  %v7836_v39 = vmul.f32 %v15456_v59, %v7765_v27  ;;  %v17214_v25 = vld [vmem:[#allocation191_spill] sm:$0xff] }
 0x845   : > { %v7558_v31 = vadd.f32 %v9726_v58, %v9398_v2  ;;  %v7549_v7 = vpop.f32.mrb[45].mxu0  ;;  %7913 = vadd.xlane.f32.xlu1 %v7838_v15  ;;  %v1827_v27 = vadd.f32 %v17214_v25, %v15439_v18  ;;  %v17215_v2 = vld [vmem:[#allocation183_spill] sm:$0xff] }
 0x846   : > { %v7550_v8 = vadd.f32 %v9724_v21, %v7549_v7  ;;  %v9399_v41 = vpop.f32.mrb[46].mxu0  ;;  %v1817_v56 = vadd.f32 %v17215_v2, %v15439_v18 }
 0x847   : > { %v7770_v13 = vmul.f32 %v7558_v31, %v1803_v38  ;;  %v7561_v46 = vadd.f32 %v9727_v61, %v9399_v41  ;;  %v7552_v1 = vpop.f32.mrb[47].mxu0  ;;  %v17216_v41 = vld [vmem:[#allocation205_spill] sm:$0xff] }
 0x848   : > { %v7768_v16 = vmul.f32 %v7550_v8, %v1793_v36  ;;  %v7553_v44 = vadd.f32 %v9725_v23, %v7552_v1  ;;  %7907 = vadd.xlane.f32.xlu0 %v7835_v14  ;;  %v9732_v23 = vadd.f32 %v14490_v51, %v15436_v63  ;;  %v1843_v14 = vadd.f32 %v17216_v41, %v15439_v18 }
 0x849   : > { %v7771_v52 = vmul.f32 %v7561_v46, %v1807_v60  ;;  %7909 = vadd.xlane.f32.xlu1 %v7836_v39  ;;  %v7841_v20 = vmul.f32 %v15456_v59, %v7770_v13  ;;  %v17217_v46 = vld [vmem:[#allocation197_spill] sm:$0xff] }
 0x84a   : > { %v7769_v47 = vmul.f32 %v7553_v44, %v1797_v9  ;;  %v7839_v5 = vmul.f32 %v15456_v59, %v7768_v16  ;;  %v1833_v1 = vadd.f32 %v17217_v46, %v15439_v18  ;;  %v17218_v9 = vld [vmem:[#allocation207_spill] sm:$0xff] }
 0x84b   : > { %v7842_v28 = vmul.f32 %v15456_v59, %v7771_v52  ;;  %v1847_v16 = vadd.f32 %v17218_v9, %v15439_v18 }
 0x84c   : > { %v9402_v40 = vpop.f32.mrb[48].mxu0  ;;  %7919 = vadd.xlane.f32.xlu0 %v7841_v20  ;;  %v7840_v62 = vmul.f32 %v15456_v59, %v7769_v47  ;;  %v17219_v47 = vld [vmem:[#allocation199_spill] sm:$0xff] }
 0x84d   : > { %v7574_v45 = vadd.f32 %v9730_v26, %v9402_v40  ;;  %v7565_v11 = vpop.f32.mrb[49].mxu0  ;;  %7921 = vadd.xlane.f32.xlu1 %v7842_v28  ;;  %v1837_v26 = vadd.f32 %v17219_v47, %v15439_v18 }
 0x84e   : > { %v7566_v0 = vadd.f32 %v9728_v43, %v7565_v11  ;;  %v9403_v37 = vpop.f32.mrb[50].mxu0 }
 0x84f   : > { %v7774_v58 = vmul.f32 %v7574_v45, %v1823_v35  ;;  %v7577_v15 = vadd.f32 %v9731_v24, %v9403_v37  ;;  %v7568_v21 = vpop.f32.mrb[51].mxu0  ;;  %v9738_v35 = vadd.f32 %v14554_v4, %v15436_v63  ;;  %v9736_v45 = vadd.f32 %v14531_v42, %v15436_v63 }
 0x850   : > { %v7772_v38 = vmul.f32 %v7566_v0, %v1813_v33  ;;  %v7569_v61 = vadd.f32 %v9729_v12, %v7568_v21  ;;  %7915 = vadd.xlane.f32.xlu0 %v7839_v5  ;;  %v1863_v33 = vadd.f32 %v17220_v19, %v15439_v18  ;;  %v9739_v12 = vadd.f32 %v14560_v50, %v15436_v63  ;;  %v17221_v5 = vld [vmem:[#allocation213_spill] sm:$0xff] }
 0x851   : > { %v7775_v31 = vmul.f32 %v7577_v15, %v1827_v27  ;;  %7917 = vadd.xlane.f32.xlu1 %v7840_v62  ;;  %v7845_v6 = vmul.f32 %v15456_v59, %v7774_v58  ;;  %v1853_v25 = vadd.f32 %v17221_v5, %v15439_v18  ;;  %v9737_v4 = vadd.f32 %v14540_v48, %v15436_v63  ;;  %v17222_v15 = vld [vmem:[#allocation223_spill] sm:$0xff] }
 0x852   : > { %v7773_v7 = vmul.f32 %v7569_v61, %v1817_v56  ;;  %v7843_v51 = vmul.f32 %v15456_v59, %v7772_v38  ;;  %v1867_v21 = vadd.f32 %v17222_v15, %v15439_v18  ;;  %v17223_v38 = vld [vmem:[#allocation215_spill] sm:$0xff] }
 0x853   : > { %v7846_v36 = vmul.f32 %v15456_v59, %v7775_v31  ;;  %v1857_v61 = vadd.f32 %v17223_v38, %v15439_v18 }
 0x854   : > { %v9406_v8 = vpop.f32.mrb[52].mxu0  ;;  %7927 = vadd.xlane.f32.xlu0 %v7845_v6  ;;  %v7844_v32 = vmul.f32 %v15456_v59, %v7773_v7 }
 0x855   : > { %v7590_v60 = vadd.f32 %v9734_v29, %v9406_v8  ;;  %v7581_v13 = vpop.f32.mrb[53].mxu0  ;;  %7929 = vadd.xlane.f32.xlu1 %v7846_v36  ;;  %v9742_v36 = vadd.f32 %v14597_v3, %v15436_v63  ;;  %v9740_v8 = vadd.f32 %v14577_v57, %v15436_v63  ;;  %v9741_v3 = vadd.f32 %v14583_v22, %v15436_v63 }
 0x856   : > { %v7582_v39 = vadd.f32 %v9732_v23, %v7581_v13  ;;  %v9407_v34 = vpop.f32.mrb[54].mxu0 }
 0x857   : > { %v7778_v44 = vmul.f32 %v7590_v60, %v1843_v14  ;;  %v7593_v52 = vadd.f32 %v9735_v17, %v9407_v34  ;;  %v7584_v20 = vpop.f32.mrb[55].mxu0  ;;  %v17224_v14 = vld [vmem:[#allocation237_spill] sm:$0xff]  ;;  %v9743_v60 = vadd.f32 %v14603_v10, %v15436_v63 }
 0x858   : > { %v7776_v28 = vmul.f32 %v7582_v39, %v1833_v1  ;;  %v7585_v43 = vadd.f32 %v9733_v53, %v7584_v20  ;;  %7923 = vadd.xlane.f32.xlu0 %v7843_v51  ;;  %v1883_v17 = vadd.f32 %v17224_v14, %v15439_v18  ;;  %v17225_v1 = vld [vmem:[#allocation229_spill] sm:$0xff]  ;;  %v17226_v51 = vld [vmem:[#allocation239_spill] sm:$0xff] }
 0x859   : > { %v7779_v40 = vmul.f32 %v7593_v52, %v1847_v16  ;;  %7925 = vadd.xlane.f32.xlu1 %v7844_v32  ;;  %v7849_v49 = vmul.f32 %v15456_v59, %v7778_v44  ;;  %v1873_v53 = vadd.f32 %v17225_v1, %v15439_v18  ;;  %v1887_v9 = vadd.f32 %v17226_v51, %v15439_v18  ;;  %v17227_v20 = vld [vmem:[#allocation231_spill] sm:$0xff]  ;;  %v17238_v1 = vld [vmem:[#allocation261_spill] sm:$0xff] }
 0x85a   : > { %v7777_v30 = vmul.f32 %v7585_v43, %v1837_v26  ;;  %v7847_v42 = vmul.f32 %v15456_v59, %v7776_v28  ;;  %v1877_v32 = vadd.f32 %v17227_v20, %v15439_v18 }
 0x85b   : > { %v7850_v24 = vmul.f32 %v15456_v59, %v7779_v40  ;;  %v9746_v40 = vadd.f32 %v14640_v55, %v15436_v63  ;;  %v17231_v55 = vld [vmem:[#allocation6_spill] sm:$0xff] }
 0x85c   : > { %v9410_v11 = vpop.f32.mrb[56].mxu0  ;;  %7935 = vadd.xlane.f32.xlu0 %v7849_v49  ;;  %v7848_v50 = vmul.f32 %v15456_v59, %v7777_v30  ;;  %v9744_v30 = vadd.f32 %v14620_v54, %v15436_v63  ;;  %v9745_v5 = vadd.f32 %v17231_v55, %v15436_v63 }
 0x85d   : > { %v7606_v0 = vadd.f32 %v9738_v35, %v9410_v11  ;;  %v7597_v37 = vpop.f32.mrb[57].mxu0  ;;  %7937 = vadd.xlane.f32.xlu1 %v7850_v24  ;;  %v17228_v24 = vld [vmem:[#allocation253_spill] sm:$0xff]  ;;  %v17229_v11 = vld [vmem:[#allocation4_spill] sm:$0xff] }
 0x85e   : > { %v7598_v27 = vadd.f32 %v9736_v45, %v7597_v37  ;;  %v9411_v58 = vpop.f32.mrb[58].mxu0  ;;  %v1903_v45 = vadd.f32 %v17228_v24, %v15439_v18  ;;  %v9747_v19 = vadd.f32 %v17229_v11, %v15436_v63  ;;  %v17243_v24 = vld [vmem:[#allocation10_spill] sm:$0xff] }
 0x85f   : > { %v7782_v62 = vmul.f32 %v7606_v0, %v1863_v33  ;;  %v7609_v2 = vadd.f32 %v9739_v12, %v9411_v58  ;;  %v7600_v56 = vpop.f32.mrb[59].mxu0  ;;  %v17230_v0 = vld [vmem:[#allocation245_spill] sm:$0xff] }
 0x860   : > { %v7780_v31 = vmul.f32 %v7598_v27, %v1853_v25  ;;  %v7601_v6 = vadd.f32 %v9737_v4, %v7600_v56  ;;  %7931 = vadd.xlane.f32.xlu0 %v7847_v42  ;;  %v1893_v37 = vadd.f32 %v17230_v0, %v15439_v18  ;;  %v17232_v27 = vld [vmem:[#allocation255_spill] sm:$0xff] }
 0x861   : > { %v7783_v7 = vmul.f32 %v7609_v2, %v1867_v21  ;;  %7933 = vadd.xlane.f32.xlu1 %v7848_v50  ;;  %v7853_v48 = vmul.f32 %v15456_v59, %v7782_v62  ;;  %v1907_v58 = vadd.f32 %v17232_v27, %v15439_v18  ;;  %v17233_v2 = vld [vmem:[#allocation247_spill] sm:$0xff] }
 0x862   : > { %v7781_v29 = vmul.f32 %v7601_v6, %v1857_v61  ;;  %v7851_v57 = vmul.f32 %v15456_v59, %v7780_v31  ;;  %v1897_v56 = vadd.f32 %v17233_v2, %v15439_v18 }
 0x863   : > { %v7854_v23 = vmul.f32 %v15456_v59, %v7783_v7  ;;  %v17234_v7 = vld [vmem:[#allocation5_spill] sm:$0xff] }
 0x864   : > { %v9414_v41 = vpop.f32.mrb[60].mxu0  ;;  %7943 = vadd.xlane.f32.xlu0 %v7853_v48  ;;  %v7852_v10 = vmul.f32 %v15456_v59, %v7781_v29  ;;  %v9750_v48 = vadd.f32 %v17234_v7, %v15436_v63 }
 0x865   : > { %v7622_v13 = vadd.f32 %v9742_v36, %v9414_v41  ;;  %v7613_v46 = vpop.f32.mrb[61].mxu0  ;;  %7945 = vadd.xlane.f32.xlu1 %v7854_v23  ;;  %v17235_v36 = vld [vmem:[#allocation369_spill] sm:$0xff] }
 0x866   : > { %v7614_v39 = vadd.f32 %v9740_v8, %v7613_v46  ;;  %v9415_v34 = vpop.f32.mrb[62].mxu0  ;;  %v9748_v23 = vadd.f32 %v17235_v36, %v15436_v63  ;;  %v17236_v41 = vld [vmem:[#allocation269_spill] sm:$0xff]  ;;  %v17250_v36 = vld [vmem:[#allocation380_spill] sm:$0xff] }
 0x867   : > { %v7786_v16 = vmul.f32 %v7622_v13, %v1883_v17  ;;  %v7625_v44 = vadd.f32 %v9743_v60, %v9415_v34  ;;  %v7616_v52 = vpop.f32.mrb[63].mxu0  ;;  %v1923_v14 = vadd.f32 %v17236_v41, %v15439_v18  ;;  %v17237_v17 = vld [vmem:[#allocation373_spill] sm:$0xff]  ;;  %v17251_v41 = vld [vmem:[#allocation11_spill] sm:$0xff] }
 0x868   : > { %v7784_v47 = vmul.f32 %v7614_v39, %v1873_v53  ;;  %v7617_v26 = vadd.f32 %v9741_v3, %v7616_v52  ;;  %7939 = vadd.xlane.f32.xlu0 %v7851_v57  ;;  %v9751_v60 = vadd.f32 %v17237_v17, %v15436_v63  ;;  %v1913_v53 = vadd.f32 %v17238_v1, %v15439_v18  ;;  %v17239_v3 = vld [vmem:[#allocation7_spill] sm:$0xff] }
 0x869   : > { %v7787_v28 = vmul.f32 %v7625_v44, %v1887_v9  ;;  %7941 = vadd.xlane.f32.xlu1 %v7852_v10  ;;  %v7857_v22 = vmul.f32 %v15456_v59, %v7786_v16  ;;  %v9749_v39 = vadd.f32 %v17239_v3, %v15436_v63  ;;  %v17240_v9 = vld [vmem:[#allocation271_spill] sm:$0xff] }
 0x86a   : > { %v7785_v43 = vmul.f32 %v7617_v26, %v1877_v32  ;;  %v7855_v54 = vmul.f32 %v15456_v59, %v7784_v47  ;;  %v1927_v16 = vadd.f32 %v17240_v9, %v15439_v18  ;;  %v17241_v32 = vld [vmem:[#allocation263_spill] sm:$0xff] }
 0x86b   : > { %v7858_v49 = vmul.f32 %v15456_v59, %v7787_v28  ;;  %v1917_v47 = vadd.f32 %v17241_v32, %v15439_v18 }
 0x86c   : > { %v9418_v35 = vpop.f32.mrb[64].mxu0  ;;  %7951 = vadd.xlane.f32.xlu0 %v7857_v22  ;;  %v7856_v62 = vmul.f32 %v15456_v59, %v7785_v43 }
 0x86d   : > { %v7638_v33 = vadd.f32 %v9746_v40, %v9418_v35  ;;  %v7629_v12 = vpop.f32.mrb[65].mxu0  ;;  %7953 = vadd.xlane.f32.xlu1 %v7858_v49  ;;  %v17242_v49 = vld [vmem:[#allocation8_spill] sm:$0xff] }
 0x86e   : > { %v7630_v25 = vadd.f32 %v9744_v30, %v7629_v12  ;;  %v9419_v4 = vpop.f32.mrb[66].mxu0  ;;  %v9754_v30 = vadd.f32 %v17242_v49, %v15436_v63  ;;  %v17245_v12 = vld [vmem:[#allocation375_spill] sm:$0xff] }
 0x86f   : > { %v7790_v42 = vmul.f32 %v7638_v33, %v1903_v45  ;;  %v7641_v15 = vadd.f32 %v9747_v19, %v9419_v4  ;;  %v7632_v21 = vpop.f32.mrb[67].mxu0  ;;  %v9752_v45 = vadd.f32 %v17243_v24, %v15436_v63  ;;  %v17244_v19 = vld [vmem:[#allocation285_spill] sm:$0xff]  ;;  %v9755_v0 = vadd.f32 %v17245_v12, %v15436_v63  ;;  %v17247_v4 = vld [vmem:[#allocation378_spill] sm:$0xff] }
 0x870   : > { %v7788_v50 = vmul.f32 %v7630_v25, %v1893_v37  ;;  %v7633_v38 = vadd.f32 %v9745_v5, %v7632_v21  ;;  %7947 = vadd.xlane.f32.xlu0 %v7855_v54  ;;  %v1943_v33 = vadd.f32 %v17244_v19, %v15439_v18  ;;  %v17246_v5 = vld [vmem:[#allocation277_spill] sm:$0xff]  ;;  %v9753_v54 = vadd.f32 %v17247_v4, %v15436_v63  ;;  %v17258_v24 = vld [vmem:[#allocation382_spill] sm:$0xff] }
 0x871   : > { %v7791_v61 = vmul.f32 %v7641_v15, %v1907_v58  ;;  %7949 = vadd.xlane.f32.xlu1 %v7856_v62  ;;  %v7861_v31 = vmul.f32 %v15456_v59, %v7790_v42  ;;  %v1933_v25 = vadd.f32 %v17246_v5, %v15439_v18  ;;  %v17248_v15 = vld [vmem:[#allocation287_spill] sm:$0xff]  ;;  %v17259_v19 = vld [vmem:[#allocation385_spill] sm:$0xff] }
 0x872   : > { %v7789_v6 = vmul.f32 %v7633_v38, %v1897_v56  ;;  %v7859_v51 = vmul.f32 %v15456_v59, %v7788_v50  ;;  %v1947_v21 = vadd.f32 %v17248_v15, %v15439_v18  ;;  %v17249_v38 = vld [vmem:[#allocation279_spill] sm:$0xff] }
 0x873   : > { %v7862_v29 = vmul.f32 %v15456_v59, %v7791_v61  ;;  %v1937_v61 = vadd.f32 %v17249_v38, %v15439_v18 }
 0x874   : > { %v9422_v8 = vpop.f32.mrb[68].mxu0  ;;  %7959 = vadd.xlane.f32.xlu0 %v7861_v31  ;;  %v7860_v20 = vmul.f32 %v15456_v59, %v7789_v6 }
 0x875   : > { %v7654_v13 = vadd.f32 %v9750_v48, %v9422_v8  ;;  %v7645_v46 = vpop.f32.mrb[69].mxu0  ;;  %7961 = vadd.xlane.f32.xlu1 %v7862_v29 }
 0x876   : > { %v7646_v34 = vadd.f32 %v9748_v23, %v7645_v46  ;;  %v9423_v57 = vpop.f32.mrb[70].mxu0  ;;  %v9758_v23 = vadd.f32 %v17250_v36, %v15436_v63  ;;  %v17253_v46 = vld [vmem:[#allocation14_spill] sm:$0xff] }
 0x877   : > { %v7794_v44 = vmul.f32 %v7654_v13, %v1923_v14  ;;  %v7657_v52 = vadd.f32 %v9751_v60, %v9423_v57  ;;  %v7648_v10 = vpop.f32.mrb[71].mxu0  ;;  %v9756_v14 = vadd.f32 %v17251_v41, %v15436_v63  ;;  %v17252_v60 = vld [vmem:[#allocation301_spill] sm:$0xff]  ;;  %v9759_v1 = vadd.f32 %v17253_v46, %v15436_v63  ;;  %v17266_v41 = vld [vmem:[#allocation16_spill] sm:$0xff] }
 0x878   : > { %v7792_v26 = vmul.f32 %v7646_v34, %v1913_v53  ;;  %v7649_v28 = vadd.f32 %v9749_v39, %v7648_v10  ;;  %7955 = vadd.xlane.f32.xlu0 %v7859_v51  ;;  %v1963_v13 = vadd.f32 %v17252_v60, %v15439_v18  ;;  %v17254_v39 = vld [vmem:[#allocation293_spill] sm:$0xff] }
 0x879   : > { %v7795_v22 = vmul.f32 %v7657_v52, %v1927_v16  ;;  %7957 = vadd.xlane.f32.xlu1 %v7860_v20  ;;  %v7865_v43 = vmul.f32 %v15456_v59, %v7794_v44  ;;  %v1953_v34 = vadd.f32 %v17254_v39, %v15439_v18  ;;  %v17255_v57 = vld [vmem:[#allocation9_spill] sm:$0xff]  ;;  %v17256_v52 = vld [vmem:[#allocation303_spill] sm:$0xff] }
 0x87a   : > { %v7793_v40 = vmul.f32 %v7649_v28, %v1917_v47  ;;  %v7863_v42 = vmul.f32 %v15456_v59, %v7792_v26  ;;  %v9757_v51 = vadd.f32 %v17255_v57, %v15436_v63  ;;  %v1967_v10 = vadd.f32 %v17256_v52, %v15439_v18  ;;  %v17257_v28 = vld [vmem:[#allocation295_spill] sm:$0xff]  ;;  %v17267_v60 = vld [vmem:[#allocation13_spill] sm:$0xff] }
 0x87b   : > { %v7866_v35 = vmul.f32 %v15456_v59, %v7795_v22  ;;  %v1957_v22 = vadd.f32 %v17257_v28, %v15439_v18 }
 0x87c   : > { %v9426_v11 = vpop.f32.mrb[72].mxu0  ;;  %7967 = vadd.xlane.f32.xlu0 %v7865_v43  ;;  %v7864_v50 = vmul.f32 %v15456_v59, %v7793_v40 }
 0x87d   : > { %v7670_v37 = vadd.f32 %v9754_v30, %v9426_v11  ;;  %v7661_v55 = vpop.f32.mrb[73].mxu0  ;;  %7969 = vadd.xlane.f32.xlu1 %v7866_v35 }
 0x87e   : > { %v7662_v27 = vadd.f32 %v9752_v45, %v7661_v55  ;;  %v9427_v58 = vpop.f32.mrb[74].mxu0  ;;  %v9762_v45 = vadd.f32 %v17258_v24, %v15436_v63  ;;  %v17261_v55 = vld [vmem:[#allocation15_spill] sm:$0xff] }
 0x87f   : > { %v7798_v62 = vmul.f32 %v7670_v37, %v1943_v33  ;;  %v7673_v2 = vadd.f32 %v9755_v0, %v9427_v58  ;;  %v7664_v56 = vpop.f32.mrb[75].mxu0  ;;  %v9760_v33 = vadd.f32 %v17259_v19, %v15436_v63  ;;  %v17260_v0 = vld [vmem:[#allocation317_spill] sm:$0xff]  ;;  %v9763_v5 = vadd.f32 %v17261_v55, %v15436_v63  ;;  %v17263_v58 = vld [vmem:[#allocation12_spill] sm:$0xff] }
 0x880   : > { %v7796_v31 = vmul.f32 %v7662_v27, %v1933_v25  ;;  %v7665_v6 = vadd.f32 %v9753_v54, %v7664_v56  ;;  %7963 = vadd.xlane.f32.xlu0 %v7863_v42  ;;  %v1983_v37 = vadd.f32 %v17260_v0, %v15439_v18  ;;  %v17262_v54 = vld [vmem:[#allocation309_spill] sm:$0xff]  ;;  %v9761_v42 = vadd.f32 %v17263_v58, %v15436_v63  ;;  %v17274_v19 = vld [vmem:[#allocation20_spill] sm:$0xff] }
 0x881   : > { %v7799_v7 = vmul.f32 %v7673_v2, %v1947_v21  ;;  %7965 = vadd.xlane.f32.xlu1 %v7864_v50  ;;  %v7869_v48 = vmul.f32 %v15456_v59, %v7798_v62  ;;  %v1973_v27 = vadd.f32 %v17262_v54, %v15439_v18  ;;  %v17264_v2 = vld [vmem:[#allocation319_spill] sm:$0xff]  ;;  %v17275_v0 = vld [vmem:[#allocation17_spill] sm:$0xff] }
 0x882   : > { %v7797_v29 = vmul.f32 %v7665_v6, %v1937_v61  ;;  %v7867_v44 = vmul.f32 %v15456_v59, %v7796_v31  ;;  %v1987_v56 = vadd.f32 %v17264_v2, %v15439_v18  ;;  %v17265_v6 = vld [vmem:[#allocation311_spill] sm:$0xff] }
 0x883   : > { %v7870_v8 = vmul.f32 %v15456_v59, %v7799_v7  ;;  %v1977_v7 = vadd.f32 %v17265_v6, %v15439_v18 }
 0x884   : > { %v9430_v17 = vpop.f32.mrb[76].mxu0  ;;  %7975 = vadd.xlane.f32.xlu0 %v7869_v48  ;;  %v7868_v26 = vmul.f32 %v15456_v59, %v7797_v29 }
 0x885   : > { %v7686_v53 = vadd.f32 %v9758_v23, %v9430_v17  ;;  %v7677_v3 = vpop.f32.mrb[77].mxu0  ;;  %7977 = vadd.xlane.f32.xlu1 %v7870_v8 }
 0x886   : > { %v7678_v9 = vadd.f32 %v9756_v14, %v7677_v3  ;;  %v9431_v16 = vpop.f32.mrb[78].mxu0  ;;  %v9766_v14 = vadd.f32 %v17266_v41, %v15436_v63  ;;  %v17269_v3 = vld [vmem:[#allocation19_spill] sm:$0xff] }
 0x887   : > { %v7802_v20 = vmul.f32 %v7686_v53, %v1963_v13  ;;  %v7689_v32 = vadd.f32 %v9759_v1, %v9431_v16  ;;  %v7680_v47 = vpop.f32.mrb[79].mxu0  ;;  %v9764_v13 = vadd.f32 %v17267_v60, %v15436_v63  ;;  %v17268_v1 = vld [vmem:[#allocation333_spill] sm:$0xff]  ;;  %v9767_v39 = vadd.f32 %v17269_v3, %v15436_v63  ;;  %v17271_v16 = vld [vmem:[#allocation18_spill] sm:$0xff]  ;;  %v17282_v60 = vld [vmem:[#allocation24_spill] sm:$0xff] }
 0x888   : > { %v7800_v43 = vmul.f32 %v7678_v9, %v1953_v34  ;;  %v7681_v40 = vadd.f32 %v9757_v51, %v7680_v47  ;;  %7971 = vadd.xlane.f32.xlu0 %v7867_v44  ;;  %v2003_v53 = vadd.f32 %v17268_v1, %v15439_v18  ;;  %v17270_v51 = vld [vmem:[#allocation325_spill] sm:$0xff]  ;;  %v9765_v44 = vadd.f32 %v17271_v16, %v15436_v63 }
 0x889   : > { %v7803_v49 = vmul.f32 %v7689_v32, %v1967_v10  ;;  %7973 = vadd.xlane.f32.xlu1 %v7868_v26  ;;  %v7873_v30 = vmul.f32 %v15456_v59, %v7802_v20  ;;  %v1993_v9 = vadd.f32 %v17270_v51, %v15439_v18  ;;  %v17272_v32 = vld [vmem:[#allocation335_spill] sm:$0xff]  ;;  %v17283_v1 = vld [vmem:[#allocation21_spill] sm:$0xff] }
 0x88a   : > { %v7801_v35 = vmul.f32 %v7681_v40, %v1957_v22  ;;  %v7871_v62 = vmul.f32 %v15456_v59, %v7800_v43  ;;  %v2007_v47 = vadd.f32 %v17272_v32, %v15439_v18  ;;  %v17273_v40 = vld [vmem:[#allocation327_spill] sm:$0xff] }
 0x88b   : > { %v7874_v11 = vmul.f32 %v15456_v59, %v7803_v49  ;;  %v1997_v49 = vadd.f32 %v17273_v40, %v15439_v18 }
 0x88c   : > { %v9434_v12 = vpop.f32.mrb[80].mxu0  ;;  %7983 = vadd.xlane.f32.xlu0 %v7873_v30  ;;  %v7872_v31 = vmul.f32 %v15456_v59, %v7801_v35 }
 0x88d   : > { %v7702_v25 = vadd.f32 %v9762_v45, %v9434_v12  ;;  %v7693_v4 = vpop.f32.mrb[81].mxu0  ;;  %7985 = vadd.xlane.f32.xlu1 %v7874_v11 }
 0x88e   : > { %v7694_v15 = vadd.f32 %v9760_v33, %v7693_v4  ;;  %v9435_v21 = vpop.f32.mrb[82].mxu0  ;;  %v9770_v33 = vadd.f32 %v17274_v19, %v15436_v63  ;;  %v17277_v4 = vld [vmem:[#allocation23_spill] sm:$0xff] }
 0x88f   : > { %v7806_v50 = vmul.f32 %v7702_v25, %v1983_v37  ;;  %v7705_v38 = vadd.f32 %v9763_v5, %v9435_v21  ;;  %v7696_v61 = vpop.f32.mrb[83].mxu0  ;;  %v9768_v37 = vadd.f32 %v17275_v0, %v15436_v63  ;;  %v17276_v5 = vld [vmem:[#allocation349_spill] sm:$0xff]  ;;  %v9771_v54 = vadd.f32 %v17277_v4, %v15436_v63  ;;  %v17279_v21 = vld [vmem:[#allocation22_spill] sm:$0xff] }
 0x890   : > { %v7804_v48 = vmul.f32 %v7694_v15, %v1973_v27  ;;  %v7697_v29 = vadd.f32 %v9761_v42, %v7696_v61  ;;  %7979 = vadd.xlane.f32.xlu0 %v7871_v62  ;;  %v2023_v25 = vadd.f32 %v17276_v5, %v15439_v18  ;;  %v17278_v42 = vld [vmem:[#allocation341_spill] sm:$0xff]  ;;  %v9769_v62 = vadd.f32 %v17279_v21, %v15436_v63 }
 0x891   : > { %v7807_v36 = vmul.f32 %v7705_v38, %v1987_v56  ;;  %7981 = vadd.xlane.f32.xlu1 %v7872_v31  ;;  %v7877_v23 = vmul.f32 %v15456_v59, %v7806_v50  ;;  %v2013_v15 = vadd.f32 %v17278_v42, %v15439_v18  ;;  %v17280_v38 = vld [vmem:[#allocation351_spill] sm:$0xff] }
 0x892   : > { %v7805_v8 = vmul.f32 %v7697_v29, %v1977_v7  ;;  %v7875_v20 = vmul.f32 %v15456_v59, %v7804_v48  ;;  %v2027_v61 = vadd.f32 %v17280_v38, %v15439_v18  ;;  %v17281_v29 = vld [vmem:[#allocation343_spill] sm:$0xff] }
 0x893   : > { %v7878_v17 = vmul.f32 %v15456_v59, %v7807_v36  ;;  %v2017_v36 = vadd.f32 %v17281_v29, %v15439_v18 }
 0x894   : > { %v9438_v46 = vpop.f32.mrb[84].mxu0  ;;  %7991 = vadd.xlane.f32.xlu0 %v7877_v23  ;;  %v7876_v43 = vmul.f32 %v15456_v59, %v7805_v8 }
 0x895   : > { %v7718_v34 = vadd.f32 %v9766_v14, %v9438_v46  ;;  %v7709_v57 = vpop.f32.mrb[85].mxu0  ;;  %7993 = vadd.xlane.f32.xlu1 %v7878_v17 }
 0x896   : > { %v7710_v52 = vadd.f32 %v9764_v13, %v7709_v57  ;;  %v9439_v10 = vpop.f32.mrb[86].mxu0  ;;  %v9774_v13 = vadd.f32 %v17282_v60, %v15436_v63  ;;  %v17285_v57 = vld [vmem:[#allocation31_spill] sm:$0xff] }
 0x897   : > { %v7810_v26 = vmul.f32 %v7718_v34, %v2003_v53  ;;  %v7721_v28 = vadd.f32 %v9767_v39, %v9439_v10  ;;  %v7712_v22 = vpop.f32.mrb[87].mxu0  ;;  %v9772_v53 = vadd.f32 %v17283_v1, %v15436_v63  ;;  %v17284_v39 = vld [vmem:[#allocation365_spill] sm:$0xff]  ;;  %v9775_v51 = vadd.f32 %v17285_v57, %v15436_v63  ;;  %v17287_v10 = vld [vmem:[#allocation28_spill] sm:$0xff] }
 0x898   : > { %v7808_v30 = vmul.f32 %v7710_v52, %v1993_v9  ;;  %v7713_v35 = vadd.f32 %v9765_v44, %v7712_v22  ;;  %7987 = vadd.xlane.f32.xlu0 %v7875_v20  ;;  %v2043_v34 = vadd.f32 %v17284_v39, %v15439_v18  ;;  %v17286_v44 = vld [vmem:[#allocation357_spill] sm:$0xff]  ;;  %v9773_v20 = vadd.f32 %v17287_v10, %v15436_v63 }
 0x899   : > { %v7811_v24 = vmul.f32 %v7721_v28, %v2007_v47  ;;  %7989 = vadd.xlane.f32.xlu1 %v7876_v43  ;;  %v7881_v45 = vmul.f32 %v15456_v59, %v7810_v26  ;;  %v2033_v52 = vadd.f32 %v17286_v44, %v15439_v18  ;;  %v17288_v28 = vld [vmem:[#allocation367_spill] sm:$0xff] }
 0x89a   : > { %v7809_v11 = vmul.f32 %v7713_v35, %v1997_v49  ;;  %v7879_v50 = vmul.f32 %v15456_v59, %v7808_v30  ;;  %v2047_v22 = vadd.f32 %v17288_v28, %v15439_v18  ;;  %v17289_v35 = vld [vmem:[#allocation359_spill] sm:$0xff] }
 0x89b   : > { %v7882_v12 = vmul.f32 %v15456_v59, %v7811_v24  ;;  %v2037_v24 = vadd.f32 %v17289_v35, %v15439_v18  ;;  %v15767_v18 = vld [vmem:[#allocation2] ss:$0 sm:$0xff] }
 0x89c   : > { %v9442_v55 = vpop.f32.mrb[88].mxu0  ;;  %7999 = vadd.xlane.f32.xlu0 %v7881_v45  ;;  %v7880_v48 = vmul.f32 %v15456_v59, %v7809_v11 }
 0x89d   : > { %v7734_v27 = vadd.f32 %v9770_v33, %v9442_v55  ;;  %v7725_v58 = vpop.f32.mrb[89].mxu0  ;;  %8001 = vadd.xlane.f32.xlu1 %v7882_v12 }
 0x89e   : > { %v7726_v2 = vadd.f32 %v9768_v37, %v7725_v58  ;;  %v9443_v56 = vpop.f32.mrb[90].mxu0 }
 0x89f   : > { %v7814_v31 = vmul.f32 %v7734_v27, %v2023_v25  ;;  %v7737_v6 = vadd.f32 %v9771_v54, %v9443_v56  ;;  %v7728_v7 = vpop.f32.mrb[91].mxu0 }
 0x8a0   : > { %v7812_v23 = vmul.f32 %v7726_v2, %v2013_v15  ;;  %v7729_v8 = vadd.f32 %v9769_v62, %v7728_v7  ;;  %7995 = vadd.xlane.f32.xlu0 %v7879_v50 }
 0x8a1   : > { %v7815_v41 = vmul.f32 %v7737_v6, %v2027_v61  ;;  %7997 = vadd.xlane.f32.xlu1 %v7880_v48  ;;  %v7885_v14 = vmul.f32 %v15456_v59, %v7814_v31 }
 0x8a2   : > { %v7813_v17 = vmul.f32 %v7729_v8, %v2017_v36  ;;  %v7883_v26 = vmul.f32 %v15456_v59, %v7812_v23 }
 0x8a3   : > { %v7886_v46 = vmul.f32 %v15456_v59, %v7815_v41 }
 0x8a4   : > { %v9446_v3 = vpop.f32.mrb[92].mxu0  ;;  %8007 = vadd.xlane.f32.xlu0 %v7885_v14  ;;  %v7884_v30 = vmul.f32 %v15456_v59, %v7813_v17 }
 0x8a5   : > { %v7750_v9 = vadd.f32 %v9774_v13, %v9446_v3  ;;  %v7741_v16 = vpop.f32.mrb[93].mxu0  ;;  %8009 = vadd.xlane.f32.xlu1 %v7886_v46 }
 0x8a6   : > { %v7742_v32 = vadd.f32 %v9772_v53, %v7741_v16  ;;  %v9447_v47 = vpop.f32.mrb[94].mxu0 }
 0x8a7   : > { %v7818_v43 = vmul.f32 %v7750_v9, %v2043_v34  ;;  %v7753_v40 = vadd.f32 %v9775_v51, %v9447_v47  ;;  %v7744_v49 = vpop.f32.mrb[95].mxu0 }
 0x8a8   : > { %v7816_v45 = vmul.f32 %v7742_v32, %v2033_v52  ;;  %v7745_v11 = vadd.f32 %v9773_v20, %v7744_v49  ;;  %8003 = vadd.xlane.f32.xlu0 %v7883_v26 }
 0x8a9   : > { %v7819_v63 = vmul.f32 %v7753_v40, %v2047_v22  ;;  %8005 = vadd.xlane.f32.xlu1 %v7884_v30  ;;  %v7889_v0 = vmul.f32 %v15456_v59, %v7818_v43 }
 0x8aa   : > { %v7817_v19 = vmul.f32 %v7745_v11, %v2037_v24  ;;  %v7887_v33 = vmul.f32 %v15456_v59, %v7816_v45 }
 0x8ab   : > { %v7890_v37 = vmul.f32 %v15456_v59, %v7819_v63 }
 0x8ac   : > { %8011 = vadd.xlane.f32.xlu0 %v7887_v33  ;;  %v7888_v12 = vmul.f32 %v15456_v59, %v7817_v19 }
 0x8ae   : > { %8013 = vadd.xlane.f32.xlu1 %v7888_v12 }
 0x8b0   : > { %8015 = vadd.xlane.f32.xlu0 %v7889_v0 }
 0x8b2   : > { %8017 = vadd.xlane.f32.xlu1 %v7890_v37 }
 0x8c0   : > { %v7896_v55 = vpop.xlane.xlu1 %7895 }
 0x8c1   : > { %v8028_v5 = vadd.f32 %v15767_v18, %v7896_v55  ;;  %v7892_v59 = vpop.xlane.xlu0 %7891 }
 0x8c2   : > { %v8026_v25 = vadd.f32 %v15767_v18, %v7892_v59 }
 0x8c3   : > { %8093 = vst.msk [vmem:[%s15772_s15 + $0x10] sm:$0xff] %vm8090_vm3, %v8028_v5 }
 0x8c4   : > { %8091 = vst.msk [vmem:[%s15772_s15] sm:$0xff] %vm8090_vm3, %v8026_v25  ;;  %v7898_v4 = vpop.xlane.xlu1 %7897 }
 0x8c5   : > { %v8029_v54 = vadd.f32 %v15767_v18, %v7898_v4  ;;  %v7894_v27 = vpop.xlane.xlu0 %7893 }
 0x8c6   : > { %v8027_v58 = vadd.f32 %v15767_v18, %v7894_v27 }
 0x8c7   : > { %8094 = vst.msk [vmem:[%s15772_s15 + $0x18] sm:$0xff] %vm8090_vm3, %v8029_v54 }
 0x8c8   : > { %8092 = vst.msk [vmem:[%s15772_s15 + $0x8] sm:$0xff] %vm8090_vm3, %v8027_v58 }
 0x8c9   : > { %v7904_v42 = vpop.xlane.xlu0 %7903 }
 0x8ca   : > { %v8032_v15 = vadd.f32 %v15767_v18, %v7904_v42  ;;  %v7906_v21 = vpop.xlane.xlu1 %7905 }
 0x8cb   : > { %v8033_v62 = vadd.f32 %v15767_v18, %v7906_v21 }
 0x8cc   : > { %8097 = vst.msk [vmem:[%s15772_s15 + $0x30] sm:$0xff] %vm8090_vm3, %v8032_v15 }
 0x8cd   : > { %8098 = vst.msk [vmem:[%s15772_s15 + $0x38] sm:$0xff] %vm8090_vm3, %v8033_v62  ;;  %v7900_v2 = vpop.xlane.xlu0 %7899 }
 0x8ce   : > { %v8030_v56 = vadd.f32 %v15767_v18, %v7900_v2  ;;  %v7902_v50 = vpop.xlane.xlu1 %7901 }
 0x8cf   : > { %v8031_v38 = vadd.f32 %v15767_v18, %v7902_v50 }
 0x8d0   : > { %8095 = vst.msk [vmem:[%s15772_s15 + $0x20] sm:$0xff] %vm8090_vm3, %v8030_v56 }
 0x8d1   : > { %8096 = vst.msk [vmem:[%s15772_s15 + $0x28] sm:$0xff] %vm8090_vm3, %v8031_v38  ;;  %v7912_v61 = vpop.xlane.xlu0 %7911 }
 0x8d2   : > { %v8036_v31 = vadd.f32 %v15767_v18, %v7912_v61  ;;  %v7914_v6 = vpop.xlane.xlu1 %7913 }
 0x8d3   : > { %v8037_v7 = vadd.f32 %v15767_v18, %v7914_v6 }
 0x8d4   : > { %8101 = vst.msk [vmem:[%s15772_s15 + $0x50] sm:$0xff] %vm8090_vm3, %v8036_v31 }
 0x8d5   : > { %8102 = vst.msk [vmem:[%s15772_s15 + $0x58] sm:$0xff] %vm8090_vm3, %v8037_v7  ;;  %v7908_v48 = vpop.xlane.xlu0 %7907 }
 0x8d6   : > { %v8034_v29 = vadd.f32 %v15767_v18, %v7908_v48  ;;  %v7910_v36 = vpop.xlane.xlu1 %7909 }
 0x8d7   : > { %v8035_v23 = vadd.f32 %v15767_v18, %v7910_v36 }
 0x8d8   : > { %8099 = vst.msk [vmem:[%s15772_s15 + $0x40] sm:$0xff] %vm8090_vm3, %v8034_v29 }
 0x8d9   : > { %8100 = vst.msk [vmem:[%s15772_s15 + $0x48] sm:$0xff] %vm8090_vm3, %v8035_v23  ;;  %v7920_v8 = vpop.xlane.xlu0 %7919 }
 0x8da   : > { %v8040_v41 = vadd.f32 %v15767_v18, %v7920_v8  ;;  %v7922_v14 = vpop.xlane.xlu1 %7921 }
 0x8db   : > { %v8041_v17 = vadd.f32 %v15767_v18, %v7922_v14 }
 0x8dc   : > { %8105 = vst.msk [vmem:[%s15772_s15 + $0x70] sm:$0xff] %vm8090_vm3, %v8040_v41 }
 0x8dd   : > { %8106 = vst.msk [vmem:[%s15772_s15 + $0x78] sm:$0xff] %vm8090_vm3, %v8041_v17  ;;  %v7916_v60 = vpop.xlane.xlu0 %7915 }
 0x8de   : > { %v8038_v13 = vadd.f32 %v15767_v18, %v7916_v60  ;;  %v7918_v46 = vpop.xlane.xlu1 %7917 }
 0x8df   : > { %v8039_v1 = vadd.f32 %v15767_v18, %v7918_v46 }
 0x8e0   : > { %8103 = vst.msk [vmem:[%s15772_s15 + $0x60] sm:$0xff] %vm8090_vm3, %v8038_v13 }
 0x8e1   : > { %8104 = vst.msk [vmem:[%s15772_s15 + $0x68] sm:$0xff] %vm8090_vm3, %v8039_v1  ;;  %v7928_v53 = vpop.xlane.xlu0 %7927 }
 0x8e2   : > { %v8044_v3 = vadd.f32 %v15767_v18, %v7928_v53  ;;  %v7930_v39 = vpop.xlane.xlu1 %7929 }
 0x8e3   : > { %v8045_v34 = vadd.f32 %v15767_v18, %v7930_v39 }
 0x8e4   : > { %8109 = vst.msk [vmem:[%s15772_s15 + $0x90] sm:$0xff] %vm8090_vm3, %v8044_v3 }
 0x8e5   : > { %8110 = vst.msk [vmem:[%s15772_s15 + $0x98] sm:$0xff] %vm8090_vm3, %v8045_v34  ;;  %v7924_v57 = vpop.xlane.xlu0 %7923 }
 0x8e6   : > { %v8042_v51 = vadd.f32 %v15767_v18, %v7924_v57  ;;  %v7926_v9 = vpop.xlane.xlu1 %7925 }
 0x8e7   : > { %v8043_v16 = vadd.f32 %v15767_v18, %v7926_v9 }
 0x8e8   : > { %8107 = vst.msk [vmem:[%s15772_s15 + $0x80] sm:$0xff] %vm8090_vm3, %v8042_v51 }
 0x8e9   : > { %8108 = vst.msk [vmem:[%s15772_s15 + $0x88] sm:$0xff] %vm8090_vm3, %v8043_v16  ;;  %v7936_v44 = vpop.xlane.xlu0 %7935 }
 0x8ea   : > { %v8048_v52 = vadd.f32 %v15767_v18, %v7936_v44  ;;  %v7938_v10 = vpop.xlane.xlu1 %7937 }
 0x8eb   : > { %v8049_v20 = vadd.f32 %v15767_v18, %v7938_v10 }
 0x8ec   : > { %8113 = vst.msk [vmem:[%s15772_s15 + $0xb0] sm:$0xff] %vm8090_vm3, %v8048_v52 }
 0x8ed   : > { %8114 = vst.msk [vmem:[%s15772_s15 + $0xb8] sm:$0xff] %vm8090_vm3, %v8049_v20  ;;  %v7932_v32 = vpop.xlane.xlu0 %7931 }
 0x8ee   : > { %v8046_v47 = vadd.f32 %v15767_v18, %v7932_v32  ;;  %v7934_v26 = vpop.xlane.xlu1 %7933 }
 0x8ef   : > { %v8047_v28 = vadd.f32 %v15767_v18, %v7934_v26 }
 0x8f0   : > { %8111 = vst.msk [vmem:[%s15772_s15 + $0xa0] sm:$0xff] %vm8090_vm3, %v8046_v47 }
 0x8f1   : > { %8112 = vst.msk [vmem:[%s15772_s15 + $0xa8] sm:$0xff] %vm8090_vm3, %v8047_v28  ;;  %v7944_v22 = vpop.xlane.xlu0 %7943 }
 0x8f2   : > { %v8052_v43 = vadd.f32 %v15767_v18, %v7944_v22  ;;  %v7946_v40 = vpop.xlane.xlu1 %7945 }
 0x8f3   : > { %v8053_v49 = vadd.f32 %v15767_v18, %v7946_v40 }
 0x8f4   : > { %8117 = vst.msk [vmem:[%s15772_s15 + $0xd0] sm:$0xff] %vm8090_vm3, %v8052_v43 }
 0x8f5   : > { %8118 = vst.msk [vmem:[%s15772_s15 + $0xd8] sm:$0xff] %vm8090_vm3, %v8053_v49  ;;  %v7940_v30 = vpop.xlane.xlu0 %7939 }
 0x8f6   : > { %v8050_v35 = vadd.f32 %v15767_v18, %v7940_v30  ;;  %v7942_v24 = vpop.xlane.xlu1 %7941 }
 0x8f7   : > { %v8051_v45 = vadd.f32 %v15767_v18, %v7942_v24 }
 0x8f8   : > { %8115 = vst.msk [vmem:[%s15772_s15 + $0xc0] sm:$0xff] %vm8090_vm3, %v8050_v35 }
 0x8f9   : > { %8116 = vst.msk [vmem:[%s15772_s15 + $0xc8] sm:$0xff] %vm8090_vm3, %v8051_v45  ;;  %v7952_v11 = vpop.xlane.xlu0 %7951 }
 0x8fa   : > { %v8056_v63 = vadd.f32 %v15767_v18, %v7952_v11  ;;  %v7954_v19 = vpop.xlane.xlu1 %7953 }
 0x8fb   : > { %v8057_v33 = vadd.f32 %v15767_v18, %v7954_v19 }
 0x8fc   : > { %8121 = vst.msk [vmem:[%s15772_s15 + $0xf0] sm:$0xff] %vm8090_vm3, %v8056_v63 }
 0x8fd   : > { %8122 = vst.msk [vmem:[%s15772_s15 + $0xf8] sm:$0xff] %vm8090_vm3, %v8057_v33  ;;  %v7948_v12 = vpop.xlane.xlu0 %7947 }
 0x8fe   : > { %v8054_v0 = vadd.f32 %v15767_v18, %v7948_v12  ;;  %v7950_v37 = vpop.xlane.xlu1 %7949 }
 0x8ff   : > { %v8055_v55 = vadd.f32 %v15767_v18, %v7950_v37 }
 0x900   : > { %8119 = vst.msk [vmem:[%s15772_s15 + $0xe0] sm:$0xff] %vm8090_vm3, %v8054_v0 }
 0x901   : > { %8120 = vst.msk [vmem:[%s15772_s15 + $0xe8] sm:$0xff] %vm8090_vm3, %v8055_v55  ;;  %v7960_v5 = vpop.xlane.xlu0 %7959 }
 0x902   : > { %v8060_v59 = vadd.f32 %v15767_v18, %v7960_v5  ;;  %v7962_v25 = vpop.xlane.xlu1 %7961 }
 0x903   : > { %v8061_v4 = vadd.f32 %v15767_v18, %v7962_v25 }
 0x904   : > { %8125 = vst.msk [vmem:[%s15772_s15 + $0x110] sm:$0xff] %vm8090_vm3, %v8060_v59 }
 0x905   : > { %8126 = vst.msk [vmem:[%s15772_s15 + $0x118] sm:$0xff] %vm8090_vm3, %v8061_v4  ;;  %v7956_v54 = vpop.xlane.xlu0 %7955 }
 0x906   : > { %v8058_v27 = vadd.f32 %v15767_v18, %v7956_v54  ;;  %v7958_v58 = vpop.xlane.xlu1 %7957 }
 0x907   : > { %v8059_v42 = vadd.f32 %v15767_v18, %v7958_v58 }
 0x908   : > { %8123 = vst.msk [vmem:[%s15772_s15 + $0x100] sm:$0xff] %vm8090_vm3, %v8058_v27 }
 0x909   : > { %8124 = vst.msk [vmem:[%s15772_s15 + $0x108] sm:$0xff] %vm8090_vm3, %v8059_v42  ;;  %v7968_v15 = vpop.xlane.xlu0 %7967 }
 0x90a   : > { %v8064_v21 = vadd.f32 %v15767_v18, %v7968_v15  ;;  %v7970_v62 = vpop.xlane.xlu1 %7969 }
 0x90b   : > { %v8065_v2 = vadd.f32 %v15767_v18, %v7970_v62 }
 0x90c   : > { %8129 = vst.msk [vmem:[%s15772_s15 + $0x130] sm:$0xff] %vm8090_vm3, %v8064_v21 }
 0x90d   : > { %8130 = vst.msk [vmem:[%s15772_s15 + $0x138] sm:$0xff] %vm8090_vm3, %v8065_v2  ;;  %v7964_v56 = vpop.xlane.xlu0 %7963 }
 0x90e   : > { %v8062_v50 = vadd.f32 %v15767_v18, %v7964_v56  ;;  %v7966_v38 = vpop.xlane.xlu1 %7965 }
 0x90f   : > { %v8063_v61 = vadd.f32 %v15767_v18, %v7966_v38 }
 0x910   : > { %8127 = vst.msk [vmem:[%s15772_s15 + $0x120] sm:$0xff] %vm8090_vm3, %v8062_v50 }
 0x911   : > { %8128 = vst.msk [vmem:[%s15772_s15 + $0x128] sm:$0xff] %vm8090_vm3, %v8063_v61  ;;  %v7976_v31 = vpop.xlane.xlu0 %7975 }
 0x912   : > { %v8068_v6 = vadd.f32 %v15767_v18, %v7976_v31  ;;  %v7978_v7 = vpop.xlane.xlu1 %7977 }
 0x913   : > { %v8069_v48 = vadd.f32 %v15767_v18, %v7978_v7 }
 0x914   : > { %8133 = vst.msk [vmem:[%s15772_s15 + $0x150] sm:$0xff] %vm8090_vm3, %v8068_v6 }
 0x915   : > { %8134 = vst.msk [vmem:[%s15772_s15 + $0x158] sm:$0xff] %vm8090_vm3, %v8069_v48  ;;  %v7972_v29 = vpop.xlane.xlu0 %7971 }
 0x916   : > { %v8066_v36 = vadd.f32 %v15767_v18, %v7972_v29  ;;  %v7974_v23 = vpop.xlane.xlu1 %7973 }
 0x917   : > { %v8067_v8 = vadd.f32 %v15767_v18, %v7974_v23 }
 0x918   : > { %8131 = vst.msk [vmem:[%s15772_s15 + $0x140] sm:$0xff] %vm8090_vm3, %v8066_v36 }
 0x919   : > { %8132 = vst.msk [vmem:[%s15772_s15 + $0x148] sm:$0xff] %vm8090_vm3, %v8067_v8  ;;  %v7984_v41 = vpop.xlane.xlu0 %7983 }
 0x91a   : > { %v8072_v14 = vadd.f32 %v15767_v18, %v7984_v41  ;;  %v7986_v17 = vpop.xlane.xlu1 %7985 }
 0x91b   : > { %v8073_v60 = vadd.f32 %v15767_v18, %v7986_v17 }
 0x91c   : > { %8137 = vst.msk [vmem:[%s15772_s15 + $0x170] sm:$0xff] %vm8090_vm3, %v8072_v14 }
 0x91d   : > { %8138 = vst.msk [vmem:[%s15772_s15 + $0x178] sm:$0xff] %vm8090_vm3, %v8073_v60  ;;  %v7980_v13 = vpop.xlane.xlu0 %7979 }
 0x91e   : > { %v8070_v46 = vadd.f32 %v15767_v18, %v7980_v13  ;;  %v7982_v1 = vpop.xlane.xlu1 %7981 }
 0x91f   : > { %v8071_v53 = vadd.f32 %v15767_v18, %v7982_v1 }
 0x920   : > { %8135 = vst.msk [vmem:[%s15772_s15 + $0x160] sm:$0xff] %vm8090_vm3, %v8070_v46 }
 0x921   : > { %8136 = vst.msk [vmem:[%s15772_s15 + $0x168] sm:$0xff] %vm8090_vm3, %v8071_v53  ;;  %v7992_v3 = vpop.xlane.xlu0 %7991 }
 0x922   : > { %v8076_v39 = vadd.f32 %v15767_v18, %v7992_v3  ;;  %v7994_v34 = vpop.xlane.xlu1 %7993 }
 0x923   : > { %v8077_v57 = vadd.f32 %v15767_v18, %v7994_v34 }
 0x924   : > { %8141 = vst.msk [vmem:[%s15772_s15 + $0x190] sm:$0xff] %vm8090_vm3, %v8076_v39 }
 0x925   : > { %8142 = vst.msk [vmem:[%s15772_s15 + $0x198] sm:$0xff] %vm8090_vm3, %v8077_v57  ;;  %v7988_v51 = vpop.xlane.xlu0 %7987 }
 0x926   : > { %v8074_v9 = vadd.f32 %v15767_v18, %v7988_v51  ;;  %v7990_v16 = vpop.xlane.xlu1 %7989 }
 0x927   : > { %v8075_v44 = vadd.f32 %v15767_v18, %v7990_v16 }
 0x928   : > { %8139 = vst.msk [vmem:[%s15772_s15 + $0x180] sm:$0xff] %vm8090_vm3, %v8074_v9 }
 0x929   : > { %8140 = vst.msk [vmem:[%s15772_s15 + $0x188] sm:$0xff] %vm8090_vm3, %v8075_v44  ;;  %v8000_v52 = vpop.xlane.xlu0 %7999 }
 0x92a   : > { %v8080_v10 = vadd.f32 %v15767_v18, %v8000_v52  ;;  %v8002_v20 = vpop.xlane.xlu1 %8001 }
 0x92b   : > { %v8081_v32 = vadd.f32 %v15767_v18, %v8002_v20 }
 0x92c   : > { %8145 = vst.msk [vmem:[%s15772_s15 + $0x1b0] sm:$0xff] %vm8090_vm3, %v8080_v10 }
 0x92d   : > { %8146 = vst.msk [vmem:[%s15772_s15 + $0x1b8] sm:$0xff] %vm8090_vm3, %v8081_v32  ;;  %v7996_v47 = vpop.xlane.xlu0 %7995 }
 0x92e   : > { %v8078_v26 = vadd.f32 %v15767_v18, %v7996_v47  ;;  %v7998_v28 = vpop.xlane.xlu1 %7997 }
 0x92f   : > { %v8079_v22 = vadd.f32 %v15767_v18, %v7998_v28 }
 0x930   : > { %8143 = vst.msk [vmem:[%s15772_s15 + $0x1a0] sm:$0xff] %vm8090_vm3, %v8078_v26 }
 0x931   : > { %8144 = vst.msk [vmem:[%s15772_s15 + $0x1a8] sm:$0xff] %vm8090_vm3, %v8079_v22  ;;  %v8008_v43 = vpop.xlane.xlu0 %8007 }
 0x932   : > { %v8084_v40 = vadd.f32 %v15767_v18, %v8008_v43  ;;  %v8010_v49 = vpop.xlane.xlu1 %8009 }
 0x933   : > { %v8085_v30 = vadd.f32 %v15767_v18, %v8010_v49 }
 0x934   : > { %8149 = vst.msk [vmem:[%s15772_s15 + $0x1d0] sm:$0xff] %vm8090_vm3, %v8084_v40 }
 0x935   : > { %8150 = vst.msk [vmem:[%s15772_s15 + $0x1d8] sm:$0xff] %vm8090_vm3, %v8085_v30  ;;  %v8004_v35 = vpop.xlane.xlu0 %8003 }
 0x936   : > { %v8082_v24 = vadd.f32 %v15767_v18, %v8004_v35  ;;  %v8006_v45 = vpop.xlane.xlu1 %8005 }
 0x937   : > { %v8083_v11 = vadd.f32 %v15767_v18, %v8006_v45 }
 0x938   : > { %8147 = vst.msk [vmem:[%s15772_s15 + $0x1c0] sm:$0xff] %vm8090_vm3, %v8082_v24 }
 0x939   : > { %8148 = vst.msk [vmem:[%s15772_s15 + $0x1c8] sm:$0xff] %vm8090_vm3, %v8083_v11  ;;  %v8012_v63 = vpop.xlane.xlu0 %8011 }
 0x93a   : > { %v8086_v19 = vadd.f32 %v15767_v18, %v8012_v63 }
 0x93b   : > { %v8014_v33 = vpop.xlane.xlu1 %8013 }
 0x93c   : > { %8151 = vst.msk [vmem:[%s15772_s15 + $0x1e0] sm:$0xff] %vm8090_vm3, %v8086_v19  ;;  %v8087_v12 = vadd.f32 %v15767_v18, %v8014_v33 }
 0x93d   : > { %v8016_v0 = vpop.xlane.xlu0 %8015 }
 0x93e   : > { %8152 = vst.msk [vmem:[%s15772_s15 + $0x1e8] sm:$0xff] %vm8090_vm3, %v8087_v12  ;;  %v8088_v37 = vadd.f32 %v15767_v18, %v8016_v0 }
 0x93f   : > { %v8018_v55 = vpop.xlane.xlu1 %8017 }
 0x940   : > { %8153 = vst.msk [vmem:[%s15772_s15 + $0x1f0] sm:$0xff] %vm8090_vm3, %v8088_v37  ;;  %v8089_v5 = vadd.f32 %v15767_v18, %v8018_v55 }
 0x942   : > { %8154 = vst.msk [vmem:[%s15772_s15 + $0x1f8] sm:$0xff] %vm8090_vm3, %v8089_v5 }
 0x943 PF: > { %s21_s11 = sadd.s32 1, %s10798_s11  }
 0x944   : > { %p18_p4 = scmp.ge.s32.totalorder %s21_s11, 4  }
 0x946   :  { %20 = sbr.rel (!%p18_p4) target bundleno = 3 (0x3), region = 93 }

</bundles_post_ra>
